<compile_context>
chip_gen: v7x
topology: tpu7x:2x2x1
jax: 0.10.0
libtpu: 0.0.40
codegen_flags: <defaults>
</compile_context>

<pallas_src>
import functools

import jax
import jax.numpy as jnp
from jax import lax
from jax.experimental import pallas as pl
from jax.experimental.pallas import tpu as pltpu

LANE = 128


def _pick_block(n, cap, align=8):
    """Largest block <= cap that divides n (multiple of `align` when tiling,
    otherwise the full extent n, which is always a legal block)."""
    if n <= cap:
        return n
    start = (cap // align) * align
    for b in range(start, 0, -align):
        if n % b == 0:
            return b
    return n


def _full_spec(a):
    return pl.BlockSpec(a.shape, lambda i: (0,) * a.ndim)


# ----------------------- Char CNN + concat kernel ---------------------------
def _char_cnn_kernel(x_ref, word_ref, w3_ref, b3_ref, w4_ref, b4_ref,
                     w5_ref, b5_ref, out_ref, *, char_len, char_dim):
    # x_ref:    [Nb, char_len*char_dim] f32  (flattened char embeddings)
    # word_ref: [Nb, We] f32                 (word embeddings)
    # wK_ref:   [k*char_dim, Fp] bf16        (Fp = 128, cols >= 100 are zero)
    # bK_ref:   [1, Fp] f32
    # out_ref:  [Nb, 4*Fp] bf16 = [word | 0-pad, c3, c4, c5]
    nb = x_ref.shape[0]
    fp = w3_ref.shape[1]
    x = x_ref[...].astype(jnp.bfloat16)
    word = word_ref[...].astype(jnp.bfloat16)
    we = word.shape[1]
    feats = [word]
    if fp > we:
        feats.append(jnp.zeros((nb, fp - we), jnp.bfloat16))
    for k, w_ref, b_ref in ((3, w3_ref, b3_ref), (4, w4_ref, b4_ref),
                            (5, w5_ref, b5_ref)):
        n_win = char_len - k + 1
        # im2col: stack all sliding windows along rows -> one MXU matmul per k.
        wins = jnp.concatenate(
            [x[:, p * char_dim:(p + k) * char_dim] for p in range(n_win)],
            axis=0)                                         # [n_win*Nb, k*C]
        y = jnp.dot(wins, w_ref[...],
                    preferred_element_type=jnp.float32) + b_ref[...]
        y = jnp.maximum(y, 0.0)                             # ReLU before pool
        y = y.reshape(n_win, nb, fp).max(axis=0)            # max over positions
        feats.append(y.astype(jnp.bfloat16))
    out_ref[...] = jnp.concatenate(feats, axis=-1)


def char_cnn_concat_forward(char_x, word_x, conv_w, conv_b, *, char_len,
                            char_dim):
    n = char_x.shape[0]
    fp = conv_w[0].shape[1]
    d_out = 4 * fp
    block_n = _pick_block(n, 512)
    grid = (n // block_n,)

    in_specs = [pl.BlockSpec((block_n, char_x.shape[1]), lambda i: (i, 0)),
                pl.BlockSpec((block_n, word_x.shape[1]), lambda i: (i, 0))]
    args = [char_x, word_x]
    for w, b in zip(conv_w, conv_b):
        in_specs += [_full_spec(w), _full_spec(b)]
        args += [w, b]

    kernel = functools.partial(_char_cnn_kernel, char_len=char_len,
                               char_dim=char_dim)
    return pl.pallas_call(
        kernel,
        out_shape=jax.ShapeDtypeStruct((n, d_out), jnp.bfloat16),
        grid=grid,
        in_specs=in_specs,
        out_specs=pl.BlockSpec((block_n, d_out), lambda i: (i, 0)),
        compiler_params=pltpu.CompilerParams(
            dimension_semantics=("parallel",)),
    )(*args)


# -------------------- Fused BiLSTM + MLP-head kernel -------------------------
def _bilstm_head_kernel(x_ref, wih_f_ref, whh_f_ref, b_f_ref,
                        wih_b_ref, whh_b_ref, b_b_ref,
                        w1f_ref, w1b_ref, b1_ref, w2_ref, b2_ref,
                        out_ref, xp_f_ref, xp_b_ref, acc_f_ref, acc_b_ref):
    # x_ref: [S, Bb, D] bf16 (time-major); wih: [D, 4H] bf16; whh: [H, 4H] bf16
    # b_*:   [1, 4H] f32; w1f/w1b: [H, Dl] bf16; b1: [1, Dl] f32
    # w2:    [Dl, Tp] bf16; b2: [1, Tp] f32
    # out_ref:  [S, Bb, Tp] f32
    # xp_*_ref: [S, Bb, 4H] f32 scratch (precomputed input projections)
    # acc_*_ref:[S, Bb, H]  f32 scratch (per-direction hidden states)
    s_len, bb, d = x_ref.shape
    h_dim = whh_f_ref.shape[0]

    # Input projections for both directions in two big MXU matmuls, parked in
    # VMEM scratch so the recurrence can use cheap dynamic ref indexing.
    x2d = x_ref[...].reshape(s_len * bb, d)
    xp_f_ref[...] = (jnp.dot(x2d, wih_f_ref[...],
                             preferred_element_type=jnp.float32)
                     + b_f_ref[...]).reshape(s_len, bb, 4 * h_dim)
    xp_b_ref[...] = (jnp.dot(x2d, wih_b_ref[...],
                             preferred_element_type=jnp.float32)
                     + b_b_ref[...]).reshape(s_len, bb, 4 * h_dim)
    whh_f = whh_f_ref[...]
    whh_b = whh_b_ref[...]

    def lstm_cell(g, c):
        # PyTorch gate order: i, f, g, o.  Sigmoid on the contiguous (i,f) slab.
        sig_if = jax.nn.sigmoid(g[:, :2 * h_dim])
        i_g = sig_if[:, :h_dim]
        f_g = sig_if[:, h_dim:]
        g_g = jnp.tanh(g[:, 2 * h_dim:3 * h_dim])
        o_g = jax.nn.sigmoid(g[:, 3 * h_dim:])
        c_new = f_g * c + i_g * g_g
        return o_g * jnp.tanh(c_new), c_new

    def step(t, carry):
        # Forward and backward directions interleaved in one step.
        h_f, c_f, h_b, c_b = carry
        tb = s_len - 1 - t
        g_f = xp_f_ref[t] + jnp.dot(h_f.astype(jnp.bfloat16), whh_f,
                                    preferred_element_type=jnp.float32)
        g_b = xp_b_ref[tb] + jnp.dot(h_b.astype(jnp.bfloat16), whh_b,
                                     preferred_element_type=jnp.float32)
        h_f, c_f = lstm_cell(g_f, c_f)
        h_b, c_b = lstm_cell(g_b, c_b)
        acc_f_ref[t] = h_f
        acc_b_ref[tb] = h_b
        return (h_f, c_f, h_b, c_b)

    z0 = jnp.zeros((bb, h_dim), jnp.float32)
    lax.fori_loop(0, s_len, step, (z0, z0, z0, z0))

    # Fused head: linear(2H -> Dl) split per direction (avoids in-kernel concat),
    # ELU, classifier(Dl -> Tp).  LSTM output never touches HBM.
    hf = acc_f_ref[...].reshape(s_len * bb, h_dim).astype(jnp.bfloat16)
    hb = acc_b_ref[...].reshape(s_len * bb, h_dim).astype(jnp.bfloat16)
    z = (jnp.dot(hf, w1f_ref[...], preferred_element_type=jnp.float32)
         + jnp.dot(hb, w1b_ref[...], preferred_element_type=jnp.float32)
         + b1_ref[...])
    z = jnp.where(z > 0, z, jnp.exp(jnp.minimum(z, 0.0)) - 1.0)  # ELU(alpha=1)
    logits = jnp.dot(z.astype(jnp.bfloat16), w2_ref[...],
                     preferred_element_type=jnp.float32) + b2_ref[...]
    out_ref[...] = logits.reshape(s_len, bb, -1)


def bilstm_head_forward(x_tm, lstm_w, head_w):
    s_len, batch, d = x_tm.shape
    wih_f, whh_f, b_f, wih_b, whh_b, b_b = lstm_w
    w1f, w1b, b1, w2, b2 = head_w
    h_dim = whh_f.shape[0]
    t_pad = w2.shape[1]
    # Grid over batch blocks (parallel across cores; VMEM-bounded per block).
    # TODO(synk): for very long S, xp should additionally be computed in time
    # chunks inside the recurrence to bound VMEM.
    block_b = _pick_block(batch, 64)
    grid = (batch // block_b,)

    in_specs = ([pl.BlockSpec((s_len, block_b, d), lambda i: (0, i, 0))]
                + [_full_spec(a) for a in (wih_f, whh_f, b_f,
                                           wih_b, whh_b, b_b,
                                           w1f, w1b, b1, w2, b2)])
    return pl.pallas_call(
        _bilstm_head_kernel,
        out_shape=jax.ShapeDtypeStruct((s_len, batch, t_pad), jnp.float32),
        grid=grid,
        in_specs=in_specs,
        out_specs=pl.BlockSpec((s_len, block_b, t_pad), lambda i: (0, i, 0)),
        scratch_shapes=[pltpu.VMEM((s_len, block_b, 4 * h_dim), jnp.float32),
                        pltpu.VMEM((s_len, block_b, 4 * h_dim), jnp.float32),
                        pltpu.VMEM((s_len, block_b, h_dim), jnp.float32),
                        pltpu.VMEM((s_len, block_b, h_dim), jnp.float32)],
        compiler_params=pltpu.CompilerParams(
            dimension_semantics=("parallel",)),
    )(x_tm, wih_f, whh_f, b_f, wih_b, whh_b, b_b, w1f, w1b, b1, w2, b2)


# ------------------------------ Full forward ---------------------------------
def bilstm_ner_forward(params, words, chars):
    batch, seq = words.shape
    char_len = chars.shape[2]
    char_dim = params["char_embedding"].shape[1]
    emb_dim = params["embedding"].shape[1]
    h_dim = params["whh_f"].shape[0]
    target = params["cls_w"].shape[1]
    nf = params["conv3_w"].shape[1]
    fp = LANE                                 # pad filters / segments to 128

    # ----- weight prep (constant-folded under jit: params are closed over) ---
    def pad_conv(w, b):
        return (jnp.pad(w, ((0, 0), (0, fp - nf))).astype(jnp.bfloat16),
                jnp.pad(b, (0, fp - nf)).reshape(1, fp).astype(jnp.float32))
    conv_w, conv_b = zip(*(pad_conv(params[f"conv{k}_w"], params[f"conv{k}_b"])
                           for k in (3, 4, 5)))

    segs = (emb_dim, nf, nf, nf)              # LSTM-input feature segments

    def expand_wih(wih):
        # Insert zero rows so the padded [word|0, c3, c4, c5] layout (128 each)
        # produces numerically identical input projections.
        parts, off = [], 0
        for s in segs:
            parts.append(jnp.pad(wih[off:off + s], ((0, fp - s), (0, 0))))
            off += s
        return jnp.concatenate(parts, axis=0).astype(jnp.bfloat16)

    lstm_w = (expand_wih(params["wih_f"]),
              params["whh_f"].astype(jnp.bfloat16),
              params["b_f"].reshape(1, -1).astype(jnp.float32),
              expand_wih(params["wih_b"]),
              params["whh_b"].astype(jnp.bfloat16),
              params["b_b"].reshape(1, -1).astype(jnp.float32))

    t_pad = LANE                              # lane-dense head output
    head_w = (params["lin_w"][:h_dim].astype(jnp.bfloat16),
              params["lin_w"][h_dim:].astype(jnp.bfloat16),
              params["lin_b"].reshape(1, -1).astype(jnp.float32),
              jnp.pad(params["cls_w"],
                      ((0, 0), (0, t_pad - target))).astype(jnp.bfloat16),
              jnp.pad(params["cls_b"],
                      (0, t_pad - target)).reshape(1, t_pad).astype(jnp.float32))

    # ----- embeddings (glue), gathered directly in time-major order ----------
    words_tm = jnp.transpose(words, (1, 0))             # [S, B]   (tiny ints)
    chars_tm = jnp.transpose(chars, (1, 0, 2))          # [S, B, Lc]
    word_emb = params["embedding"][words_tm]            # [S, B, 100]
    char_emb = params["char_embedding"][chars_tm]       # [S, B, Lc, 30]
    # Dropout layers: identity (eval mode).
    # TODO(synk): train-mode dropout RNG not modeled.

    n_tok = seq * batch
    char_x = char_emb.reshape(n_tok, char_len * char_dim)
    word_x = word_emb.reshape(n_tok, emb_dim)

    x = char_cnn_concat_forward(char_x, word_x, conv_w, conv_b,
                                char_len=char_len, char_dim=char_dim)
    x_tm = x.reshape(seq, batch, 4 * fp)                 # [S, B, 512] bf16

    logits_tm = bilstm_head_forward(x_tm, lstm_w, head_w)  # [S, B, 128] f32
    logits = logits_tm[:, :, :target]                    # [S, B, T]
    return jnp.transpose(logits, (1, 0, 2))              # [B, S, T]


# --------------------------- Parameter construction --------------------------
def init_params(key, vocab_size, target_size, char_vocab_size,
                char_embedding_dim=30, embedding_dim=100,
                lstm_hidden_dim=256, linear_dim=128, num_filters=100):
    ks = jax.random.split(key, 20)
    nrm = lambda k, s, sc=0.1: sc * jax.random.normal(k, s, jnp.float32)

    lstm_in = embedding_dim + num_filters * 3            # 100 + 300 = 400
    H = lstm_hidden_dim

    params = {
        # embeddings (padding_idx=0 -> zero row)
        "embedding": nrm(ks[0], (vocab_size, embedding_dim)).at[0].set(0.0),
        "char_embedding": nrm(ks[1], (char_vocab_size, char_embedding_dim)).at[0].set(0.0),
        # char CNN convs, stored as [k*char_dim, num_filters] matmul weights
        "conv3_w": nrm(ks[2], (3 * char_embedding_dim, num_filters)),
        "conv3_b": nrm(ks[3], (num_filters,)),
        "conv4_w": nrm(ks[4], (4 * char_embedding_dim, num_filters)),
        "conv4_b": nrm(ks[5], (num_filters,)),
        "conv5_w": nrm(ks[6], (5 * char_embedding_dim, num_filters)),
        "conv5_b": nrm(ks[7], (num_filters,)),
        # BiLSTM: W_ih^T [D, 4H], W_hh^T [H, 4H], combined bias (b_ih + b_hh)
        "wih_f": nrm(ks[8], (lstm_in, 4 * H), 0.05),
        "whh_f": nrm(ks[9], (H, 4 * H), 0.05),
        "b_f": nrm(ks[10], (4 * H,), 0.05) + nrm(ks[11], (4 * H,), 0.05),
        "wih_b": nrm(ks[12], (lstm_in, 4 * H), 0.05),
        "whh_b": nrm(ks[13], (H, 4 * H), 0.05),
        "b_b": nrm(ks[14], (4 * H,), 0.05) + nrm(ks[15], (4 * H,), 0.05),
        # head: linear(2H -> linear_dim), ELU, classifier(linear_dim -> target)
        "lin_w": nrm(ks[16], (2 * H, linear_dim)),
        "lin_b": nrm(ks[17], (linear_dim,)),
        "cls_w": nrm(ks[18], (linear_dim, target_size)),
        "cls_b": nrm(ks[19], (target_size,)),
    }
    return params


# ----------------------------------- main ------------------------------------
if __name__ == "__main__":
    vocab_size = 50
    char_vocab_size = 30
    target_size = 9
    B, S, max_char_len = 2, 8, 10

    params = init_params(jax.random.PRNGKey(42), vocab_size, target_size,
                         char_vocab_size)

    key = jax.random.PRNGKey(0)
    k_w, k_c = jax.random.split(key)
    words = jax.random.randint(k_w, (B, S), 0, vocab_size, dtype=jnp.int32)
    chars = jax.random.randint(k_c, (B, S, max_char_len), 0, char_vocab_size,
                               dtype=jnp.int32)

    fwd = jax.jit(functools.partial(bilstm_ner_forward, params))
    out = fwd(words, chars)
    jax.block_until_ready(out)

    assert out.shape == (B, S, target_size), out.shape
    assert out.dtype == jnp.float32
    assert bool(jnp.all(jnp.isfinite(out)))
    print("KERNEL_OK")
</pallas_src>

<mosaic_0001>
module attributes {stable_mosaic.version = 11 : i64} {
  func.func @_char_cnn_kernel(%arg0: i32, %arg1: memref<16x300xf32, #tpu.memory_space<vmem>>, %arg2: memref<16x100xf32, #tpu.memory_space<vmem>>, %arg3: memref<90x128xbf16, #tpu.memory_space<vmem>>, %arg4: memref<1x128xf32, #tpu.memory_space<vmem>>, %arg5: memref<120x128xbf16, #tpu.memory_space<vmem>>, %arg6: memref<1x128xf32, #tpu.memory_space<vmem>>, %arg7: memref<150x128xbf16, #tpu.memory_space<vmem>>, %arg8: memref<1x128xf32, #tpu.memory_space<vmem>>, %arg9: memref<16x512xbf16, #tpu.memory_space<vmem>>) attributes {dimension_semantics = [#tpu.dimension_semantics<parallel>], iteration_bounds = array<i64: 1>, scalar_prefetch = 0 : i64, scratch_operands = 0 : i64, tpu.core_type = #tpu.core_type<tc>, window_params = [{transform_indices = @transform_0, window_bounds = array<i64: 16, 300>}, {transform_indices = @transform_1, window_bounds = array<i64: 16, 100>}, {pipeline_mode = #tpu.pipeline_mode<synchronous>, transform_indices = @transform_2, window_bounds = array<i64: 90, 128>}, {pipeline_mode = #tpu.pipeline_mode<synchronous>, transform_indices = @transform_3, window_bounds = array<i64: 1, 128>}, {pipeline_mode = #tpu.pipeline_mode<synchronous>, transform_indices = @transform_4, window_bounds = array<i64: 120, 128>}, {pipeline_mode = #tpu.pipeline_mode<synchronous>, transform_indices = @transform_5, window_bounds = array<i64: 1, 128>}, {pipeline_mode = #tpu.pipeline_mode<synchronous>, transform_indices = @transform_6, window_bounds = array<i64: 150, 128>}, {pipeline_mode = #tpu.pipeline_mode<synchronous>, transform_indices = @transform_7, window_bounds = array<i64: 1, 128>}, {transform_indices = @transform_8, window_bounds = array<i64: 16, 512>}]} {
    %c0 = arith.constant 0 : index
    %c0_0 = arith.constant 0 : index
    %0 = vector.load %arg1[%c0, %c0_0] : memref<16x300xf32, #tpu.memory_space<vmem>>, vector<16x300xf32>
    %1 = arith.truncf %0 : vector<16x300xf32> to vector<16x300xbf16>
    %c0_1 = arith.constant 0 : index
    %c0_2 = arith.constant 0 : index
    %2 = vector.load %arg2[%c0_1, %c0_2] : memref<16x100xf32, #tpu.memory_space<vmem>>, vector<16x100xf32>
    %3 = arith.truncf %2 : vector<16x100xf32> to vector<16x100xbf16>
    %cst = arith.constant 0.000000e+00 : bf16
    %4 = vector.broadcast %cst : bf16 to vector<16x28xbf16>
    %5 = vector.extract_strided_slice %1 {offsets = [0, 0], sizes = [16, 90], strides = [1, 1]} : vector<16x300xbf16> to vector<16x90xbf16>
    %6 = vector.extract_strided_slice %1 {offsets = [0, 30], sizes = [16, 90], strides = [1, 1]} : vector<16x300xbf16> to vector<16x90xbf16>
    %7 = vector.extract_strided_slice %1 {offsets = [0, 60], sizes = [16, 90], strides = [1, 1]} : vector<16x300xbf16> to vector<16x90xbf16>
    %8 = vector.extract_strided_slice %1 {offsets = [0, 90], sizes = [16, 90], strides = [1, 1]} : vector<16x300xbf16> to vector<16x90xbf16>
    %9 = vector.extract_strided_slice %1 {offsets = [0, 120], sizes = [16, 90], strides = [1, 1]} : vector<16x300xbf16> to vector<16x90xbf16>
    %10 = vector.extract_strided_slice %1 {offsets = [0, 150], sizes = [16, 90], strides = [1, 1]} : vector<16x300xbf16> to vector<16x90xbf16>
    %11 = vector.extract_strided_slice %1 {offsets = [0, 180], sizes = [16, 90], strides = [1, 1]} : vector<16x300xbf16> to vector<16x90xbf16>
    %12 = vector.extract_strided_slice %1 {offsets = [0, 210], sizes = [16, 90], strides = [1, 1]} : vector<16x300xbf16> to vector<16x90xbf16>
    %13 = tpu.concatenate %5, %6, %7, %8, %9, %10, %11, %12 in 0 : vector<16x90xbf16>, vector<16x90xbf16>, vector<16x90xbf16>, vector<16x90xbf16>, vector<16x90xbf16>, vector<16x90xbf16>, vector<16x90xbf16>, vector<16x90xbf16> -> vector<128x90xbf16>
    %c0_3 = arith.constant 0 : index
    %c0_4 = arith.constant 0 : index
    %14 = vector.load %arg3[%c0_3, %c0_4] : memref<90x128xbf16, #tpu.memory_space<vmem>>, vector<90x128xbf16>
    %cst_5 = arith.constant dense<0.000000e+00> : vector<128x128xf32>
    %15 = tpu.matmul %13, %14, %cst_5 {dimension_numbers = #tpu.dot_dimension_numbers<[1], [0], [0], [1], [0, 0, 1, 1], [], []>} : vector<128x90xbf16>, vector<90x128xbf16>, vector<128x128xf32> -> vector<128x128xf32>
    %c0_6 = arith.constant 0 : index
    %c0_7 = arith.constant 0 : index
    %16 = vector.load %arg4[%c0_6, %c0_7] : memref<1x128xf32, #tpu.memory_space<vmem>>, vector<1x128xf32>
    %17 = vector.broadcast %16 : vector<1x128xf32> to vector<128x128xf32>
    %18 = arith.addf %15, %17 : vector<128x128xf32>
    %cst_8 = arith.constant 0.000000e+00 : f32
    %19 = vector.broadcast %cst_8 : f32 to vector<128x128xf32>
    %20 = arith.maximumf %18, %19 : vector<128x128xf32>
    %21 = vector.shape_cast %20 : vector<128x128xf32> to vector<8x16x128xf32>
    %cst_9 = arith.constant dense<0xFF800000> : vector<16x128xf32>
    %22 = vector.multi_reduction <maximumf>, %21, %cst_9 [0] : vector<8x16x128xf32> to vector<16x128xf32>
    %23 = arith.truncf %22 : vector<16x128xf32> to vector<16x128xbf16>
    %24 = vector.extract_strided_slice %1 {offsets = [0, 0], sizes = [16, 120], strides = [1, 1]} : vector<16x300xbf16> to vector<16x120xbf16>
    %25 = vector.extract_strided_slice %1 {offsets = [0, 30], sizes = [16, 120], strides = [1, 1]} : vector<16x300xbf16> to vector<16x120xbf16>
    %26 = vector.extract_strided_slice %1 {offsets = [0, 60], sizes = [16, 120], strides = [1, 1]} : vector<16x300xbf16> to vector<16x120xbf16>
    %27 = vector.extract_strided_slice %1 {offsets = [0, 90], sizes = [16, 120], strides = [1, 1]} : vector<16x300xbf16> to vector<16x120xbf16>
    %28 = vector.extract_strided_slice %1 {offsets = [0, 120], sizes = [16, 120], strides = [1, 1]} : vector<16x300xbf16> to vector<16x120xbf16>
    %29 = vector.extract_strided_slice %1 {offsets = [0, 150], sizes = [16, 120], strides = [1, 1]} : vector<16x300xbf16> to vector<16x120xbf16>
    %30 = vector.extract_strided_slice %1 {offsets = [0, 180], sizes = [16, 120], strides = [1, 1]} : vector<16x300xbf16> to vector<16x120xbf16>
    %31 = tpu.concatenate %24, %25, %26, %27, %28, %29, %30 in 0 : vector<16x120xbf16>, vector<16x120xbf16>, vector<16x120xbf16>, vector<16x120xbf16>, vector<16x120xbf16>, vector<16x120xbf16>, vector<16x120xbf16> -> vector<112x120xbf16>
    %c0_10 = arith.constant 0 : index
    %c0_11 = arith.constant 0 : index
    %32 = vector.load %arg5[%c0_10, %c0_11] : memref<120x128xbf16, #tpu.memory_space<vmem>>, vector<120x128xbf16>
    %cst_12 = arith.constant dense<0.000000e+00> : vector<112x128xf32>
    %33 = tpu.matmul %31, %32, %cst_12 {dimension_numbers = #tpu.dot_dimension_numbers<[1], [0], [0], [1], [0, 0, 1, 1], [], []>} : vector<112x120xbf16>, vector<120x128xbf16>, vector<112x128xf32> -> vector<112x128xf32>
    %c0_13 = arith.constant 0 : index
    %c0_14 = arith.constant 0 : index
    %34 = vector.load %arg6[%c0_13, %c0_14] : memref<1x128xf32, #tpu.memory_space<vmem>>, vector<1x128xf32>
    %35 = vector.broadcast %34 : vector<1x128xf32> to vector<112x128xf32>
    %36 = arith.addf %33, %35 : vector<112x128xf32>
    %cst_15 = arith.constant 0.000000e+00 : f32
    %37 = vector.broadcast %cst_15 : f32 to vector<112x128xf32>
    %38 = arith.maximumf %36, %37 : vector<112x128xf32>
    %39 = vector.shape_cast %38 : vector<112x128xf32> to vector<7x16x128xf32>
    %cst_16 = arith.constant dense<0xFF800000> : vector<16x128xf32>
    %40 = vector.multi_reduction <maximumf>, %39, %cst_16 [0] : vector<7x16x128xf32> to vector<16x128xf32>
    %41 = arith.truncf %40 : vector<16x128xf32> to vector<16x128xbf16>
    %42 = vector.extract_strided_slice %1 {offsets = [0, 0], sizes = [16, 150], strides = [1, 1]} : vector<16x300xbf16> to vector<16x150xbf16>
    %43 = vector.extract_strided_slice %1 {offsets = [0, 30], sizes = [16, 150], strides = [1, 1]} : vector<16x300xbf16> to vector<16x150xbf16>
    %44 = vector.extract_strided_slice %1 {offsets = [0, 60], sizes = [16, 150], strides = [1, 1]} : vector<16x300xbf16> to vector<16x150xbf16>
    %45 = vector.extract_strided_slice %1 {offsets = [0, 90], sizes = [16, 150], strides = [1, 1]} : vector<16x300xbf16> to vector<16x150xbf16>
    %46 = vector.extract_strided_slice %1 {offsets = [0, 120], sizes = [16, 150], strides = [1, 1]} : vector<16x300xbf16> to vector<16x150xbf16>
    %47 = vector.extract_strided_slice %1 {offsets = [0, 150], sizes = [16, 150], strides = [1, 1]} : vector<16x300xbf16> to vector<16x150xbf16>
    %48 = tpu.concatenate %42, %43, %44, %45, %46, %47 in 0 : vector<16x150xbf16>, vector<16x150xbf16>, vector<16x150xbf16>, vector<16x150xbf16>, vector<16x150xbf16>, vector<16x150xbf16> -> vector<96x150xbf16>
    %c0_17 = arith.constant 0 : index
    %c0_18 = arith.constant 0 : index
    %49 = vector.load %arg7[%c0_17, %c0_18] : memref<150x128xbf16, #tpu.memory_space<vmem>>, vector<150x128xbf16>
    %cst_19 = arith.constant dense<0.000000e+00> : vector<96x128xf32>
    %50 = tpu.matmul %48, %49, %cst_19 {dimension_numbers = #tpu.dot_dimension_numbers<[1], [0], [0], [1], [0, 0, 1, 1], [], []>} : vector<96x150xbf16>, vector<150x128xbf16>, vector<96x128xf32> -> vector<96x128xf32>
    %c0_20 = arith.constant 0 : index
    %c0_21 = arith.constant 0 : index
    %51 = vector.load %arg8[%c0_20, %c0_21] : memref<1x128xf32, #tpu.memory_space<vmem>>, vector<1x128xf32>
    %52 = vector.broadcast %51 : vector<1x128xf32> to vector<96x128xf32>
    %53 = arith.addf %50, %52 : vector<96x128xf32>
    %cst_22 = arith.constant 0.000000e+00 : f32
    %54 = vector.broadcast %cst_22 : f32 to vector<96x128xf32>
    %55 = arith.maximumf %53, %54 : vector<96x128xf32>
    %56 = vector.shape_cast %55 : vector<96x128xf32> to vector<6x16x128xf32>
    %cst_23 = arith.constant dense<0xFF800000> : vector<16x128xf32>
    %57 = vector.multi_reduction <maximumf>, %56, %cst_23 [0] : vector<6x16x128xf32> to vector<16x128xf32>
    %58 = arith.truncf %57 : vector<16x128xf32> to vector<16x128xbf16>
    %59 = tpu.concatenate %3, %4, %23, %41, %58 in 1 : vector<16x100xbf16>, vector<16x28xbf16>, vector<16x128xbf16>, vector<16x128xbf16>, vector<16x128xbf16> -> vector<16x512xbf16>
    %c0_24 = arith.constant 0 : index
    %c0_25 = arith.constant 0 : index
    %60 = vector.load %arg9[%c0_24, %c0_25] : memref<16x512xbf16, #tpu.memory_space<vmem>>, vector<16x512xbf16>
    tpu.vector_store %arg9[%c0_24, %c0_25], %59 {strides = array<i32>} : memref<16x512xbf16, #tpu.memory_space<vmem>>, vector<16x512xbf16>,
    return
  }
  func.func @transform_0(%arg0: i32) -> (i32, i32) {
    %c0_i32 = arith.constant 0 : i32
    %c0_i32_0 = arith.constant 0 : i32
    return %arg0, %c0_i32 : i32, i32
  }
  func.func @transform_1(%arg0: i32) -> (i32, i32) {
    %c0_i32 = arith.constant 0 : i32
    %c0_i32_0 = arith.constant 0 : i32
    return %arg0, %c0_i32 : i32, i32
  }
  func.func @transform_2(%arg0: i32) -> (i32, i32) {
    %c0_i32 = arith.constant 0 : i32
    %c0_i32_0 = arith.constant 0 : i32
    %c0_i32_1 = arith.constant 0 : i32
    return %c0_i32, %c0_i32_0 : i32, i32
  }
  func.func @transform_3(%arg0: i32) -> (i32, i32) {
    %c0_i32 = arith.constant 0 : i32
    %c0_i32_0 = arith.constant 0 : i32
    %c0_i32_1 = arith.constant 0 : i32
    return %c0_i32, %c0_i32_0 : i32, i32
  }
  func.func @transform_4(%arg0: i32) -> (i32, i32) {
    %c0_i32 = arith.constant 0 : i32
    %c0_i32_0 = arith.constant 0 : i32
    %c0_i32_1 = arith.constant 0 : i32
    return %c0_i32, %c0_i32_0 : i32, i32
  }
  func.func @transform_5(%arg0: i32) -> (i32, i32) {
    %c0_i32 = arith.constant 0 : i32
    %c0_i32_0 = arith.constant 0 : i32
    %c0_i32_1 = arith.constant 0 : i32
    return %c0_i32, %c0_i32_0 : i32, i32
  }
  func.func @transform_6(%arg0: i32) -> (i32, i32) {
    %c0_i32 = arith.constant 0 : i32
    %c0_i32_0 = arith.constant 0 : i32
    %c0_i32_1 = arith.constant 0 : i32
    return %c0_i32, %c0_i32_0 : i32, i32
  }
  func.func @transform_7(%arg0: i32) -> (i32, i32) {
    %c0_i32 = arith.constant 0 : i32
    %c0_i32_0 = arith.constant 0 : i32
    %c0_i32_1 = arith.constant 0 : i32
    return %c0_i32, %c0_i32_0 : i32, i32
  }
  func.func @transform_8(%arg0: i32) -> (i32, i32) {
    %c0_i32 = arith.constant 0 : i32
    %c0_i32_0 = arith.constant 0 : i32
    return %arg0, %c0_i32 : i32, i32
  }
}

module attributes {stable_mosaic.version = 11 : i64} {
  func.func @_bilstm_head_kernel(%arg0: i32, %arg1: memref<8x2x512xbf16, #tpu.memory_space<vmem>>, %arg2: memref<512x1024xbf16, #tpu.memory_space<vmem>>, %arg3: memref<256x1024xbf16, #tpu.memory_space<vmem>>, %arg4: memref<1x1024xf32, #tpu.memory_space<vmem>>, %arg5: memref<512x1024xbf16, #tpu.memory_space<vmem>>, %arg6: memref<256x1024xbf16, #tpu.memory_space<vmem>>, %arg7: memref<1x1024xf32, #tpu.memory_space<vmem>>, %arg8: memref<256x128xbf16, #tpu.memory_space<vmem>>, %arg9: memref<256x128xbf16, #tpu.memory_space<vmem>>, %arg10: memref<1x128xf32, #tpu.memory_space<vmem>>, %arg11: memref<128x128xbf16, #tpu.memory_space<vmem>>, %arg12: memref<1x128xf32, #tpu.memory_space<vmem>>, %arg13: memref<8x2x128xf32, #tpu.memory_space<vmem>>, %arg14: memref<8x2x1024xf32, #tpu.memory_space<vmem>>, %arg15: memref<8x2x1024xf32, #tpu.memory_space<vmem>>, %arg16: memref<8x2x256xf32, #tpu.memory_space<vmem>>, %arg17: memref<8x2x256xf32, #tpu.memory_space<vmem>>) attributes {dimension_semantics = [#tpu.dimension_semantics<parallel>], iteration_bounds = array<i64: 1>, scalar_prefetch = 0 : i64, scratch_operands = 4 : i64, tpu.core_type = #tpu.core_type<tc>, window_params = [{transform_indices = @transform_0, window_bounds = array<i64: 8, 2, 512>}, {pipeline_mode = #tpu.pipeline_mode<synchronous>, transform_indices = @transform_1, window_bounds = array<i64: 512, 1024>}, {pipeline_mode = #tpu.pipeline_mode<synchronous>, transform_indices = @transform_2, window_bounds = array<i64: 256, 1024>}, {pipeline_mode = #tpu.pipeline_mode<synchronous>, transform_indices = @transform_3, window_bounds = array<i64: 1, 1024>}, {pipeline_mode = #tpu.pipeline_mode<synchronous>, transform_indices = @transform_4, window_bounds = array<i64: 512, 1024>}, {pipeline_mode = #tpu.pipeline_mode<synchronous>, transform_indices = @transform_5, window_bounds = array<i64: 256, 1024>}, {pipeline_mode = #tpu.pipeline_mode<synchronous>, transform_indices = @transform_6, window_bounds = array<i64: 1, 1024>}, {pipeline_mode = #tpu.pipeline_mode<synchronous>, transform_indices = @transform_7, window_bounds = array<i64: 256, 128>}, {pipeline_mode = #tpu.pipeline_mode<synchronous>, transform_indices = @transform_8, window_bounds = array<i64: 256, 128>}, {pipeline_mode = #tpu.pipeline_mode<synchronous>, transform_indices = @transform_9, window_bounds = array<i64: 1, 128>}, {pipeline_mode = #tpu.pipeline_mode<synchronous>, transform_indices = @transform_10, window_bounds = array<i64: 128, 128>}, {pipeline_mode = #tpu.pipeline_mode<synchronous>, transform_indices = @transform_11, window_bounds = array<i64: 1, 128>}, {transform_indices = @transform_12, window_bounds = array<i64: 8, 2, 128>}]} {
    %c0 = arith.constant 0 : index
    %c0_0 = arith.constant 0 : index
    %c0_1 = arith.constant 0 : index
    %0 = vector.load %arg1[%c0, %c0_0, %c0_1] : memref<8x2x512xbf16, #tpu.memory_space<vmem>>, vector<8x2x512xbf16>
    %1 = vector.shape_cast %0 : vector<8x2x512xbf16> to vector<16x512xbf16>
    %c0_2 = arith.constant 0 : index
    %c0_3 = arith.constant 0 : index
    %2 = vector.load %arg2[%c0_2, %c0_3] : memref<512x1024xbf16, #tpu.memory_space<vmem>>, vector<512x1024xbf16>
    %cst = arith.constant dense<0.000000e+00> : vector<16x1024xf32>
    %3 = tpu.matmul %1, %2, %cst {dimension_numbers = #tpu.dot_dimension_numbers<[1], [0], [0], [1], [0, 0, 1, 1], [], []>} : vector<16x512xbf16>, vector<512x1024xbf16>, vector<16x1024xf32> -> vector<16x1024xf32>
    %c0_4 = arith.constant 0 : index
    %c0_5 = arith.constant 0 : index
    %4 = vector.load %arg4[%c0_4, %c0_5] : memref<1x1024xf32, #tpu.memory_space<vmem>>, vector<1x1024xf32>
    %5 = vector.broadcast %4 : vector<1x1024xf32> to vector<16x1024xf32>
    %6 = arith.addf %3, %5 : vector<16x1024xf32>
    %7 = vector.shape_cast %6 : vector<16x1024xf32> to vector<8x2x1024xf32>
    %c0_6 = arith.constant 0 : index
    %c0_7 = arith.constant 0 : index
    %c0_8 = arith.constant 0 : index
    %8 = vector.load %arg14[%c0_6, %c0_7, %c0_8] : memref<8x2x1024xf32, #tpu.memory_space<vmem>>, vector<8x2x1024xf32>
    tpu.vector_store %arg14[%c0_6, %c0_7, %c0_8], %7 {strides = array<i32>} : memref<8x2x1024xf32, #tpu.memory_space<vmem>>, vector<8x2x1024xf32>,
    %c0_9 = arith.constant 0 : index
    %c0_10 = arith.constant 0 : index
    %9 = vector.load %arg5[%c0_9, %c0_10] : memref<512x1024xbf16, #tpu.memory_space<vmem>>, vector<512x1024xbf16>
    %cst_11 = arith.constant dense<0.000000e+00> : vector<16x1024xf32>
    %10 = tpu.matmul %1, %9, %cst_11 {dimension_numbers = #tpu.dot_dimension_numbers<[1], [0], [0], [1], [0, 0, 1, 1], [], []>} : vector<16x512xbf16>, vector<512x1024xbf16>, vector<16x1024xf32> -> vector<16x1024xf32>
    %c0_12 = arith.constant 0 : index
    %c0_13 = arith.constant 0 : index
    %11 = vector.load %arg7[%c0_12, %c0_13] : memref<1x1024xf32, #tpu.memory_space<vmem>>, vector<1x1024xf32>
    %12 = vector.broadcast %11 : vector<1x1024xf32> to vector<16x1024xf32>
    %13 = arith.addf %10, %12 : vector<16x1024xf32>
    %14 = vector.shape_cast %13 : vector<16x1024xf32> to vector<8x2x1024xf32>
    %c0_14 = arith.constant 0 : index
    %c0_15 = arith.constant 0 : index
    %c0_16 = arith.constant 0 : index
    %15 = vector.load %arg15[%c0_14, %c0_15, %c0_16] : memref<8x2x1024xf32, #tpu.memory_space<vmem>>, vector<8x2x1024xf32>
    tpu.vector_store %arg15[%c0_14, %c0_15, %c0_16], %14 {strides = array<i32>} : memref<8x2x1024xf32, #tpu.memory_space<vmem>>, vector<8x2x1024xf32>,
    %c0_17 = arith.constant 0 : index
    %c0_18 = arith.constant 0 : index
    %16 = vector.load %arg3[%c0_17, %c0_18] : memref<256x1024xbf16, #tpu.memory_space<vmem>>, vector<256x1024xbf16>
    %c0_19 = arith.constant 0 : index
    %c0_20 = arith.constant 0 : index
    %17 = vector.load %arg6[%c0_19, %c0_20] : memref<256x1024xbf16, #tpu.memory_space<vmem>>, vector<256x1024xbf16>
    %cst_21 = arith.constant 0.000000e+00 : f32
    %18 = vector.broadcast %cst_21 : f32 to vector<2x256xf32>
    %c0_i32 = arith.constant 0 : i32
    %c8_i32 = arith.constant 8 : i32
    %19 = arith.addi %c0_i32, %c8_i32 : i32
    %c1_i32 = arith.constant 1 : i32
    %20:4 = scf.for %arg18 = %c0_i32 to %19 step %c1_i32 iter_args(%arg19 = %18, %arg20 = %18, %arg21 = %18, %arg22 = %18) -> (vector<2x256xf32>, vector<2x256xf32>, vector<2x256xf32>, vector<2x256xf32>)  : i32 {
      %c7_i32 = arith.constant 7 : i32
      %51 = arith.subi %c7_i32, %arg18 : i32
      %52 = arith.index_cast %arg18 : i32 to index
      %c0_48 = arith.constant 0 : index
      %c0_49 = arith.constant 0 : index
      %53 = vector.load %arg14[%52, %c0_48, %c0_49] : memref<8x2x1024xf32, #tpu.memory_space<vmem>>, vector<1x2x1024xf32>
      %54 = vector.shape_cast %53 : vector<1x2x1024xf32> to vector<2x1024xf32>
      %55 = arith.truncf %arg19 : vector<2x256xf32> to vector<2x256xbf16>
      %cst_50 = arith.constant dense<0.000000e+00> : vector<2x1024xf32>
      %56 = tpu.matmul %55, %16, %cst_50 {dimension_numbers = #tpu.dot_dimension_numbers<[1], [0], [0], [1], [0, 0, 1, 1], [], []>} : vector<2x256xbf16>, vector<256x1024xbf16>, vector<2x1024xf32> -> vector<2x1024xf32>
      %57 = arith.addf %54, %56 : vector<2x1024xf32>
      %58 = arith.index_cast %51 : i32 to index
      %c0_51 = arith.constant 0 : index
      %c0_52 = arith.constant 0 : index
      %59 = vector.load %arg15[%58, %c0_51, %c0_52] : memref<8x2x1024xf32, #tpu.memory_space<vmem>>, vector<1x2x1024xf32>
      %60 = vector.shape_cast %59 : vector<1x2x1024xf32> to vector<2x1024xf32>
      %61 = arith.truncf %arg21 : vector<2x256xf32> to vector<2x256xbf16>
      %cst_53 = arith.constant dense<0.000000e+00> : vector<2x1024xf32>
      %62 = tpu.matmul %61, %17, %cst_53 {dimension_numbers = #tpu.dot_dimension_numbers<[1], [0], [0], [1], [0, 0, 1, 1], [], []>} : vector<2x256xbf16>, vector<256x1024xbf16>, vector<2x1024xf32> -> vector<2x1024xf32>
      %63 = arith.addf %60, %62 : vector<2x1024xf32>
      %64 = vector.extract_strided_slice %57 {offsets = [0, 0], sizes = [2, 512], strides = [1, 1]} : vector<2x1024xf32> to vector<2x512xf32>
      %65 = arith.negf %64 : vector<2x512xf32>
      %66 = math.exp %65 : vector<2x512xf32>
      %cst_54 = arith.constant 1.000000e+00 : f32
      %67 = vector.broadcast %cst_54 : f32 to vector<2x512xf32>
      %68 = arith.addf %67, %66 : vector<2x512xf32>
      %69 = arith.divf %67, %68 : vector<2x512xf32>
      %70 = vector.extract_strided_slice %69 {offsets = [0, 0], sizes = [2, 256], strides = [1, 1]} : vector<2x512xf32> to vector<2x256xf32>
      %71 = vector.extract_strided_slice %69 {offsets = [0, 256], sizes = [2, 256], strides = [1, 1]} : vector<2x512xf32> to vector<2x256xf32>
      %72 = vector.extract_strided_slice %57 {offsets = [0, 512], sizes = [2, 256], strides = [1, 1]} : vector<2x1024xf32> to vector<2x256xf32>
      %73 = math.tanh %72 : vector<2x256xf32>
      %74 = vector.extract_strided_slice %57 {offsets = [0, 768], sizes = [2, 256], strides = [1, 1]} : vector<2x1024xf32> to vector<2x256xf32>
      %75 = arith.negf %74 : vector<2x256xf32>
      %76 = math.exp %75 : vector<2x256xf32>
      %cst_55 = arith.constant 1.000000e+00 : f32
      %77 = vector.broadcast %cst_55 : f32 to vector<2x256xf32>
      %78 = arith.addf %77, %76 : vector<2x256xf32>
      %79 = arith.divf %77, %78 : vector<2x256xf32>
      %80 = arith.mulf %71, %arg20 : vector<2x256xf32>
      %81 = arith.mulf %70, %73 : vector<2x256xf32>
      %82 = arith.addf %80, %81 : vector<2x256xf32>
      %83 = math.tanh %82 : vector<2x256xf32>
      %84 = arith.mulf %79, %83 : vector<2x256xf32>
      %85 = vector.extract_strided_slice %63 {offsets = [0, 0], sizes = [2, 512], strides = [1, 1]} : vector<2x1024xf32> to vector<2x512xf32>
      %86 = arith.negf %85 : vector<2x512xf32>
      %87 = math.exp %86 : vector<2x512xf32>
      %cst_56 = arith.constant 1.000000e+00 : f32
      %88 = vector.broadcast %cst_56 : f32 to vector<2x512xf32>
      %89 = arith.addf %88, %87 : vector<2x512xf32>
      %90 = arith.divf %88, %89 : vector<2x512xf32>
      %91 = vector.extract_strided_slice %90 {offsets = [0, 0], sizes = [2, 256], strides = [1, 1]} : vector<2x512xf32> to vector<2x256xf32>
      %92 = vector.extract_strided_slice %90 {offsets = [0, 256], sizes = [2, 256], strides = [1, 1]} : vector<2x512xf32> to vector<2x256xf32>
      %93 = vector.extract_strided_slice %63 {offsets = [0, 512], sizes = [2, 256], strides = [1, 1]} : vector<2x1024xf32> to vector<2x256xf32>
      %94 = math.tanh %93 : vector<2x256xf32>
      %95 = vector.extract_strided_slice %63 {offsets = [0, 768], sizes = [2, 256], strides = [1, 1]} : vector<2x1024xf32> to vector<2x256xf32>
      %96 = arith.negf %95 : vector<2x256xf32>
      %97 = math.exp %96 : vector<2x256xf32>
      %cst_57 = arith.constant 1.000000e+00 : f32
      %98 = vector.broadcast %cst_57 : f32 to vector<2x256xf32>
      %99 = arith.addf %98, %97 : vector<2x256xf32>
      %100 = arith.divf %98, %99 : vector<2x256xf32>
      %101 = arith.mulf %92, %arg22 : vector<2x256xf32>
      %102 = arith.mulf %91, %94 : vector<2x256xf32>
      %103 = arith.addf %101, %102 : vector<2x256xf32>
      %104 = math.tanh %103 : vector<2x256xf32>
      %105 = arith.mulf %100, %104 : vector<2x256xf32>
      %106 = arith.index_cast %arg18 : i32 to index
      %c0_58 = arith.constant 0 : index
      %c0_59 = arith.constant 0 : index
      %107 = vector.load %arg16[%106, %c0_58, %c0_59] : memref<8x2x256xf32, #tpu.memory_space<vmem>>, vector<1x2x256xf32>
      %108 = vector.shape_cast %107 : vector<1x2x256xf32> to vector<2x256xf32>
      %109 = vector.shape_cast %84 : vector<2x256xf32> to vector<1x2x256xf32>
      tpu.vector_store %arg16[%106, %c0_58, %c0_59], %109 {strides = array<i32>} : memref<8x2x256xf32, #tpu.memory_space<vmem>>, vector<1x2x256xf32>,
      %110 = arith.index_cast %51 : i32 to index
      %c0_60 = arith.constant 0 : index
      %c0_61 = arith.constant 0 : index
      %111 = vector.load %arg17[%110, %c0_60, %c0_61] : memref<8x2x256xf32, #tpu.memory_space<vmem>>, vector<1x2x256xf32>
      %112 = vector.shape_cast %111 : vector<1x2x256xf32> to vector<2x256xf32>
      %113 = vector.shape_cast %105 : vector<2x256xf32> to vector<1x2x256xf32>
      tpu.vector_store %arg17[%110, %c0_60, %c0_61], %113 {strides = array<i32>} : memref<8x2x256xf32, #tpu.memory_space<vmem>>, vector<1x2x256xf32>,
      scf.yield %84, %82, %105, %103 : vector<2x256xf32>, vector<2x256xf32>, vector<2x256xf32>, vector<2x256xf32>
    }
    %c8_i32_22 = arith.constant 8 : i32
    %c0_23 = arith.constant 0 : index
    %c0_24 = arith.constant 0 : index
    %c0_25 = arith.constant 0 : index
    %21 = vector.load %arg16[%c0_23, %c0_24, %c0_25] : memref<8x2x256xf32, #tpu.memory_space<vmem>>, vector<8x2x256xf32>
    %22 = vector.shape_cast %21 : vector<8x2x256xf32> to vector<16x256xf32>
    %23 = arith.truncf %22 : vector<16x256xf32> to vector<16x256xbf16>
    %c0_26 = arith.constant 0 : index
    %c0_27 = arith.constant 0 : index
    %c0_28 = arith.constant 0 : index
    %24 = vector.load %arg17[%c0_26, %c0_27, %c0_28] : memref<8x2x256xf32, #tpu.memory_space<vmem>>, vector<8x2x256xf32>
    %25 = vector.shape_cast %24 : vector<8x2x256xf32> to vector<16x256xf32>
    %26 = arith.truncf %25 : vector<16x256xf32> to vector<16x256xbf16>
    %c0_29 = arith.constant 0 : index
    %c0_30 = arith.constant 0 : index
    %27 = vector.load %arg8[%c0_29, %c0_30] : memref<256x128xbf16, #tpu.memory_space<vmem>>, vector<256x128xbf16>
    %cst_31 = arith.constant dense<0.000000e+00> : vector<16x128xf32>
    %28 = tpu.matmul %23, %27, %cst_31 {dimension_numbers = #tpu.dot_dimension_numbers<[1], [0], [0], [1], [0, 0, 1, 1], [], []>} : vector<16x256xbf16>, vector<256x128xbf16>, vector<16x128xf32> -> vector<16x128xf32>
    %c0_32 = arith.constant 0 : index
    %c0_33 = arith.constant 0 : index
    %29 = vector.load %arg9[%c0_32, %c0_33] : memref<256x128xbf16, #tpu.memory_space<vmem>>, vector<256x128xbf16>
    %cst_34 = arith.constant dense<0.000000e+00> : vector<16x128xf32>
    %30 = tpu.matmul %26, %29, %cst_34 {dimension_numbers = #tpu.dot_dimension_numbers<[1], [0], [0], [1], [0, 0, 1, 1], [], []>} : vector<16x256xbf16>, vector<256x128xbf16>, vector<16x128xf32> -> vector<16x128xf32>
    %31 = arith.addf %28, %30 : vector<16x128xf32>
    %c0_35 = arith.constant 0 : index
    %c0_36 = arith.constant 0 : index
    %32 = vector.load %arg10[%c0_35, %c0_36] : memref<1x128xf32, #tpu.memory_space<vmem>>, vector<1x128xf32>
    %33 = vector.broadcast %32 : vector<1x128xf32> to vector<16x128xf32>
    %34 = arith.addf %31, %33 : vector<16x128xf32>
    %cst_37 = arith.constant 0.000000e+00 : f32
    %35 = vector.broadcast %cst_37 : f32 to vector<16x128xf32>
    %36 = arith.cmpf ogt, %34, %35 : vector<16x128xf32>
    %cst_38 = arith.constant 0.000000e+00 : f32
    %37 = vector.broadcast %cst_38 : f32 to vector<16x128xf32>
    %38 = arith.minimumf %34, %37 : vector<16x128xf32>
    %39 = math.exp %38 : vector<16x128xf32>
    %cst_39 = arith.constant 1.000000e+00 : f32
    %40 = vector.broadcast %cst_39 : f32 to vector<16x128xf32>
    %41 = arith.subf %39, %40 : vector<16x128xf32>
    %42 = arith.select %36, %34, %41 : vector<16x128xi1>, vector<16x128xf32>
    %43 = arith.truncf %42 : vector<16x128xf32> to vector<16x128xbf16>
    %c0_40 = arith.constant 0 : index
    %c0_41 = arith.constant 0 : index
    %44 = vector.load %arg11[%c0_40, %c0_41] : memref<128x128xbf16, #tpu.memory_space<vmem>>, vector<128x128xbf16>
    %cst_42 = arith.constant dense<0.000000e+00> : vector<16x128xf32>
    %45 = tpu.matmul %43, %44, %cst_42 {dimension_numbers = #tpu.dot_dimension_numbers<[1], [0], [0], [1], [0, 0, 1, 1], [], []>} : vector<16x128xbf16>, vector<128x128xbf16>, vector<16x128xf32> -> vector<16x128xf32>
    %c0_43 = arith.constant 0 : index
    %c0_44 = arith.constant 0 : index
    %46 = vector.load %arg12[%c0_43, %c0_44] : memref<1x128xf32, #tpu.memory_space<vmem>>, vector<1x128xf32>
    %47 = vector.broadcast %46 : vector<1x128xf32> to vector<16x128xf32>
    %48 = arith.addf %45, %47 : vector<16x128xf32>
    %49 = vector.shape_cast %48 : vector<16x128xf32> to vector<8x2x128xf32>
    %c0_45 = arith.constant 0 : index
    %c0_46 = arith.constant 0 : index
    %c0_47 = arith.constant 0 : index
    %50 = vector.load %arg13[%c0_45, %c0_46, %c0_47] : memref<8x2x128xf32, #tpu.memory_space<vmem>>, vector<8x2x128xf32>
    tpu.vector_store %arg13[%c0_45, %c0_46, %c0_47], %49 {strides = array<i32>} : memref<8x2x128xf32, #tpu.memory_space<vmem>>, vector<8x2x128xf32>,
    return
  }
  func.func @transform_0(%arg0: i32) -> (i32, i32, i32) {
    %c0_i32 = arith.constant 0 : i32
    %c0_i32_0 = arith.constant 0 : i32
    %c0_i32_1 = arith.constant 0 : i32
    return %c0_i32, %arg0, %c0_i32_0 : i32, i32, i32
  }
  func.func @transform_1(%arg0: i32) -> (i32, i32) {
    %c0_i32 = arith.constant 0 : i32
    %c0_i32_0 = arith.constant 0 : i32
    %c0_i32_1 = arith.constant 0 : i32
    return %c0_i32, %c0_i32_0 : i32, i32
  }
  func.func @transform_2(%arg0: i32) -> (i32, i32) {
    %c0_i32 = arith.constant 0 : i32
    %c0_i32_0 = arith.constant 0 : i32
    %c0_i32_1 = arith.constant 0 : i32
    return %c0_i32, %c0_i32_0 : i32, i32
  }
  func.func @transform_3(%arg0: i32) -> (i32, i32) {
    %c0_i32 = arith.constant 0 : i32
    %c0_i32_0 = arith.constant 0 : i32
    %c0_i32_1 = arith.constant 0 : i32
    return %c0_i32, %c0_i32_0 : i32, i32
  }
  func.func @transform_4(%arg0: i32) -> (i32, i32) {
    %c0_i32 = arith.constant 0 : i32
    %c0_i32_0 = arith.constant 0 : i32
    %c0_i32_1 = arith.constant 0 : i32
    return %c0_i32, %c0_i32_0 : i32, i32
  }
  func.func @transform_5(%arg0: i32) -> (i32, i32) {
    %c0_i32 = arith.constant 0 : i32
    %c0_i32_0 = arith.constant 0 : i32
    %c0_i32_1 = arith.constant 0 : i32
    return %c0_i32, %c0_i32_0 : i32, i32
  }
  func.func @transform_6(%arg0: i32) -> (i32, i32) {
    %c0_i32 = arith.constant 0 : i32
    %c0_i32_0 = arith.constant 0 : i32
    %c0_i32_1 = arith.constant 0 : i32
    return %c0_i32, %c0_i32_0 : i32, i32
  }
  func.func @transform_7(%arg0: i32) -> (i32, i32) {
    %c0_i32 = arith.constant 0 : i32
    %c0_i32_0 = arith.constant 0 : i32
    %c0_i32_1 = arith.constant 0 : i32
    return %c0_i32, %c0_i32_0 : i32, i32
  }
  func.func @transform_8(%arg0: i32) -> (i32, i32) {
    %c0_i32 = arith.constant 0 : i32
    %c0_i32_0 = arith.constant 0 : i32
    %c0_i32_1 = arith.constant 0 : i32
    return %c0_i32, %c0_i32_0 : i32, i32
  }
  func.func @transform_9(%arg0: i32) -> (i32, i32) {
    %c0_i32 = arith.constant 0 : i32
    %c0_i32_0 = arith.constant 0 : i32
    %c0_i32_1 = arith.constant 0 : i32
    return %c0_i32, %c0_i32_0 : i32, i32
  }
  func.func @transform_10(%arg0: i32) -> (i32, i32) {
    %c0_i32 = arith.constant 0 : i32
    %c0_i32_0 = arith.constant 0 : i32
    %c0_i32_1 = arith.constant 0 : i32
    return %c0_i32, %c0_i32_0 : i32, i32
  }
  func.func @transform_11(%arg0: i32) -> (i32, i32) {
    %c0_i32 = arith.constant 0 : i32
    %c0_i32_0 = arith.constant 0 : i32
    %c0_i32_1 = arith.constant 0 : i32
    return %c0_i32, %c0_i32_0 : i32, i32
  }
  func.func @transform_12(%arg0: i32) -> (i32, i32, i32) {
    %c0_i32 = arith.constant 0 : i32
    %c0_i32_0 = arith.constant 0 : i32
    %c0_i32_1 = arith.constant 0 : i32
    return %c0_i32, %arg0, %c0_i32_0 : i32, i32, i32
  }
}

</mosaic_0001>

<bundles_post_ra>
// kernel: bilstm_ner_forward.2
= control target key start
LH: loop header
LB: loop body
LE: loop exit
PB: predicated region body
PF: predicated region fallthrough
CT: control target
= control target key end

     0   :  { %v962_v3 = vmov 0.0   ;;  %s963_s15 = smov 68   ;;  %vm133_vm0 = vcmask 736256   ;;  %s964_s18 = smov 98   ;;  %vm966_vm1 = vmmov 0   ;;  %vm158_vm2 = vcmask 1044480   ;;  %s1279_s0 = inlined_call_operand.vmem [shape: f32[16,300], index: 0, kind: input, shape index: {}]   ;;  %s1280_s4 = inlined_call_operand.vmem [shape: bf16[120,128], index: 4, kind: input, shape index: {}]   ;;  %s1281_s2 = inlined_call_operand.vmem [shape: bf16[90,128], index: 2, kind: input, shape index: {}]   ;;  %s1282_s6 = inlined_call_operand.vmem [shape: bf16[150,128], index: 6, kind: input, shape index: {}]   ;;  %s1283_s3 = inlined_call_operand.vmem [shape: f32[1,128], index: 3, kind: input, shape index: {}]   ;;  %s1284_s5 = inlined_call_operand.vmem [shape: f32[1,128], index: 5, kind: input, shape index: {}]   ;;  %s1285_s1 = inlined_call_operand.vmem [shape: f32[16,100], index: 1, kind: input, shape index: {}]   ;;  %s1286_s8 = inlined_call_operand.vmem [shape: bf16[16,512], index: 8, kind: output, shape index: {}]   ;;  %s1287_s7 = inlined_call_operand.vmem [shape: f32[1,128], index: 7, kind: input, shape index: {}]  }
   0x1   :  { %v31_v0 = vld [vmem:[%s1279_s0 + $0x8] sm:$0xff]  ;;  %v34_v1 = vld [vmem:[%s1279_s0 + $0x20] sm:$0xff]  ;;  %863 = vmatprep.subr.bf16.mxu1 %v962_v3  ;;  %v33_v5 = vld [vmem:[%s1279_s0 + $0x18] sm:$0xff]  ;;  %s965_s23 = smov 38   ;;  %879 = vmatprep.mubr.msk.bf16.mxu1 %vm966_vm1, %v962_v3  ;;  %s967_s28 = smov 8   ;;  %vm382_vm3 = vcmask 1043456  }
   0x2   :  { %v30_v2 = vld [vmem:[%s1279_s0] sm:$0xff]  ;;  %v1027_v4 = vpack.c.bf16 %v34_v1, %v31_v0  ;;  %v940_v9 = vld [vmem:[%s1280_s4 + $0x8] sm:$0xff]   ;;  %v943_v11 = vld [vmem:[%s1281_s2 + $0x10] sm:$0xff]   ;;  %s969_s22 = smov 106   ;;  %v971_v25 = vmov 0   ;;  %vm365_vm4 = vcmask 982016  }
   0x3   :  { %v1032_v6 = vpack.c.bf16 %v33_v5, %v30_v2  ;;  %v938_v7 = vld [vmem:[%s1280_s4] sm:$0xff]   ;;  %v941_v10 = vld [vmem:[%s1281_s2 + $0x8] sm:$0xff]   ;;  %v942_v12 = vld [vmem:[%s1280_s4 + $0x10] sm:$0xff]   ;;  %vm612_vm5 = vcmask 1042432   ;;  %vm50_vm6 = vcmask 556032   ;;  %vm56_vm7 = vcmask 310272  }
   0x4   :  { %48 = vrot.lane.b32.xlu1 %v1027_v4, %s963_s15  ;;  %v939_v8 = vld [vmem:[%s1281_s2] sm:$0xff]   ;;  %864 = vmatpush3.bf16.msra.mxu1 %v938_v7  ;;  %v945_v13 = vld [vmem:[%s1281_s2 + $0x18] sm:$0xff]   ;;  %v32_v15 = vld [vmem:[%s1279_s0 + $0x10] sm:$0xff]  ;;  %vm292_vm8 = vcmask 801792   ;;  %vm62_vm9 = vcmask 64512   ;;  %vm71_vm10 = vcmask 621568  }
   0x5   :  { %43 = vrot.lane.b32.xlu0 %v1032_v6, %s964_s18  ;;  %835 = vmatprep.subr.bf16.mxu0 %v939_v8  ;;  %v944_v14 = vld [vmem:[%s1280_s4 + $0x18] sm:$0xff]   ;;  %v947_v16 = vld [vmem:[%s1281_s2 + $0x20] sm:$0xff]   ;;  %v35_v18 = vld [vmem:[%s1279_s0 + $0x28] sm:$0xff]  ;;  %s970_s0 = smov 46   ;;  %vm77_vm11 = vcmask 375808   ;;  %vm593_vm12 = vcmask 179200  }
   0x6   :  { %865 = vmatprep.subr.bf16.mxu1 %v962_v3  ;;  %836 = vmatpush3.bf16.msra.mxu0 %v939_v8  ;;  %v946_v17 = vld [vmem:[%s1280_s4 + $0x20] sm:$0xff]   ;;  %v949_v19 = vld [vmem:[%s1281_s2 + $0x28] sm:$0x1f]   ;;  %v38_v20 = vpack.c.bf16 %v35_v18, %v32_v15  ;;  %v950_v23 = vld [vmem:[%s1280_s4 + $0x30] sm:$0xff]   ;;  %vm296_vm13 = vcmask 867328   ;;  %vm720_vm14 = vcmask 818176  }
   0x7   :  { %847 = vmatprep.mubr.msk.bf16.mxu0 %vm133_vm0, %v1032_v6  ;;  %837 = vmatprep.subr.bf16.mxu0 %v941_v10  ;;  %v948_v21 = vld [vmem:[%s1280_s4 + $0x28] sm:$0xff]   ;;  %v160_v22 = vsel %vm158_vm2, %v949_v19, 0  ;;  %v952_v24 = vld [vmem:[%s1280_s4 + $0x38] ss:$0 sps:$4 sm:$0xff]   ;;  %v951_v27 = vld [vmem:[%s1282_s6] sm:$0xff]  }
   0x8   :  { %52 = vrot.lane.b32.xlu1 %v1032_v6, %s965_s23  ;;  %866 = vmatpush3.bf16.msra.mxu1 %v940_v9  ;;  %v384_v26 = vsel %vm382_vm3, %v952_v24, 0  ;;  %v953_v28 = vld [vmem:[%s1282_s6 + $0x8] sm:$0xff]   ;;  %v954_v29 = vld [vmem:[%s1282_s6 + $0x10] sm:$0xff]   ;;  %v955_v30 = vld [vmem:[%s1282_s6 + $0x18] sm:$0xff]  }
   0x9   :  { %46 = vrot.lane.b32.xlu0 %v1032_v6, %s963_s15  ;;  %867 = vmatprep.subr.bf16.mxu1 %v962_v3  ;;  %v956_v31 = vld [vmem:[%s1282_s6 + $0x20] sm:$0xff]   ;;  %v957_v32 = vld [vmem:[%s1282_s6 + $0x28] sm:$0xff]   ;;  %v958_v33 = vld [vmem:[%s1282_s6 + $0x30] sm:$0xff]  }
   0xa   :  { %838 = vmatpush3.bf16.msra.mxu0 %v941_v10  ;;  %v1144_v34 = vld [vmem:[%s1282_s6 + $0x38] sm:$0xff]   ;;  %v960_v35 = vld [vmem:[%s1282_s6 + $0x40] sm:$0xff]   ;;  %v961_v36 = vld [vmem:[%s1282_s6 + $0x48] ss:$0 sps:$4 sm:$0x77]  }
   0xb   :  { %839 = vmatprep.subr.bf16.mxu0 %v943_v11  ;;  %v614_v37 = vsel %vm612_vm5, %v961_v36, 0  ;;  %v1215_v5 = vld [vmem:[%s1283_s3] ss:$0 sm:$0xff] }
   0xc   :  { %58 = vrot.lane.b32.xlu1 %v1032_v6, %s967_s28  ;;  %868 = vmatpush3.bf16.msra.mxu1 %v942_v12 }
   0xd   :  { %54 = vrot.lane.b32.xlu0 %v1027_v4, %s965_s23  ;;  %869 = vmatprep.subr.bf16.mxu1 %v962_v3 }
   0xe   :  { %840 = vmatpush3.bf16.msra.mxu0 %v943_v11 }
   0xf   :  { %841 = vmatprep.subr.bf16.mxu0 %v945_v13 }
  0x10   :  { %290 = vrot.lane.b32.xlu1 %v1027_v4, %s964_s18  ;;  %870 = vmatpush3.bf16.msra.mxu1 %v944_v14  ;;  %s968_s18 = smov 76  }
  0x11   :  { %60 = vrot.lane.b32.xlu0 %v1027_v4, %s967_s28  ;;  %871 = vmatprep.subr.bf16.mxu1 %v962_v3 }
  0x12   :  { %842 = vmatpush3.bf16.msra.mxu0 %v945_v13 }
  0x13   :  { %843 = vmatprep.subr.bf16.mxu0 %v947_v16 }
  0x14   :  { %67 = vrot.lane.b32.xlu1 %v1027_v4, %s968_s18  ;;  %872 = vmatpush3.bf16.msra.mxu1 %v946_v17 }
  0x15   :  { %64 = vrot.lane.b32.xlu0 %v1027_v4, %s969_s22  ;;  %873 = vmatprep.subr.bf16.mxu1 %v962_v3 }
  0x16   :  { %844 = vmatpush3.bf16.msra.mxu0 %v947_v16 }
  0x17   :  { %927 = vmatprep.subr.msk.bf16.mxu0 %vm158_vm2, %v949_v19 }
  0x18   :  { %73 = vrot.lane.b32.xlu1 %v1027_v4, %s970_s0  ;;  %874 = vmatpush3.bf16.msra.mxu1 %v948_v21 }
  0x19   :  { %69 = vrot.lane.b32.xlu0 %v38_v20, %s968_s18  ;;  %875 = vmatprep.subr.bf16.mxu1 %v962_v3 }
  0x1a   :  { %846 = vmatpush3.bf16.msra.mxu0 %v160_v22 }
  0x1b   :  { %616 = vmatprep.subr.bf16.mxu0 %v971_v25 }
  0x1c   :  { %294 = vrot.lane.b32.xlu1 %v38_v20, %s969_s22  ;;  %876 = vmatpush3.bf16.msra.mxu1 %v950_v23 }
  0x1d   :  { %75 = vrot.lane.b32.xlu0 %v38_v20, %s970_s0  ;;  %877 = vmatprep.subr.bf16.mxu1 %v962_v3 }
  0x20   :  { %878 = vmatpush3.bf16.msra.mxu1 %v384_v26 }
  0x21   :  { %505 = vrot.lane.b32.xlu0 %v38_v20, %s967_s28  ;;  %907 = vmatprep.subr.bf16.mxu1 %v971_v25 }
  0x23   :  { %880 = vmatmul.mubr.msk.bf16.vlgmr.msra.gmra.mrb[0].mxu1 %vm365_vm4, %v1032_v6 }
  0x24   :  { %883 = vmatprep.mubr.msk.bf16.mxu1 %vm966_vm1, %v962_v3  ;;  %917 = vmatpush1.bf16.msra.mxu1 %v951_v27 }
  0x25   :  { %908 = vmatprep.subr.bf16.mxu1 %v971_v25 }
  0x28   :  { %918 = vmatpush1.bf16.msra.mxu1 %v953_v28 }
  0x29   :  { %909 = vmatprep.subr.bf16.mxu1 %v971_v25 }
  0x2c   :  { %919 = vmatpush1.bf16.msra.mxu1 %v954_v29 }
  0x2d   :  { %910 = vmatprep.subr.bf16.mxu1 %v971_v25 }
  0x30   :  { %920 = vmatpush1.bf16.msra.mxu1 %v955_v30 }
  0x31   :  { %911 = vmatprep.subr.bf16.mxu1 %v971_v25 }
  0x34   :  { %921 = vmatpush1.bf16.msra.mxu1 %v956_v31 }
  0x35   :  { %912 = vmatprep.subr.bf16.mxu1 %v971_v25 }
  0x38   :  { %922 = vmatpush1.bf16.msra.mxu1 %v957_v32 }
  0x39   :  { %913 = vmatprep.subr.bf16.mxu1 %v971_v25 }
  0x3c   :  { %923 = vmatpush1.bf16.msra.mxu1 %v958_v33 }
  0x3d   :  { %914 = vmatprep.subr.bf16.mxu1 %v971_v25 }
  0x40   :  { %924 = vmatpush1.bf16.msra.mxu1 %v1144_v34 }
  0x41   :  { %915 = vmatprep.subr.bf16.mxu1 %v971_v25 }
  0x44   :  { %925 = vmatpush1.bf16.msra.mxu1 %v960_v35 }
  0x45   :  { %916 = vmatprep.subr.bf16.mxu1 %v971_v25 }
  0x48   :  { %926 = vmatpush1.bf16.msra.mxu1 %v614_v37 }
  0x76   :  { %v1155_v38 = vpop.permute.xlu1 %48 }
  0x77   :  { %v44_v39 = vpop.permute.xlu0 %43 }
  0x78   :  { %848 = vmatmul.mubr.msk.bf16.vlgmr.msra.gmra.mrb[0].mxu0 %vm133_vm0, %v44_v39 }
  0x79   :  { %617 = vmatpush1.bf16.msra.mxu0 %v951_v27 }
  0x7a   :  { %v53_v40 = vpop.permute.xlu1 %52  ;;  %618 = vmatprep.subr.bf16.mxu0 %v971_v25 }
  0x7b   :  { %v47_v41 = vpop.permute.xlu0 %46 }
  0x7c   :  { %v1160_v42 = vsel %vm50_vm6, %v47_v41, %v1155_v38 }
  0x7d   :  { %619 = vmatpush1.bf16.msra.mxu0 %v953_v28  ;;  %851 = vmatprep.mubr.msk.bf16.mxu0 %vm133_vm0, %v1160_v42 }
  0x7e   :  { %v59_v43 = vpop.permute.xlu1 %58  ;;  %620 = vmatprep.subr.bf16.mxu0 %v971_v25 }
  0x7f   :  { %v55_v44 = vpop.permute.xlu0 %54 }
  0x80   :  { %v1165_v45 = vsel %vm56_vm7, %v53_v40, %v55_v44 }
  0x81   :  { %621 = vmatpush1.bf16.msra.mxu0 %v954_v29 }
  0x82   :  { %852 = vmatmul.mubr.msk.bf16.gmra.mrb[4].mxu0 %vm133_vm0, %v1165_v45  ;;  %v291_v46 = vpop.permute.xlu1 %290  ;;  %622 = vmatprep.subr.bf16.mxu0 %v971_v25 }
  0x83   :  { %v293_v47 = vsel %vm292_vm8, %v44_v39, %v291_v46  ;;  %v61_v48 = vpop.permute.xlu0 %60 }
  0x84   :  { %v63_v49 = vsel %vm62_vm9, %v59_v43, %v61_v48  ;;  %884 = vmatmul.mubr.msk.bf16.gmra.mrb[4].mxu1 %vm365_vm4, %v293_v47 }
  0x85   :  { %623 = vmatpush1.bf16.msra.mxu0 %v955_v30  ;;  %855 = vmatprep.mubr.msk.bf16.mxu0 %vm133_vm0, %v63_v49 }
  0x86   :  { %624 = vmatprep.subr.bf16.mxu0 %v971_v25  ;;  %887 = vmatprep.mubr.msk.bf16.mxu1 %vm966_vm1, %v962_v3  ;;  %v68_v51 = vpop.permute.xlu1 %67 }
  0x87   :  { %v65_v50 = vpop.permute.xlu0 %64 }
  0x89   :  { %625 = vmatpush1.bf16.msra.mxu0 %v956_v31 }
  0x8a   :  { %856 = vmatmul.mubr.msk.bf16.gmra.mrb[8].mxu0 %vm133_vm0, %v65_v50  ;;  %626 = vmatprep.subr.bf16.mxu0 %v971_v25  ;;  %v74_v54 = vpop.permute.xlu1 %73 }
  0x8b   :  { %v70_v52 = vpop.permute.xlu0 %69 }
  0x8c   :  { %v72_v53 = vsel %vm71_vm10, %v68_v51, %v70_v52  ;;  %888 = vmatmul.mubr.msk.bf16.gmra.mrb[8].mxu1 %vm365_vm4, %v1160_v42 }
  0x8d   :  { %627 = vmatpush1.bf16.msra.mxu0 %v957_v32  ;;  %859 = vmatprep.mubr.msk.bf16.mxu0 %vm133_vm0, %v72_v53  ;;  %v1228_v32 = vld [vmem:[%s1284_s5] ss:$0 sm:$0xff] }
  0x8e   :  { %628 = vmatprep.subr.bf16.mxu0 %v971_v25  ;;  %891 = vmatprep.mubr.msk.bf16.mxu1 %vm966_vm1, %v962_v3  ;;  %v295_v57 = vpop.permute.xlu1 %294 }
  0x8f   :  { %v76_v55 = vpop.permute.xlu0 %75  ;;  %v297_v58 = vsel %vm296_vm13, %v65_v50, %v295_v57 }
  0x90   :  { %v78_v56 = vsel %vm77_vm11, %v74_v54, %v76_v55 }
  0x91   :  { %629 = vmatpush1.bf16.msra.mxu0 %v958_v33 }
  0x92   :  { %860 = vmatmul.mubr.msk.bf16.gmra.mrb[12].mxu0 %vm133_vm0, %v78_v56  ;;  %630 = vmatprep.subr.bf16.mxu0 %v971_v25 }
  0x93   :  { %794 = vmatprep.mubr.msk.bf16.mxu0 %vm593_vm12, %v1027_v4  ;;  %v506_v59 = vpop.permute.xlu0 %505 }
  0x94   :  { %892 = vmatmul.mubr.msk.bf16.gmra.mrb[12].mxu1 %vm365_vm4, %v1165_v45  ;;  %v507_v60 = vsel %vm62_vm9, %v61_v48, %v506_v59 }
  0x95   :  { %631 = vmatpush1.bf16.msra.mxu0 %v1144_v34  ;;  %895 = vmatprep.mubr.msk.bf16.mxu1 %vm966_vm1, %v962_v3 }
  0x96   :  { %632 = vmatprep.subr.bf16.mxu0 %v971_v25 }
  0x99   :  { %633 = vmatpush1.bf16.msra.mxu0 %v960_v35 }
  0x9a   :  { %634 = vmatprep.subr.bf16.mxu0 %v971_v25 }
  0x9c   :  { %896 = vmatmul.mubr.msk.bf16.gmra.mrb[16].mxu1 %vm365_vm4, %v63_v49 }
  0x9d   :  { %635 = vmatpush1.bf16.msra.mxu0 %v614_v37  ;;  %899 = vmatprep.mubr.msk.bf16.mxu1 %vm966_vm1, %v962_v3 }
  0xa0   :  { %649 = vmatmul.mubr.bf16.vlgmr.msra.gmra.mrb[16].mxu0 %v1032_v6 }
  0xa1   :  { %795 = vmatprep.mubr.msk.bf16.mxu0 %vm593_vm12, %v291_v46 }
  0xa4   :  { %900 = vmatmul.mubr.msk.bf16.gmra.mrb[20].mxu1 %vm365_vm4, %v297_v58 }
  0xa5   :  { %903 = vmatprep.mubr.msk.bf16.mxu1 %vm966_vm1, %v962_v3 }
  0xa8   :  { %657 = vmatmul.mubr.bf16.gmra.mrb[20].mxu0 %v293_v47 }
  0xa9   :  { %796 = vmatprep.mubr.msk.bf16.mxu0 %vm593_vm12, %v1155_v38 }
  0xac   :  { %904 = vmatmul.mubr.msk.bf16.gmra.mrb[24].mxu1 %vm365_vm4, %v72_v53 }
  0xad   :  { %799 = vmatprep.mubr.msk.bf16.mxu1 %vm593_vm12, %v295_v57 }
  0xb0   :  { %665 = vmatmul.mubr.bf16.gmra.mrb[24].mxu0 %v1160_v42 }
  0xb1   :  { %797 = vmatprep.mubr.msk.bf16.mxu0 %vm593_vm12, %v55_v44 }
  0xb4   :  { %689 = vmatmul.mubr.bf16.vlgmr.msra.gmra.mrb[28].mxu1 %v297_v58 }
  0xb8   :  { %673 = vmatmul.mubr.bf16.gmra.mrb[28].mxu0 %v1165_v45 }
  0xb9   :  { %798 = vmatprep.mubr.msk.bf16.mxu0 %vm593_vm12, %v507_v60 }
  0xc0   :  { %681 = vmatmul.mubr.bf16.gmra.mrb[32].mxu0 %v63_v49 }
  0xf6   :  { %v420_v61 = vpop.f32.mrb[0].mxu1 }
  0xf7   :  { %v881_v62 = vpop.f32.mrb[1].mxu1  ;;  %v421_v34 = vadd.f32 %v1228_v32, %v420_v61 }
  0xf8   :  { %v423_v63 = vpop.f32.mrb[2].mxu1 }
  0xf9   :  { %v882_v0 = vpop.f32.mrb[3].mxu1  ;;  %v424_v42 = vadd.f32 %v1228_v32, %v423_v63  ;;  %v475_v48 = vmax.f32 %v421_v34, 0.0 }
  0xfb   :  { %v476_v59 = vmax.f32 %v424_v42, 0.0 }
 0x14b   :  { %v849_v1 = vpop.f32.mrb[0].mxu0 }
 0x14c   :  { %v196_v2 = vpop.f32.mrb[1].mxu0  ;;  %v205_v6 = vadd.f32 %v849_v1, %v1215_v5 }
 0x14d   :  { %v850_v3 = vpop.f32.mrb[2].mxu0  ;;  %v197_v7 = vadd.f32 %v1215_v5, %v196_v2 }
 0x14e   :  { %v199_v4 = vpop.f32.mrb[3].mxu0  ;;  %v208_v9 = vadd.f32 %v850_v3, %v1215_v5  ;;  %v261_v16 = vmax.f32 %v205_v6, 0.0 }
 0x14f   :  { %v200_v12 = vadd.f32 %v1215_v5, %v199_v4  ;;  %v259_v21 = vmax.f32 %v197_v7, 0.0 }
 0x150   :  { %v262_v25 = vmax.f32 %v208_v9, 0.0 }
 0x151   :  { %v260_v29 = vmax.f32 %v200_v12, 0.0  ;;  %v39_v12 = vld [vmem:[%s1285_s1] sm:$0xff] }
 0x155   :  { %v853_v8 = vpop.f32.mrb[4].mxu0 }
 0x156   :  { %v221_v10 = vadd.f32 %v853_v8, %v1215_v5  ;;  %v212_v11 = vpop.f32.mrb[5].mxu0 }
 0x157   :  { %v213_v13 = vadd.f32 %v1215_v5, %v212_v11  ;;  %v854_v14 = vpop.f32.mrb[6].mxu0  ;;  %v428_v15 = vpop.f32.mrb[4].mxu1 }
 0x158   :  { %v265_v17 = vmax.f32 %v221_v10, 0.0  ;;  %v224_v18 = vadd.f32 %v854_v14, %v1215_v5  ;;  %v215_v19 = vpop.f32.mrb[7].mxu0  ;;  %v885_v20 = vpop.f32.mrb[5].mxu1  ;;  %v429_v63 = vadd.f32 %v1228_v32, %v428_v15 }
 0x159   :  { %v263_v22 = vmax.f32 %v213_v13, 0.0  ;;  %v216_v23 = vadd.f32 %v1215_v5, %v215_v19  ;;  %v431_v24 = vpop.f32.mrb[6].mxu1  ;;  %v40_v13 = vld [vmem:[%s1285_s1 + $0x8] sm:$0xff] }
 0x15a   :  { %v276_v26 = vmax.f32 %v261_v16, %v265_v17  ;;  %v266_v27 = vmax.f32 %v224_v18, 0.0  ;;  %v886_v28 = vpop.f32.mrb[7].mxu1  ;;  %v432_v9 = vadd.f32 %v1228_v32, %v431_v24  ;;  %v477_v17 = vmax.f32 %v429_v63, 0.0 }
 0x15b   :  { %v275_v30 = vmax.f32 %v259_v21, %v263_v22  ;;  %v264_v31 = vmax.f32 %v216_v23, 0.0 }
 0x15c   :  { %v283_v33 = vmax.f32 %v262_v25, %v266_v27  ;;  %v41_v27 = vpack.c.bf16 %v40_v13, %v39_v12 }
 0x15d   :  { %v282_v35 = vmax.f32 %v260_v29, %v264_v31  ;;  %v857_v36 = vpop.f32.mrb[8].mxu0  ;;  %v478_v29 = vmax.f32 %v432_v9, 0.0 }
 0x15e   :  { %v237_v37 = vadd.f32 %v857_v36, %v1215_v5  ;;  %v228_v38 = vpop.f32.mrb[9].mxu0 }
 0x15f   :  { %v229_v39 = vadd.f32 %v1215_v5, %v228_v38  ;;  %v858_v40 = vpop.f32.mrb[10].mxu0  ;;  %v436_v41 = vpop.f32.mrb[8].mxu1  ;;  %v723_v38 = vsel %vm720_vm14, %v41_v27, 0 }
 0x160   :  { %v269_v43 = vmax.f32 %v237_v37, 0.0  ;;  %v240_v44 = vadd.f32 %v858_v40, %v1215_v5  ;;  %v231_v45 = vpop.f32.mrb[11].mxu0  ;;  %v437_v46 = vadd.f32 %v1228_v32, %v436_v41  ;;  %v889_v47 = vpop.f32.mrb[9].mxu1 }
 0x161   :  { %v267_v49 = vmax.f32 %v229_v39, 0.0  ;;  %v232_v50 = vadd.f32 %v1215_v5, %v231_v45  ;;  %v439_v51 = vpop.f32.mrb[10].mxu1 }
 0x162   :  { %v278_v52 = vmax.f32 %v276_v26, %v269_v43  ;;  %v270_v53 = vmax.f32 %v240_v44, 0.0  ;;  %v479_v54 = vmax.f32 %v437_v46, 0.0  ;;  %v440_v55 = vadd.f32 %v1228_v32, %v439_v51  ;;  %v890_v56 = vpop.f32.mrb[11].mxu1 }
 0x163   :  { %v277_v57 = vmax.f32 %v275_v30, %v267_v49  ;;  %v268_v58 = vmax.f32 %v232_v50, 0.0 }
 0x164   :  { %v285_v60 = vmax.f32 %v283_v33, %v270_v53  ;;  %v489_v61 = vmax.f32 %v475_v48, %v479_v54  ;;  %v480_v62 = vmax.f32 %v440_v55, 0.0 }
 0x165   :  { %v284_v0 = vmax.f32 %v282_v35, %v268_v58  ;;  %v861_v1 = vpop.f32.mrb[12].mxu0 }
 0x166   :  { %v495_v2 = vmax.f32 %v476_v59, %v480_v62  ;;  %v253_v3 = vadd.f32 %v861_v1, %v1215_v5  ;;  %v244_v4 = vpop.f32.mrb[13].mxu0 }
 0x167   :  { %v245_v6 = vadd.f32 %v1215_v5, %v244_v4  ;;  %v862_v7 = vpop.f32.mrb[14].mxu0  ;;  %v444_v8 = vpop.f32.mrb[12].mxu1 }
 0x168   :  { %v273_v10 = vmax.f32 %v253_v3, 0.0  ;;  %v256_v11 = vadd.f32 %v862_v7, %v1215_v5  ;;  %v247_v14 = vpop.f32.mrb[15].mxu0  ;;  %v445_v15 = vadd.f32 %v1228_v32, %v444_v8  ;;  %v893_v16 = vpop.f32.mrb[13].mxu1 }
 0x169   :  { %v271_v18 = vmax.f32 %v245_v6, 0.0  ;;  %v248_v19 = vadd.f32 %v1215_v5, %v247_v14  ;;  %v447_v20 = vpop.f32.mrb[14].mxu1 }
 0x16a   :  { %v280_v21 = vmax.f32 %v278_v52, %v273_v10  ;;  %v274_v22 = vmax.f32 %v256_v11, 0.0  ;;  %v481_v23 = vmax.f32 %v445_v15, 0.0  ;;  %v448_v24 = vadd.f32 %v1228_v32, %v447_v20  ;;  %v894_v25 = vpop.f32.mrb[15].mxu1 }
 0x16b   :  { %v279_v26 = vmax.f32 %v277_v57, %v271_v18  ;;  %v272_v28 = vmax.f32 %v248_v19, 0.0 }
 0x16c   :  { %v287_v30 = vmax.f32 %v285_v60, %v274_v22  ;;  %v490_v31 = vmax.f32 %v477_v17, %v481_v23  ;;  %v482_v33 = vmax.f32 %v448_v24, 0.0 }
 0x16d   :  { %v281_v34 = vmax.f32 %v279_v26, %v280_v21  ;;  %v286_v35 = vmax.f32 %v284_v0, %v272_v28 }
 0x16e   :  { %v496_v36 = vmax.f32 %v478_v29, %v482_v33 }
 0x16f   :  { %v288_v37 = vmax.f32 %v286_v35, %v287_v30  ;;  %v452_v5 = vpop.f32.mrb[16].mxu1 }
 0x170   :  { %v453_v39 = vadd.f32 %v1228_v32, %v452_v5  ;;  %v897_v40 = vpop.f32.mrb[17].mxu1 }
 0x171   :  { %v289_v41 = vpack.c.bf16 %v288_v37, %v281_v34  ;;  %v455_v42 = vpop.f32.mrb[18].mxu1 }
 0x172   :  { %v483_v43 = vmax.f32 %v453_v39, 0.0  ;;  %v456_v44 = vadd.f32 %v1228_v32, %v455_v42  ;;  %v898_v45 = vpop.f32.mrb[19].mxu1 }
 0x173   :  { %v800_v46 = vcombine.low %v723_v38, %v289_v41  ;;  %v802_v47 = vcombine.high %v723_v38, %v289_v41  ;;  %v650_v48 = vpop.f32.mrb[16].mxu0 }
 0x174   :  { %v491_v49 = vmax.f32 %v489_v61, %v483_v43  ;;  %v484_v50 = vmax.f32 %v456_v44, 0.0  ;;  %v652_v51 = vpop.f32.mrb[17].mxu0 }
 0x175   :  { %744 = vst [vmem:[%s1286_s8] sm:$0xff] %v800_v46  ;;  %746 = vst [vmem:[%s1286_s8 + $0x10] sm:$0xff] %v802_v47  ;;  %v653_v52 = vpop.f32.mrb[18].mxu0 }
 0x176   :  { %v497_v53 = vmax.f32 %v495_v2, %v484_v50  ;;  %v655_v54 = vpop.f32.mrb[19].mxu0  ;;  %v783_v2 = vld [vmem:[%s1287_s7] ss:$0 sm:$0xff] }
 0x177   :  { %v460_v55 = vpop.f32.mrb[20].mxu1  ;;  %v651_v10 = vadd.f32 %v783_v2, %v650_v48  ;;  %v654_v16 = vadd.f32 %v783_v2, %v653_v52 }
 0x178   :  { %v461_v56 = vadd.f32 %v1228_v32, %v460_v55  ;;  %v901_v57 = vpop.f32.mrb[21].mxu1 }
 0x179   :  { %v463_v58 = vpop.f32.mrb[22].mxu1  ;;  %v697_v21 = vmax.f32 %v651_v10, 0.0  ;;  %v698_v29 = vmax.f32 %v654_v16, 0.0 }
 0x17a   :  { %v485_v59 = vmax.f32 %v461_v56, 0.0  ;;  %v464_v60 = vadd.f32 %v1228_v32, %v463_v58  ;;  %v902_v61 = vpop.f32.mrb[23].mxu1 }
 0x17b   :  { %v658_v62 = vpop.f32.mrb[20].mxu0 }
 0x17c   :  { %v1262_v63 = vmax.f32 %v490_v31, %v485_v59  ;;  %v486_v0 = vmax.f32 %v464_v60, 0.0  ;;  %v660_v1 = vpop.f32.mrb[21].mxu0  ;;  %v659_v35 = vadd.f32 %v783_v2, %v658_v62 }
 0x17d   :  { %v661_v3 = vpop.f32.mrb[22].mxu0 }
 0x17e   :  { %v1267_v4 = vmax.f32 %v496_v36, %v486_v0  ;;  %v663_v6 = vpop.f32.mrb[23].mxu0  ;;  %v662_v38 = vadd.f32 %v783_v2, %v661_v3  ;;  %v699_v43 = vmax.f32 %v659_v35, 0.0 }
 0x17f   :  { %v468_v7 = vpop.f32.mrb[24].mxu1 }
 0x180   :  { %v469_v8 = vadd.f32 %v1228_v32, %v468_v7  ;;  %v905_v9 = vpop.f32.mrb[25].mxu1  ;;  %v700_v48 = vmax.f32 %v662_v38, 0.0 }
 0x181   :  { %v471_v11 = vpop.f32.mrb[26].mxu1 }
 0x182   :  { %v487_v12 = vmax.f32 %v469_v8, 0.0  ;;  %v472_v13 = vadd.f32 %v1228_v32, %v471_v11  ;;  %v906_v14 = vpop.f32.mrb[27].mxu1 }
 0x183   :  { %v666_v15 = vpop.f32.mrb[24].mxu0 }
 0x184   :  { %v493_v17 = vmax.f32 %v491_v49, %v487_v12  ;;  %v488_v18 = vmax.f32 %v472_v13, 0.0  ;;  %v667_v19 = vadd.f32 %v783_v2, %v666_v15  ;;  %v668_v20 = vpop.f32.mrb[25].mxu0 }
 0x185   :  { %v669_v22 = vpop.f32.mrb[26].mxu0 }
 0x186   :  { %v494_v23 = vmax.f32 %v493_v17, %v1262_v63  ;;  %v499_v24 = vmax.f32 %v497_v53, %v488_v18  ;;  %v701_v25 = vmax.f32 %v667_v19, 0.0  ;;  %v670_v26 = vadd.f32 %v783_v2, %v669_v22  ;;  %v671_v27 = vpop.f32.mrb[27].mxu0 }
 0x187   :  { %v690_v28 = vpop.f32.mrb[28].mxu1 }
 0x188   :  { %v500_v30 = vmax.f32 %v499_v24, %v1267_v4  ;;  %v709_v32 = vmax.f32 %v697_v21, %v701_v25  ;;  %v702_v31 = vmax.f32 %v670_v26, 0.0  ;;  %v692_v33 = vpop.f32.mrb[29].mxu1  ;;  %v691_v39 = vadd.f32 %v783_v2, %v690_v28 }
 0x189   :  { %v693_v34 = vpop.f32.mrb[30].mxu1 }
 0x18a   :  { %v714_v36 = vmax.f32 %v698_v29, %v702_v31  ;;  %v695_v37 = vpop.f32.mrb[31].mxu1  ;;  %v694_v45 = vadd.f32 %v783_v2, %v693_v34  ;;  %v707_v49 = vmax.f32 %v691_v39, 0.0 }
 0x18b   :  { %v674_v5 = vpop.f32.mrb[28].mxu0 }
 0x18c   :  { %v675_v40 = vadd.f32 %v783_v2, %v674_v5  ;;  %v676_v41 = vpop.f32.mrb[29].mxu0  ;;  %v708_v53 = vmax.f32 %v694_v45, 0.0 }
 0x18d   :  { %v677_v42 = vpop.f32.mrb[30].mxu0 }
 0x18e   :  { %v703_v44 = vmax.f32 %v675_v40, 0.0  ;;  %v678_v46 = vadd.f32 %v783_v2, %v677_v42  ;;  %v679_v47 = vpop.f32.mrb[31].mxu0 }
 0x190   :  { %v710_v50 = vmax.f32 %v699_v43, %v703_v44  ;;  %v704_v51 = vmax.f32 %v678_v46, 0.0 }
 0x192   :  { %v712_v52 = vmax.f32 %v710_v50, %v707_v49  ;;  %v715_v54 = vmax.f32 %v700_v48, %v704_v51 }
 0x193   :  { %v682_v55 = vpop.f32.mrb[32].mxu0 }
 0x194   :  { %v717_v56 = vmax.f32 %v715_v54, %v708_v53  ;;  %v683_v57 = vadd.f32 %v783_v2, %v682_v55  ;;  %v684_v58 = vpop.f32.mrb[33].mxu0 }
 0x195   :  { %v685_v59 = vpop.f32.mrb[34].mxu0 }
 0x196   :  { %v705_v60 = vmax.f32 %v683_v57, 0.0  ;;  %v686_v61 = vadd.f32 %v783_v2, %v685_v59  ;;  %v687_v62 = vpop.f32.mrb[35].mxu0 }
 0x198   :  { %v711_v63 = vmax.f32 %v709_v32, %v705_v60  ;;  %v706_v0 = vmax.f32 %v686_v61, 0.0 }
 0x19a   :  { %v713_v1 = vmax.f32 %v711_v63, %v712_v52  ;;  %v716_v3 = vmax.f32 %v714_v36, %v706_v0 }
 0x19c   :  { %v804_v4 = vpack.c.bf16 %v713_v1, %v494_v23  ;;  %v718_v6 = vmax.f32 %v716_v3, %v717_v56 }
 0x19e   :  { %745 = vst [vmem:[%s1286_s8 + $0x8] sm:$0xff] %v804_v4  ;;  %v805_v7 = vpack.c.bf16 %v718_v6, %v500_v30 }
 0x1a0   :  { %747 = vst [vmem:[%s1286_s8 + $0x18] sm:$0xff] %v805_v7 }

// kernel: bilstm_ner_forward.3
= control target key start
LH: loop header
LB: loop body
LE: loop exit
PB: predicated region body
PF: predicated region fallthrough
CT: control target
= control target key end

     0   :  { %v308_v40 = vlaneseq  ;;  %v8231_v41 = vmov 1966171168   ;;  %s12114_s1 = inlined_call_operand.vmem [shape: bf16[512,1024], index: 1, kind: input, shape index: {}]   ;;  %s12115_s7 = inlined_call_operand.vmem [shape: bf16[256,128], index: 7, kind: input, shape index: {}]   ;;  %s12116_s8 = inlined_call_operand.vmem [shape: bf16[256,128], index: 8, kind: input, shape index: {}]   ;;  %s12117_s9 = inlined_call_operand.vmem [shape: f32[1,128], index: 9, kind: input, shape index: {}]   ;;  %s12118_s10 = inlined_call_operand.vmem [shape: bf16[128,128], index: 10, kind: input, shape index: {}]   ;;  %s12119_s11 = inlined_call_operand.vmem [shape: f32[1,128], index: 11, kind: input, shape index: {}]   ;;  %s12120_s12 = inlined_call_operand.vmem [shape: f32[8,2,128], index: 12, kind: output, shape index: {}]   ;;  %s12121_s0 = inlined_call_operand.vmem [shape: bf16[8,2,512], index: 0, kind: input, shape index: {}]   ;;  %s12122_s4 = inlined_call_operand.vmem [shape: bf16[512,1024], index: 4, kind: input, shape index: {}]   ;;  %s12123_s3 = inlined_call_operand.vmem [shape: f32[1,1024], index: 3, kind: input, shape index: {}]   ;;  %s12124_s6 = inlined_call_operand.vmem [shape: f32[1,1024], index: 6, kind: input, shape index: {}]   ;;  %s12125_s2 = inlined_call_operand.vmem [shape: bf16[256,1024], index: 2, kind: input, shape index: {}]   ;;  %s12126_s5 = inlined_call_operand.vmem [shape: bf16[256,1024], index: 5, kind: input, shape index: {}]  }
   0x1   :  { %v50_v0 = vld [vmem:[%s12114_s1] sm:$0xff]  ;;  %v51_v2 = vld [vmem:[%s12114_s1 + $0x8] sm:$0xff]  ;;  %v361_v42 = vunpack.c.l.s4 %v8231_v41 }
   0x2   :  { %v54_v1 = vld [vmem:[%s12114_s1 + $0x20] sm:$0xff]  ;;  %v55_v4 = vld [vmem:[%s12114_s1 + $0x28] sm:$0xff]  ;;  %v8378_v51 = vshrl.u32 %v308_v40, 7 }
   0x3   :  { %v7087_v3 = vcombine.high %v50_v0, %v54_v1  ;;  %v7086_v5 = vcombine.low %v50_v0, %v54_v1  ;;  %v58_v6 = vld [vmem:[%s12114_s1 + $0x40] sm:$0xff]  ;;  %v7089_v8 = vcombine.high %v51_v2, %v55_v4  ;;  %v7088_v9 = vcombine.low %v51_v2, %v55_v4  ;;  %v59_v11 = vld [vmem:[%s12114_s1 + $0x48] sm:$0xff] }
   0x4   :  { %v62_v7 = vld [vmem:[%s12114_s1 + $0x60] sm:$0xff]  ;;  %v63_v12 = vld [vmem:[%s12114_s1 + $0x68] sm:$0xff]  ;;  %v362_v52 = vunpack.c.0.s8 %v361_v42 }
   0x5   :  { %v7095_v10 = vcombine.high %v58_v6, %v62_v7  ;;  %v66_v13 = vld [vmem:[%s12114_s1 + $0x80] sm:$0xff]  ;;  %1708 = vmatprep.subr.bf16.mxu0 %v7087_v3  ;;  %v7097_v14 = vcombine.high %v59_v11, %v63_v12  ;;  %v67_v16 = vld [vmem:[%s12114_s1 + $0x88] sm:$0xff]  ;;  %1794 = vmatprep.subr.bf16.mxu1 %v7089_v8  ;;  %v7094_v18 = vcombine.low %v58_v6, %v62_v7  ;;  %v8414_v3 = vld.sshfl [vmem:[%s12121_s0 + $0x10] sm:$0xff pattern:$0x75316420] }
   0x6   :  { %v70_v15 = vld [vmem:[%s12114_s1 + $0xa0] sm:$0xff]  ;;  %v71_v17 = vld [vmem:[%s12114_s1 + $0xa8] sm:$0xff]  ;;  %1709 = vmatpush1.bf16.msra.mxu0 %v7086_v5  ;;  %1795 = vmatpush1.bf16.msra.mxu1 %v7088_v9  ;;  %v7096_v19 = vcombine.low %v59_v11, %v63_v12  ;;  %v8399_v63 = vsub.s32 %v362_v52, %v8378_v51  ;;  %v8419_v6 = vld.sshfl [vmem:[%s12121_s0 + $0x18] sm:$0xff pattern:$0x75316420] }
   0x7   :  { %1710 = vmatprep.subr.bf16.mxu0 %v7095_v10  ;;  %v7103_v20 = vcombine.high %v66_v13, %v70_v15  ;;  %1796 = vmatprep.subr.bf16.mxu1 %v7097_v14  ;;  %v7105_v21 = vcombine.high %v67_v16, %v71_v17  ;;  %v74_v22 = vld [vmem:[%s12114_s1 + $0xc0] sm:$0xff]  ;;  %v75_v24 = vld [vmem:[%s12114_s1 + $0xc8] sm:$0xff]  ;;  %v7102_v26 = vcombine.low %v66_v13, %v70_v15 }
   0x8   :  { %v78_v23 = vld [vmem:[%s12114_s1 + $0xe0] sm:$0xff]  ;;  %v79_v25 = vld [vmem:[%s12114_s1 + $0xe8] sm:$0xff]  ;;  %v7104_v27 = vcombine.low %v67_v16, %v71_v17  ;;  %v391_v16 = vcombine.high %v8414_v3, %v8419_v6  ;;  %v390_v42 = vcombine.low %v8414_v3, %v8419_v6 }
   0x9   :  { %v7111_v28 = vcombine.high %v74_v22, %v78_v23  ;;  %v7113_v29 = vcombine.high %v75_v24, %v79_v25  ;;  %v82_v30 = vld [vmem:[%s12114_s1 + $0x100] sm:$0xff]  ;;  %v83_v32 = vld [vmem:[%s12114_s1 + $0x108] sm:$0xff]  ;;  %v7110_v34 = vcombine.low %v74_v22, %v78_v23  ;;  %v7112_v35 = vcombine.low %v75_v24, %v79_v25 }
   0xa   :  { %1711 = vmatpush1.bf16.msra.mxu0 %v7094_v18  ;;  %1797 = vmatpush1.bf16.msra.mxu1 %v7096_v19  ;;  %v86_v31 = vld [vmem:[%s12114_s1 + $0x120] sm:$0xff]  ;;  %v87_v33 = vld [vmem:[%s12114_s1 + $0x128] sm:$0xff]  ;;  %v8453_v23 = vrot.slane %v391_v16, %v8399_v63 }
   0xb   :  { %1712 = vmatprep.subr.bf16.mxu0 %v7103_v20  ;;  %1798 = vmatprep.subr.bf16.mxu1 %v7105_v21  ;;  %v7119_v36 = vcombine.high %v82_v30, %v86_v31  ;;  %v7121_v37 = vcombine.high %v83_v32, %v87_v33  ;;  %v90_v38 = vld [vmem:[%s12114_s1 + $0x140] sm:$0xff]  ;;  %v91_v43 = vld [vmem:[%s12114_s1 + $0x148] sm:$0xff]  ;;  %v7118_v45 = vcombine.low %v82_v30, %v86_v31 }
   0xc   :  { %v94_v39 = vld [vmem:[%s12114_s1 + $0x160] sm:$0xff]  ;;  %v95_v44 = vld [vmem:[%s12114_s1 + $0x168] sm:$0xff]  ;;  %v7120_v46 = vcombine.low %v83_v32, %v87_v33 }
   0xd   :  { %v7127_v47 = vcombine.high %v90_v38, %v94_v39  ;;  %v7129_v48 = vcombine.high %v91_v43, %v95_v44  ;;  %v98_v49 = vld [vmem:[%s12114_s1 + $0x180] sm:$0xff]  ;;  %v99_v53 = vld [vmem:[%s12114_s1 + $0x188] sm:$0xff]  ;;  %v7126_v55 = vcombine.low %v90_v38, %v94_v39  ;;  %v7128_v58 = vcombine.low %v91_v43, %v95_v44 }
   0xe   :  { %1713 = vmatpush1.bf16.msra.mxu0 %v7102_v26  ;;  %1799 = vmatpush1.bf16.msra.mxu1 %v7104_v27  ;;  %v102_v50 = vld [vmem:[%s12114_s1 + $0x1a0] sm:$0xff]  ;;  %v103_v54 = vld [vmem:[%s12114_s1 + $0x1a8] sm:$0xff] }
   0xf   :  { %1714 = vmatprep.subr.bf16.mxu0 %v7111_v28  ;;  %1800 = vmatprep.subr.bf16.mxu1 %v7113_v29  ;;  %v106_v56 = vld [vmem:[%s12114_s1 + $0x1c0] sm:$0xff]  ;;  %v7135_v59 = vcombine.high %v98_v49, %v102_v50  ;;  %v107_v60 = vld [vmem:[%s12114_s1 + $0x1c8] sm:$0xff]  ;;  %v7137_v62 = vcombine.high %v99_v53, %v103_v54  ;;  %v7134_v0 = vcombine.low %v98_v49, %v102_v50 }
  0x10   :  { %v110_v57 = vld [vmem:[%s12114_s1 + $0x1e0] sm:$0xff]  ;;  %v111_v61 = vld [vmem:[%s12114_s1 + $0x1e8] sm:$0xff]  ;;  %v7136_v4 = vcombine.low %v99_v53, %v103_v54  ;;  %v412_v53 = vrot.slane %v390_v42, %v8399_v63 }
  0x11   :  { %v8404_v1 = vld.sshfl [vmem:[%s12121_s0] sm:$0xff pattern:$0x75316420]  ;;  %v8409_v2 = vld.sshfl [vmem:[%s12121_s0 + $0x8] sm:$0xff pattern:$0x75316420]  ;;  %v7143_v5 = vcombine.high %v106_v56, %v110_v57  ;;  %v7145_v7 = vcombine.high %v107_v60, %v111_v61  ;;  %v7142_v12 = vcombine.low %v106_v56, %v110_v57  ;;  %v7144_v14 = vcombine.low %v107_v60, %v111_v61 }
  0x12   :  { %1715 = vmatpush1.bf16.msra.mxu0 %v7110_v34  ;;  %1801 = vmatpush1.bf16.msra.mxu1 %v7112_v35  ;;  %v114_v8 = vld [vmem:[%s12114_s1 + $0x200] sm:$0xff]  ;;  %v115_v10 = vld [vmem:[%s12114_s1 + $0x208] sm:$0xff]  ;;  %v389_v13 = vcombine.high %v8404_v1, %v8409_v2  ;;  %v388_v41 = vcombine.low %v8404_v1, %v8409_v2 }
  0x13   :  { %1716 = vmatprep.subr.bf16.mxu0 %v7119_v36  ;;  %1802 = vmatprep.subr.bf16.mxu1 %v7121_v37  ;;  %v118_v9 = vld [vmem:[%s12114_s1 + $0x220] sm:$0xff]  ;;  %v119_v11 = vld [vmem:[%s12114_s1 + $0x228] sm:$0xff] }
  0x14   :  { %v7151_v15 = vcombine.high %v114_v8, %v118_v9  ;;  %v7153_v17 = vcombine.high %v115_v10, %v119_v11  ;;  %v122_v18 = vld [vmem:[%s12114_s1 + $0x240] sm:$0xff]  ;;  %v8444_v20 = vrot.slane %v389_v13, %v8399_v63  ;;  %v123_v21 = vld [vmem:[%s12114_s1 + $0x248] sm:$0xff]  ;;  %v7150_v24 = vcombine.low %v114_v8, %v118_v9 }
  0x15   :  { %v126_v19 = vld [vmem:[%s12114_s1 + $0x260] sm:$0xff]  ;;  %v127_v22 = vld [vmem:[%s12114_s1 + $0x268] sm:$0xff]  ;;  %v7152_v25 = vcombine.low %v115_v10, %v119_v11  ;;  %v398_v52 = vrot.slane %v388_v41, %v8399_v63 }
  0x16   :  { %1717 = vmatpush1.bf16.msra.mxu0 %v7118_v45  ;;  %1803 = vmatpush1.bf16.msra.mxu1 %v7120_v46  ;;  %v7159_v26 = vcombine.high %v122_v18, %v126_v19  ;;  %v8457_v27 = vcombine.low %v8444_v20, %v8453_v23  ;;  %v7161_v28 = vcombine.high %v123_v21, %v127_v22  ;;  %v130_v29 = vld [vmem:[%s12114_s1 + $0x280] sm:$0xff]  ;;  %v131_v31 = vld [vmem:[%s12114_s1 + $0x288] sm:$0xff] }
  0x17   :  { %1718 = vmatprep.subr.bf16.mxu0 %v7127_v47  ;;  %1804 = vmatprep.subr.bf16.mxu1 %v7129_v48  ;;  %v134_v30 = vld [vmem:[%s12114_s1 + $0x2a0] sm:$0xff]  ;;  %v135_v32 = vld [vmem:[%s12114_s1 + $0x2a8] sm:$0xff]  ;;  %v7158_v33 = vcombine.low %v122_v18, %v126_v19  ;;  %v7160_v34 = vcombine.low %v123_v21, %v127_v22  ;;  %v8503_v57 = vcombine.high %v398_v52, %v412_v53 }
  0x18   :  { %1740 = vmatprep.mubr.bf16.mxu0 %v8457_v27  ;;  %1826 = vmatprep.mubr.bf16.mxu1 %v8457_v27  ;;  %v7167_v35 = vcombine.high %v130_v29, %v134_v30  ;;  %v7169_v36 = vcombine.high %v131_v31, %v135_v32  ;;  %v138_v37 = vld [vmem:[%s12114_s1 + $0x2c0] sm:$0xff]  ;;  %v139_v39 = vld [vmem:[%s12114_s1 + $0x2c8] sm:$0xff]  ;;  %v7166_v43 = vcombine.low %v130_v29, %v134_v30 }
  0x19   :  { %v142_v38 = vld [vmem:[%s12114_s1 + $0x2e0] sm:$0xff]  ;;  %v143_v40 = vld [vmem:[%s12114_s1 + $0x2e8] sm:$0xff]  ;;  %v7168_v44 = vcombine.low %v131_v31, %v135_v32  ;;  %v8559_v32 = vcombine.low %v398_v52, %v412_v53  ;;  %v8575_v41 = vcombine.high %v8444_v20, %v8453_v23 }
  0x1a   :  { %1719 = vmatpush1.bf16.msra.mxu0 %v7126_v55  ;;  %1805 = vmatpush1.bf16.msra.mxu1 %v7128_v58  ;;  %v7175_v45 = vcombine.high %v138_v37, %v142_v38  ;;  %v7177_v46 = vcombine.high %v139_v39, %v143_v40  ;;  %v146_v47 = vld [vmem:[%s12114_s1 + $0x300] sm:$0xff]  ;;  %v147_v49 = vld [vmem:[%s12114_s1 + $0x308] sm:$0xff]  ;;  %v7174_v54 = vcombine.low %v138_v37, %v142_v38 }
  0x1b   :  { %1720 = vmatprep.subr.bf16.mxu0 %v7135_v59  ;;  %1806 = vmatprep.subr.bf16.mxu1 %v7137_v62  ;;  %v150_v48 = vld [vmem:[%s12114_s1 + $0x320] sm:$0xff]  ;;  %v151_v50 = vld [vmem:[%s12114_s1 + $0x328] sm:$0xff]  ;;  %v7176_v55 = vcombine.low %v139_v39, %v143_v40 }
  0x1c   :  { %v7183_v56 = vcombine.high %v146_v47, %v150_v48  ;;  %v7185_v58 = vcombine.high %v147_v49, %v151_v50  ;;  %v154_v59 = vld [vmem:[%s12114_s1 + $0x340] sm:$0xff]  ;;  %v155_v61 = vld [vmem:[%s12114_s1 + $0x348] sm:$0xff]  ;;  %v7182_v63 = vcombine.low %v146_v47, %v150_v48 }
  0x1d   :  { %v158_v60 = vld [vmem:[%s12114_s1 + $0x360] sm:$0xff]  ;;  %v159_v62 = vld [vmem:[%s12114_s1 + $0x368] sm:$0xff] }
  0x1e   :  { %1721 = vmatpush1.bf16.msra.mxu0 %v7134_v0  ;;  %1807 = vmatpush1.bf16.msra.mxu1 %v7136_v4  ;;  %v7184_v0 = vcombine.low %v147_v49, %v151_v50  ;;  %v7191_v1 = vcombine.high %v154_v59, %v158_v60  ;;  %v7193_v2 = vcombine.high %v155_v61, %v159_v62  ;;  %v162_v3 = vld [vmem:[%s12114_s1 + $0x380] sm:$0xff]  ;;  %v167_v6 = vld [vmem:[%s12114_s1 + $0x3a8] sm:$0xff] }
  0x1f   :  { %1722 = vmatprep.subr.bf16.mxu0 %v7143_v5  ;;  %1808 = vmatprep.subr.bf16.mxu1 %v7145_v7  ;;  %v166_v4 = vld [vmem:[%s12114_s1 + $0x3a0] sm:$0xff]  ;;  %v163_v5 = vld [vmem:[%s12114_s1 + $0x388] sm:$0xff]  ;;  %v7190_v7 = vcombine.low %v154_v59, %v158_v60  ;;  %v7192_v8 = vcombine.low %v155_v61, %v159_v62 }
  0x20   :  { %v7199_v9 = vcombine.high %v162_v3, %v166_v4  ;;  %v7201_v10 = vcombine.high %v163_v5, %v167_v6  ;;  %v170_v11 = vld [vmem:[%s12114_s1 + $0x3c0] sm:$0xff]  ;;  %v171_v13 = vld [vmem:[%s12114_s1 + $0x3c8] sm:$0xff]  ;;  %v7200_v16 = vcombine.low %v163_v5, %v167_v6 }
  0x21   :  { %v178_v19 = vld [vmem:[%s12114_s1 + $0x400] sm:$0xff]  ;;  %v179_v22 = vld [vmem:[%s12114_s1 + $0x408] sm:$0xff] }
  0x22   :  { %1723 = vmatpush1.bf16.msra.mxu0 %v7142_v12  ;;  %1809 = vmatpush1.bf16.msra.mxu1 %v7144_v14  ;;  %v174_v12 = vld [vmem:[%s12114_s1 + $0x3e0] sm:$0xff]  ;;  %v175_v14 = vld [vmem:[%s12114_s1 + $0x3e8] sm:$0xff] }
  0x23   :  { %1724 = vmatprep.subr.bf16.mxu0 %v7151_v15  ;;  %1810 = vmatprep.subr.bf16.mxu1 %v7153_v17  ;;  %v7198_v15 = vcombine.low %v162_v3, %v166_v4  ;;  %v7207_v17 = vcombine.high %v170_v11, %v174_v12  ;;  %v7209_v18 = vcombine.high %v171_v13, %v175_v14  ;;  %v182_v21 = vld [vmem:[%s12114_s1 + $0x420] sm:$0xff]  ;;  %v195_v42 = vld [vmem:[%s12114_s1 + $0x488] sm:$0xff] }
  0x24   :  { %v186_v30 = vld [vmem:[%s12114_s1 + $0x440] sm:$0xff]  ;;  %v203_v48 = vld [vmem:[%s12114_s1 + $0x4c8] sm:$0xff] }
  0x25   :  { %v190_v31 = vld [vmem:[%s12114_s1 + $0x460] sm:$0xff]  ;;  %v207_v49 = vld [vmem:[%s12114_s1 + $0x4e8] sm:$0xff] }
  0x26   :  { %1725 = vmatpush1.bf16.msra.mxu0 %v7150_v24  ;;  %1811 = vmatpush1.bf16.msra.mxu1 %v7152_v25  ;;  %v183_v24 = vld [vmem:[%s12114_s1 + $0x428] sm:$0xff]  ;;  %v7206_v25 = vcombine.low %v170_v11, %v174_v12  ;;  %v7223_v37 = vcombine.high %v186_v30, %v190_v31  ;;  %v194_v39 = vld [vmem:[%s12114_s1 + $0x480] sm:$0xff]  ;;  %v7240_v61 = vcombine.low %v203_v48, %v207_v49 }
  0x27   :  { %1726 = vmatprep.subr.bf16.mxu0 %v7159_v26  ;;  %1812 = vmatprep.subr.bf16.mxu1 %v7161_v28  ;;  %v7208_v26 = vcombine.low %v171_v13, %v175_v14  ;;  %v7215_v28 = vcombine.high %v178_v19, %v182_v21  ;;  %v7217_v29 = vcombine.high %v179_v22, %v183_v24  ;;  %v198_v40 = vld [vmem:[%s12114_s1 + $0x4a0] sm:$0xff]  ;;  %v215_v59 = vld [vmem:[%s12114_s1 + $0x528] sm:$0xff] }
  0x28   :  { %v202_v23 = vld [vmem:[%s12114_s1 + $0x4c0] sm:$0xff]  ;;  %v7230_v50 = vcombine.low %v194_v39, %v198_v40  ;;  %v223_v3 = vld [vmem:[%s12114_s1 + $0x568] sm:$0xff] }
  0x29   :  { %v206_v47 = vld [vmem:[%s12114_s1 + $0x4e0] sm:$0xff]  ;;  %v231_v11 = vld [vmem:[%s12114_s1 + $0x5a8] sm:$0xff] }
  0x2a   :  { %1727 = vmatpush1.bf16.msra.mxu0 %v7158_v33  ;;  %1813 = vmatpush1.bf16.msra.mxu1 %v7160_v34  ;;  %v187_v33 = vld [vmem:[%s12114_s1 + $0x448] sm:$0xff]  ;;  %v7239_v53 = vcombine.high %v202_v23, %v206_v47  ;;  %v7238_v60 = vcombine.low %v202_v23, %v206_v47 }
  0x2b   :  { %1728 = vmatprep.subr.bf16.mxu0 %v7167_v35  ;;  %1814 = vmatprep.subr.bf16.mxu1 %v7169_v36  ;;  %v191_v34 = vld [vmem:[%s12114_s1 + $0x468] sm:$0xff]  ;;  %v7214_v35 = vcombine.low %v178_v19, %v182_v21  ;;  %v7216_v36 = vcombine.low %v179_v22, %v183_v24 }
  0x2c   :  { %v7225_v38 = vcombine.high %v187_v33, %v191_v34  ;;  %v239_v19 = vld [vmem:[%s12114_s1 + $0x5e8] sm:$0xff] }
  0x2d   :  { %v263_v23 = vld [vmem:[%s12114_s1 + $0x6a8] sm:$0xff] }
  0x2e   :  { %1729 = vmatpush1.bf16.msra.mxu0 %v7166_v43  ;;  %1815 = vmatpush1.bf16.msra.mxu1 %v7168_v44  ;;  %v199_v43 = vld [vmem:[%s12114_s1 + $0x4a8] sm:$0xff]  ;;  %v7222_v44 = vcombine.low %v186_v30, %v190_v31 }
  0x2f   :  { %1730 = vmatprep.subr.bf16.mxu0 %v7175_v45  ;;  %1816 = vmatprep.subr.bf16.mxu1 %v7177_v46  ;;  %v7224_v45 = vcombine.low %v187_v33, %v191_v34  ;;  %v7231_v46 = vcombine.high %v194_v39, %v198_v40  ;;  %v7233_v20 = vcombine.high %v195_v42, %v199_v43  ;;  %v247_v30 = vld [vmem:[%s12114_s1 + $0x628] sm:$0xff] }
  0x30   :  { %v7232_v52 = vcombine.low %v195_v42, %v199_v43  ;;  %v255_v39 = vld [vmem:[%s12114_s1 + $0x668] sm:$0xff] }
  0x32   :  { %1731 = vmatpush1.bf16.msra.mxu0 %v7174_v54  ;;  %1817 = vmatpush1.bf16.msra.mxu1 %v7176_v55  ;;  %v7241_v54 = vcombine.high %v203_v48, %v207_v49  ;;  %v210_v55 = vld [vmem:[%s12114_s1 + $0x500] sm:$0xff] }
  0x33   :  { %1732 = vmatprep.subr.bf16.mxu0 %v7183_v56  ;;  %1818 = vmatprep.subr.bf16.mxu1 %v7185_v58  ;;  %v214_v56 = vld [vmem:[%s12114_s1 + $0x520] sm:$0xff]  ;;  %v211_v58 = vld [vmem:[%s12114_s1 + $0x508] sm:$0xff] }
  0x34   :  { %v7247_v62 = vcombine.high %v210_v55, %v214_v56  ;;  %v7246_v4 = vcombine.low %v210_v55, %v214_v56  ;;  %v7248_v5 = vcombine.low %v211_v58, %v215_v59  ;;  %v271_v55 = vld [vmem:[%s12114_s1 + $0x6e8] sm:$0xff] }
  0x36   :  { %1733 = vmatpush1.bf16.msra.mxu0 %v7182_v63  ;;  %1819 = vmatpush1.bf16.msra.mxu1 %v7184_v0  ;;  %v7249_v63 = vcombine.high %v211_v58, %v215_v59  ;;  %v218_v0 = vld [vmem:[%s12114_s1 + $0x540] sm:$0xff] }
  0x37   :  { %1734 = vmatprep.subr.bf16.mxu0 %v7191_v1  ;;  %1820 = vmatprep.subr.bf16.mxu1 %v7193_v2  ;;  %v222_v1 = vld [vmem:[%s12114_s1 + $0x560] sm:$0xff]  ;;  %v219_v2 = vld [vmem:[%s12114_s1 + $0x548] sm:$0xff] }
  0x38   :  { %v7255_v6 = vcombine.high %v218_v0, %v222_v1  ;;  %v7254_v12 = vcombine.low %v218_v0, %v222_v1  ;;  %v7256_v13 = vcombine.low %v219_v2, %v223_v3  ;;  %v279_v0 = vld [vmem:[%s12114_s1 + $0x728] sm:$0xff] }
  0x3a   :  { %1735 = vmatpush1.bf16.msra.mxu0 %v7190_v7  ;;  %1821 = vmatpush1.bf16.msra.mxu1 %v7192_v8  ;;  %v7257_v7 = vcombine.high %v219_v2, %v223_v3  ;;  %v226_v8 = vld [vmem:[%s12114_s1 + $0x580] sm:$0xff] }
  0x3b   :  { %1736 = vmatprep.subr.bf16.mxu0 %v7199_v9  ;;  %1822 = vmatprep.subr.bf16.mxu1 %v7201_v10  ;;  %v230_v9 = vld [vmem:[%s12114_s1 + $0x5a0] sm:$0xff]  ;;  %v227_v10 = vld [vmem:[%s12114_s1 + $0x588] sm:$0xff] }
  0x3c   :  { %v7263_v14 = vcombine.high %v226_v8, %v230_v9  ;;  %v7262_v21 = vcombine.low %v226_v8, %v230_v9  ;;  %v7264_v22 = vcombine.low %v227_v10, %v231_v11  ;;  %v287_v8 = vld [vmem:[%s12114_s1 + $0x768] sm:$0xff] }
  0x3e   :  { %1737 = vmatpush1.bf16.msra.mxu0 %v7198_v15  ;;  %1823 = vmatpush1.bf16.msra.mxu1 %v7200_v16  ;;  %v7265_v15 = vcombine.high %v227_v10, %v231_v11  ;;  %v234_v16 = vld [vmem:[%s12114_s1 + $0x5c0] sm:$0xff] }
  0x3f   :  { %1738 = vmatprep.subr.bf16.mxu0 %v7207_v17  ;;  %1824 = vmatprep.subr.bf16.mxu1 %v7209_v18  ;;  %v238_v17 = vld [vmem:[%s12114_s1 + $0x5e0] sm:$0xff]  ;;  %v235_v18 = vld [vmem:[%s12114_s1 + $0x5c8] sm:$0xff] }
  0x40   :  { %v7271_v24 = vcombine.high %v234_v16, %v238_v17  ;;  %v7270_v31 = vcombine.low %v234_v16, %v238_v17  ;;  %v7272_v33 = vcombine.low %v235_v18, %v239_v19  ;;  %v295_v16 = vld [vmem:[%s12114_s1 + $0x7a8] sm:$0xff] }
  0x42   :  { %1739 = vmatpush1.bf16.msra.mxu0 %v7206_v25  ;;  %1825 = vmatpush1.bf16.msra.mxu1 %v7208_v26  ;;  %v7273_v25 = vcombine.high %v235_v18, %v239_v19  ;;  %v242_v26 = vld [vmem:[%s12114_s1 + $0x600] sm:$0xff] }
  0x43   :  { %1751 = vmatprep.subr.bf16.mxu0 %v7215_v28  ;;  %1837 = vmatprep.subr.bf16.mxu1 %v7217_v29  ;;  %v246_v28 = vld [vmem:[%s12114_s1 + $0x620] sm:$0xff]  ;;  %v243_v29 = vld [vmem:[%s12114_s1 + $0x608] sm:$0xff] }
  0x44   :  { %v7279_v34 = vcombine.high %v242_v26, %v246_v28  ;;  %v7278_v40 = vcombine.low %v242_v26, %v246_v28  ;;  %v7280_v42 = vcombine.low %v243_v29, %v247_v30  ;;  %v303_v26 = vld [vmem:[%s12114_s1 + $0x7e8] sm:$0xff] }
  0x45   :  { %1741 = vmatmul.mubr.bf16.vlgmr.msra.gmra.mrb[0].mxu0 %v8559_v32  ;;  %1827 = vmatmul.mubr.bf16.vlgmr.msra.gmra.mrb[0].mxu1 %v8559_v32 }
  0x46   :  { %1752 = vmatpush1.bf16.msra.mxu0 %v7214_v35  ;;  %1838 = vmatpush1.bf16.msra.mxu1 %v7216_v36  ;;  %v7281_v35 = vcombine.high %v243_v29, %v247_v30  ;;  %v250_v36 = vld [vmem:[%s12114_s1 + $0x640] sm:$0xff] }
  0x47   :  { %1753 = vmatprep.subr.bf16.mxu0 %v7223_v37  ;;  %1839 = vmatprep.subr.bf16.mxu1 %v7225_v38  ;;  %v254_v37 = vld [vmem:[%s12114_s1 + $0x660] sm:$0xff]  ;;  %v251_v38 = vld [vmem:[%s12114_s1 + $0x648] sm:$0xff] }
  0x48   :  { %1783 = vmatprep.mubr.bf16.mxu0 %v8575_v41  ;;  %1869 = vmatprep.mubr.bf16.mxu1 %v8575_v41  ;;  %v7287_v43 = vcombine.high %v250_v36, %v254_v37  ;;  %v7286_v47 = vcombine.low %v250_v36, %v254_v37  ;;  %v7288_v48 = vcombine.low %v251_v38, %v255_v39  ;;  %v57_v36 = vld [vmem:[%s12114_s1 + $0x38] sm:$0xff] }
  0x4a   :  { %1754 = vmatpush1.bf16.msra.mxu0 %v7222_v44  ;;  %1840 = vmatpush1.bf16.msra.mxu1 %v7224_v45  ;;  %v7289_v44 = vcombine.high %v251_v38, %v255_v39  ;;  %v258_v45 = vld [vmem:[%s12114_s1 + $0x680] sm:$0xff] }
  0x4b   :  { %1755 = vmatprep.subr.bf16.mxu0 %v7231_v46  ;;  %1841 = vmatprep.subr.bf16.mxu1 %v7233_v20  ;;  %v262_v46 = vld [vmem:[%s12114_s1 + $0x6a0] sm:$0xff]  ;;  %v259_v20 = vld [vmem:[%s12114_s1 + $0x688] sm:$0xff] }
  0x4c   :  { %v7295_v49 = vcombine.high %v258_v45, %v262_v46  ;;  %v7294_v56 = vcombine.low %v258_v45, %v262_v46  ;;  %v7296_v58 = vcombine.low %v259_v20, %v263_v23  ;;  %v65_v45 = vld [vmem:[%s12114_s1 + $0x78] sm:$0xff] }
  0x4e   :  { %1756 = vmatpush1.bf16.msra.mxu0 %v7230_v50  ;;  %1842 = vmatpush1.bf16.msra.mxu1 %v7232_v52  ;;  %v7297_v50 = vcombine.high %v259_v20, %v263_v23  ;;  %v266_v52 = vld [vmem:[%s12114_s1 + $0x6c0] sm:$0xff] }
  0x4f   :  { %1757 = vmatprep.subr.bf16.mxu0 %v7239_v53  ;;  %1843 = vmatprep.subr.bf16.mxu1 %v7241_v54  ;;  %v270_v53 = vld [vmem:[%s12114_s1 + $0x6e0] sm:$0xff]  ;;  %v267_v54 = vld [vmem:[%s12114_s1 + $0x6c8] sm:$0xff] }
  0x50   :  { %v7303_v59 = vcombine.high %v266_v52, %v270_v53  ;;  %v7302_v1 = vcombine.low %v266_v52, %v270_v53  ;;  %v7304_v2 = vcombine.low %v267_v54, %v271_v55  ;;  %v73_v52 = vld [vmem:[%s12114_s1 + $0xb8] sm:$0xff] }
  0x52   :  { %1758 = vmatpush1.bf16.msra.mxu0 %v7238_v60  ;;  %1844 = vmatpush1.bf16.msra.mxu1 %v7240_v61  ;;  %v7305_v60 = vcombine.high %v267_v54, %v271_v55  ;;  %v274_v61 = vld [vmem:[%s12114_s1 + $0x700] sm:$0xff] }
  0x53   :  { %1759 = vmatprep.subr.bf16.mxu0 %v7247_v62  ;;  %1845 = vmatprep.subr.bf16.mxu1 %v7249_v63  ;;  %v278_v62 = vld [vmem:[%s12114_s1 + $0x720] sm:$0xff]  ;;  %v275_v63 = vld [vmem:[%s12114_s1 + $0x708] sm:$0xff] }
  0x54   :  { %v7311_v3 = vcombine.high %v274_v61, %v278_v62  ;;  %v7310_v9 = vcombine.low %v274_v61, %v278_v62  ;;  %v7312_v10 = vcombine.low %v275_v63, %v279_v0  ;;  %v81_v61 = vld [vmem:[%s12114_s1 + $0xf8] sm:$0xff] }
  0x56   :  { %1760 = vmatpush1.bf16.msra.mxu0 %v7246_v4  ;;  %1846 = vmatpush1.bf16.msra.mxu1 %v7248_v5  ;;  %v7313_v4 = vcombine.high %v275_v63, %v279_v0  ;;  %v282_v5 = vld [vmem:[%s12114_s1 + $0x740] sm:$0xff] }
  0x57   :  { %1761 = vmatprep.subr.bf16.mxu0 %v7255_v6  ;;  %1847 = vmatprep.subr.bf16.mxu1 %v7257_v7  ;;  %v286_v6 = vld [vmem:[%s12114_s1 + $0x760] sm:$0xff]  ;;  %v283_v7 = vld [vmem:[%s12114_s1 + $0x748] sm:$0xff] }
  0x58   :  { %v7319_v11 = vcombine.high %v282_v5, %v286_v6  ;;  %v7318_v17 = vcombine.low %v282_v5, %v286_v6  ;;  %v7320_v18 = vcombine.low %v283_v7, %v287_v8  ;;  %v89_v5 = vld [vmem:[%s12114_s1 + $0x138] sm:$0xff] }
  0x5a   :  { %1762 = vmatpush1.bf16.msra.mxu0 %v7254_v12  ;;  %1848 = vmatpush1.bf16.msra.mxu1 %v7256_v13  ;;  %v7321_v12 = vcombine.high %v283_v7, %v287_v8  ;;  %v290_v13 = vld [vmem:[%s12114_s1 + $0x780] sm:$0xff] }
  0x5b   :  { %1763 = vmatprep.subr.bf16.mxu0 %v7263_v14  ;;  %1849 = vmatprep.subr.bf16.mxu1 %v7265_v15  ;;  %v294_v14 = vld [vmem:[%s12114_s1 + $0x7a0] sm:$0xff]  ;;  %v291_v15 = vld [vmem:[%s12114_s1 + $0x788] sm:$0xff] }
  0x5c   :  { %v7327_v19 = vcombine.high %v290_v13, %v294_v14  ;;  %v7326_v28 = vcombine.low %v290_v13, %v294_v14  ;;  %v7328_v29 = vcombine.low %v291_v15, %v295_v16  ;;  %v97_v13 = vld [vmem:[%s12114_s1 + $0x178] sm:$0xff] }
  0x5e   :  { %1764 = vmatpush1.bf16.msra.mxu0 %v7262_v21  ;;  %1850 = vmatpush1.bf16.msra.mxu1 %v7264_v22  ;;  %v7329_v21 = vcombine.high %v291_v15, %v295_v16  ;;  %v298_v22 = vld [vmem:[%s12114_s1 + $0x7c0] sm:$0xff] }
  0x5f   :  { %1765 = vmatprep.subr.bf16.mxu0 %v7271_v24  ;;  %1851 = vmatprep.subr.bf16.mxu1 %v7273_v25  ;;  %v302_v24 = vld [vmem:[%s12114_s1 + $0x7e0] sm:$0xff]  ;;  %v299_v25 = vld [vmem:[%s12114_s1 + $0x7c8] sm:$0xff] }
  0x60   :  { %v7335_v30 = vcombine.high %v298_v22, %v302_v24  ;;  %v7334_v37 = vcombine.low %v298_v22, %v302_v24  ;;  %v7336_v38 = vcombine.low %v299_v25, %v303_v26  ;;  %v105_v22 = vld [vmem:[%s12114_s1 + $0x1b8] sm:$0xff] }
  0x62   :  { %1766 = vmatpush1.bf16.msra.mxu0 %v7270_v31  ;;  %1852 = vmatpush1.bf16.msra.mxu1 %v7272_v33  ;;  %v7337_v31 = vcombine.high %v299_v25, %v303_v26  ;;  %v52_v33 = vld [vmem:[%s12114_s1 + $0x10] sm:$0xff] }
  0x63   :  { %1767 = vmatprep.subr.bf16.mxu0 %v7279_v34  ;;  %1853 = vmatprep.subr.bf16.mxu1 %v7281_v35  ;;  %v56_v34 = vld [vmem:[%s12114_s1 + $0x30] sm:$0xff]  ;;  %v53_v35 = vld [vmem:[%s12114_s1 + $0x18] sm:$0xff] }
  0x64   :  { %v7091_v39 = vcombine.high %v52_v33, %v56_v34  ;;  %v7090_v46 = vcombine.low %v52_v33, %v56_v34  ;;  %v7092_v20 = vcombine.low %v53_v35, %v57_v36  ;;  %v113_v33 = vld [vmem:[%s12114_s1 + $0x1f8] sm:$0xff] }
  0x66   :  { %1768 = vmatpush1.bf16.msra.mxu0 %v7278_v40  ;;  %1854 = vmatpush1.bf16.msra.mxu1 %v7280_v42  ;;  %v7093_v40 = vcombine.high %v53_v35, %v57_v36  ;;  %v60_v42 = vld [vmem:[%s12114_s1 + $0x50] sm:$0xff] }
  0x67   :  { %1769 = vmatprep.subr.bf16.mxu0 %v7287_v43  ;;  %1855 = vmatprep.subr.bf16.mxu1 %v7289_v44  ;;  %v64_v43 = vld [vmem:[%s12114_s1 + $0x70] sm:$0xff]  ;;  %v61_v44 = vld [vmem:[%s12114_s1 + $0x58] sm:$0xff] }
  0x68   :  { %v7099_v23 = vcombine.high %v60_v42, %v64_v43  ;;  %v7098_v53 = vcombine.low %v60_v42, %v64_v43  ;;  %v7100_v54 = vcombine.low %v61_v44, %v65_v45  ;;  %v121_v42 = vld [vmem:[%s12114_s1 + $0x238] sm:$0xff] }
  0x6a   :  { %1770 = vmatpush1.bf16.msra.mxu0 %v7286_v47  ;;  %1856 = vmatpush1.bf16.msra.mxu1 %v7288_v48  ;;  %v7101_v47 = vcombine.high %v61_v44, %v65_v45  ;;  %v68_v48 = vld [vmem:[%s12114_s1 + $0x90] sm:$0xff] }
  0x6b   :  { %1771 = vmatprep.subr.bf16.mxu0 %v7295_v49  ;;  %1857 = vmatprep.subr.bf16.mxu1 %v7297_v50  ;;  %v72_v49 = vld [vmem:[%s12114_s1 + $0xb0] sm:$0xff]  ;;  %v69_v50 = vld [vmem:[%s12114_s1 + $0x98] sm:$0xff] }
  0x6c   :  { %v7107_v55 = vcombine.high %v68_v48, %v72_v49  ;;  %v7106_v62 = vcombine.low %v68_v48, %v72_v49  ;;  %v7108_v63 = vcombine.low %v69_v50, %v73_v52  ;;  %v129_v48 = vld [vmem:[%s12114_s1 + $0x278] sm:$0xff] }
  0x6e   :  { %1772 = vmatpush1.bf16.msra.mxu0 %v7294_v56  ;;  %1858 = vmatpush1.bf16.msra.mxu1 %v7296_v58  ;;  %v7109_v56 = vcombine.high %v69_v50, %v73_v52  ;;  %v76_v58 = vld [vmem:[%s12114_s1 + $0xd0] sm:$0xff] }
  0x6f   :  { %1773 = vmatprep.subr.bf16.mxu0 %v7303_v59  ;;  %1859 = vmatprep.subr.bf16.mxu1 %v7305_v60  ;;  %v80_v59 = vld [vmem:[%s12114_s1 + $0xf0] sm:$0xff]  ;;  %v77_v60 = vld [vmem:[%s12114_s1 + $0xd8] sm:$0xff] }
  0x70   :  { %v7115_v0 = vcombine.high %v76_v58, %v80_v59  ;;  %v7114_v6 = vcombine.low %v76_v58, %v80_v59  ;;  %v7116_v7 = vcombine.low %v77_v60, %v81_v61  ;;  %v137_v58 = vld [vmem:[%s12114_s1 + $0x2b8] sm:$0xff] }
  0x72   :  { %1774 = vmatpush1.bf16.msra.mxu0 %v7302_v1  ;;  %1860 = vmatpush1.bf16.msra.mxu1 %v7304_v2  ;;  %v7117_v1 = vcombine.high %v77_v60, %v81_v61  ;;  %v84_v2 = vld [vmem:[%s12114_s1 + $0x110] sm:$0xff] }
  0x73   :  { %1775 = vmatprep.subr.bf16.mxu0 %v7311_v3  ;;  %1861 = vmatprep.subr.bf16.mxu1 %v7313_v4  ;;  %v88_v3 = vld [vmem:[%s12114_s1 + $0x130] sm:$0xff]  ;;  %v85_v4 = vld [vmem:[%s12114_s1 + $0x118] sm:$0xff] }
  0x74   :  { %v7123_v8 = vcombine.high %v84_v2, %v88_v3  ;;  %v7122_v14 = vcombine.low %v84_v2, %v88_v3  ;;  %v7124_v15 = vcombine.low %v85_v4, %v89_v5  ;;  %v145_v2 = vld [vmem:[%s12114_s1 + $0x2f8] sm:$0xff] }
  0x76   :  { %1776 = vmatpush1.bf16.msra.mxu0 %v7310_v9  ;;  %1862 = vmatpush1.bf16.msra.mxu1 %v7312_v10  ;;  %v7125_v9 = vcombine.high %v85_v4, %v89_v5  ;;  %v92_v10 = vld [vmem:[%s12114_s1 + $0x150] sm:$0xff] }
  0x77   :  { %1777 = vmatprep.subr.bf16.mxu0 %v7319_v11  ;;  %1863 = vmatprep.subr.bf16.mxu1 %v7321_v12  ;;  %v96_v11 = vld [vmem:[%s12114_s1 + $0x170] sm:$0xff]  ;;  %v93_v12 = vld [vmem:[%s12114_s1 + $0x158] sm:$0xff] }
  0x78   :  { %v7131_v16 = vcombine.high %v92_v10, %v96_v11  ;;  %v7130_v24 = vcombine.low %v92_v10, %v96_v11  ;;  %v7132_v25 = vcombine.low %v93_v12, %v97_v13  ;;  %v153_v10 = vld [vmem:[%s12114_s1 + $0x338] sm:$0xff] }
  0x7a   :  { %1778 = vmatpush1.bf16.msra.mxu0 %v7318_v17  ;;  %1864 = vmatpush1.bf16.msra.mxu1 %v7320_v18  ;;  %v7133_v17 = vcombine.high %v93_v12, %v97_v13  ;;  %v100_v18 = vld [vmem:[%s12114_s1 + $0x190] sm:$0xff] }
  0x7b   :  { %1779 = vmatprep.subr.bf16.mxu0 %v7327_v19  ;;  %1865 = vmatprep.subr.bf16.mxu1 %v7329_v21  ;;  %v104_v19 = vld [vmem:[%s12114_s1 + $0x1b0] sm:$0xff]  ;;  %v101_v21 = vld [vmem:[%s12114_s1 + $0x198] sm:$0xff] }
  0x7c   :  { %v7139_v26 = vcombine.high %v100_v18, %v104_v19  ;;  %v7138_v34 = vcombine.low %v100_v18, %v104_v19  ;;  %v7140_v35 = vcombine.low %v101_v21, %v105_v22  ;;  %v161_v18 = vld [vmem:[%s12114_s1 + $0x378] sm:$0xff] }
  0x7e   :  { %1780 = vmatpush1.bf16.msra.mxu0 %v7326_v28  ;;  %1866 = vmatpush1.bf16.msra.mxu1 %v7328_v29  ;;  %v7141_v28 = vcombine.high %v101_v21, %v105_v22  ;;  %v108_v29 = vld [vmem:[%s12114_s1 + $0x1d0] sm:$0xff] }
  0x7f   :  { %1781 = vmatprep.subr.bf16.mxu0 %v7335_v30  ;;  %1867 = vmatprep.subr.bf16.mxu1 %v7337_v31  ;;  %v112_v30 = vld [vmem:[%s12114_s1 + $0x1f0] sm:$0xff]  ;;  %v109_v31 = vld [vmem:[%s12114_s1 + $0x1d8] sm:$0xff] }
  0x80   :  { %v7147_v36 = vcombine.high %v108_v29, %v112_v30  ;;  %v7146_v43 = vcombine.low %v108_v29, %v112_v30  ;;  %v7148_v44 = vcombine.low %v109_v31, %v113_v33  ;;  %v169_v29 = vld [vmem:[%s12114_s1 + $0x3b8] sm:$0xff] }
  0x82   :  { %1782 = vmatpush1.bf16.msra.mxu0 %v7334_v37  ;;  %1868 = vmatpush1.bf16.msra.mxu1 %v7336_v38  ;;  %v7149_v37 = vcombine.high %v109_v31, %v113_v33  ;;  %v116_v38 = vld [vmem:[%s12114_s1 + $0x210] sm:$0xff] }
  0x83   :  { %1880 = vmatprep.subr.bf16.mxu0 %v7091_v39  ;;  %1966 = vmatprep.subr.bf16.mxu1 %v7093_v40  ;;  %v120_v39 = vld [vmem:[%s12114_s1 + $0x230] sm:$0xff]  ;;  %v117_v40 = vld [vmem:[%s12114_s1 + $0x218] sm:$0xff] }
  0x84   :  { %v7155_v45 = vcombine.high %v116_v38, %v120_v39  ;;  %v7154_v49 = vcombine.low %v116_v38, %v120_v39  ;;  %v7156_v50 = vcombine.low %v117_v40, %v121_v42  ;;  %v177_v38 = vld [vmem:[%s12114_s1 + $0x3f8] sm:$0xff] }
  0x85   :  { %1784 = vmatmul.mubr.bf16.vlgmr.msra.gmra.mrb[0].mxu0 %v8503_v57  ;;  %1870 = vmatmul.mubr.bf16.vlgmr.msra.gmra.mrb[0].mxu1 %v8503_v57 }
  0x86   :  { %1881 = vmatpush1.bf16.msra.mxu0 %v7090_v46  ;;  %1967 = vmatpush1.bf16.msra.mxu1 %v7092_v20  ;;  %v7157_v46 = vcombine.high %v117_v40, %v121_v42  ;;  %v124_v20 = vld [vmem:[%s12114_s1 + $0x250] sm:$0xff] }
  0x87   :  { %1882 = vmatprep.subr.bf16.mxu0 %v7099_v23  ;;  %1968 = vmatprep.subr.bf16.mxu1 %v7101_v47  ;;  %v128_v23 = vld [vmem:[%s12114_s1 + $0x270] sm:$0xff]  ;;  %v125_v47 = vld [vmem:[%s12114_s1 + $0x258] sm:$0xff] }
  0x88   :  { %1912 = vmatprep.mubr.bf16.mxu0 %v8457_v27  ;;  %1998 = vmatprep.mubr.bf16.mxu1 %v8457_v27  ;;  %v7163_v52 = vcombine.high %v124_v20, %v128_v23  ;;  %v7162_v59 = vcombine.low %v124_v20, %v128_v23  ;;  %v7164_v60 = vcombine.low %v125_v47, %v129_v48  ;;  %v185_v20 = vld [vmem:[%s12114_s1 + $0x438] sm:$0xff] }
  0x8a   :  { %1883 = vmatpush1.bf16.msra.mxu0 %v7098_v53  ;;  %1969 = vmatpush1.bf16.msra.mxu1 %v7100_v54  ;;  %v7165_v53 = vcombine.high %v125_v47, %v129_v48  ;;  %v132_v54 = vld [vmem:[%s12114_s1 + $0x290] sm:$0xff] }
  0x8b   :  { %1884 = vmatprep.subr.bf16.mxu0 %v7107_v55  ;;  %1970 = vmatprep.subr.bf16.mxu1 %v7109_v56  ;;  %v136_v55 = vld [vmem:[%s12114_s1 + $0x2b0] sm:$0xff]  ;;  %v133_v56 = vld [vmem:[%s12114_s1 + $0x298] sm:$0xff] }
  0x8c   :  { %v7171_v61 = vcombine.high %v132_v54, %v136_v55  ;;  %v7170_v3 = vcombine.low %v132_v54, %v136_v55  ;;  %v7172_v4 = vcombine.low %v133_v56, %v137_v58  ;;  %v193_v54 = vld [vmem:[%s12114_s1 + $0x478] sm:$0xff] }
  0x8e   :  { %1885 = vmatpush1.bf16.msra.mxu0 %v7106_v62  ;;  %1971 = vmatpush1.bf16.msra.mxu1 %v7108_v63  ;;  %v7173_v62 = vcombine.high %v133_v56, %v137_v58  ;;  %v140_v63 = vld [vmem:[%s12114_s1 + $0x2d0] sm:$0xff] }
  0x8f   :  { %1886 = vmatprep.subr.bf16.mxu0 %v7115_v0  ;;  %1972 = vmatprep.subr.bf16.mxu1 %v7117_v1  ;;  %v144_v0 = vld [vmem:[%s12114_s1 + $0x2f0] sm:$0xff]  ;;  %v141_v1 = vld [vmem:[%s12114_s1 + $0x2d8] sm:$0xff] }
  0x90   :  { %v7179_v5 = vcombine.high %v140_v63, %v144_v0  ;;  %v7178_v11 = vcombine.low %v140_v63, %v144_v0  ;;  %v7180_v12 = vcombine.low %v141_v1, %v145_v2  ;;  %v201_v63 = vld [vmem:[%s12114_s1 + $0x4b8] sm:$0xff] }
  0x92   :  { %1887 = vmatpush1.bf16.msra.mxu0 %v7114_v6  ;;  %1973 = vmatpush1.bf16.msra.mxu1 %v7116_v7  ;;  %v7181_v6 = vcombine.high %v141_v1, %v145_v2  ;;  %v148_v7 = vld [vmem:[%s12114_s1 + $0x310] sm:$0xff] }
  0x93   :  { %1888 = vmatprep.subr.bf16.mxu0 %v7123_v8  ;;  %1974 = vmatprep.subr.bf16.mxu1 %v7125_v9  ;;  %v152_v8 = vld [vmem:[%s12114_s1 + $0x330] sm:$0xff]  ;;  %v149_v9 = vld [vmem:[%s12114_s1 + $0x318] sm:$0xff] }
  0x94   :  { %v7187_v13 = vcombine.high %v148_v7, %v152_v8  ;;  %v7186_v19 = vcombine.low %v148_v7, %v152_v8  ;;  %v7188_v21 = vcombine.low %v149_v9, %v153_v10  ;;  %v209_v7 = vld [vmem:[%s12114_s1 + $0x4f8] sm:$0xff] }
  0x96   :  { %1889 = vmatpush1.bf16.msra.mxu0 %v7122_v14  ;;  %1975 = vmatpush1.bf16.msra.mxu1 %v7124_v15  ;;  %v7189_v14 = vcombine.high %v149_v9, %v153_v10  ;;  %v156_v15 = vld [vmem:[%s12114_s1 + $0x350] sm:$0xff] }
  0x97   :  { %1890 = vmatprep.subr.bf16.mxu0 %v7131_v16  ;;  %1976 = vmatprep.subr.bf16.mxu1 %v7133_v17  ;;  %v160_v16 = vld [vmem:[%s12114_s1 + $0x370] sm:$0xff]  ;;  %v157_v17 = vld [vmem:[%s12114_s1 + $0x358] sm:$0xff] }
  0x98   :  { %v7195_v22 = vcombine.high %v156_v15, %v160_v16  ;;  %v7194_v30 = vcombine.low %v156_v15, %v160_v16  ;;  %v7196_v31 = vcombine.low %v157_v17, %v161_v18  ;;  %v217_v15 = vld [vmem:[%s12114_s1 + $0x538] sm:$0xff] }
  0x9a   :  { %1891 = vmatpush1.bf16.msra.mxu0 %v7130_v24  ;;  %1977 = vmatpush1.bf16.msra.mxu1 %v7132_v25  ;;  %v7197_v24 = vcombine.high %v157_v17, %v161_v18  ;;  %v164_v25 = vld [vmem:[%s12114_s1 + $0x390] sm:$0xff] }
  0x9b   :  { %1892 = vmatprep.subr.bf16.mxu0 %v7139_v26  ;;  %1978 = vmatprep.subr.bf16.mxu1 %v7141_v28  ;;  %v168_v26 = vld [vmem:[%s12114_s1 + $0x3b0] sm:$0xff]  ;;  %v165_v28 = vld [vmem:[%s12114_s1 + $0x398] sm:$0xff] }
  0x9c   :  { %v7203_v33 = vcombine.high %v164_v25, %v168_v26  ;;  %v7202_v39 = vcombine.low %v164_v25, %v168_v26  ;;  %v7204_v40 = vcombine.low %v165_v28, %v169_v29  ;;  %v225_v25 = vld [vmem:[%s12114_s1 + $0x578] sm:$0xff] }
  0x9e   :  { %1893 = vmatpush1.bf16.msra.mxu0 %v7138_v34  ;;  %1979 = vmatpush1.bf16.msra.mxu1 %v7140_v35  ;;  %v7205_v34 = vcombine.high %v165_v28, %v169_v29  ;;  %v172_v35 = vld [vmem:[%s12114_s1 + $0x3d0] sm:$0xff] }
  0x9f   :  { %1894 = vmatprep.subr.bf16.mxu0 %v7147_v36  ;;  %1980 = vmatprep.subr.bf16.mxu1 %v7149_v37  ;;  %v176_v36 = vld [vmem:[%s12114_s1 + $0x3f0] sm:$0xff]  ;;  %v173_v37 = vld [vmem:[%s12114_s1 + $0x3d8] sm:$0xff] }
  0xa0   :  { %v7211_v42 = vcombine.high %v172_v35, %v176_v36  ;;  %v7210_v23 = vcombine.low %v172_v35, %v176_v36  ;;  %v7212_v47 = vcombine.low %v173_v37, %v177_v38  ;;  %v233_v35 = vld [vmem:[%s12114_s1 + $0x5b8] sm:$0xff] }
  0xa2   :  { %1895 = vmatpush1.bf16.msra.mxu0 %v7146_v43  ;;  %1981 = vmatpush1.bf16.msra.mxu1 %v7148_v44  ;;  %v7213_v43 = vcombine.high %v173_v37, %v177_v38  ;;  %v180_v44 = vld [vmem:[%s12114_s1 + $0x410] sm:$0xff] }
  0xa3   :  { %1896 = vmatprep.subr.bf16.mxu0 %v7155_v45  ;;  %1982 = vmatprep.subr.bf16.mxu1 %v7157_v46  ;;  %v184_v45 = vld [vmem:[%s12114_s1 + $0x430] sm:$0xff]  ;;  %v181_v46 = vld [vmem:[%s12114_s1 + $0x418] sm:$0xff] }
  0xa4   :  { %v7219_v48 = vcombine.high %v180_v44, %v184_v45  ;;  %v7218_v55 = vcombine.low %v180_v44, %v184_v45  ;;  %v7220_v56 = vcombine.low %v181_v46, %v185_v20  ;;  %v241_v44 = vld [vmem:[%s12114_s1 + $0x5f8] sm:$0xff] }
  0xa6   :  { %1897 = vmatpush1.bf16.msra.mxu0 %v7154_v49  ;;  %1983 = vmatpush1.bf16.msra.mxu1 %v7156_v50  ;;  %v7221_v49 = vcombine.high %v181_v46, %v185_v20  ;;  %v188_v50 = vld [vmem:[%s12114_s1 + $0x450] sm:$0xff] }
  0xa7   :  { %1898 = vmatprep.subr.bf16.mxu0 %v7163_v52  ;;  %1984 = vmatprep.subr.bf16.mxu1 %v7165_v53  ;;  %v192_v52 = vld [vmem:[%s12114_s1 + $0x470] sm:$0xff]  ;;  %v189_v53 = vld [vmem:[%s12114_s1 + $0x458] sm:$0xff] }
  0xa8   :  { %v7227_v58 = vcombine.high %v188_v50, %v192_v52  ;;  %v7226_v0 = vcombine.low %v188_v50, %v192_v52  ;;  %v7228_v1 = vcombine.low %v189_v53, %v193_v54  ;;  %v249_v50 = vld [vmem:[%s12114_s1 + $0x638] sm:$0xff] }
  0xaa   :  { %1899 = vmatpush1.bf16.msra.mxu0 %v7162_v59  ;;  %1985 = vmatpush1.bf16.msra.mxu1 %v7164_v60  ;;  %v7229_v59 = vcombine.high %v189_v53, %v193_v54  ;;  %v196_v60 = vld [vmem:[%s12114_s1 + $0x490] sm:$0xff] }
  0xab   :  { %1900 = vmatprep.subr.bf16.mxu0 %v7171_v61  ;;  %1986 = vmatprep.subr.bf16.mxu1 %v7173_v62  ;;  %v200_v61 = vld [vmem:[%s12114_s1 + $0x4b0] sm:$0xff]  ;;  %v197_v62 = vld [vmem:[%s12114_s1 + $0x498] sm:$0xff] }
  0xac   :  { %v7235_v2 = vcombine.high %v196_v60, %v200_v61  ;;  %v7234_v8 = vcombine.low %v196_v60, %v200_v61  ;;  %v7236_v9 = vcombine.low %v197_v62, %v201_v63  ;;  %v257_v60 = vld [vmem:[%s12114_s1 + $0x678] sm:$0xff] }
  0xae   :  { %1901 = vmatpush1.bf16.msra.mxu0 %v7170_v3  ;;  %1987 = vmatpush1.bf16.msra.mxu1 %v7172_v4  ;;  %v7237_v3 = vcombine.high %v197_v62, %v201_v63  ;;  %v204_v4 = vld [vmem:[%s12114_s1 + $0x4d0] sm:$0xff] }
  0xaf   :  { %1902 = vmatprep.subr.bf16.mxu0 %v7179_v5  ;;  %1988 = vmatprep.subr.bf16.mxu1 %v7181_v6  ;;  %v208_v5 = vld [vmem:[%s12114_s1 + $0x4f0] sm:$0xff]  ;;  %v205_v6 = vld [vmem:[%s12114_s1 + $0x4d8] sm:$0xff] }
  0xb0   :  { %v7243_v10 = vcombine.high %v204_v4, %v208_v5  ;;  %v7242_v16 = vcombine.low %v204_v4, %v208_v5  ;;  %v7244_v17 = vcombine.low %v205_v6, %v209_v7  ;;  %v265_v4 = vld [vmem:[%s12114_s1 + $0x6b8] sm:$0xff] }
  0xb2   :  { %1903 = vmatpush1.bf16.msra.mxu0 %v7178_v11  ;;  %1989 = vmatpush1.bf16.msra.mxu1 %v7180_v12  ;;  %v7245_v11 = vcombine.high %v205_v6, %v209_v7  ;;  %v212_v12 = vld [vmem:[%s12114_s1 + $0x510] sm:$0xff] }
  0xb3   :  { %1904 = vmatprep.subr.bf16.mxu0 %v7187_v13  ;;  %1990 = vmatprep.subr.bf16.mxu1 %v7189_v14  ;;  %v216_v13 = vld [vmem:[%s12114_s1 + $0x530] sm:$0xff]  ;;  %v213_v14 = vld [vmem:[%s12114_s1 + $0x518] sm:$0xff] }
  0xb4   :  { %v7251_v18 = vcombine.high %v212_v12, %v216_v13  ;;  %v7250_v26 = vcombine.low %v212_v12, %v216_v13  ;;  %v7252_v28 = vcombine.low %v213_v14, %v217_v15  ;;  %v273_v12 = vld [vmem:[%s12114_s1 + $0x6f8] sm:$0xff] }
  0xb6   :  { %1905 = vmatpush1.bf16.msra.mxu0 %v7186_v19  ;;  %1991 = vmatpush1.bf16.msra.mxu1 %v7188_v21  ;;  %v7253_v19 = vcombine.high %v213_v14, %v217_v15  ;;  %v220_v21 = vld [vmem:[%s12114_s1 + $0x550] sm:$0xff] }
  0xb7   :  { %1906 = vmatprep.subr.bf16.mxu0 %v7195_v22  ;;  %1992 = vmatprep.subr.bf16.mxu1 %v7197_v24  ;;  %v224_v22 = vld [vmem:[%s12114_s1 + $0x570] sm:$0xff]  ;;  %v221_v24 = vld [vmem:[%s12114_s1 + $0x558] sm:$0xff] }
  0xb8   :  { %v7259_v29 = vcombine.high %v220_v21, %v224_v22  ;;  %v7258_v36 = vcombine.low %v220_v21, %v224_v22  ;;  %v7260_v37 = vcombine.low %v221_v24, %v225_v25  ;;  %v281_v21 = vld [vmem:[%s12114_s1 + $0x738] sm:$0xff] }
  0xba   :  { %1907 = vmatpush1.bf16.msra.mxu0 %v7194_v30  ;;  %1993 = vmatpush1.bf16.msra.mxu1 %v7196_v31  ;;  %v7261_v30 = vcombine.high %v221_v24, %v225_v25  ;;  %v228_v31 = vld [vmem:[%s12114_s1 + $0x590] sm:$0xff] }
  0xbb   :  { %1908 = vmatprep.subr.bf16.mxu0 %v7203_v33  ;;  %1994 = vmatprep.subr.bf16.mxu1 %v7205_v34  ;;  %v232_v33 = vld [vmem:[%s12114_s1 + $0x5b0] sm:$0xff]  ;;  %v229_v34 = vld [vmem:[%s12114_s1 + $0x598] sm:$0xff] }
  0xbc   :  { %v7267_v38 = vcombine.high %v228_v31, %v232_v33  ;;  %v7266_v45 = vcombine.low %v228_v31, %v232_v33  ;;  %v7268_v46 = vcombine.low %v229_v34, %v233_v35  ;;  %v289_v31 = vld [vmem:[%s12114_s1 + $0x778] sm:$0xff] }
  0xbe   :  { %1909 = vmatpush1.bf16.msra.mxu0 %v7202_v39  ;;  %1995 = vmatpush1.bf16.msra.mxu1 %v7204_v40  ;;  %v7269_v39 = vcombine.high %v229_v34, %v233_v35  ;;  %v236_v40 = vld [vmem:[%s12114_s1 + $0x5d0] sm:$0xff] }
  0xbf   :  { %1910 = vmatprep.subr.bf16.mxu0 %v7211_v42  ;;  %1996 = vmatprep.subr.bf16.mxu1 %v7213_v43  ;;  %v240_v42 = vld [vmem:[%s12114_s1 + $0x5f0] sm:$0xff]  ;;  %v237_v43 = vld [vmem:[%s12114_s1 + $0x5d8] sm:$0xff] }
  0xc0   :  { %v7275_v20 = vcombine.high %v236_v40, %v240_v42  ;;  %v7274_v52 = vcombine.low %v236_v40, %v240_v42  ;;  %v7276_v53 = vcombine.low %v237_v43, %v241_v44  ;;  %v297_v40 = vld [vmem:[%s12114_s1 + $0x7b8] sm:$0xff] }
  0xc2   :  { %1911 = vmatpush1.bf16.msra.mxu0 %v7210_v23  ;;  %1997 = vmatpush1.bf16.msra.mxu1 %v7212_v47  ;;  %v7277_v23 = vcombine.high %v237_v43, %v241_v44  ;;  %v244_v47 = vld [vmem:[%s12114_s1 + $0x610] sm:$0xff] }
  0xc3   :  { %1923 = vmatprep.subr.bf16.mxu0 %v7219_v48  ;;  %2009 = vmatprep.subr.bf16.mxu1 %v7221_v49  ;;  %v248_v48 = vld [vmem:[%s12114_s1 + $0x630] sm:$0xff]  ;;  %v245_v49 = vld [vmem:[%s12114_s1 + $0x618] sm:$0xff] }
  0xc4   :  { %v7283_v54 = vcombine.high %v244_v47, %v248_v48  ;;  %v7282_v61 = vcombine.low %v244_v47, %v248_v48  ;;  %v7284_v62 = vcombine.low %v245_v49, %v249_v50  ;;  %v305_v47 = vld [vmem:[%s12114_s1 + $0x7f8] sm:$0xff] }
  0xc5   :  { %1913 = vmatmul.mubr.bf16.vlgmr.msra.gmra.mrb[4].mxu0 %v8559_v32  ;;  %1999 = vmatmul.mubr.bf16.vlgmr.msra.gmra.mrb[4].mxu1 %v8559_v32 }
  0xc6   :  { %1924 = vmatpush1.bf16.msra.mxu0 %v7218_v55  ;;  %2010 = vmatpush1.bf16.msra.mxu1 %v7220_v56  ;;  %v7285_v55 = vcombine.high %v245_v49, %v249_v50  ;;  %v252_v56 = vld [vmem:[%s12114_s1 + $0x650] sm:$0xff] }
  0xc7   :  { %1925 = vmatprep.subr.bf16.mxu0 %v7227_v58  ;;  %2011 = vmatprep.subr.bf16.mxu1 %v7229_v59  ;;  %v256_v58 = vld [vmem:[%s12114_s1 + $0x670] sm:$0xff]  ;;  %v253_v59 = vld [vmem:[%s12114_s1 + $0x658] sm:$0xff] }
  0xc8   :  { %1955 = vmatprep.mubr.bf16.mxu0 %v8575_v41  ;;  %2041 = vmatprep.mubr.bf16.mxu1 %v8575_v41  ;;  %v7291_v63 = vcombine.high %v252_v56, %v256_v58  ;;  %v7290_v5 = vcombine.low %v252_v56, %v256_v58  ;;  %v7292_v6 = vcombine.low %v253_v59, %v257_v60  ;;  %v2249_v56 = vld [vmem:[%s12122_s4 + $0x28] sm:$0xff] }
  0xca   :  { %1926 = vmatpush1.bf16.msra.mxu0 %v7226_v0  ;;  %2012 = vmatpush1.bf16.msra.mxu1 %v7228_v1  ;;  %v7293_v0 = vcombine.high %v253_v59, %v257_v60  ;;  %v260_v1 = vld [vmem:[%s12114_s1 + $0x690] sm:$0xff] }
  0xcb   :  { %1927 = vmatprep.subr.bf16.mxu0 %v7235_v2  ;;  %2013 = vmatprep.subr.bf16.mxu1 %v7237_v3  ;;  %v264_v2 = vld [vmem:[%s12114_s1 + $0x6b0] sm:$0xff]  ;;  %v261_v3 = vld [vmem:[%s12114_s1 + $0x698] sm:$0xff] }
  0xcc   :  { %v7299_v7 = vcombine.high %v260_v1, %v264_v2  ;;  %v7298_v13 = vcombine.low %v260_v1, %v264_v2  ;;  %v7300_v14 = vcombine.low %v261_v3, %v265_v4  ;;  %v2257_v1 = vld [vmem:[%s12122_s4 + $0x68] sm:$0xff] }
  0xce   :  { %1928 = vmatpush1.bf16.msra.mxu0 %v7234_v8  ;;  %2014 = vmatpush1.bf16.msra.mxu1 %v7236_v9  ;;  %v7301_v8 = vcombine.high %v261_v3, %v265_v4  ;;  %v268_v9 = vld [vmem:[%s12114_s1 + $0x6d0] sm:$0xff] }
  0xcf   :  { %1929 = vmatprep.subr.bf16.mxu0 %v7243_v10  ;;  %2015 = vmatprep.subr.bf16.mxu1 %v7245_v11  ;;  %v272_v10 = vld [vmem:[%s12114_s1 + $0x6f0] sm:$0xff]  ;;  %v269_v11 = vld [vmem:[%s12114_s1 + $0x6d8] sm:$0xff] }
  0xd0   :  { %v7307_v15 = vcombine.high %v268_v9, %v272_v10  ;;  %v7306_v22 = vcombine.low %v268_v9, %v272_v10  ;;  %v7308_v24 = vcombine.low %v269_v11, %v273_v12  ;;  %v2265_v9 = vld [vmem:[%s12122_s4 + $0xa8] sm:$0xff] }
  0xd2   :  { %1930 = vmatpush1.bf16.msra.mxu0 %v7242_v16  ;;  %2016 = vmatpush1.bf16.msra.mxu1 %v7244_v17  ;;  %v7309_v16 = vcombine.high %v269_v11, %v273_v12  ;;  %v276_v17 = vld [vmem:[%s12114_s1 + $0x710] sm:$0xff] }
  0xd3   :  { %1931 = vmatprep.subr.bf16.mxu0 %v7251_v18  ;;  %2017 = vmatprep.subr.bf16.mxu1 %v7253_v19  ;;  %v280_v18 = vld [vmem:[%s12114_s1 + $0x730] sm:$0xff]  ;;  %v277_v19 = vld [vmem:[%s12114_s1 + $0x718] sm:$0xff] }
  0xd4   :  { %v7315_v25 = vcombine.high %v276_v17, %v280_v18  ;;  %v7314_v33 = vcombine.low %v276_v17, %v280_v18  ;;  %v7316_v34 = vcombine.low %v277_v19, %v281_v21  ;;  %v2273_v17 = vld [vmem:[%s12122_s4 + $0xe8] sm:$0xff] }
  0xd6   :  { %1932 = vmatpush1.bf16.msra.mxu0 %v7250_v26  ;;  %2018 = vmatpush1.bf16.msra.mxu1 %v7252_v28  ;;  %v7317_v26 = vcombine.high %v277_v19, %v281_v21  ;;  %v284_v28 = vld [vmem:[%s12114_s1 + $0x750] sm:$0xff] }
  0xd7   :  { %1933 = vmatprep.subr.bf16.mxu0 %v7259_v29  ;;  %2019 = vmatprep.subr.bf16.mxu1 %v7261_v30  ;;  %v288_v29 = vld [vmem:[%s12114_s1 + $0x770] sm:$0xff]  ;;  %v285_v30 = vld [vmem:[%s12114_s1 + $0x758] sm:$0xff] }
  0xd8   :  { %v7323_v35 = vcombine.high %v284_v28, %v288_v29  ;;  %v7322_v42 = vcombine.low %v284_v28, %v288_v29  ;;  %v7324_v43 = vcombine.low %v285_v30, %v289_v31  ;;  %v2281_v28 = vld [vmem:[%s12122_s4 + $0x128] sm:$0xff] }
  0xda   :  { %1934 = vmatpush1.bf16.msra.mxu0 %v7258_v36  ;;  %2020 = vmatpush1.bf16.msra.mxu1 %v7260_v37  ;;  %v7325_v36 = vcombine.high %v285_v30, %v289_v31  ;;  %v292_v37 = vld [vmem:[%s12114_s1 + $0x790] sm:$0xff] }
  0xdb   :  { %1935 = vmatprep.subr.bf16.mxu0 %v7267_v38  ;;  %2021 = vmatprep.subr.bf16.mxu1 %v7269_v39  ;;  %v296_v38 = vld [vmem:[%s12114_s1 + $0x7b0] sm:$0xff]  ;;  %v293_v39 = vld [vmem:[%s12114_s1 + $0x798] sm:$0xff] }
  0xdc   :  { %v7331_v44 = vcombine.high %v292_v37, %v296_v38  ;;  %v7330_v48 = vcombine.low %v292_v37, %v296_v38  ;;  %v7332_v49 = vcombine.low %v293_v39, %v297_v40  ;;  %v2289_v37 = vld [vmem:[%s12122_s4 + $0x168] sm:$0xff] }
  0xde   :  { %1936 = vmatpush1.bf16.msra.mxu0 %v7266_v45  ;;  %2022 = vmatpush1.bf16.msra.mxu1 %v7268_v46  ;;  %v7333_v45 = vcombine.high %v293_v39, %v297_v40  ;;  %v300_v46 = vld [vmem:[%s12114_s1 + $0x7d0] sm:$0xff] }
  0xdf   :  { %1937 = vmatprep.subr.bf16.mxu0 %v7275_v20  ;;  %2023 = vmatprep.subr.bf16.mxu1 %v7277_v23  ;;  %v304_v20 = vld [vmem:[%s12114_s1 + $0x7f0] sm:$0xff]  ;;  %v301_v23 = vld [vmem:[%s12114_s1 + $0x7d8] sm:$0xff] }
  0xe0   :  { %v7339_v50 = vcombine.high %v300_v46, %v304_v20  ;;  %v7338_v58 = vcombine.low %v300_v46, %v304_v20  ;;  %v7340_v59 = vcombine.low %v301_v23, %v305_v47  ;;  %v2297_v46 = vld [vmem:[%s12122_s4 + $0x1a8] sm:$0xff] }
  0xe2   :  { %1938 = vmatpush1.bf16.msra.mxu0 %v7274_v52  ;;  %2024 = vmatpush1.bf16.msra.mxu1 %v7276_v53  ;;  %v7341_v52 = vcombine.high %v301_v23, %v305_v47  ;;  %v2244_v53 = vld [vmem:[%s12122_s4] sm:$0xff] }
  0xe3   :  { %1939 = vmatprep.subr.bf16.mxu0 %v7283_v54  ;;  %2025 = vmatprep.subr.bf16.mxu1 %v7285_v55  ;;  %v2248_v54 = vld [vmem:[%s12122_s4 + $0x20] sm:$0xff]  ;;  %v2245_v55 = vld [vmem:[%s12122_s4 + $0x8] sm:$0xff] }
  0xe4   :  { %v7343_v60 = vcombine.high %v2244_v53, %v2248_v54  ;;  %v7342_v2 = vcombine.low %v2244_v53, %v2248_v54  ;;  %v7344_v3 = vcombine.low %v2245_v55, %v2249_v56  ;;  %v2305_v53 = vld [vmem:[%s12122_s4 + $0x1e8] sm:$0xff] }
  0xe6   :  { %1940 = vmatpush1.bf16.msra.mxu0 %v7282_v61  ;;  %2026 = vmatpush1.bf16.msra.mxu1 %v7284_v62  ;;  %v7345_v61 = vcombine.high %v2245_v55, %v2249_v56  ;;  %v2252_v62 = vld [vmem:[%s12122_s4 + $0x40] sm:$0xff] }
  0xe7   :  { %1941 = vmatprep.subr.bf16.mxu0 %v7291_v63  ;;  %2027 = vmatprep.subr.bf16.mxu1 %v7293_v0  ;;  %v2256_v63 = vld [vmem:[%s12122_s4 + $0x60] sm:$0xff]  ;;  %v2253_v0 = vld [vmem:[%s12122_s4 + $0x48] sm:$0xff] }
  0xe8   :  { %v7351_v4 = vcombine.high %v2252_v62, %v2256_v63  ;;  %v7350_v10 = vcombine.low %v2252_v62, %v2256_v63  ;;  %v7352_v11 = vcombine.low %v2253_v0, %v2257_v1  ;;  %v2313_v62 = vld [vmem:[%s12122_s4 + $0x228] sm:$0xff] }
  0xea   :  { %1942 = vmatpush1.bf16.msra.mxu0 %v7290_v5  ;;  %2028 = vmatpush1.bf16.msra.mxu1 %v7292_v6  ;;  %v7353_v5 = vcombine.high %v2253_v0, %v2257_v1  ;;  %v2260_v6 = vld [vmem:[%s12122_s4 + $0x80] sm:$0xff] }
  0xeb   :  { %1943 = vmatprep.subr.bf16.mxu0 %v7299_v7  ;;  %2029 = vmatprep.subr.bf16.mxu1 %v7301_v8  ;;  %v2264_v7 = vld [vmem:[%s12122_s4 + $0xa0] sm:$0xff]  ;;  %v2261_v8 = vld [vmem:[%s12122_s4 + $0x88] sm:$0xff] }
  0xec   :  { %v7359_v12 = vcombine.high %v2260_v6, %v2264_v7  ;;  %v7358_v18 = vcombine.low %v2260_v6, %v2264_v7  ;;  %v7360_v19 = vcombine.low %v2261_v8, %v2265_v9  ;;  %v2321_v6 = vld [vmem:[%s12122_s4 + $0x268] sm:$0xff] }
  0xee   :  { %1944 = vmatpush1.bf16.msra.mxu0 %v7298_v13  ;;  %2030 = vmatpush1.bf16.msra.mxu1 %v7300_v14  ;;  %v7361_v13 = vcombine.high %v2261_v8, %v2265_v9  ;;  %v2268_v14 = vld [vmem:[%s12122_s4 + $0xc0] sm:$0xff] }
  0xef   :  { %1945 = vmatprep.subr.bf16.mxu0 %v7307_v15  ;;  %2031 = vmatprep.subr.bf16.mxu1 %v7309_v16  ;;  %v2272_v15 = vld [vmem:[%s12122_s4 + $0xe0] sm:$0xff]  ;;  %v2269_v16 = vld [vmem:[%s12122_s4 + $0xc8] sm:$0xff] }
  0xf0   :  { %v7367_v21 = vcombine.high %v2268_v14, %v2272_v15  ;;  %v7366_v29 = vcombine.low %v2268_v14, %v2272_v15  ;;  %v7368_v30 = vcombine.low %v2269_v16, %v2273_v17  ;;  %v2329_v14 = vld [vmem:[%s12122_s4 + $0x2a8] sm:$0xff] }
  0xf2   :  { %1946 = vmatpush1.bf16.msra.mxu0 %v7306_v22  ;;  %2032 = vmatpush1.bf16.msra.mxu1 %v7308_v24  ;;  %v7369_v22 = vcombine.high %v2269_v16, %v2273_v17  ;;  %v2276_v24 = vld [vmem:[%s12122_s4 + $0x100] sm:$0xff] }
  0xf3   :  { %1947 = vmatprep.subr.bf16.mxu0 %v7315_v25  ;;  %2033 = vmatprep.subr.bf16.mxu1 %v7317_v26  ;;  %v2280_v25 = vld [vmem:[%s12122_s4 + $0x120] sm:$0xff]  ;;  %v2277_v26 = vld [vmem:[%s12122_s4 + $0x108] sm:$0xff] }
  0xf4   :  { %v7375_v31 = vcombine.high %v2276_v24, %v2280_v25  ;;  %v7374_v38 = vcombine.low %v2276_v24, %v2280_v25  ;;  %v7376_v39 = vcombine.low %v2277_v26, %v2281_v28  ;;  %v2337_v24 = vld [vmem:[%s12122_s4 + $0x2e8] sm:$0xff] }
  0xf6   :  { %1948 = vmatpush1.bf16.msra.mxu0 %v7314_v33  ;;  %2034 = vmatpush1.bf16.msra.mxu1 %v7316_v34  ;;  %v7377_v33 = vcombine.high %v2277_v26, %v2281_v28  ;;  %v2284_v34 = vld [vmem:[%s12122_s4 + $0x140] sm:$0xff] }
  0xf7   :  { %1949 = vmatprep.subr.bf16.mxu0 %v7323_v35  ;;  %2035 = vmatprep.subr.bf16.mxu1 %v7325_v36  ;;  %v2288_v35 = vld [vmem:[%s12122_s4 + $0x160] sm:$0xff]  ;;  %v2285_v36 = vld [vmem:[%s12122_s4 + $0x148] sm:$0xff] }
  0xf8   :  { %v7383_v40 = vcombine.high %v2284_v34, %v2288_v35  ;;  %v7382_v20 = vcombine.low %v2284_v34, %v2288_v35  ;;  %v7384_v23 = vcombine.low %v2285_v36, %v2289_v37  ;;  %v2345_v34 = vld [vmem:[%s12122_s4 + $0x328] sm:$0xff] }
  0xfa   :  { %1950 = vmatpush1.bf16.msra.mxu0 %v7322_v42  ;;  %2036 = vmatpush1.bf16.msra.mxu1 %v7324_v43  ;;  %v7385_v42 = vcombine.high %v2285_v36, %v2289_v37  ;;  %v2292_v43 = vld [vmem:[%s12122_s4 + $0x180] sm:$0xff] }
  0xfb   :  { %1951 = vmatprep.subr.bf16.mxu0 %v7331_v44  ;;  %2037 = vmatprep.subr.bf16.mxu1 %v7333_v45  ;;  %v2296_v44 = vld [vmem:[%s12122_s4 + $0x1a0] sm:$0xff]  ;;  %v2293_v45 = vld [vmem:[%s12122_s4 + $0x188] sm:$0xff] }
  0xfc   :  { %v7391_v47 = vcombine.high %v2292_v43, %v2296_v44  ;;  %v7390_v54 = vcombine.low %v2292_v43, %v2296_v44  ;;  %v7392_v55 = vcombine.low %v2293_v45, %v2297_v46  ;;  %v2353_v43 = vld [vmem:[%s12122_s4 + $0x368] sm:$0xff] }
  0xfe   :  { %1952 = vmatpush1.bf16.msra.mxu0 %v7330_v48  ;;  %2038 = vmatpush1.bf16.msra.mxu1 %v7332_v49  ;;  %v7393_v48 = vcombine.high %v2293_v45, %v2297_v46  ;;  %v2300_v49 = vld [vmem:[%s12122_s4 + $0x1c0] sm:$0xff] }
  0xff   :  { %1953 = vmatprep.subr.bf16.mxu0 %v7339_v50  ;;  %2039 = vmatprep.subr.bf16.mxu1 %v7341_v52  ;;  %v2304_v50 = vld [vmem:[%s12122_s4 + $0x1e0] sm:$0xff]  ;;  %v2301_v52 = vld [vmem:[%s12122_s4 + $0x1c8] sm:$0xff] }
 0x100   :  { %v7399_v56 = vcombine.high %v2300_v49, %v2304_v50  ;;  %v7398_v63 = vcombine.low %v2300_v49, %v2304_v50  ;;  %v7400_v0 = vcombine.low %v2301_v52, %v2305_v53  ;;  %v2361_v49 = vld [vmem:[%s12122_s4 + $0x3a8] sm:$0xff] }
 0x102   :  { %1954 = vmatpush1.bf16.msra.mxu0 %v7338_v58  ;;  %2040 = vmatpush1.bf16.msra.mxu1 %v7340_v59  ;;  %v7401_v58 = vcombine.high %v2301_v52, %v2305_v53  ;;  %v2308_v59 = vld [vmem:[%s12122_s4 + $0x200] sm:$0xff] }
 0x103   :  { %3822 = vmatprep.subr.bf16.mxu0 %v7343_v60  ;;  %3908 = vmatprep.subr.bf16.mxu1 %v7345_v61  ;;  %v2312_v60 = vld [vmem:[%s12122_s4 + $0x220] sm:$0xff]  ;;  %v2309_v61 = vld [vmem:[%s12122_s4 + $0x208] sm:$0xff] }
 0x104   :  { %v7407_v1 = vcombine.high %v2308_v59, %v2312_v60  ;;  %v7406_v7 = vcombine.low %v2308_v59, %v2312_v60  ;;  %v7408_v8 = vcombine.low %v2309_v61, %v2313_v62  ;;  %v2369_v59 = vld [vmem:[%s12122_s4 + $0x3e8] sm:$0xff] }
 0x105   :  { %1956 = vmatmul.mubr.bf16.vlgmr.msra.gmra.mrb[4].mxu0 %v8503_v57  ;;  %2042 = vmatmul.mubr.bf16.vlgmr.msra.gmra.mrb[4].mxu1 %v8503_v57 }
 0x106   :  { %3823 = vmatpush1.bf16.msra.mxu0 %v7342_v2  ;;  %3909 = vmatpush1.bf16.msra.mxu1 %v7344_v3  ;;  %v7409_v2 = vcombine.high %v2309_v61, %v2313_v62  ;;  %v2316_v3 = vld [vmem:[%s12122_s4 + $0x240] sm:$0xff] }
 0x107   :  { %3824 = vmatprep.subr.bf16.mxu0 %v7351_v4  ;;  %3910 = vmatprep.subr.bf16.mxu1 %v7353_v5  ;;  %v2320_v4 = vld [vmem:[%s12122_s4 + $0x260] sm:$0xff]  ;;  %v2317_v5 = vld [vmem:[%s12122_s4 + $0x248] sm:$0xff] }
 0x108   :  { %3854 = vmatprep.mubr.bf16.mxu0 %v8457_v27  ;;  %3940 = vmatprep.mubr.bf16.mxu1 %v8457_v27  ;;  %v7415_v9 = vcombine.high %v2316_v3, %v2320_v4  ;;  %v7414_v15 = vcombine.low %v2316_v3, %v2320_v4  ;;  %v7416_v16 = vcombine.low %v2317_v5, %v2321_v6  ;;  %v2377_v3 = vld [vmem:[%s12122_s4 + $0x428] sm:$0xff] }
 0x10a   :  { %3825 = vmatpush1.bf16.msra.mxu0 %v7350_v10  ;;  %3911 = vmatpush1.bf16.msra.mxu1 %v7352_v11  ;;  %v7417_v10 = vcombine.high %v2317_v5, %v2321_v6  ;;  %v2324_v11 = vld [vmem:[%s12122_s4 + $0x280] sm:$0xff] }
 0x10b   :  { %3826 = vmatprep.subr.bf16.mxu0 %v7359_v12  ;;  %3912 = vmatprep.subr.bf16.mxu1 %v7361_v13  ;;  %v2328_v12 = vld [vmem:[%s12122_s4 + $0x2a0] sm:$0xff]  ;;  %v2325_v13 = vld [vmem:[%s12122_s4 + $0x288] sm:$0xff] }
 0x10c   :  { %v7423_v17 = vcombine.high %v2324_v11, %v2328_v12  ;;  %v7422_v25 = vcombine.low %v2324_v11, %v2328_v12  ;;  %v7424_v26 = vcombine.low %v2325_v13, %v2329_v14  ;;  %v2385_v11 = vld [vmem:[%s12122_s4 + $0x468] sm:$0xff] }
 0x10e   :  { %3827 = vmatpush1.bf16.msra.mxu0 %v7358_v18  ;;  %3913 = vmatpush1.bf16.msra.mxu1 %v7360_v19  ;;  %v7425_v18 = vcombine.high %v2325_v13, %v2329_v14  ;;  %v2332_v19 = vld [vmem:[%s12122_s4 + $0x2c0] sm:$0xff] }
 0x10f   :  { %3828 = vmatprep.subr.bf16.mxu0 %v7367_v21  ;;  %3914 = vmatprep.subr.bf16.mxu1 %v7369_v22  ;;  %v2336_v21 = vld [vmem:[%s12122_s4 + $0x2e0] sm:$0xff]  ;;  %v2333_v22 = vld [vmem:[%s12122_s4 + $0x2c8] sm:$0xff] }
 0x110   :  { %v7431_v28 = vcombine.high %v2332_v19, %v2336_v21  ;;  %v7430_v35 = vcombine.low %v2332_v19, %v2336_v21  ;;  %v7432_v36 = vcombine.low %v2333_v22, %v2337_v24  ;;  %v2393_v19 = vld [vmem:[%s12122_s4 + $0x4a8] sm:$0xff] }
 0x112   :  { %3829 = vmatpush1.bf16.msra.mxu0 %v7366_v29  ;;  %3915 = vmatpush1.bf16.msra.mxu1 %v7368_v30  ;;  %v7433_v29 = vcombine.high %v2333_v22, %v2337_v24  ;;  %v2340_v30 = vld [vmem:[%s12122_s4 + $0x300] sm:$0xff] }
 0x113   :  { %3830 = vmatprep.subr.bf16.mxu0 %v7375_v31  ;;  %3916 = vmatprep.subr.bf16.mxu1 %v7377_v33  ;;  %v2344_v31 = vld [vmem:[%s12122_s4 + $0x320] sm:$0xff]  ;;  %v2341_v33 = vld [vmem:[%s12122_s4 + $0x308] sm:$0xff] }
 0x114   :  { %v7439_v37 = vcombine.high %v2340_v30, %v2344_v31  ;;  %v7438_v44 = vcombine.low %v2340_v30, %v2344_v31  ;;  %v7440_v45 = vcombine.low %v2341_v33, %v2345_v34  ;;  %v2401_v30 = vld [vmem:[%s12122_s4 + $0x4e8] sm:$0xff] }
 0x116   :  { %3831 = vmatpush1.bf16.msra.mxu0 %v7374_v38  ;;  %3917 = vmatpush1.bf16.msra.mxu1 %v7376_v39  ;;  %v7441_v38 = vcombine.high %v2341_v33, %v2345_v34  ;;  %v2348_v39 = vld [vmem:[%s12122_s4 + $0x340] sm:$0xff] }
 0x117   :  { %3832 = vmatprep.subr.bf16.mxu0 %v7383_v40  ;;  %3918 = vmatprep.subr.bf16.mxu1 %v7385_v42  ;;  %v2352_v40 = vld [vmem:[%s12122_s4 + $0x360] sm:$0xff]  ;;  %v2349_v42 = vld [vmem:[%s12122_s4 + $0x348] sm:$0xff] }
 0x118   :  { %v7447_v46 = vcombine.high %v2348_v39, %v2352_v40  ;;  %v7446_v50 = vcombine.low %v2348_v39, %v2352_v40  ;;  %v7448_v52 = vcombine.low %v2349_v42, %v2353_v43  ;;  %v2409_v39 = vld [vmem:[%s12122_s4 + $0x528] sm:$0xff] }
 0x11a   :  { %3833 = vmatpush1.bf16.msra.mxu0 %v7382_v20  ;;  %3919 = vmatpush1.bf16.msra.mxu1 %v7384_v23  ;;  %v7449_v20 = vcombine.high %v2349_v42, %v2353_v43  ;;  %v2356_v23 = vld [vmem:[%s12122_s4 + $0x380] sm:$0xff] }
 0x11b   :  { %3834 = vmatprep.subr.bf16.mxu0 %v7391_v47  ;;  %3920 = vmatprep.subr.bf16.mxu1 %v7393_v48  ;;  %v2360_v47 = vld [vmem:[%s12122_s4 + $0x3a0] sm:$0xff]  ;;  %v2357_v48 = vld [vmem:[%s12122_s4 + $0x388] sm:$0xff] }
 0x11c   :  { %v7455_v53 = vcombine.high %v2356_v23, %v2360_v47  ;;  %v7454_v60 = vcombine.low %v2356_v23, %v2360_v47  ;;  %v7456_v61 = vcombine.low %v2357_v48, %v2361_v49  ;;  %v2416_v23 = vld [vmem:[%s12122_s4 + $0x560] sm:$0xff]  ;;  %v310_v47 = vsub.s32 0, %v8378_v51 }
 0x11e   :  { %3835 = vmatpush1.bf16.msra.mxu0 %v7390_v54  ;;  %3921 = vmatpush1.bf16.msra.mxu1 %v7392_v55  ;;  %v7457_v54 = vcombine.high %v2357_v48, %v2361_v49  ;;  %v2364_v55 = vld [vmem:[%s12122_s4 + $0x3c0] sm:$0xff]  ;;  %v2413_v48 = vld [vmem:[%s12122_s4 + $0x548] sm:$0xff] }
 0x11f   :  { %3836 = vmatprep.subr.bf16.mxu0 %v7399_v56  ;;  %3922 = vmatprep.subr.bf16.mxu1 %v7401_v58  ;;  %v2368_v56 = vld [vmem:[%s12122_s4 + $0x3e0] sm:$0xff]  ;;  %v2365_v58 = vld [vmem:[%s12122_s4 + $0x3c8] sm:$0xff] }
 0x120   :  { %v7463_v62 = vcombine.high %v2364_v55, %v2368_v56  ;;  %v7462_v4 = vcombine.low %v2364_v55, %v2368_v56  ;;  %v7464_v5 = vcombine.low %v2365_v58, %v2369_v59  ;;  %v2417_v49 = vld [vmem:[%s12122_s4 + $0x568] sm:$0xff]  ;;  %v322_v56 = vsub.s32 3, %v8378_v51 }
 0x122   :  { %3837 = vmatpush1.bf16.msra.mxu0 %v7398_v63  ;;  %3923 = vmatpush1.bf16.msra.mxu1 %v7400_v0  ;;  %v7465_v63 = vcombine.high %v2365_v58, %v2369_v59  ;;  %v2372_v0 = vld [vmem:[%s12122_s4 + $0x400] sm:$0xff] }
 0x123   :  { %3838 = vmatprep.subr.bf16.mxu0 %v7407_v1  ;;  %3924 = vmatprep.subr.bf16.mxu1 %v7409_v2  ;;  %v2376_v1 = vld [vmem:[%s12122_s4 + $0x420] sm:$0xff]  ;;  %v2373_v2 = vld [vmem:[%s12122_s4 + $0x408] sm:$0xff] }
 0x124   :  { %v7471_v6 = vcombine.high %v2372_v0, %v2376_v1  ;;  %v7470_v12 = vcombine.low %v2372_v0, %v2376_v1  ;;  %v7472_v13 = vcombine.low %v2373_v2, %v2377_v3  ;;  %v2421_v0 = vld [vmem:[%s12122_s4 + $0x588] sm:$0xff] }
 0x125   :  { %v2425_v1 = vld [vmem:[%s12122_s4 + $0x5a8] sm:$0xff] }
 0x126   :  { %3839 = vmatpush1.bf16.msra.mxu0 %v7406_v7  ;;  %3925 = vmatpush1.bf16.msra.mxu1 %v7408_v8  ;;  %v7473_v7 = vcombine.high %v2373_v2, %v2377_v3  ;;  %v2380_v8 = vld [vmem:[%s12122_s4 + $0x440] sm:$0xff] }
 0x127   :  { %3840 = vmatprep.subr.bf16.mxu0 %v7415_v9  ;;  %3926 = vmatprep.subr.bf16.mxu1 %v7417_v10  ;;  %v2384_v9 = vld [vmem:[%s12122_s4 + $0x460] sm:$0xff]  ;;  %v2381_v10 = vld [vmem:[%s12122_s4 + $0x448] sm:$0xff] }
 0x128   :  { %v7479_v14 = vcombine.high %v2380_v8, %v2384_v9  ;;  %v7478_v21 = vcombine.low %v2380_v8, %v2384_v9  ;;  %v7480_v22 = vcombine.low %v2381_v10, %v2385_v11  ;;  %v7512_v8 = vcombine.low %v2413_v48, %v2417_v49 }
 0x12a   :  { %3841 = vmatpush1.bf16.msra.mxu0 %v7414_v15  ;;  %3927 = vmatpush1.bf16.msra.mxu1 %v7416_v16  ;;  %v7481_v15 = vcombine.high %v2381_v10, %v2385_v11  ;;  %v2388_v16 = vld [vmem:[%s12122_s4 + $0x480] sm:$0xff]  ;;  %v9453_v10 = vld [vmem:[%s12122_s4 + $0x5c8] sm:$0xff] }
 0x12b   :  { %3842 = vmatprep.subr.bf16.mxu0 %v7423_v17  ;;  %3928 = vmatprep.subr.bf16.mxu1 %v7425_v18  ;;  %v2392_v17 = vld [vmem:[%s12122_s4 + $0x4a0] sm:$0xff]  ;;  %v2389_v18 = vld [vmem:[%s12122_s4 + $0x488] sm:$0xff] }
 0x12c   :  { %v7487_v24 = vcombine.high %v2388_v16, %v2392_v17  ;;  %v7486_v31 = vcombine.low %v2388_v16, %v2392_v17  ;;  %v7488_v33 = vcombine.low %v2389_v18, %v2393_v19  ;;  %v9458_v11 = vld [vmem:[%s12122_s4 + $0x5e8] sm:$0xff] }
 0x12e   :  { %3843 = vmatpush1.bf16.msra.mxu0 %v7422_v25  ;;  %3929 = vmatpush1.bf16.msra.mxu1 %v7424_v26  ;;  %v7489_v25 = vcombine.high %v2389_v18, %v2393_v19  ;;  %v2396_v26 = vld [vmem:[%s12122_s4 + $0x4c0] sm:$0xff]  ;;  %v7520_v19 = vcombine.low %v2421_v0, %v2425_v1 }
 0x12f   :  { %3844 = vmatprep.subr.bf16.mxu0 %v7431_v28  ;;  %3930 = vmatprep.subr.bf16.mxu1 %v7433_v29  ;;  %v2400_v28 = vld [vmem:[%s12122_s4 + $0x4e0] sm:$0xff]  ;;  %v2397_v29 = vld [vmem:[%s12122_s4 + $0x4c8] sm:$0xff] }
 0x130   :  { %v7495_v34 = vcombine.high %v2396_v26, %v2400_v28  ;;  %v7494_v40 = vcombine.low %v2396_v26, %v2400_v28  ;;  %v7496_v42 = vcombine.low %v2397_v29, %v2401_v30 }
 0x132   :  { %3845 = vmatpush1.bf16.msra.mxu0 %v7430_v35  ;;  %3931 = vmatpush1.bf16.msra.mxu1 %v7432_v36  ;;  %v7497_v35 = vcombine.high %v2397_v29, %v2401_v30  ;;  %v2404_v36 = vld [vmem:[%s12122_s4 + $0x500] sm:$0xff]  ;;  %v7528_v29 = vcombine.low %v9453_v10, %v9458_v11 }
 0x133   :  { %3846 = vmatprep.subr.bf16.mxu0 %v7439_v37  ;;  %3932 = vmatprep.subr.bf16.mxu1 %v7441_v38  ;;  %v2408_v37 = vld [vmem:[%s12122_s4 + $0x520] sm:$0xff]  ;;  %v2405_v38 = vld [vmem:[%s12122_s4 + $0x508] sm:$0xff] }
 0x134   :  { %v7503_v43 = vcombine.high %v2404_v36, %v2408_v37  ;;  %v7504_v55 = vcombine.low %v2405_v38, %v2409_v39  ;;  %v9472_v30 = vld [vmem:[%s12122_s4 + $0x600] sm:$0xff] }
 0x136   :  { %3847 = vmatpush1.bf16.msra.mxu0 %v7438_v44  ;;  %3933 = vmatpush1.bf16.msra.mxu1 %v7440_v45  ;;  %v7505_v44 = vcombine.high %v2405_v38, %v2409_v39  ;;  %v8232_v45 = vmov 1983009808  }
 0x137   :  { %3848 = vmatprep.subr.bf16.mxu0 %v7447_v46  ;;  %3934 = vmatprep.subr.bf16.mxu1 %v7449_v20  ;;  %v2073_v46 = vunpack.c.l.s4 %v8232_v45  ;;  %v2412_v20 = vld [vmem:[%s12122_s4 + $0x540] sm:$0xff] }
 0x138   :  { %v7511_v58 = vcombine.high %v2412_v20, %v2416_v23 }
 0x139   :  { %v2074_v59 = vunpack.c.0.s8 %v2073_v46 }
 0x13a   :  { %3849 = vmatpush1.bf16.msra.mxu0 %v7446_v50  ;;  %3935 = vmatpush1.bf16.msra.mxu1 %v7448_v52  ;;  %v7502_v50 = vcombine.low %v2404_v36, %v2408_v37  ;;  %v9411_v52 = vld [vmem:[%s12123_s3] sm:$0xff]  ;;  %v7529_v37 = vcombine.high %v9453_v10, %v9458_v11 }
 0x13b   :  { %3850 = vmatprep.subr.bf16.mxu0 %v7455_v53  ;;  %3936 = vmatprep.subr.bf16.mxu1 %v7457_v54  ;;  %v318_v53 = vsub.s32 2, %v8378_v51  ;;  %v314_v54 = vsub.s32 1, %v8378_v51 }
 0x13d   :  { %v319_v2 = vrot.slane %v9411_v52, %v318_v53  ;;  %v315_v3 = vrot.slane %v9411_v52, %v314_v54 }
 0x13e   :  { %3851 = vmatpush1.bf16.msra.mxu0 %v7454_v60  ;;  %3937 = vmatpush1.bf16.msra.mxu1 %v7456_v61  ;;  %v7513_v60 = vcombine.high %v2413_v48, %v2417_v49  ;;  %v2420_v61 = vld [vmem:[%s12122_s4 + $0x580] sm:$0xff]  ;;  %v2441_v48 = vld [vmem:[%s12122_s4 + $0x628] sm:$0xff] }
 0x13f   :  { %3852 = vmatprep.subr.bf16.mxu0 %v7463_v62  ;;  %3938 = vmatprep.subr.bf16.mxu1 %v7465_v63  ;;  %v2424_v62 = vld [vmem:[%s12122_s4 + $0x5a0] sm:$0xff]  ;;  %v311_v63 = vrot.slane %v9411_v52, %v310_v47 }
 0x140   :  { %v7519_v9 = vcombine.high %v2420_v61, %v2424_v62  ;;  %v7518_v18 = vcombine.low %v2420_v61, %v2424_v62 }
 0x142   :  { %3853 = vmatpush1.bf16.msra.mxu0 %v7462_v4  ;;  %3939 = vmatpush1.bf16.msra.mxu1 %v7464_v5  ;;  %v7510_v4 = vcombine.low %v2412_v20, %v2416_v23  ;;  %v9440_v5 = vld [vmem:[%s12122_s4 + $0x5c0] sm:$0xff]  ;;  %v2437_v23 = vld [vmem:[%s12122_s4 + $0x608] sm:$0xff] }
 0x143   :  { %3865 = vmatprep.subr.bf16.mxu0 %v7471_v6  ;;  %3951 = vmatprep.subr.bf16.mxu1 %v7473_v7  ;;  %v9445_v6 = vld [vmem:[%s12122_s4 + $0x5e0] sm:$0xff]  ;;  %v323_v7 = vrot.slane %v9411_v52, %v322_v56 }
 0x144   :  { %v7526_v28 = vcombine.low %v9440_v5, %v9445_v6 }
 0x145   :  { %3855 = vmatmul.mubr.bf16.vlgmr.msra.gmra.mrb[8].mxu0 %v8559_v32  ;;  %3941 = vmatmul.mubr.bf16.vlgmr.msra.gmra.mrb[8].mxu1 %v8559_v32 }
 0x146   :  { %3866 = vmatpush1.bf16.msra.mxu0 %v7470_v12  ;;  %3952 = vmatpush1.bf16.msra.mxu1 %v7472_v13  ;;  %v9461_v13 = vsub.s32 %v2074_v59, %v8378_v51 }
 0x147   :  { %3867 = vmatprep.subr.bf16.mxu0 %v7479_v14  ;;  %3953 = vmatprep.subr.bf16.mxu1 %v7481_v15  ;;  %v7521_v14 = vcombine.high %v2421_v0, %v2425_v1 }
 0x148   :  { %3897 = vmatprep.mubr.bf16.mxu0 %v8575_v41  ;;  %3983 = vmatprep.mubr.bf16.mxu1 %v8575_v41 }
 0x14a   :  { %3868 = vmatpush1.bf16.msra.mxu0 %v7478_v21  ;;  %3954 = vmatpush1.bf16.msra.mxu1 %v7480_v22  ;;  %v7527_v21 = vcombine.high %v9440_v5, %v9445_v6  ;;  %v2449_v5 = vld [vmem:[%s12122_s4 + $0x668] sm:$0xff] }
 0x14b   :  { %3869 = vmatprep.subr.bf16.mxu0 %v7487_v24  ;;  %3955 = vmatprep.subr.bf16.mxu1 %v7489_v25 }
 0x14e   :  { %3870 = vmatpush1.bf16.msra.mxu0 %v7486_v31  ;;  %3956 = vmatpush1.bf16.msra.mxu1 %v7488_v33  ;;  %v9477_v31 = vld [vmem:[%s12122_s4 + $0x620] sm:$0xff] }
 0x14f   :  { %3871 = vmatprep.subr.bf16.mxu0 %v7495_v34  ;;  %3957 = vmatprep.subr.bf16.mxu1 %v7497_v35  ;;  %v7535_v20 = vcombine.high %v9472_v30, %v9477_v31 }
 0x152   :  { %3872 = vmatpush1.bf16.msra.mxu0 %v7494_v40  ;;  %3958 = vmatpush1.bf16.msra.mxu1 %v7496_v42 }
 0x153   :  { %3873 = vmatprep.subr.bf16.mxu0 %v7503_v43  ;;  %3959 = vmatprep.subr.bf16.mxu1 %v7505_v44 }
 0x156   :  { %3874 = vmatpush1.bf16.msra.mxu0 %v7502_v50  ;;  %3960 = vmatpush1.bf16.msra.mxu1 %v7504_v55 }
 0x157   :  { %3875 = vmatprep.subr.bf16.mxu0 %v7511_v58  ;;  %3961 = vmatprep.subr.bf16.mxu1 %v7513_v60 }
 0x158   :  { %v1785_v12 = vpop.f32.mrb[0].mxu0  ;;  %v1871_v16 = vpop.f32.mrb[0].mxu1 }
 0x159   :  { %v7991_v15 = vadd.f32 %v1785_v12, %v311_v63  ;;  %v1787_v17 = vpop.f32.mrb[1].mxu0  ;;  %v7995_v22 = vadd.f32 %v1871_v16, %v319_v2  ;;  %v1873_v25 = vpop.f32.mrb[1].mxu1  ;;  %v7534_v12 = vcombine.low %v9472_v30, %v9477_v31 }
 0x15a   :  { %v7992_v24 = vadd.f32 %v1787_v17, %v315_v3  ;;  %v1789_v26 = vpop.f32.mrb[2].mxu0  ;;  %3876 = vmatpush1.bf16.msra.mxu0 %v7510_v4  ;;  %v7996_v33 = vadd.f32 %v1873_v25, %v323_v7  ;;  %v1875_v35 = vpop.f32.mrb[2].mxu1  ;;  %3962 = vmatpush1.bf16.msra.mxu1 %v7512_v8  ;;  %v2445_v4 = vld [vmem:[%s12122_s4 + $0x648] sm:$0xff] }
 0x15b   :  { %v7993_v34 = vadd.f32 %v1789_v26, %v311_v63  ;;  %v1791_v36 = vpop.f32.mrb[3].mxu0  ;;  %3877 = vmatprep.subr.bf16.mxu0 %v7519_v9  ;;  %v7997_v40 = vadd.f32 %v1875_v35, %v319_v2  ;;  %v1877_v43 = vpop.f32.mrb[3].mxu1  ;;  %3963 = vmatprep.subr.bf16.mxu1 %v7521_v14  ;;  %v2444_v63 = vld [vmem:[%s12122_s4 + $0x640] sm:$0xff]  ;;  %v7537_v2 = vcombine.high %v2437_v23, %v2441_v48  ;;  %v2453_v25 = vld [vmem:[%s12122_s4 + $0x688] sm:$0xff] }
 0x15c   :  { %v2068_v38 = vcombine.low %v7991_v15, %v7992_v24  ;;  %v2069_v39 = vcombine.high %v7991_v15, %v7992_v24  ;;  %v7994_v42 = vadd.f32 %v1791_v36, %v315_v3  ;;  %v2070_v44 = vcombine.low %v7995_v22, %v7996_v33  ;;  %v2448_v3 = vld [vmem:[%s12122_s4 + $0x660] sm:$0xff]  ;;  %v2457_v26 = vld [vmem:[%s12122_s4 + $0x6a8] sm:$0xff] }
 0x15d   :  { %v2071_v45 = vcombine.high %v7995_v22, %v7996_v33  ;;  %v7998_v46 = vadd.f32 %v1877_v43, %v323_v7  ;;  %v7536_v14 = vcombine.low %v2437_v23, %v2441_v48  ;;  %v7543_v15 = vcombine.high %v2444_v63, %v2448_v3  ;;  %v2452_v22 = vld [vmem:[%s12122_s4 + $0x680] sm:$0xff]  ;;  %v2461_v35 = vld [vmem:[%s12122_s4 + $0x6c8] sm:$0xff] }
 0x15e   :  { %v2078_v49 = vrot.slane %v2068_v38, %v9461_v13  ;;  %v2085_v50 = vrot.slane %v2069_v39, %v9461_v13  ;;  %v2140_v55 = vcombine.low %v7993_v34, %v7994_v42  ;;  %v2141_v58 = vcombine.high %v7993_v34, %v7994_v42  ;;  %3878 = vmatpush1.bf16.msra.mxu0 %v7518_v18  ;;  %v2456_v24 = vld [vmem:[%s12122_s4 + $0x6a0] sm:$0xff]  ;;  %v2465_v36 = vld [vmem:[%s12122_s4 + $0x6e8] sm:$0xff] }
 0x15f   :  { %v2092_v59 = vrot.slane %v2070_v44, %v9461_v13  ;;  %v2099_v60 = vrot.slane %v2071_v45, %v9461_v13  ;;  %v2142_v61 = vcombine.low %v7997_v40, %v7998_v46  ;;  %v2143_v62 = vcombine.high %v7997_v40, %v7998_v46  ;;  %3964 = vmatpush1.bf16.msra.mxu1 %v7520_v19  ;;  %v2460_v33 = vld [vmem:[%s12122_s4 + $0x6c0] sm:$0xff]  ;;  %v2469_v44 = vld [vmem:[%s12122_s4 + $0x708] sm:$0xff] }
 0x160   :  { %v2150_v0 = vrot.slane %v2140_v55, %v9461_v13  ;;  %v2157_v1 = vrot.slane %v2141_v58, %v9461_v13  ;;  %3879 = vmatprep.subr.bf16.mxu0 %v7527_v21  ;;  %3965 = vmatprep.subr.bf16.mxu1 %v7529_v37  ;;  %v7545_v16 = vcombine.high %v2445_v4, %v2449_v5  ;;  %v2464_v34 = vld [vmem:[%s12122_s4 + $0x6e0] sm:$0xff]  ;;  %v2473_v45 = vld [vmem:[%s12122_s4 + $0x728] sm:$0xff] }
 0x161   :  { %v2100_v6 = vcombine.low %v2078_v49, %v2092_v59  ;;  %v2101_v7 = vcombine.high %v2078_v49, %v2092_v59  ;;  %v2102_v8 = vcombine.low %v2085_v50, %v2099_v60  ;;  %v2103_v9 = vcombine.high %v2085_v50, %v2099_v60  ;;  %v2468_v42 = vld [vmem:[%s12122_s4 + $0x700] sm:$0xff]  ;;  %v2477_v55 = vld [vmem:[%s12122_s4 + $0x748] sm:$0xff] }
 0x162   :  { %v2164_v10 = vrot.slane %v2142_v61, %v9461_v13  ;;  %v2171_v11 = vrot.slane %v2143_v62, %v9461_v13  ;;  %3880 = vmatpush1.bf16.msra.mxu0 %v7526_v28  ;;  %v7542_v28 = vcombine.low %v2444_v63, %v2448_v3  ;;  %v7551_v30 = vcombine.high %v2452_v22, %v2456_v24  ;;  %v2472_v43 = vld [vmem:[%s12122_s4 + $0x720] sm:$0xff]  ;;  %v2481_v58 = vld [vmem:[%s12122_s4 + $0x768] sm:$0xff] }
 0x163   :  { %2228 = vst [vmem:[#allocation2] sm:$0xff] %v2100_v6  ;;  %2230 = vst [vmem:[#allocation2 + $0x10] sm:$0xff] %v2101_v7  ;;  %3966 = vmatpush1.bf16.msra.mxu1 %v7528_v29  ;;  %3881 = vmatprep.subr.bf16.mxu0 %v7535_v20  ;;  %v7544_v29 = vcombine.low %v2445_v4, %v2449_v5  ;;  %v7553_v31 = vcombine.high %v2453_v25, %v2457_v26  ;;  %v2476_v49 = vld [vmem:[%s12122_s4 + $0x740] sm:$0xff] }
 0x164   :  { %2232 = vst [vmem:[#allocation2 + $0x20] sm:$0xff] %v2102_v8  ;;  %2234 = vst [vmem:[#allocation2 + $0x30] sm:$0xff] %v2103_v9  ;;  %v2172_v17 = vcombine.low %v2150_v0, %v2164_v10  ;;  %v2173_v18 = vcombine.high %v2150_v0, %v2164_v10  ;;  %v2174_v19 = vcombine.low %v2157_v1, %v2171_v11  ;;  %3967 = vmatprep.subr.bf16.mxu1 %v7537_v2  ;;  %v2480_v50 = vld [vmem:[%s12122_s4 + $0x760] sm:$0xff]  ;;  %v2489_v2 = vld [vmem:[%s12122_s4 + $0x7a8] sm:$0xff] }
 0x165   :  { %v2175_v21 = vcombine.high %v2157_v1, %v2171_v11  ;;  %v7550_v37 = vcombine.low %v2452_v22, %v2456_v24  ;;  %v7552_v38 = vcombine.low %v2453_v25, %v2457_v26  ;;  %v7559_v39 = vcombine.high %v2460_v33, %v2464_v34  ;;  %v2484_v63 = vld [vmem:[%s12122_s4 + $0x780] sm:$0xff]  ;;  %v2485_v1 = vld [vmem:[%s12122_s4 + $0x788] sm:$0xff]  ;;  %v2254_v26 = vld [vmem:[%s12122_s4 + $0x50] sm:$0xff] }
 0x166   :  { %2236 = vst [vmem:[#allocation2 + $0x40] sm:$0xff] %v2172_v17  ;;  %2238 = vst [vmem:[#allocation2 + $0x50] sm:$0xff] %v2173_v18  ;;  %3882 = vmatpush1.bf16.msra.mxu0 %v7534_v12  ;;  %v7561_v40 = vcombine.high %v2461_v35, %v2465_v36  ;;  %v7558_v46 = vcombine.low %v2460_v33, %v2464_v34  ;;  %v7560_v20 = vcombine.low %v2461_v35, %v2465_v36  ;;  %v2488_v0 = vld [vmem:[%s12122_s4 + $0x7a0] sm:$0xff]  ;;  %v2493_v9 = vld [vmem:[%s12122_s4 + $0x7c8] sm:$0xff] }
 0x167   :  { %2240 = vst [vmem:[#allocation2 + $0x60] sm:$0xff] %v2174_v19  ;;  %2242 = vst [vmem:[#allocation2 + $0x70] sm:$0xff] %v2175_v21  ;;  %3968 = vmatpush1.bf16.msra.mxu1 %v7536_v14  ;;  %3883 = vmatprep.subr.bf16.mxu0 %v7543_v15  ;;  %v7567_v23 = vcombine.high %v2468_v42, %v2472_v43  ;;  %v7569_v48 = vcombine.high %v2469_v44, %v2473_v45  ;;  %v2492_v7 = vld [vmem:[%s12122_s4 + $0x7c0] sm:$0xff]  ;;  %v2497_v10 = vld [vmem:[%s12122_s4 + $0x7e8] sm:$0xff] }
 0x168   :  { %3969 = vmatprep.subr.bf16.mxu1 %v7545_v16  ;;  %v7566_v59 = vcombine.low %v2468_v42, %v2472_v43  ;;  %v7568_v60 = vcombine.low %v2469_v44, %v2473_v45  ;;  %v7575_v61 = vcombine.high %v2476_v49, %v2480_v50  ;;  %v7577_v62 = vcombine.high %v2477_v55, %v2481_v58  ;;  %v2496_v8 = vld [vmem:[%s12122_s4 + $0x7e0] sm:$0xff]  ;;  %v2246_v16 = vld [vmem:[%s12122_s4 + $0x10] sm:$0xff]  ;;  %v2247_v18 = vld [vmem:[%s12122_s4 + $0x18] sm:$0xff] }
 0x169   :  { %v7574_v3 = vcombine.low %v2476_v49, %v2480_v50  ;;  %v7576_v4 = vcombine.low %v2477_v55, %v2481_v58  ;;  %v7583_v5 = vcombine.high %v2484_v63, %v2488_v0  ;;  %v7585_v6 = vcombine.high %v2485_v1, %v2489_v2  ;;  %v2250_v17 = vld [vmem:[%s12122_s4 + $0x30] sm:$0xff]  ;;  %v2251_v19 = vld [vmem:[%s12122_s4 + $0x38] sm:$0xff] }
 0x16a   :  { %3884 = vmatpush1.bf16.msra.mxu0 %v7542_v28  ;;  %v7582_v11 = vcombine.low %v2484_v63, %v2488_v0  ;;  %v7584_v12 = vcombine.low %v2485_v1, %v2489_v2  ;;  %v7591_v14 = vcombine.high %v2492_v7, %v2496_v8  ;;  %v7593_v15 = vcombine.high %v2493_v9, %v2497_v10  ;;  %v2258_v28 = vld [vmem:[%s12122_s4 + $0x70] sm:$0xff] }
 0x16b   :  { %3970 = vmatpush1.bf16.msra.mxu1 %v7544_v29  ;;  %3885 = vmatprep.subr.bf16.mxu0 %v7551_v30  ;;  %v7590_v21 = vcombine.low %v2492_v7, %v2496_v8  ;;  %v7592_v22 = vcombine.low %v2493_v9, %v2497_v10  ;;  %v7347_v24 = vcombine.high %v2246_v16, %v2250_v17  ;;  %v2255_v29 = vld [vmem:[%s12122_s4 + $0x58] sm:$0xff]  ;;  %v2262_v36 = vld [vmem:[%s12122_s4 + $0x90] sm:$0xff] }
 0x16c   :  { %3971 = vmatprep.subr.bf16.mxu1 %v7553_v31  ;;  %v7349_v25 = vcombine.high %v2247_v18, %v2251_v19  ;;  %v2259_v30 = vld [vmem:[%s12122_s4 + $0x78] sm:$0xff]  ;;  %v7346_v31 = vcombine.low %v2246_v16, %v2250_v17  ;;  %v7348_v33 = vcombine.low %v2247_v18, %v2251_v19  ;;  %v7355_v34 = vcombine.high %v2254_v26, %v2258_v28  ;;  %v2270_v45 = vld [vmem:[%s12122_s4 + $0xd0] sm:$0xff] }
 0x16d   :  { %v7357_v35 = vcombine.high %v2255_v29, %v2259_v30  ;;  %v7356_v42 = vcombine.low %v2255_v29, %v2259_v30  ;;  %v2278_v58 = vld [vmem:[%s12122_s4 + $0x110] sm:$0xff] }
 0x16e   :  { %3886 = vmatpush1.bf16.msra.mxu0 %v7550_v37  ;;  %v2266_v37 = vld [vmem:[%s12122_s4 + $0xb0] sm:$0xff] }
 0x16f   :  { %3972 = vmatpush1.bf16.msra.mxu1 %v7552_v38  ;;  %3887 = vmatprep.subr.bf16.mxu0 %v7559_v39  ;;  %v2263_v38 = vld [vmem:[%s12122_s4 + $0x98] sm:$0xff]  ;;  %v7363_v43 = vcombine.high %v2262_v36, %v2266_v37  ;;  %v2286_v1 = vld [vmem:[%s12122_s4 + $0x150] sm:$0xff] }
 0x170   :  { %3973 = vmatprep.subr.bf16.mxu1 %v7561_v40  ;;  %v2267_v39 = vld [vmem:[%s12122_s4 + $0xb8] sm:$0xff]  ;;  %v7354_v40 = vcombine.low %v2254_v26, %v2258_v28  ;;  %v2290_v2 = vld [vmem:[%s12122_s4 + $0x170] sm:$0xff] }
 0x171   :  { %v7365_v44 = vcombine.high %v2263_v38, %v2267_v39  ;;  %v7364_v49 = vcombine.low %v2263_v38, %v2267_v39  ;;  %v7387_v7 = vcombine.high %v2286_v1, %v2290_v2  ;;  %v2294_v9 = vld [vmem:[%s12122_s4 + $0x190] sm:$0xff] }
 0x172   :  { %3888 = vmatpush1.bf16.msra.mxu0 %v7558_v46  ;;  %v2274_v46 = vld [vmem:[%s12122_s4 + $0xf0] sm:$0xff] }
 0x173   :  { %3974 = vmatpush1.bf16.msra.mxu1 %v7560_v20  ;;  %3889 = vmatprep.subr.bf16.mxu0 %v7567_v23  ;;  %v2271_v20 = vld [vmem:[%s12122_s4 + $0xd8] sm:$0xff]  ;;  %v7371_v50 = vcombine.high %v2270_v45, %v2274_v46  ;;  %v2298_v10 = vld [vmem:[%s12122_s4 + $0x1b0] sm:$0xff] }
 0x174   :  { %3975 = vmatprep.subr.bf16.mxu1 %v7569_v48  ;;  %v2275_v23 = vld [vmem:[%s12122_s4 + $0xf8] sm:$0xff]  ;;  %v7362_v48 = vcombine.low %v2262_v36, %v2266_v37  ;;  %v7395_v16 = vcombine.high %v2294_v9, %v2298_v10  ;;  %v2302_v18 = vld [vmem:[%s12122_s4 + $0x1d0] sm:$0xff] }
 0x175   :  { %v7373_v55 = vcombine.high %v2271_v20, %v2275_v23  ;;  %v2306_v19 = vld [vmem:[%s12122_s4 + $0x1f0] sm:$0xff] }
 0x176   :  { %3890 = vmatpush1.bf16.msra.mxu0 %v7566_v59  ;;  %v2282_v59 = vld [vmem:[%s12122_s4 + $0x130] sm:$0xff]  ;;  %v7403_v26 = vcombine.high %v2302_v18, %v2306_v19 }
 0x177   :  { %3976 = vmatpush1.bf16.msra.mxu1 %v7568_v60  ;;  %3891 = vmatprep.subr.bf16.mxu0 %v7575_v61  ;;  %v2283_v60 = vld [vmem:[%s12122_s4 + $0x138] sm:$0xff]  ;;  %v7370_v61 = vcombine.low %v2270_v45, %v2274_v46  ;;  %v7379_v63 = vcombine.high %v2278_v58, %v2282_v59  ;;  %v2310_v29 = vld [vmem:[%s12122_s4 + $0x210] sm:$0xff] }
 0x178   :  { %3977 = vmatprep.subr.bf16.mxu1 %v7577_v62  ;;  %v7372_v62 = vcombine.low %v2271_v20, %v2275_v23  ;;  %v2314_v30 = vld [vmem:[%s12122_s4 + $0x230] sm:$0xff] }
 0x179   :  { %v7411_v36 = vcombine.high %v2310_v29, %v2314_v30  ;;  %v2318_v38 = vld [vmem:[%s12122_s4 + $0x250] sm:$0xff] }
 0x17a   :  { %3892 = vmatpush1.bf16.msra.mxu0 %v7574_v3  ;;  %v2287_v3 = vld [vmem:[%s12122_s4 + $0x158] sm:$0xff]  ;;  %v2322_v39 = vld [vmem:[%s12122_s4 + $0x270] sm:$0xff] }
 0x17b   :  { %3978 = vmatpush1.bf16.msra.mxu1 %v7576_v4  ;;  %3893 = vmatprep.subr.bf16.mxu0 %v7583_v5  ;;  %v2291_v4 = vld [vmem:[%s12122_s4 + $0x178] sm:$0xff]  ;;  %v7378_v5 = vcombine.low %v2278_v58, %v2282_v59  ;;  %v7419_v45 = vcombine.high %v2318_v38, %v2322_v39  ;;  %v2326_v20 = vld [vmem:[%s12122_s4 + $0x290] sm:$0xff] }
 0x17c   :  { %3979 = vmatprep.subr.bf16.mxu1 %v7585_v6  ;;  %v7389_v8 = vcombine.high %v2287_v3, %v2291_v4  ;;  %v2330_v23 = vld [vmem:[%s12122_s4 + $0x2b0] sm:$0xff] }
 0x17d   :  { %v7427_v58 = vcombine.high %v2326_v20, %v2330_v23 }
 0x17e   :  { %3894 = vmatpush1.bf16.msra.mxu0 %v7582_v11  ;;  %v2295_v11 = vld [vmem:[%s12122_s4 + $0x198] sm:$0xff] }
 0x17f   :  { %3980 = vmatpush1.bf16.msra.mxu1 %v7584_v12  ;;  %3895 = vmatprep.subr.bf16.mxu0 %v7591_v14  ;;  %v2299_v12 = vld [vmem:[%s12122_s4 + $0x1b8] sm:$0xff]  ;;  %v7386_v14 = vcombine.low %v2286_v1, %v2290_v2 }
 0x180   :  { %3981 = vmatprep.subr.bf16.mxu1 %v7593_v15  ;;  %v7388_v15 = vcombine.low %v2287_v3, %v2291_v4  ;;  %v7397_v17 = vcombine.high %v2295_v11, %v2299_v12  ;;  %v2342_v3 = vld [vmem:[%s12122_s4 + $0x310] sm:$0xff] }
 0x181   :  { %v2346_v4 = vld [vmem:[%s12122_s4 + $0x330] sm:$0xff] }
 0x182   :  { %3896 = vmatpush1.bf16.msra.mxu0 %v7590_v21  ;;  %v2303_v21 = vld [vmem:[%s12122_s4 + $0x1d8] sm:$0xff] }
 0x183   :  { %3982 = vmatpush1.bf16.msra.mxu1 %v7592_v22  ;;  %3994 = vmatprep.subr.bf16.mxu0 %v7347_v24  ;;  %v2307_v22 = vld [vmem:[%s12122_s4 + $0x1f8] sm:$0xff]  ;;  %v7394_v24 = vcombine.low %v2294_v9, %v2298_v10  ;;  %v7443_v9 = vcombine.high %v2342_v3, %v2346_v4 }
 0x184   :  { %4080 = vmatprep.subr.bf16.mxu1 %v7349_v25  ;;  %v7396_v25 = vcombine.low %v2295_v11, %v2299_v12  ;;  %v7405_v28 = vcombine.high %v2303_v21, %v2307_v22  ;;  %v2350_v11 = vld [vmem:[%s12122_s4 + $0x350] sm:$0xff] }
 0x185   :  { %3898 = vmatmul.mubr.bf16.vlgmr.msra.gmra.mrb[8].mxu0 %v8503_v57  ;;  %v2354_v12 = vld [vmem:[%s12122_s4 + $0x370] sm:$0xff] }
 0x186   :  { %3984 = vmatmul.mubr.bf16.vlgmr.msra.gmra.mrb[8].mxu1 %v8503_v57  ;;  %3995 = vmatpush1.bf16.msra.mxu0 %v7346_v31  ;;  %v2311_v31 = vld [vmem:[%s12122_s4 + $0x218] sm:$0xff] }
 0x187   :  { %4081 = vmatpush1.bf16.msra.mxu1 %v7348_v33  ;;  %3996 = vmatprep.subr.bf16.mxu0 %v7355_v34  ;;  %v2315_v33 = vld [vmem:[%s12122_s4 + $0x238] sm:$0xff]  ;;  %v7402_v34 = vcombine.low %v2302_v18, %v2306_v19  ;;  %v7451_v18 = vcombine.high %v2350_v11, %v2354_v12 }
 0x188   :  { %4082 = vmatprep.subr.bf16.mxu1 %v7357_v35  ;;  %4026 = vmatprep.mubr.bf16.mxu0 %v8457_v27  ;;  %v7404_v35 = vcombine.low %v2303_v21, %v2307_v22  ;;  %v7413_v37 = vcombine.high %v2311_v31, %v2315_v33  ;;  %v2358_v21 = vld [vmem:[%s12122_s4 + $0x390] sm:$0xff] }
 0x189   :  { %4112 = vmatprep.mubr.bf16.mxu1 %v8457_v27  ;;  %v2279_v27 = vld [vmem:[%s12122_s4 + $0x118] sm:$0xff]  ;;  %v2362_v22 = vld [vmem:[%s12122_s4 + $0x3b0] sm:$0xff] }
 0x18a   :  { %3997 = vmatpush1.bf16.msra.mxu0 %v7354_v40  ;;  %v7381_v0 = vcombine.high %v2279_v27, %v2283_v60  ;;  %v7380_v6 = vcombine.low %v2279_v27, %v2283_v60  ;;  %v2319_v40 = vld [vmem:[%s12122_s4 + $0x258] sm:$0xff]  ;;  %v2334_v27 = vld [vmem:[%s12122_s4 + $0x2d0] sm:$0xff] }
 0x18b   :  { %4083 = vmatpush1.bf16.msra.mxu1 %v7356_v42  ;;  %3998 = vmatprep.subr.bf16.mxu0 %v7363_v43  ;;  %v2323_v42 = vld [vmem:[%s12122_s4 + $0x278] sm:$0xff]  ;;  %v7410_v43 = vcombine.low %v2310_v29, %v2314_v30  ;;  %v2338_v60 = vld [vmem:[%s12122_s4 + $0x2f0] sm:$0xff]  ;;  %v7459_v29 = vcombine.high %v2358_v21, %v2362_v22 }
 0x18c   :  { %4084 = vmatprep.subr.bf16.mxu1 %v7365_v44  ;;  %v7412_v44 = vcombine.low %v2311_v31, %v2315_v33  ;;  %v7421_v46 = vcombine.high %v2319_v40, %v2323_v42  ;;  %v7435_v1 = vcombine.high %v2334_v27, %v2338_v60  ;;  %v2366_v31 = vld [vmem:[%s12122_s4 + $0x3d0] sm:$0xff] }
 0x18d   :  { %v2370_v33 = vld [vmem:[%s12122_s4 + $0x3f0] sm:$0xff] }
 0x18e   :  { %3999 = vmatpush1.bf16.msra.mxu0 %v7362_v48  ;;  %v2327_v48 = vld [vmem:[%s12122_s4 + $0x298] sm:$0xff] }
 0x18f   :  { %4085 = vmatpush1.bf16.msra.mxu1 %v7364_v49  ;;  %4000 = vmatprep.subr.bf16.mxu0 %v7371_v50  ;;  %v2331_v49 = vld [vmem:[%s12122_s4 + $0x2b8] sm:$0xff]  ;;  %v7418_v50 = vcombine.low %v2318_v38, %v2322_v39  ;;  %v7467_v38 = vcombine.high %v2366_v31, %v2370_v33 }
 0x190   :  { %4086 = vmatprep.subr.bf16.mxu1 %v7373_v55  ;;  %v7420_v55 = vcombine.low %v2319_v40, %v2323_v42  ;;  %v7429_v59 = vcombine.high %v2327_v48, %v2331_v49  ;;  %v2374_v40 = vld [vmem:[%s12122_s4 + $0x410] sm:$0xff] }
 0x191   :  { %v2378_v42 = vld [vmem:[%s12122_s4 + $0x430] sm:$0xff] }
 0x192   :  { %4001 = vmatpush1.bf16.msra.mxu0 %v7370_v61  ;;  %v2335_v61 = vld [vmem:[%s12122_s4 + $0x2d8] sm:$0xff] }
 0x193   :  { %4087 = vmatpush1.bf16.msra.mxu1 %v7372_v62  ;;  %4002 = vmatprep.subr.bf16.mxu0 %v7379_v63  ;;  %v2339_v62 = vld [vmem:[%s12122_s4 + $0x2f8] sm:$0xff]  ;;  %v7426_v63 = vcombine.low %v2326_v20, %v2330_v23  ;;  %v7475_v20 = vcombine.high %v2374_v40, %v2378_v42 }
 0x194   :  { %4088 = vmatprep.subr.bf16.mxu1 %v7381_v0  ;;  %v7428_v0 = vcombine.low %v2327_v48, %v2331_v49  ;;  %v7437_v2 = vcombine.high %v2335_v61, %v2339_v62  ;;  %v2382_v48 = vld [vmem:[%s12122_s4 + $0x450] sm:$0xff] }
 0x195   :  { %v2386_v49 = vld [vmem:[%s12122_s4 + $0x470] sm:$0xff] }
 0x196   :  { %4003 = vmatpush1.bf16.msra.mxu0 %v7378_v5  ;;  %v2343_v5 = vld [vmem:[%s12122_s4 + $0x318] sm:$0xff] }
 0x197   :  { %4089 = vmatpush1.bf16.msra.mxu1 %v7380_v6  ;;  %4004 = vmatprep.subr.bf16.mxu0 %v7387_v7  ;;  %v2347_v6 = vld [vmem:[%s12122_s4 + $0x338] sm:$0xff]  ;;  %v7434_v7 = vcombine.low %v2334_v27, %v2338_v60  ;;  %v7483_v27 = vcombine.high %v2382_v48, %v2386_v49 }
 0x198   :  { %4090 = vmatprep.subr.bf16.mxu1 %v7389_v8  ;;  %v7436_v8 = vcombine.low %v2335_v61, %v2339_v62  ;;  %v7445_v10 = vcombine.high %v2343_v5, %v2347_v6  ;;  %v2390_v61 = vld [vmem:[%s12122_s4 + $0x490] sm:$0xff] }
 0x199   :  { %v2394_v62 = vld [vmem:[%s12122_s4 + $0x4b0] sm:$0xff] }
 0x19a   :  { %4005 = vmatpush1.bf16.msra.mxu0 %v7386_v14  ;;  %v2351_v14 = vld [vmem:[%s12122_s4 + $0x358] sm:$0xff] }
 0x19b   :  { %4091 = vmatpush1.bf16.msra.mxu1 %v7388_v15  ;;  %4006 = vmatprep.subr.bf16.mxu0 %v7395_v16  ;;  %v2355_v15 = vld [vmem:[%s12122_s4 + $0x378] sm:$0xff]  ;;  %v7442_v16 = vcombine.low %v2342_v3, %v2346_v4  ;;  %v7491_v3 = vcombine.high %v2390_v61, %v2394_v62 }
 0x19c   :  { %4092 = vmatprep.subr.bf16.mxu1 %v7397_v17  ;;  %v7444_v17 = vcombine.low %v2343_v5, %v2347_v6  ;;  %v7453_v19 = vcombine.high %v2351_v14, %v2355_v15  ;;  %v2398_v5 = vld [vmem:[%s12122_s4 + $0x4d0] sm:$0xff] }
 0x19d   :  { %v2402_v6 = vld [vmem:[%s12122_s4 + $0x4f0] sm:$0xff] }
 0x19e   :  { %4007 = vmatpush1.bf16.msra.mxu0 %v7394_v24  ;;  %v2359_v24 = vld [vmem:[%s12122_s4 + $0x398] sm:$0xff] }
 0x19f   :  { %4093 = vmatpush1.bf16.msra.mxu1 %v7396_v25  ;;  %4008 = vmatprep.subr.bf16.mxu0 %v7403_v26  ;;  %v2363_v25 = vld [vmem:[%s12122_s4 + $0x3b8] sm:$0xff]  ;;  %v7450_v26 = vcombine.low %v2350_v11, %v2354_v12  ;;  %v2406_v12 = vld [vmem:[%s12122_s4 + $0x510] sm:$0xff] }
 0x1a0   :  { %4094 = vmatprep.subr.bf16.mxu1 %v7405_v28  ;;  %v7452_v28 = vcombine.low %v2351_v14, %v2355_v15  ;;  %v7461_v30 = vcombine.high %v2359_v24, %v2363_v25  ;;  %v2410_v14 = vld [vmem:[%s12122_s4 + $0x530] sm:$0xff]  ;;  %v2411_v15 = vld [vmem:[%s12122_s4 + $0x538] sm:$0xff] }
 0x1a2   :  { %4009 = vmatpush1.bf16.msra.mxu0 %v7402_v34  ;;  %v2367_v34 = vld [vmem:[%s12122_s4 + $0x3d8] sm:$0xff] }
 0x1a3   :  { %4095 = vmatpush1.bf16.msra.mxu1 %v7404_v35  ;;  %4010 = vmatprep.subr.bf16.mxu0 %v7411_v36  ;;  %v2371_v35 = vld [vmem:[%s12122_s4 + $0x3f8] sm:$0xff]  ;;  %v7458_v36 = vcombine.low %v2358_v21, %v2362_v22  ;;  %v2414_v21 = vld [vmem:[%s12122_s4 + $0x550] sm:$0xff] }
 0x1a4   :  { %4096 = vmatprep.subr.bf16.mxu1 %v7413_v37  ;;  %v7460_v37 = vcombine.low %v2359_v24, %v2363_v25  ;;  %v7469_v39 = vcombine.high %v2367_v34, %v2371_v35  ;;  %v2418_v22 = vld [vmem:[%s12122_s4 + $0x570] sm:$0xff]  ;;  %v12130_v24 = vsub.s32 4, %v8378_v51  ;;  %v2415_v25 = vld [vmem:[%s12122_s4 + $0x558] sm:$0xff] }
 0x1a6   :  { %4011 = vmatpush1.bf16.msra.mxu0 %v7410_v43  ;;  %v2375_v43 = vld [vmem:[%s12122_s4 + $0x418] sm:$0xff] }
 0x1a7   :  { %4097 = vmatpush1.bf16.msra.mxu1 %v7412_v44  ;;  %4012 = vmatprep.subr.bf16.mxu0 %v7419_v45  ;;  %v2379_v44 = vld [vmem:[%s12122_s4 + $0x438] sm:$0xff]  ;;  %v7466_v45 = vcombine.low %v2366_v31, %v2370_v33  ;;  %v12127_v33 = vsub.s32 7, %v8378_v51 }
 0x1a8   :  { %4098 = vmatprep.subr.bf16.mxu1 %v7421_v46  ;;  %v7468_v46 = vcombine.low %v2367_v34, %v2371_v35  ;;  %v7477_v23 = vcombine.high %v2375_v43, %v2379_v44  ;;  %v7515_v34 = vcombine.high %v2414_v21, %v2418_v22 }
 0x1aa   :  { %4013 = vmatpush1.bf16.msra.mxu0 %v7418_v50  ;;  %v2383_v50 = vld [vmem:[%s12122_s4 + $0x458] sm:$0xff] }
 0x1ab   :  { %4099 = vmatpush1.bf16.msra.mxu1 %v7420_v55  ;;  %4014 = vmatprep.subr.bf16.mxu0 %v7427_v58  ;;  %v2387_v55 = vld [vmem:[%s12122_s4 + $0x478] sm:$0xff]  ;;  %v7474_v58 = vcombine.low %v2374_v40, %v2378_v42 }
 0x1ac   :  { %4100 = vmatprep.subr.bf16.mxu1 %v7429_v59  ;;  %v7476_v59 = vcombine.low %v2375_v43, %v2379_v44  ;;  %v7485_v60 = vcombine.high %v2383_v50, %v2387_v55  ;;  %v2427_v40 = vld [vmem:[%s12122_s4 + $0x5b8] sm:$0xff]  ;;  %v7514_v44 = vcombine.low %v2414_v21, %v2418_v22 }
 0x1ad   :  { %v2439_v21 = vld [vmem:[%s12122_s4 + $0x618] sm:$0xff] }
 0x1ae   :  { %4015 = vmatpush1.bf16.msra.mxu0 %v7426_v63  ;;  %v2391_v63 = vld [vmem:[%s12122_s4 + $0x498] sm:$0xff] }
 0x1af   :  { %4101 = vmatpush1.bf16.msra.mxu1 %v7428_v0  ;;  %4016 = vmatprep.subr.bf16.mxu0 %v7435_v1  ;;  %v2395_v0 = vld [vmem:[%s12122_s4 + $0x4b8] sm:$0xff]  ;;  %v7482_v1 = vcombine.low %v2382_v48, %v2386_v49 }
 0x1b0   :  { %4102 = vmatprep.subr.bf16.mxu1 %v7437_v2  ;;  %v7484_v2 = vcombine.low %v2383_v50, %v2387_v55  ;;  %v7493_v4 = vcombine.high %v2391_v63, %v2395_v0  ;;  %v9896_v49 = vld [vmem:[%s12122_s4 + $0x5d8] sm:$0xff] }
 0x1b1   :  { %v9901_v50 = vld [vmem:[%s12122_s4 + $0x5f8] sm:$0xff] }
 0x1b2   :  { %4017 = vmatpush1.bf16.msra.mxu0 %v7434_v7  ;;  %v2403_v7 = vld [vmem:[%s12122_s4 + $0x4f8] sm:$0xff] }
 0x1b3   :  { %4103 = vmatpush1.bf16.msra.mxu1 %v7436_v8  ;;  %4018 = vmatprep.subr.bf16.mxu0 %v7443_v9  ;;  %v7490_v8 = vcombine.low %v2390_v61, %v2394_v62  ;;  %v7492_v9 = vcombine.low %v2391_v63, %v2395_v0  ;;  %v2443_v22 = vld [vmem:[%s12122_s4 + $0x638] sm:$0xff] }
 0x1b4   :  { %4104 = vmatprep.subr.bf16.mxu1 %v7445_v10  ;;  %v7499_v10 = vcombine.high %v2398_v5, %v2402_v6 }
 0x1b6   :  { %4019 = vmatpush1.bf16.msra.mxu0 %v7442_v16  ;;  %v7498_v16 = vcombine.low %v2398_v5, %v2402_v6  ;;  %v9912_v5 = vld [vmem:[%s12122_s4 + $0x610] sm:$0xff] }
 0x1b7   :  { %4105 = vmatpush1.bf16.msra.mxu1 %v7444_v17  ;;  %4020 = vmatprep.subr.bf16.mxu0 %v7451_v18  ;;  %v7507_v18 = vcombine.high %v2406_v12, %v2410_v14  ;;  %v9917_v6 = vld [vmem:[%s12122_s4 + $0x630] sm:$0xff] }
 0x1b8   :  { %4106 = vmatprep.subr.bf16.mxu1 %v7453_v19 }
 0x1ba   :  { %4021 = vmatpush1.bf16.msra.mxu0 %v7450_v26  ;;  %v2419_v26 = vld [vmem:[%s12122_s4 + $0x578] sm:$0xff] }
 0x1bb   :  { %4107 = vmatpush1.bf16.msra.mxu1 %v7452_v28  ;;  %4022 = vmatprep.subr.bf16.mxu0 %v7459_v29  ;;  %v7506_v28 = vcombine.low %v2406_v12, %v2410_v14  ;;  %v12129_v29 = vsub.s32 6, %v8378_v51  ;;  %v7517_v35 = vcombine.high %v2415_v25, %v2419_v26 }
 0x1bc   :  { %4108 = vmatprep.subr.bf16.mxu1 %v7461_v30  ;;  %v12128_v30 = vsub.s32 5, %v8378_v51 }
 0x1bd   :  { %v335_v42 = vrot.slane %v9411_v52, %v12129_v29  ;;  %v10348_v29 = vld [vmem:[%s12125_s2 + $0x1d8] sm:$0xff] }
 0x1be   :  { %4023 = vmatpush1.bf16.msra.mxu0 %v7458_v36  ;;  %v2422_v36 = vld [vmem:[%s12122_s4 + $0x590] sm:$0xff]  ;;  %v331_v43 = vrot.slane %v9411_v52, %v12128_v30  ;;  %12600 = vst [vmem:[#allocation41_spill] sm:$0xff] %v10348_v29  ;;  %v10373_v29 = vld [vmem:[%s12125_s2 + $0x200] sm:$0xff] }
 0x1bf   :  { %4109 = vmatpush1.bf16.msra.mxu1 %v7460_v37  ;;  %4024 = vmatprep.subr.bf16.mxu0 %v7467_v38  ;;  %v2426_v37 = vld [vmem:[%s12122_s4 + $0x5b0] sm:$0xff]  ;;  %v327_v38 = vrot.slane %v9411_v52, %v12130_v24  ;;  %v10353_v24 = vld [vmem:[%s12125_s2 + $0x1e0] sm:$0xff] }
 0x1c0   :  { %4110 = vmatprep.subr.bf16.mxu1 %v7469_v39  ;;  %v2423_v39 = vld [vmem:[%s12122_s4 + $0x598] sm:$0xff]  ;;  %v7523_v48 = vcombine.high %v2422_v36, %v2426_v37  ;;  %v10343_v30 = vld [vmem:[%s12125_s2 + $0x1d0] sm:$0xff] }
 0x1c1   :  { %v7524_v61 = vcombine.low %v2423_v39, %v2427_v40  ;;  %12599 = vst [vmem:[#allocation40_spill] sm:$0xff] %v10343_v30  ;;  %v10368_v30 = vld [vmem:[%s12125_s2 + $0x1f8] sm:$0xff] }
 0x1c2   :  { %4025 = vmatpush1.bf16.msra.mxu0 %v7466_v45  ;;  %v9883_v45 = vld [vmem:[%s12122_s4 + $0x5d0] sm:$0xff]  ;;  %12602 = vst [vmem:[#allocation43_spill] sm:$0xff] %v10368_v30  ;;  %v10393_v30 = vld [vmem:[%s12125_s2 + $0x220] sm:$0xff] }
 0x1c3   :  { %4111 = vmatpush1.bf16.msra.mxu1 %v7468_v46  ;;  %4037 = vmatprep.subr.bf16.mxu0 %v7475_v20  ;;  %v9888_v46 = vld [vmem:[%s12122_s4 + $0x5f0] sm:$0xff]  ;;  %v339_v20 = vrot.slane %v9411_v52, %v12127_v33  ;;  %v7522_v52 = vcombine.low %v2422_v36, %v2426_v37  ;;  %v10338_v33 = vld [vmem:[%s12125_s2 + $0x1c8] sm:$0xff] }
 0x1c4   :  { %4123 = vmatprep.subr.bf16.mxu1 %v7477_v23  ;;  %v7516_v23 = vcombine.low %v2415_v25, %v2419_v26  ;;  %v7530_v62 = vcombine.low %v9883_v45, %v9888_v46 }
 0x1c5   :  { %4027 = vmatmul.mubr.bf16.vlgmr.msra.gmra.mrb[12].mxu0 %v8559_v32 }
 0x1c6   :  { %4038 = vmatpush1.bf16.msra.mxu0 %v7474_v58  ;;  %4113 = vmatmul.mubr.bf16.vlgmr.msra.gmra.mrb[12].mxu1 %v8559_v32  ;;  %v2399_v32 = vld [vmem:[%s12122_s4 + $0x4d8] sm:$0xff]  ;;  %v7525_v58 = vcombine.high %v2423_v39, %v2427_v40 }
 0x1c7   :  { %4124 = vmatpush1.bf16.msra.mxu1 %v7476_v59  ;;  %4039 = vmatprep.subr.bf16.mxu0 %v7483_v27  ;;  %v7501_v11 = vcombine.high %v2399_v32, %v2403_v7  ;;  %v7500_v17 = vcombine.low %v2399_v32, %v2403_v7 }
 0x1c8   :  { %4125 = vmatprep.subr.bf16.mxu1 %v7485_v60  ;;  %4069 = vmatprep.mubr.bf16.mxu0 %v8575_v41 }
 0x1c9   :  { %4155 = vmatprep.mubr.bf16.mxu1 %v8575_v41  ;;  %v2407_v41 = vld [vmem:[%s12122_s4 + $0x518] sm:$0xff] }
 0x1ca   :  { %4040 = vmatpush1.bf16.msra.mxu0 %v7482_v1  ;;  %v7509_v19 = vcombine.high %v2407_v41, %v2411_v15  ;;  %v7508_v31 = vcombine.low %v2407_v41, %v2411_v15 }
 0x1cb   :  { %4126 = vmatpush1.bf16.msra.mxu1 %v7484_v2  ;;  %4041 = vmatprep.subr.bf16.mxu0 %v7491_v3  ;;  %v7531_v3 = vcombine.high %v9883_v45, %v9888_v46  ;;  %v2451_v45 = vld [vmem:[%s12122_s4 + $0x678] sm:$0xff] }
 0x1cc   :  { %4127 = vmatprep.subr.bf16.mxu1 %v7493_v4  ;;  %v7532_v4 = vcombine.low %v9896_v49, %v9901_v50 }
 0x1ce   :  { %4042 = vmatpush1.bf16.msra.mxu0 %v7490_v8 }
 0x1cf   :  { %4128 = vmatpush1.bf16.msra.mxu1 %v7492_v9  ;;  %4043 = vmatprep.subr.bf16.mxu0 %v7499_v10  ;;  %v7533_v10 = vcombine.high %v9896_v49, %v9901_v50 }
 0x1d0   :  { %4129 = vmatprep.subr.bf16.mxu1 %v7501_v11 }
 0x1d2   :  { %4044 = vmatpush1.bf16.msra.mxu0 %v7498_v16 }
 0x1d3   :  { %4130 = vmatpush1.bf16.msra.mxu1 %v7500_v17  ;;  %4045 = vmatprep.subr.bf16.mxu0 %v7507_v18 }
 0x1d4   :  { %4131 = vmatprep.subr.bf16.mxu1 %v7509_v19  ;;  %v7539_v19 = vcombine.high %v9912_v5, %v9917_v6 }
 0x1d6   :  { %4046 = vmatpush1.bf16.msra.mxu0 %v7506_v28 }
 0x1d7   :  { %4132 = vmatpush1.bf16.msra.mxu1 %v7508_v31  ;;  %4047 = vmatprep.subr.bf16.mxu0 %v7515_v34 }
 0x1d8   :  { %v1957_v55 = vpop.f32.mrb[4].mxu0  ;;  %4133 = vmatprep.subr.bf16.mxu1 %v7517_v35  ;;  %v2043_v27 = vpop.f32.mrb[4].mxu1 }
 0x1d9   :  { %v7999_v59 = vadd.f32 %v1957_v55, %v327_v38  ;;  %v1959_v60 = vpop.f32.mrb[5].mxu0  ;;  %v8003_v63 = vadd.f32 %v2043_v27, %v335_v42  ;;  %v2045_v1 = vpop.f32.mrb[5].mxu1  ;;  %v7538_v55 = vcombine.low %v9912_v5, %v9917_v6 }
 0x1da   :  { %v8000_v0 = vadd.f32 %v1959_v60, %v331_v43  ;;  %v1961_v2 = vpop.f32.mrb[6].mxu0  ;;  %4048 = vmatpush1.bf16.msra.mxu0 %v7514_v44  ;;  %v8004_v32 = vadd.f32 %v2045_v1, %v339_v20  ;;  %v2047_v8 = vpop.f32.mrb[6].mxu1  ;;  %v2447_v44 = vld [vmem:[%s12122_s4 + $0x658] sm:$0xff] }
 0x1db   :  { %v8001_v7 = vadd.f32 %v1961_v2, %v327_v38  ;;  %4134 = vmatpush1.bf16.msra.mxu1 %v7516_v23  ;;  %v1963_v9 = vpop.f32.mrb[7].mxu0  ;;  %4049 = vmatprep.subr.bf16.mxu0 %v7523_v48  ;;  %v8005_v14 = vadd.f32 %v2047_v8, %v335_v42  ;;  %v2049_v15 = vpop.f32.mrb[7].mxu1  ;;  %v2446_v38 = vld [vmem:[%s12122_s4 + $0x650] sm:$0xff]  ;;  %v7541_v42 = vcombine.high %v2439_v21, %v2443_v22  ;;  %v2455_v1 = vld [vmem:[%s12122_s4 + $0x698] sm:$0xff] }
 0x1dc   :  { %v2104_v11 = vcombine.low %v7999_v59, %v8000_v0  ;;  %v2105_v12 = vcombine.high %v7999_v59, %v8000_v0  ;;  %v8002_v41 = vadd.f32 %v1963_v9, %v331_v43  ;;  %4135 = vmatprep.subr.bf16.mxu1 %v7525_v58  ;;  %v2106_v16 = vcombine.low %v8003_v63, %v8004_v32  ;;  %v2450_v43 = vld [vmem:[%s12122_s4 + $0x670] sm:$0xff]  ;;  %v2459_v2 = vld [vmem:[%s12122_s4 + $0x6b8] sm:$0xff] }
 0x1dd   :  { %v2107_v17 = vcombine.high %v8003_v63, %v8004_v32  ;;  %v8006_v18 = vadd.f32 %v2049_v15, %v339_v20  ;;  %v7540_v58 = vcombine.low %v2439_v21, %v2443_v22  ;;  %v7547_v59 = vcombine.high %v2446_v38, %v2450_v43  ;;  %v2458_v0 = vld [vmem:[%s12122_s4 + $0x6b0] sm:$0xff]  ;;  %v2463_v8 = vld [vmem:[%s12122_s4 + $0x6d8] sm:$0xff] }
 0x1de   :  { %v2114_v25 = vrot.slane %v2104_v11, %v9461_v13  ;;  %v2121_v26 = vrot.slane %v2105_v12, %v9461_v13  ;;  %v2176_v28 = vcombine.low %v8001_v7, %v8002_v41  ;;  %v2177_v31 = vcombine.high %v8001_v7, %v8002_v41  ;;  %4050 = vmatpush1.bf16.msra.mxu0 %v7522_v52  ;;  %v2462_v32 = vld [vmem:[%s12122_s4 + $0x6d0] sm:$0xff]  ;;  %v2467_v9 = vld [vmem:[%s12122_s4 + $0x6f8] sm:$0xff] }
 0x1df   :  { %v2128_v34 = vrot.slane %v2106_v16, %v9461_v13  ;;  %v2135_v35 = vrot.slane %v2107_v17, %v9461_v13  ;;  %v2178_v36 = vcombine.low %v8005_v14, %v8006_v18  ;;  %v2179_v37 = vcombine.high %v8005_v14, %v8006_v18  ;;  %4136 = vmatpush1.bf16.msra.mxu1 %v7524_v61  ;;  %v2466_v7 = vld [vmem:[%s12122_s4 + $0x6f0] sm:$0xff]  ;;  %v2471_v16 = vld [vmem:[%s12122_s4 + $0x718] sm:$0xff] }
 0x1e0   :  { %v2186_v39 = vrot.slane %v2176_v28, %v9461_v13  ;;  %v2193_v40 = vrot.slane %v2177_v31, %v9461_v13  ;;  %4051 = vmatprep.subr.bf16.mxu0 %v7531_v3  ;;  %4137 = vmatprep.subr.bf16.mxu1 %v7533_v10  ;;  %v7549_v27 = vcombine.high %v2447_v44, %v2451_v45  ;;  %v2470_v41 = vld [vmem:[%s12122_s4 + $0x710] sm:$0xff]  ;;  %v2475_v17 = vld [vmem:[%s12122_s4 + $0x738] sm:$0xff] }
 0x1e1   :  { %v2136_v46 = vcombine.low %v2114_v25, %v2128_v34  ;;  %v2137_v20 = vcombine.high %v2114_v25, %v2128_v34  ;;  %v2138_v23 = vcombine.low %v2121_v26, %v2135_v35  ;;  %v2139_v48 = vcombine.high %v2121_v26, %v2135_v35  ;;  %v2474_v15 = vld [vmem:[%s12122_s4 + $0x730] sm:$0xff]  ;;  %v2479_v28 = vld [vmem:[%s12122_s4 + $0x758] sm:$0xff] }
 0x1e2   :  { %v2200_v49 = vrot.slane %v2178_v36, %v9461_v13  ;;  %v2207_v50 = vrot.slane %v2179_v37, %v9461_v13  ;;  %4052 = vmatpush1.bf16.msra.mxu0 %v7530_v62  ;;  %v2454_v62 = vld [vmem:[%s12122_s4 + $0x690] sm:$0xff]  ;;  %v7546_v3 = vcombine.low %v2446_v38, %v2450_v43  ;;  %v7557_v6 = vcombine.high %v2455_v1, %v2459_v2  ;;  %v2483_v31 = vld [vmem:[%s12122_s4 + $0x778] sm:$0xff] }
 0x1e3   :  { %2229 = vst [vmem:[#allocation2 + $0x8] sm:$0xff] %v2136_v46  ;;  %2231 = vst [vmem:[#allocation2 + $0x18] sm:$0xff] %v2137_v20  ;;  %4138 = vmatpush1.bf16.msra.mxu1 %v7532_v4  ;;  %4053 = vmatprep.subr.bf16.mxu0 %v7539_v19  ;;  %v7548_v4 = vcombine.low %v2447_v44, %v2451_v45  ;;  %v7555_v5 = vcombine.high %v2454_v62, %v2458_v0  ;;  %v2478_v25 = vld [vmem:[%s12122_s4 + $0x750] sm:$0xff] }
 0x1e4   :  { %2233 = vst [vmem:[#allocation2 + $0x28] sm:$0xff] %v2138_v23  ;;  %2235 = vst [vmem:[#allocation2 + $0x38] sm:$0xff] %v2139_v48  ;;  %v2208_v60 = vcombine.low %v2186_v39, %v2200_v49  ;;  %v2209_v52 = vcombine.high %v2186_v39, %v2200_v49  ;;  %v2210_v61 = vcombine.low %v2193_v40, %v2207_v50  ;;  %4139 = vmatprep.subr.bf16.mxu1 %v7541_v42  ;;  %v2482_v26 = vld [vmem:[%s12122_s4 + $0x770] sm:$0xff]  ;;  %v2491_v42 = vld [vmem:[%s12122_s4 + $0x7b8] sm:$0xff] }
 0x1e5   :  { %v2211_v63 = vcombine.high %v2193_v40, %v2207_v50  ;;  %v7554_v10 = vcombine.low %v2454_v62, %v2458_v0  ;;  %v7556_v11 = vcombine.low %v2455_v1, %v2459_v2  ;;  %v7563_v12 = vcombine.high %v2462_v32, %v2466_v7  ;;  %v2486_v38 = vld [vmem:[%s12122_s4 + $0x790] sm:$0xff]  ;;  %v2487_v40 = vld [vmem:[%s12122_s4 + $0x798] sm:$0xff] }
 0x1e6   :  { %2237 = vst [vmem:[#allocation2 + $0x48] sm:$0xff] %v2208_v60  ;;  %2239 = vst [vmem:[#allocation2 + $0x58] sm:$0xff] %v2209_v52  ;;  %4054 = vmatpush1.bf16.msra.mxu0 %v7538_v55  ;;  %v7565_v14 = vcombine.high %v2463_v8, %v2467_v9  ;;  %v7562_v18 = vcombine.low %v2462_v32, %v2466_v7  ;;  %v7564_v19 = vcombine.low %v2463_v8, %v2467_v9  ;;  %v2490_v39 = vld [vmem:[%s12122_s4 + $0x7b0] sm:$0xff]  ;;  %v2495_v48 = vld [vmem:[%s12122_s4 + $0x7d8] sm:$0xff] }
 0x1e7   :  { %2241 = vst [vmem:[#allocation2 + $0x68] sm:$0xff] %v2210_v61  ;;  %2243 = vst [vmem:[#allocation2 + $0x78] sm:$0xff] %v2211_v63  ;;  %4140 = vmatpush1.bf16.msra.mxu1 %v7540_v58  ;;  %4055 = vmatprep.subr.bf16.mxu0 %v7547_v59  ;;  %v7571_v21 = vcombine.high %v2470_v41, %v2474_v15  ;;  %v7573_v22 = vcombine.high %v2471_v16, %v2475_v17  ;;  %v2494_v20 = vld [vmem:[%s12122_s4 + $0x7d0] sm:$0xff]  ;;  %v2499_v49 = vld [vmem:[%s12122_s4 + $0x7f8] sm:$0xff] }
 0x1e8   :  { %4141 = vmatprep.subr.bf16.mxu1 %v7549_v27  ;;  %v7570_v34 = vcombine.low %v2470_v41, %v2474_v15  ;;  %v7572_v35 = vcombine.low %v2471_v16, %v2475_v17  ;;  %v7579_v36 = vcombine.high %v2478_v25, %v2482_v26  ;;  %v7581_v37 = vcombine.high %v2479_v28, %v2483_v31  ;;  %v2498_v23 = vld [vmem:[%s12122_s4 + $0x7f0] sm:$0xff]  ;;  %v10028_v52 = vld [vmem:[%s12124_s6] sm:$0xff] }
 0x1e9   :  { %v7578_v43 = vcombine.low %v2478_v25, %v2482_v26  ;;  %v7580_v44 = vcombine.low %v2479_v28, %v2483_v31  ;;  %v7587_v45 = vcombine.high %v2486_v38, %v2490_v39  ;;  %v7589_v46 = vcombine.high %v2487_v40, %v2491_v42 }
 0x1ea   :  { %4056 = vmatpush1.bf16.msra.mxu0 %v7546_v3  ;;  %v7586_v50 = vcombine.low %v2486_v38, %v2490_v39  ;;  %v7588_v55 = vcombine.low %v2487_v40, %v2491_v42  ;;  %v7595_v58 = vcombine.high %v2494_v20, %v2498_v23  ;;  %v7597_v59 = vcombine.high %v2495_v48, %v2499_v49 }
 0x1eb   :  { %4142 = vmatpush1.bf16.msra.mxu1 %v7548_v4  ;;  %4057 = vmatprep.subr.bf16.mxu0 %v7555_v5  ;;  %v7594_v27 = vcombine.low %v2494_v20, %v2498_v23  ;;  %v7596_v60 = vcombine.low %v2495_v48, %v2499_v49  ;;  %v2505_v61 = vrot.slane %v10028_v52, %v310_v47  ;;  %v10068_v20 = vld [vmem:[%s12125_s2 + $0x18] sm:$0xff]  ;;  %v10073_v23 = vld [vmem:[%s12125_s2 + $0x20] sm:$0xff]  ;;  %v10078_v48 = vld [vmem:[%s12125_s2 + $0x28] sm:$0xff] }
 0x1ec   :  { %4143 = vmatprep.subr.bf16.mxu1 %v7557_v6  ;;  %v2513_v63 = vrot.slane %v10028_v52, %v318_v53  ;;  %v2509_v62 = vrot.slane %v10028_v52, %v314_v54  ;;  %12566 = vst [vmem:[#allocation7_spill] sm:$0xff] %v10068_v20  ;;  %v10083_v49 = vld [vmem:[%s12125_s2 + $0x30] sm:$0xff]  ;;  %v10598_v20 = vld [vmem:[%s12125_s2 + $0x368] sm:$0xff] }
 0x1ed   :  { %12567 = vst [vmem:[#allocation8_spill] sm:$0xff] %v10083_v49  ;;  %12643 = vst [vmem:[#allocation84_spill] sm:$0xff] %v10598_v20  ;;  %v10623_v49 = vld [vmem:[%s12125_s2 + $0x390] sm:$0xff] }
 0x1ee   :  { %4058 = vmatpush1.bf16.msra.mxu0 %v7554_v10  ;;  %12648 = vst [vmem:[#allocation89_spill] sm:$0xff] %v10623_v49  ;;  %v10648_v49 = vld [vmem:[%s12125_s2 + $0x3b8] sm:$0xff] }
 0x1ef   :  { %4144 = vmatpush1.bf16.msra.mxu1 %v7556_v11  ;;  %4059 = vmatprep.subr.bf16.mxu0 %v7563_v12  ;;  %12653 = vst [vmem:[#allocation94_spill] sm:$0xff] %v10648_v49  ;;  %v10673_v49 = vld [vmem:[%s12125_s2 + $0x3e0] sm:$0xff] }
 0x1f0   :  { %4145 = vmatprep.subr.bf16.mxu1 %v7565_v14  ;;  %12658 = vst [vmem:[#allocation99_spill] sm:$0xff] %v10673_v49  ;;  %v10698_v49 = vld [vmem:[%s12126_s5 + $0x8] sm:$0xff] }
 0x1f1   :  { %12663 = vst [vmem:[#allocation104_spill] sm:$0xff] %v10698_v49  ;;  %v10723_v49 = vld [vmem:[%s12126_s5 + $0x30] sm:$0xff] }
 0x1f2   :  { %4060 = vmatpush1.bf16.msra.mxu0 %v7562_v18  ;;  %12668 = vst [vmem:[#allocation109_spill] sm:$0xff] %v10723_v49  ;;  %v10748_v49 = vld [vmem:[%s12126_s5 + $0x58] sm:$0xff] }
 0x1f3   :  { %4146 = vmatpush1.bf16.msra.mxu1 %v7564_v19  ;;  %4061 = vmatprep.subr.bf16.mxu0 %v7571_v21  ;;  %12673 = vst [vmem:[#allocation114_spill] sm:$0xff] %v10748_v49  ;;  %v10773_v49 = vld [vmem:[%s12126_s5 + $0x80] sm:$0xff] }
 0x1f4   :  { %4147 = vmatprep.subr.bf16.mxu1 %v7573_v22  ;;  %12678 = vst [vmem:[#allocation119_spill] sm:$0xff] %v10773_v49  ;;  %v10798_v49 = vld [vmem:[%s12126_s5 + $0xa8] sm:$0xff] }
 0x1f5   :  { %12683 = vst [vmem:[#allocation124_spill] sm:$0xff] %v10798_v49  ;;  %v10823_v49 = vld [vmem:[%s12126_s5 + $0xd0] sm:$0xff] }
 0x1f6   :  { %4062 = vmatpush1.bf16.msra.mxu0 %v7570_v34  ;;  %12688 = vst [vmem:[#allocation129_spill] sm:$0xff] %v10823_v49  ;;  %v10848_v49 = vld [vmem:[%s12126_s5 + $0xf8] sm:$0xff] }
 0x1f7   :  { %4148 = vmatpush1.bf16.msra.mxu1 %v7572_v35  ;;  %4063 = vmatprep.subr.bf16.mxu0 %v7579_v36  ;;  %12693 = vst [vmem:[#allocation134_spill] sm:$0xff] %v10848_v49  ;;  %v10873_v49 = vld [vmem:[%s12126_s5 + $0x120] sm:$0xff] }
 0x1f8   :  { %4149 = vmatprep.subr.bf16.mxu1 %v7581_v37  ;;  %12698 = vst [vmem:[#allocation139_spill] sm:$0xff] %v10873_v49  ;;  %v10898_v49 = vld [vmem:[%s12126_s5 + $0x148] sm:$0xff] }
 0x1f9   :  { %12703 = vst [vmem:[#allocation144_spill] sm:$0xff] %v10898_v49  ;;  %v10923_v49 = vld [vmem:[%s12126_s5 + $0x170] sm:$0xff] }
 0x1fa   :  { %4064 = vmatpush1.bf16.msra.mxu0 %v7578_v43  ;;  %12708 = vst [vmem:[#allocation149_spill] sm:$0xff] %v10923_v49  ;;  %v10948_v49 = vld [vmem:[%s12126_s5 + $0x198] sm:$0xff] }
 0x1fb   :  { %4150 = vmatpush1.bf16.msra.mxu1 %v7580_v44  ;;  %4065 = vmatprep.subr.bf16.mxu0 %v7587_v45  ;;  %v10053_v44 = vld [vmem:[%s12125_s2] sm:$0xff]  ;;  %v10058_v45 = vld [vmem:[%s12125_s2 + $0x8] sm:$0xff]  ;;  %12713 = vst [vmem:[#allocation154_spill] sm:$0xff] %v10948_v49 }
 0x1fc   :  { %4151 = vmatprep.subr.bf16.mxu1 %v7589_v46  ;;  %v10063_v46 = vld [vmem:[%s12125_s2 + $0x10] sm:$0xff]  ;;  %v10973_v49 = vld [vmem:[%s12126_s5 + $0x1c0] sm:$0xff] }
 0x1fd   :  { %12565 = vst [vmem:[#allocation6_spill] sm:$0xff] %v10063_v46  ;;  %v10618_v46 = vld [vmem:[%s12125_s2 + $0x388] sm:$0xff]  ;;  %12718 = vst [vmem:[#allocation159_spill] sm:$0xff] %v10973_v49 }
 0x1fe   :  { %4066 = vmatpush1.bf16.msra.mxu0 %v7586_v50  ;;  %v10088_v50 = vld [vmem:[%s12125_s2 + $0x38] sm:$0xff]  ;;  %12647 = vst [vmem:[#allocation88_spill] sm:$0xff] %v10618_v46  ;;  %v10643_v46 = vld [vmem:[%s12125_s2 + $0x3b0] sm:$0xff]  ;;  %v10998_v49 = vld [vmem:[%s12126_s5 + $0x1e8] sm:$0xff] }
 0x1ff   :  { %4152 = vmatpush1.bf16.msra.mxu1 %v7588_v55  ;;  %4067 = vmatprep.subr.bf16.mxu0 %v7595_v58  ;;  %12568 = vst [vmem:[#allocation9_spill] sm:$0xff] %v10088_v50  ;;  %v10093_v55 = vld [vmem:[%s12125_s2 + $0x40] sm:$0xff]  ;;  %v10098_v58 = vld [vmem:[%s12125_s2 + $0x48] sm:$0xff]  ;;  %v10603_v50 = vld [vmem:[%s12125_s2 + $0x370] sm:$0xff] }
 0x200   :  { %4153 = vmatprep.subr.bf16.mxu1 %v7597_v59  ;;  %v10103_v59 = vld [vmem:[%s12125_s2 + $0x50] sm:$0xff]  ;;  %12644 = vst [vmem:[#allocation85_spill] sm:$0xff] %v10603_v50  ;;  %v10628_v50 = vld [vmem:[%s12125_s2 + $0x398] sm:$0xff]  ;;  %12652 = vst [vmem:[#allocation93_spill] sm:$0xff] %v10643_v46 }
 0x201   :  { %12569 = vst [vmem:[#allocation10_spill] sm:$0xff] %v10103_v59  ;;  %v10578_v59 = vld [vmem:[%s12125_s2 + $0x348] sm:$0xff]  ;;  %12649 = vst [vmem:[#allocation90_spill] sm:$0xff] %v10628_v50  ;;  %v10653_v50 = vld [vmem:[%s12125_s2 + $0x3c0] sm:$0xff] }
 0x202   :  { %4068 = vmatpush1.bf16.msra.mxu0 %v7594_v27  ;;  %v10108_v27 = vld [vmem:[%s12125_s2 + $0x58] sm:$0xff]  ;;  %12639 = vst [vmem:[#allocation80_spill] sm:$0xff] %v10578_v59  ;;  %12654 = vst [vmem:[#allocation95_spill] sm:$0xff] %v10653_v50  ;;  %v10678_v50 = vld [vmem:[%s12125_s2 + $0x3e8] sm:$0xff] }
 0x203   :  { %4154 = vmatpush1.bf16.msra.mxu1 %v7596_v60  ;;  %12570 = vst [vmem:[#allocation11_spill] sm:$0xff] %v10108_v27  ;;  %v10113_v60 = vld [vmem:[%s12125_s2 + $0x60] sm:$0xff]  ;;  %v10558_v27 = vld [vmem:[%s12125_s2 + $0x328] sm:$0xff]  ;;  %v10668_v46 = vld [vmem:[%s12125_s2 + $0x3d8] sm:$0xff] }
 0x204   :  { %12635 = vst [vmem:[#allocation76_spill] sm:$0xff] %v10558_v27  ;;  %12657 = vst [vmem:[#allocation98_spill] sm:$0xff] %v10668_v46  ;;  %v10693_v46 = vld [vmem:[%s12126_s5] sm:$0xff] }
 0x205   :  { %4070 = vmatmul.mubr.bf16.vlgmr.msra.gmra.mrb[12].mxu0 %v8503_v57  ;;  %12659 = vst [vmem:[#allocation100_spill] sm:$0xff] %v10678_v50  ;;  %12662 = vst [vmem:[#allocation103_spill] sm:$0xff] %v10693_v46  ;;  %v10703_v50 = vld [vmem:[%s12126_s5 + $0x10] sm:$0xff]  ;;  %v10718_v46 = vld [vmem:[%s12126_s5 + $0x28] sm:$0xff] }
 0x206   :  { %4156 = vmatmul.mubr.bf16.vlgmr.msra.gmra.mrb[12].mxu1 %v8503_v57  ;;  %v2517_v57 = vrot.slane %v10028_v52, %v322_v56  ;;  %12664 = vst [vmem:[#allocation105_spill] sm:$0xff] %v10703_v50  ;;  %12667 = vst [vmem:[#allocation108_spill] sm:$0xff] %v10718_v46  ;;  %v10728_v50 = vld [vmem:[%s12126_s5 + $0x38] sm:$0xff]  ;;  %v10743_v46 = vld [vmem:[%s12126_s5 + $0x50] sm:$0xff] }
 0x207   :  { %12669 = vst [vmem:[#allocation110_spill] sm:$0xff] %v10728_v50  ;;  %12672 = vst [vmem:[#allocation113_spill] sm:$0xff] %v10743_v46  ;;  %v10753_v50 = vld [vmem:[%s12126_s5 + $0x60] sm:$0xff]  ;;  %v10768_v46 = vld [vmem:[%s12126_s5 + $0x78] sm:$0xff] }
 0x208   :  { %12674 = vst [vmem:[#allocation115_spill] sm:$0xff] %v10753_v50  ;;  %12677 = vst [vmem:[#allocation118_spill] sm:$0xff] %v10768_v46  ;;  %v10778_v50 = vld [vmem:[%s12126_s5 + $0x88] sm:$0xff]  ;;  %v10793_v46 = vld [vmem:[%s12126_s5 + $0xa0] sm:$0xff] }
 0x209   :  { %12679 = vst [vmem:[#allocation120_spill] sm:$0xff] %v10778_v50  ;;  %12682 = vst [vmem:[#allocation123_spill] sm:$0xff] %v10793_v46  ;;  %v10803_v50 = vld [vmem:[%s12126_s5 + $0xb0] sm:$0xff]  ;;  %v10818_v46 = vld [vmem:[%s12126_s5 + $0xc8] sm:$0xff] }
 0x20a   :  { %12684 = vst [vmem:[#allocation125_spill] sm:$0xff] %v10803_v50  ;;  %12687 = vst [vmem:[#allocation128_spill] sm:$0xff] %v10818_v46  ;;  %v10828_v50 = vld [vmem:[%s12126_s5 + $0xd8] sm:$0xff]  ;;  %v10843_v46 = vld [vmem:[%s12126_s5 + $0xf0] sm:$0xff] }
 0x20b   :  { %12689 = vst [vmem:[#allocation130_spill] sm:$0xff] %v10828_v50  ;;  %12692 = vst [vmem:[#allocation133_spill] sm:$0xff] %v10843_v46  ;;  %v10853_v50 = vld [vmem:[%s12126_s5 + $0x100] sm:$0xff]  ;;  %v10868_v46 = vld [vmem:[%s12126_s5 + $0x118] sm:$0xff] }
 0x20c   :  { %12694 = vst [vmem:[#allocation135_spill] sm:$0xff] %v10853_v50  ;;  %12697 = vst [vmem:[#allocation138_spill] sm:$0xff] %v10868_v46  ;;  %v10878_v50 = vld [vmem:[%s12126_s5 + $0x128] sm:$0xff]  ;;  %v10893_v46 = vld [vmem:[%s12126_s5 + $0x140] sm:$0xff] }
 0x20d   :  { %12699 = vst [vmem:[#allocation140_spill] sm:$0xff] %v10878_v50  ;;  %12702 = vst [vmem:[#allocation143_spill] sm:$0xff] %v10893_v46  ;;  %v10903_v50 = vld [vmem:[%s12126_s5 + $0x150] sm:$0xff]  ;;  %v10918_v46 = vld [vmem:[%s12126_s5 + $0x168] sm:$0xff] }
 0x20e   :  { %12704 = vst [vmem:[#allocation145_spill] sm:$0xff] %v10903_v50  ;;  %12707 = vst [vmem:[#allocation148_spill] sm:$0xff] %v10918_v46  ;;  %v10928_v50 = vld [vmem:[%s12126_s5 + $0x178] sm:$0xff]  ;;  %v10943_v46 = vld [vmem:[%s12126_s5 + $0x190] sm:$0xff] }
 0x20f   :  { %12709 = vst [vmem:[#allocation150_spill] sm:$0xff] %v10928_v50  ;;  %12712 = vst [vmem:[#allocation153_spill] sm:$0xff] %v10943_v46  ;;  %v10953_v50 = vld [vmem:[%s12126_s5 + $0x1a0] sm:$0xff]  ;;  %v10968_v46 = vld [vmem:[%s12126_s5 + $0x1b8] sm:$0xff] }
 0x210   :  { %12714 = vst [vmem:[#allocation155_spill] sm:$0xff] %v10953_v50  ;;  %12717 = vst [vmem:[#allocation158_spill] sm:$0xff] %v10968_v46  ;;  %v10978_v50 = vld [vmem:[%s12126_s5 + $0x1c8] sm:$0xff]  ;;  %v10993_v46 = vld [vmem:[%s12126_s5 + $0x1e0] sm:$0xff] }
 0x211   :  { %12719 = vst [vmem:[#allocation160_spill] sm:$0xff] %v10978_v50  ;;  %12722 = vst [vmem:[#allocation163_spill] sm:$0xff] %v10993_v46  ;;  %v11003_v50 = vld [vmem:[%s12126_s5 + $0x1f0] sm:$0xff]  ;;  %v11018_v46 = vld [vmem:[%s12126_s5 + $0x208] sm:$0xff] }
 0x212   :  { %12723 = vst [vmem:[#allocation164_spill] sm:$0xff] %v10998_v49  ;;  %12724 = vst [vmem:[#allocation165_spill] sm:$0xff] %v11003_v50  ;;  %v11023_v49 = vld [vmem:[%s12126_s5 + $0x210] sm:$0xff]  ;;  %v11028_v50 = vld [vmem:[%s12126_s5 + $0x218] sm:$0xff] }
 0x213   :  { %12727 = vst [vmem:[#allocation168_spill] sm:$0xff] %v11018_v46  ;;  %12728 = vst [vmem:[#allocation169_spill] sm:$0xff] %v11023_v49  ;;  %v11043_v46 = vld [vmem:[%s12126_s5 + $0x230] sm:$0xff]  ;;  %v11048_v49 = vld [vmem:[%s12126_s5 + $0x238] sm:$0xff] }
 0x214   :  { %12729 = vst [vmem:[#allocation170_spill] sm:$0xff] %v11028_v50  ;;  %12732 = vst [vmem:[#allocation173_spill] sm:$0xff] %v11043_v46  ;;  %v11053_v50 = vld [vmem:[%s12126_s5 + $0x240] sm:$0xff]  ;;  %v11068_v46 = vld [vmem:[%s12126_s5 + $0x258] sm:$0xff] }
 0x215   :  { %12733 = vst [vmem:[#allocation174_spill] sm:$0xff] %v11048_v49  ;;  %12734 = vst [vmem:[#allocation175_spill] sm:$0xff] %v11053_v50  ;;  %v11073_v49 = vld [vmem:[%s12126_s5 + $0x260] sm:$0xff]  ;;  %v11078_v50 = vld [vmem:[%s12126_s5 + $0x268] sm:$0xff] }
 0x216   :  { %12737 = vst [vmem:[#allocation178_spill] sm:$0xff] %v11068_v46  ;;  %12738 = vst [vmem:[#allocation179_spill] sm:$0xff] %v11073_v49  ;;  %v11093_v46 = vld [vmem:[%s12126_s5 + $0x280] sm:$0xff]  ;;  %v11098_v49 = vld [vmem:[%s12126_s5 + $0x288] sm:$0xff] }
 0x217   :  { %12739 = vst [vmem:[#allocation180_spill] sm:$0xff] %v11078_v50  ;;  %12742 = vst [vmem:[#allocation183_spill] sm:$0xff] %v11093_v46  ;;  %v11103_v50 = vld [vmem:[%s12126_s5 + $0x290] sm:$0xff]  ;;  %v11118_v46 = vld [vmem:[%s12126_s5 + $0x2a8] sm:$0xff] }
 0x218   :  { %12743 = vst [vmem:[#allocation184_spill] sm:$0xff] %v11098_v49  ;;  %12744 = vst [vmem:[#allocation185_spill] sm:$0xff] %v11103_v50  ;;  %v11123_v49 = vld [vmem:[%s12126_s5 + $0x2b0] sm:$0xff]  ;;  %v11128_v50 = vld [vmem:[%s12126_s5 + $0x2b8] sm:$0xff] }
 0x219   :  { %12747 = vst [vmem:[#allocation188_spill] sm:$0xff] %v11118_v46  ;;  %12748 = vst [vmem:[#allocation189_spill] sm:$0xff] %v11123_v49  ;;  %v11143_v46 = vld [vmem:[%s12126_s5 + $0x2d0] sm:$0xff]  ;;  %v11148_v49 = vld [vmem:[%s12126_s5 + $0x2d8] sm:$0xff] }
 0x21a   :  { %12749 = vst [vmem:[#allocation190_spill] sm:$0xff] %v11128_v50  ;;  %12752 = vst [vmem:[#allocation193_spill] sm:$0xff] %v11143_v46  ;;  %v11153_v50 = vld [vmem:[%s12126_s5 + $0x2e0] sm:$0xff]  ;;  %v11168_v46 = vld [vmem:[%s12126_s5 + $0x2f8] sm:$0xff] }
 0x21b   :  { %12753 = vst [vmem:[#allocation194_spill] sm:$0xff] %v11148_v49  ;;  %12754 = vst [vmem:[#allocation195_spill] sm:$0xff] %v11153_v50  ;;  %v11173_v49 = vld [vmem:[%s12126_s5 + $0x300] sm:$0xff]  ;;  %v11178_v50 = vld [vmem:[%s12126_s5 + $0x308] sm:$0xff] }
 0x21c   :  { %12757 = vst [vmem:[#allocation198_spill] sm:$0xff] %v11168_v46  ;;  %12758 = vst [vmem:[#allocation199_spill] sm:$0xff] %v11173_v49  ;;  %v11193_v46 = vld [vmem:[%s12126_s5 + $0x320] sm:$0xff]  ;;  %v11198_v49 = vld [vmem:[%s12126_s5 + $0x328] sm:$0xff] }
 0x21d   :  { %12759 = vst [vmem:[#allocation200_spill] sm:$0xff] %v11178_v50  ;;  %12762 = vst [vmem:[#allocation203_spill] sm:$0xff] %v11193_v46  ;;  %v11203_v50 = vld [vmem:[%s12126_s5 + $0x330] sm:$0xff]  ;;  %v11218_v46 = vld [vmem:[%s12126_s5 + $0x348] sm:$0xff] }
 0x21e   :  { %12763 = vst [vmem:[#allocation204_spill] sm:$0xff] %v11198_v49  ;;  %12764 = vst [vmem:[#allocation205_spill] sm:$0xff] %v11203_v50  ;;  %v11223_v49 = vld [vmem:[%s12126_s5 + $0x350] sm:$0xff]  ;;  %v11228_v50 = vld [vmem:[%s12126_s5 + $0x358] sm:$0xff] }
 0x21f   :  { %12767 = vst [vmem:[#allocation208_spill] sm:$0xff] %v11218_v46  ;;  %12768 = vst [vmem:[#allocation209_spill] sm:$0xff] %v11223_v49  ;;  %v11243_v46 = vld [vmem:[%s12126_s5 + $0x370] sm:$0xff]  ;;  %v11248_v49 = vld [vmem:[%s12126_s5 + $0x378] sm:$0xff] }
 0x220   :  { %12769 = vst [vmem:[#allocation210_spill] sm:$0xff] %v11228_v50  ;;  %12772 = vst [vmem:[#allocation213_spill] sm:$0xff] %v11243_v46  ;;  %v11253_v50 = vld [vmem:[%s12126_s5 + $0x380] sm:$0xff]  ;;  %v11268_v46 = vld [vmem:[%s12126_s5 + $0x398] sm:$0xff] }
 0x221   :  { %12773 = vst [vmem:[#allocation214_spill] sm:$0xff] %v11248_v49  ;;  %12774 = vst [vmem:[#allocation215_spill] sm:$0xff] %v11253_v50  ;;  %v11273_v49 = vld [vmem:[%s12126_s5 + $0x3a0] sm:$0xff]  ;;  %v11278_v50 = vld [vmem:[%s12126_s5 + $0x3a8] sm:$0xff] }
 0x222   :  { %12777 = vst [vmem:[#allocation218_spill] sm:$0xff] %v11268_v46  ;;  %12778 = vst [vmem:[#allocation219_spill] sm:$0xff] %v11273_v49  ;;  %v11293_v46 = vld [vmem:[%s12126_s5 + $0x3c0] sm:$0xff]  ;;  %v11298_v49 = vld [vmem:[%s12126_s5 + $0x3c8] sm:$0xff] }
 0x223   :  { %12779 = vst [vmem:[#allocation220_spill] sm:$0xff] %v11278_v50  ;;  %12782 = vst [vmem:[#allocation223_spill] sm:$0xff] %v11293_v46  ;;  %v11303_v50 = vld [vmem:[%s12126_s5 + $0x3d0] sm:$0xff]  ;;  %v11318_v46 = vld [vmem:[%s12126_s5 + $0x3e8] sm:$0xff] }
 0x224   :  { %12783 = vst [vmem:[#allocation224_spill] sm:$0xff] %v11298_v49  ;;  %12784 = vst [vmem:[#allocation225_spill] sm:$0xff] %v11303_v50  ;;  %v11323_v49 = vld [vmem:[%s12126_s5 + $0x3f0] sm:$0xff]  ;;  %v11328_v50 = vld [vmem:[%s12126_s5 + $0x3f8] sm:$0xff] }
 0x225   :  { %12787 = vst [vmem:[#allocation228_spill] sm:$0xff] %v11318_v46  ;;  %12788 = vst [vmem:[#allocation229_spill] sm:$0xff] %v11323_v49  ;;  %v12792_v46 = vsub.s32 5, %v8378_v51 }
 0x226   :  { %12789 = vst [vmem:[#allocation230_spill] sm:$0xff] %v11328_v50 }
 0x258   :  { %v3899_v0 = vpop.f32.mrb[8].mxu0 }
 0x259   :  { %v8007_v1 = vadd.f32 %v3899_v0, %v2505_v61  ;;  %v3985_v2 = vpop.f32.mrb[8].mxu1  ;;  %v3901_v3 = vpop.f32.mrb[9].mxu0  ;;  %v10138_v0 = vld [vmem:[%s12125_s2 + $0x88] sm:$0xff] }
 0x25a   :  { %v8011_v4 = vadd.f32 %v3985_v2, %v2513_v63  ;;  %v8008_v5 = vadd.f32 %v3901_v3, %v2509_v62  ;;  %v3987_v6 = vpop.f32.mrb[9].mxu1  ;;  %v3903_v47 = vpop.f32.mrb[10].mxu0  ;;  %12573 = vst [vmem:[#allocation14_spill] sm:$0xff] %v10138_v0  ;;  %v10148_v2 = vld [vmem:[%s12125_s2 + $0x98] sm:$0xff]  ;;  %v10153_v3 = vld [vmem:[%s12125_s2 + $0xa0] sm:$0xff] }
 0x25b   :  { %v8012_v32 = vadd.f32 %v3987_v6, %v2517_v57  ;;  %v8009_v7 = vadd.f32 %v3903_v47, %v2505_v61  ;;  %v3989_v8 = vpop.f32.mrb[10].mxu1  ;;  %v3905_v53 = vpop.f32.mrb[11].mxu0  ;;  %v10118_v61 = vld [vmem:[%s12125_s2 + $0x68] sm:$0xff]  ;;  %12575 = vst [vmem:[#allocation16_spill] sm:$0xff] %v10148_v2  ;;  %12576 = vst [vmem:[#allocation17_spill] sm:$0xff] %v10153_v3  ;;  %v10168_v6 = vld [vmem:[%s12125_s2 + $0xb8] sm:$0xff] }
 0x25c   :  { %v4182_v9 = vcombine.low %v8007_v1, %v8008_v5  ;;  %v4183_v10 = vcombine.high %v8007_v1, %v8008_v5  ;;  %v8013_v11 = vadd.f32 %v3989_v8, %v2513_v63  ;;  %v8010_v54 = vadd.f32 %v3905_v53, %v2509_v62  ;;  %v3991_v12 = vpop.f32.mrb[11].mxu1  ;;  %v10123_v63 = vld [vmem:[%s12125_s2 + $0x70] sm:$0xff]  ;;  %v10128_v62 = vld [vmem:[%s12125_s2 + $0x78] sm:$0xff]  ;;  %12579 = vst [vmem:[#allocation20_spill] sm:$0xff] %v10168_v6  ;;  %v10173_v47 = vld [vmem:[%s12125_s2 + $0xc0] sm:$0xff] }
 0x25d   :  { %v4184_v14 = vcombine.low %v8011_v4, %v8012_v32  ;;  %v4185_v41 = vcombine.high %v8011_v4, %v8012_v32  ;;  %v8014_v56 = vadd.f32 %v3991_v12, %v2517_v57  ;;  %12571 = vst [vmem:[#allocation12_spill] sm:$0xff] %v10123_v63  ;;  %12572 = vst [vmem:[#allocation13_spill] sm:$0xff] %v10128_v62  ;;  %v10133_v57 = vld [vmem:[%s12125_s2 + $0x80] sm:$0xff]  ;;  %v10143_v1 = vld [vmem:[%s12125_s2 + $0x90] sm:$0xff] }
 0x25e   :  { %v4192_v15 = vrot.slane %v4182_v9, %v9461_v13  ;;  %v4199_v16 = vrot.slane %v4183_v10, %v9461_v13  ;;  %v4254_v17 = vcombine.low %v8009_v7, %v8010_v54  ;;  %v4255_v18 = vcombine.high %v8009_v7, %v8010_v54  ;;  %12574 = vst [vmem:[#allocation15_spill] sm:$0xff] %v10143_v1  ;;  %v10158_v4 = vld [vmem:[%s12125_s2 + $0xa8] sm:$0xff]  ;;  %v10163_v5 = vld [vmem:[%s12125_s2 + $0xb0] sm:$0xff]  ;;  %v10188_v8 = vld [vmem:[%s12125_s2 + $0xd8] sm:$0xff] }
 0x25f   :  { %v4206_v19 = vrot.slane %v4184_v14, %v9461_v13  ;;  %v4213_v21 = vrot.slane %v4185_v41, %v9461_v13  ;;  %v4256_v22 = vcombine.low %v8013_v11, %v8014_v56  ;;  %v4257_v25 = vcombine.high %v8013_v11, %v8014_v56  ;;  %12577 = vst [vmem:[#allocation18_spill] sm:$0xff] %v10158_v4  ;;  %v10178_v32 = vld [vmem:[%s12125_s2 + $0xc8] sm:$0xff]  ;;  %v10183_v7 = vld [vmem:[%s12125_s2 + $0xd0] sm:$0xff]  ;;  %v10193_v53 = vld [vmem:[%s12125_s2 + $0xe0] sm:$0xff] }
 0x260   :  { %v4264_v26 = vrot.slane %v4254_v17, %v9461_v13  ;;  %v4271_v28 = vrot.slane %v4255_v18, %v9461_v13  ;;  %12578 = vst [vmem:[#allocation19_spill] sm:$0xff] %v10163_v5  ;;  %12580 = vst [vmem:[#allocation21_spill] sm:$0xff] %v10183_v7  ;;  %v10198_v9 = vld [vmem:[%s12125_s2 + $0xe8] sm:$0xff]  ;;  %v10203_v10 = vld [vmem:[%s12125_s2 + $0xf0] sm:$0xff] }
 0x261   :  { %v4214_v31 = vcombine.low %v4192_v15, %v4206_v19  ;;  %v4215_v34 = vcombine.high %v4192_v15, %v4206_v19  ;;  %v4216_v35 = vcombine.low %v4199_v16, %v4213_v21  ;;  %v4217_v36 = vcombine.high %v4199_v16, %v4213_v21  ;;  %12581 = vst [vmem:[#allocation22_spill] sm:$0xff] %v10188_v8  ;;  %v10208_v11 = vld [vmem:[%s12125_s2 + $0xf8] sm:$0xff]  ;;  %v10213_v54 = vld [vmem:[%s12125_s2 + $0x100] sm:$0xff]  ;;  %v10218_v12 = vld [vmem:[%s12125_s2 + $0x108] sm:$0xff] }
 0x262   :  { %v4278_v37 = vrot.slane %v4256_v22, %v9461_v13  ;;  %v4285_v38 = vrot.slane %v4257_v25, %v9461_v13  ;;  %12582 = vst [vmem:[#allocation23_spill] sm:$0xff] %v10198_v9  ;;  %12583 = vst [vmem:[#allocation24_spill] sm:$0xff] %v10203_v10  ;;  %v10223_v14 = vld [vmem:[%s12125_s2 + $0x110] sm:$0xff]  ;;  %v10228_v41 = vld [vmem:[%s12125_s2 + $0x118] sm:$0xff] }
 0x263   :  { %4342 = vst [vmem:[#allocation3] sm:$0xff] %v4214_v31  ;;  %4344 = vst [vmem:[#allocation3 + $0x10] sm:$0xff] %v4215_v34  ;;  %v10233_v56 = vld [vmem:[%s12125_s2 + $0x120] sm:$0xff]  ;;  %v10238_v15 = vld [vmem:[%s12125_s2 + $0x128] sm:$0xff] }
 0x264   :  { %4346 = vst [vmem:[#allocation3 + $0x20] sm:$0xff] %v4216_v35  ;;  %4348 = vst [vmem:[#allocation3 + $0x30] sm:$0xff] %v4217_v36  ;;  %v4286_v39 = vcombine.low %v4264_v26, %v4278_v37  ;;  %v4287_v40 = vcombine.high %v4264_v26, %v4278_v37  ;;  %v4288_v42 = vcombine.low %v4271_v28, %v4285_v38  ;;  %v10243_v16 = vld [vmem:[%s12125_s2 + $0x130] sm:$0xff]  ;;  %v10248_v17 = vld [vmem:[%s12125_s2 + $0x138] sm:$0xff] }
 0x265   :  { %v4289_v43 = vcombine.high %v4271_v28, %v4285_v38  ;;  %12584 = vst [vmem:[#allocation25_spill] sm:$0xff] %v10208_v11  ;;  %12585 = vst [vmem:[#allocation26_spill] sm:$0xff] %v10218_v12  ;;  %v10253_v18 = vld [vmem:[%s12125_s2 + $0x140] sm:$0xff]  ;;  %v10258_v19 = vld [vmem:[%s12125_s2 + $0x148] sm:$0xff] }
 0x266   :  { %4350 = vst [vmem:[#allocation3 + $0x40] sm:$0xff] %v4286_v39  ;;  %4352 = vst [vmem:[#allocation3 + $0x50] sm:$0xff] %v4287_v40  ;;  %v10263_v21 = vld [vmem:[%s12125_s2 + $0x150] sm:$0xff]  ;;  %v10268_v22 = vld [vmem:[%s12125_s2 + $0x158] sm:$0xff] }
 0x267   :  { %4354 = vst [vmem:[#allocation3 + $0x60] sm:$0xff] %v4288_v42  ;;  %4356 = vst [vmem:[#allocation3 + $0x70] sm:$0xff] %v4289_v43  ;;  %v10273_v25 = vld [vmem:[%s12125_s2 + $0x160] sm:$0xff]  ;;  %v10278_v26 = vld [vmem:[%s12125_s2 + $0x168] sm:$0xff] }
 0x268   :  { %12586 = vst [vmem:[#allocation27_spill] sm:$0xff] %v10223_v14  ;;  %12587 = vst [vmem:[#allocation28_spill] sm:$0xff] %v10228_v41  ;;  %v10283_v28 = vld [vmem:[%s12125_s2 + $0x170] sm:$0xff]  ;;  %v10288_v31 = vld [vmem:[%s12125_s2 + $0x178] sm:$0xff] }
 0x269   :  { %12588 = vst [vmem:[#allocation29_spill] sm:$0xff] %v10238_v15  ;;  %12589 = vst [vmem:[#allocation30_spill] sm:$0xff] %v10243_v16  ;;  %v10293_v34 = vld [vmem:[%s12125_s2 + $0x180] sm:$0xff]  ;;  %v10298_v35 = vld [vmem:[%s12125_s2 + $0x188] sm:$0xff] }
 0x26a   :  { %12590 = vst [vmem:[#allocation31_spill] sm:$0xff] %v10248_v17  ;;  %12591 = vst [vmem:[#allocation32_spill] sm:$0xff] %v10263_v21  ;;  %v10303_v36 = vld [vmem:[%s12125_s2 + $0x190] sm:$0xff]  ;;  %v10308_v37 = vld [vmem:[%s12125_s2 + $0x198] sm:$0xff] }
 0x26b   :  { %12592 = vst [vmem:[#allocation33_spill] sm:$0xff] %v10268_v22  ;;  %12593 = vst [vmem:[#allocation34_spill] sm:$0xff] %v10283_v28  ;;  %v10313_v38 = vld [vmem:[%s12125_s2 + $0x1a0] sm:$0xff]  ;;  %v10318_v39 = vld [vmem:[%s12125_s2 + $0x1a8] sm:$0xff] }
 0x26c   :  { %12594 = vst [vmem:[#allocation35_spill] sm:$0xff] %v10288_v31  ;;  %12595 = vst [vmem:[#allocation36_spill] sm:$0xff] %v10303_v36  ;;  %v10323_v40 = vld [vmem:[%s12125_s2 + $0x1b0] sm:$0xff]  ;;  %v10328_v42 = vld [vmem:[%s12125_s2 + $0x1b8] sm:$0xff] }
 0x26d   :  { %12596 = vst [vmem:[#allocation37_spill] sm:$0xff] %v10308_v37  ;;  %12597 = vst [vmem:[#allocation38_spill] sm:$0xff] %v10323_v40  ;;  %v10333_v43 = vld [vmem:[%s12125_s2 + $0x1c0] sm:$0xff]  ;;  %v10358_v37 = vld [vmem:[%s12125_s2 + $0x1e8] sm:$0xff] }
 0x26e   :  { %12598 = vst [vmem:[#allocation39_spill] sm:$0xff] %v10328_v42  ;;  %v10363_v42 = vld [vmem:[%s12125_s2 + $0x1f0] sm:$0xff]  ;;  %v10378_v36 = vld [vmem:[%s12125_s2 + $0x208] sm:$0xff] }
 0x26f   :  { %12601 = vst [vmem:[#allocation42_spill] sm:$0xff] %v10363_v42  ;;  %v10383_v40 = vld [vmem:[%s12125_s2 + $0x210] sm:$0xff]  ;;  %v10388_v42 = vld [vmem:[%s12125_s2 + $0x218] sm:$0xff]  ;;  %v10398_v22 = vld [vmem:[%s12125_s2 + $0x228] sm:$0xff] }
 0x270   :  { %12603 = vst [vmem:[#allocation44_spill] sm:$0xff] %v10383_v40  ;;  %12604 = vst [vmem:[#allocation45_spill] sm:$0xff] %v10388_v42  ;;  %v10403_v31 = vld [vmem:[%s12125_s2 + $0x230] sm:$0xff]  ;;  %v10408_v40 = vld [vmem:[%s12125_s2 + $0x238] sm:$0xff] }
 0x271   :  { %12605 = vst [vmem:[#allocation46_spill] sm:$0xff] %v10403_v31  ;;  %12606 = vst [vmem:[#allocation47_spill] sm:$0xff] %v10408_v40  ;;  %v10413_v42 = vld [vmem:[%s12125_s2 + $0x240] sm:$0xff]  ;;  %v10418_v21 = vld [vmem:[%s12125_s2 + $0x248] sm:$0xff] }
 0x272   :  { %12607 = vst [vmem:[#allocation48_spill] sm:$0xff] %v10413_v42  ;;  %12608 = vst [vmem:[#allocation49_spill] sm:$0xff] %v10418_v21  ;;  %v10423_v28 = vld [vmem:[%s12125_s2 + $0x250] sm:$0xff]  ;;  %v10428_v31 = vld [vmem:[%s12125_s2 + $0x258] sm:$0xff] }
 0x273   :  { %12609 = vst [vmem:[#allocation50_spill] sm:$0xff] %v10423_v28  ;;  %12610 = vst [vmem:[#allocation51_spill] sm:$0xff] %v10428_v31  ;;  %v10433_v40 = vld [vmem:[%s12125_s2 + $0x260] sm:$0xff]  ;;  %v10438_v41 = vld [vmem:[%s12125_s2 + $0x268] sm:$0xff] }
 0x274   :  { %12611 = vst [vmem:[#allocation52_spill] sm:$0xff] %v10438_v41  ;;  %v10443_v17 = vld [vmem:[%s12125_s2 + $0x270] sm:$0xff]  ;;  %v10448_v28 = vld [vmem:[%s12125_s2 + $0x278] sm:$0xff]  ;;  %v10453_v31 = vld [vmem:[%s12125_s2 + $0x280] sm:$0xff] }
 0x275   :  { %12612 = vst [vmem:[#allocation53_spill] sm:$0xff] %v10443_v17  ;;  %12613 = vst [vmem:[#allocation54_spill] sm:$0xff] %v10448_v28  ;;  %v10458_v14 = vld [vmem:[%s12125_s2 + $0x288] sm:$0xff]  ;;  %v10463_v16 = vld [vmem:[%s12125_s2 + $0x290] sm:$0xff] }
 0x276   :  { %12614 = vst [vmem:[#allocation55_spill] sm:$0xff] %v10453_v31  ;;  %12615 = vst [vmem:[#allocation56_spill] sm:$0xff] %v10458_v14  ;;  %v10468_v17 = vld [vmem:[%s12125_s2 + $0x298] sm:$0xff]  ;;  %v10473_v28 = vld [vmem:[%s12125_s2 + $0x2a0] sm:$0xff] }
 0x277   :  { %12616 = vst [vmem:[#allocation57_spill] sm:$0xff] %v10463_v16  ;;  %12617 = vst [vmem:[#allocation58_spill] sm:$0xff] %v10468_v17  ;;  %v10478_v8 = vld [vmem:[%s12125_s2 + $0x2a8] sm:$0xff]  ;;  %v10483_v11 = vld [vmem:[%s12125_s2 + $0x2b0] sm:$0xff] }
 0x278   :  { %12618 = vst [vmem:[#allocation59_spill] sm:$0xff] %v10473_v28  ;;  %12619 = vst [vmem:[#allocation60_spill] sm:$0xff] %v10478_v8  ;;  %v10488_v16 = vld [vmem:[%s12125_s2 + $0x2b8] sm:$0xff]  ;;  %v10493_v17 = vld [vmem:[%s12125_s2 + $0x2c0] sm:$0xff] }
 0x279   :  { %12620 = vst [vmem:[#allocation61_spill] sm:$0xff] %v10483_v11  ;;  %12621 = vst [vmem:[#allocation62_spill] sm:$0xff] %v10488_v16  ;;  %v10498_v7 = vld [vmem:[%s12125_s2 + $0x2c8] sm:$0xff]  ;;  %v10503_v10 = vld [vmem:[%s12125_s2 + $0x2d0] sm:$0xff] }
 0x27a   :  { %12622 = vst [vmem:[#allocation63_spill] sm:$0xff] %v10493_v17  ;;  %12623 = vst [vmem:[#allocation64_spill] sm:$0xff] %v10498_v7  ;;  %v10508_v11 = vld [vmem:[%s12125_s2 + $0x2d8] sm:$0xff]  ;;  %v10513_v16 = vld [vmem:[%s12125_s2 + $0x2e0] sm:$0xff] }
 0x27b   :  { %12624 = vst [vmem:[#allocation65_spill] sm:$0xff] %v10503_v10  ;;  %12625 = vst [vmem:[#allocation66_spill] sm:$0xff] %v10508_v11  ;;  %v10518_v2 = vld [vmem:[%s12125_s2 + $0x2e8] sm:$0xff]  ;;  %v10523_v6 = vld [vmem:[%s12125_s2 + $0x2f0] sm:$0xff] }
 0x27c   :  { %12626 = vst [vmem:[#allocation67_spill] sm:$0xff] %v10513_v16  ;;  %12627 = vst [vmem:[#allocation68_spill] sm:$0xff] %v10518_v2  ;;  %v10528_v10 = vld [vmem:[%s12125_s2 + $0x2f8] sm:$0xff]  ;;  %v10533_v11 = vld [vmem:[%s12125_s2 + $0x300] sm:$0xff] }
 0x27d   :  { %12628 = vst [vmem:[#allocation69_spill] sm:$0xff] %v10523_v6  ;;  %12629 = vst [vmem:[#allocation70_spill] sm:$0xff] %v10528_v10  ;;  %v10538_v1 = vld [vmem:[%s12125_s2 + $0x308] sm:$0xff]  ;;  %v10543_v5 = vld [vmem:[%s12125_s2 + $0x310] sm:$0xff] }
 0x27e   :  { %12630 = vst [vmem:[#allocation71_spill] sm:$0xff] %v10533_v11  ;;  %12631 = vst [vmem:[#allocation72_spill] sm:$0xff] %v10538_v1  ;;  %v10548_v6 = vld [vmem:[%s12125_s2 + $0x318] sm:$0xff]  ;;  %v10553_v10 = vld [vmem:[%s12125_s2 + $0x320] sm:$0xff] }
 0x27f   :  { %12632 = vst [vmem:[#allocation73_spill] sm:$0xff] %v10543_v5  ;;  %12633 = vst [vmem:[#allocation74_spill] sm:$0xff] %v10548_v6  ;;  %v10563_v62 = vld [vmem:[%s12125_s2 + $0x330] sm:$0xff]  ;;  %v10568_v5 = vld [vmem:[%s12125_s2 + $0x338] sm:$0xff] }
 0x280   :  { %12634 = vst [vmem:[#allocation75_spill] sm:$0xff] %v10553_v10  ;;  %12636 = vst [vmem:[#allocation77_spill] sm:$0xff] %v10563_v62  ;;  %v10573_v6 = vld [vmem:[%s12125_s2 + $0x340] sm:$0xff]  ;;  %v10583_v63 = vld [vmem:[%s12125_s2 + $0x350] sm:$0xff] }
 0x281   :  { %12637 = vst [vmem:[#allocation78_spill] sm:$0xff] %v10568_v5  ;;  %12638 = vst [vmem:[#allocation79_spill] sm:$0xff] %v10573_v6  ;;  %v10588_v62 = vld [vmem:[%s12125_s2 + $0x358] sm:$0xff]  ;;  %v10593_v5 = vld [vmem:[%s12125_s2 + $0x360] sm:$0xff]  ;;  %v2525_v6 = vrot.slane %v10028_v52, %v12792_v46 }
 0x282   :  { %12640 = vst [vmem:[#allocation81_spill] sm:$0xff] %v10583_v63  ;;  %12641 = vst [vmem:[#allocation82_spill] sm:$0xff] %v10588_v62  ;;  %v10608_v63 = vld [vmem:[%s12125_s2 + $0x378] sm:$0xff]  ;;  %v10613_v62 = vld [vmem:[%s12125_s2 + $0x380] sm:$0xff] }
 0x283   :  { %12642 = vst [vmem:[#allocation83_spill] sm:$0xff] %v10593_v5  ;;  %12645 = vst [vmem:[#allocation86_spill] sm:$0xff] %v10608_v63  ;;  %v10633_v63 = vld [vmem:[%s12125_s2 + $0x3a0] sm:$0xff]  ;;  %v12793_v5 = vsub.s32 7, %v8378_v51 }
 0x284   :  { %12646 = vst [vmem:[#allocation87_spill] sm:$0xff] %v10613_v62  ;;  %12650 = vst [vmem:[#allocation91_spill] sm:$0xff] %v10633_v63  ;;  %v10638_v62 = vld [vmem:[%s12125_s2 + $0x3a8] sm:$0xff] }
 0x285   :  { %12651 = vst [vmem:[#allocation92_spill] sm:$0xff] %v10638_v62  ;;  %v10658_v63 = vld [vmem:[%s12125_s2 + $0x3c8] sm:$0xff]  ;;  %v10663_v62 = vld [vmem:[%s12125_s2 + $0x3d0] sm:$0xff]  ;;  %v2533_v49 = vrot.slane %v10028_v52, %v12793_v5 }
 0x286   :  { %12655 = vst [vmem:[#allocation96_spill] sm:$0xff] %v10658_v63  ;;  %12656 = vst [vmem:[#allocation97_spill] sm:$0xff] %v10663_v62  ;;  %v10683_v63 = vld [vmem:[%s12125_s2 + $0x3f0] sm:$0xff]  ;;  %v10688_v62 = vld [vmem:[%s12125_s2 + $0x3f8] sm:$0xff] }
 0x287   :  { %12660 = vst [vmem:[#allocation101_spill] sm:$0xff] %v10683_v63  ;;  %12661 = vst [vmem:[#allocation102_spill] sm:$0xff] %v10688_v62  ;;  %v10708_v63 = vld [vmem:[%s12126_s5 + $0x18] sm:$0xff]  ;;  %v10713_v62 = vld [vmem:[%s12126_s5 + $0x20] sm:$0xff] }
 0x288   :  { %12665 = vst [vmem:[#allocation106_spill] sm:$0xff] %v10708_v63  ;;  %12666 = vst [vmem:[#allocation107_spill] sm:$0xff] %v10713_v62  ;;  %v10733_v63 = vld [vmem:[%s12126_s5 + $0x40] sm:$0xff]  ;;  %v10738_v62 = vld [vmem:[%s12126_s5 + $0x48] sm:$0xff] }
 0x289   :  { %12670 = vst [vmem:[#allocation111_spill] sm:$0xff] %v10733_v63  ;;  %12671 = vst [vmem:[#allocation112_spill] sm:$0xff] %v10738_v62  ;;  %v10758_v63 = vld [vmem:[%s12126_s5 + $0x68] sm:$0xff]  ;;  %v10763_v62 = vld [vmem:[%s12126_s5 + $0x70] sm:$0xff] }
 0x28a   :  { %12675 = vst [vmem:[#allocation116_spill] sm:$0xff] %v10758_v63  ;;  %12676 = vst [vmem:[#allocation117_spill] sm:$0xff] %v10763_v62  ;;  %v10783_v63 = vld [vmem:[%s12126_s5 + $0x90] sm:$0xff]  ;;  %v10788_v62 = vld [vmem:[%s12126_s5 + $0x98] sm:$0xff] }
 0x28b   :  { %12680 = vst [vmem:[#allocation121_spill] sm:$0xff] %v10783_v63  ;;  %12681 = vst [vmem:[#allocation122_spill] sm:$0xff] %v10788_v62  ;;  %v10808_v63 = vld [vmem:[%s12126_s5 + $0xb8] sm:$0xff]  ;;  %v10813_v62 = vld [vmem:[%s12126_s5 + $0xc0] sm:$0xff] }
 0x28c   :  { %12685 = vst [vmem:[#allocation126_spill] sm:$0xff] %v10808_v63  ;;  %12686 = vst [vmem:[#allocation127_spill] sm:$0xff] %v10813_v62  ;;  %v10833_v63 = vld [vmem:[%s12126_s5 + $0xe0] sm:$0xff]  ;;  %v10838_v62 = vld [vmem:[%s12126_s5 + $0xe8] sm:$0xff] }
 0x28d   :  { %12690 = vst [vmem:[#allocation131_spill] sm:$0xff] %v10833_v63  ;;  %12691 = vst [vmem:[#allocation132_spill] sm:$0xff] %v10838_v62  ;;  %v10858_v63 = vld [vmem:[%s12126_s5 + $0x108] sm:$0xff]  ;;  %v10863_v62 = vld [vmem:[%s12126_s5 + $0x110] sm:$0xff] }
 0x28e   :  { %12695 = vst [vmem:[#allocation136_spill] sm:$0xff] %v10858_v63  ;;  %12696 = vst [vmem:[#allocation137_spill] sm:$0xff] %v10863_v62  ;;  %v10883_v63 = vld [vmem:[%s12126_s5 + $0x130] sm:$0xff]  ;;  %v10888_v62 = vld [vmem:[%s12126_s5 + $0x138] sm:$0xff] }
 0x28f   :  { %12700 = vst [vmem:[#allocation141_spill] sm:$0xff] %v10883_v63  ;;  %12701 = vst [vmem:[#allocation142_spill] sm:$0xff] %v10888_v62  ;;  %v10908_v63 = vld [vmem:[%s12126_s5 + $0x158] sm:$0xff]  ;;  %v10913_v62 = vld [vmem:[%s12126_s5 + $0x160] sm:$0xff] }
 0x290   :  { %12705 = vst [vmem:[#allocation146_spill] sm:$0xff] %v10908_v63  ;;  %12706 = vst [vmem:[#allocation147_spill] sm:$0xff] %v10913_v62  ;;  %v10933_v63 = vld [vmem:[%s12126_s5 + $0x180] sm:$0xff]  ;;  %v10938_v62 = vld [vmem:[%s12126_s5 + $0x188] sm:$0xff] }
 0x291   :  { %12710 = vst [vmem:[#allocation151_spill] sm:$0xff] %v10933_v63  ;;  %12711 = vst [vmem:[#allocation152_spill] sm:$0xff] %v10938_v62  ;;  %v10958_v63 = vld [vmem:[%s12126_s5 + $0x1a8] sm:$0xff]  ;;  %v10963_v62 = vld [vmem:[%s12126_s5 + $0x1b0] sm:$0xff] }
 0x292   :  { %12715 = vst [vmem:[#allocation156_spill] sm:$0xff] %v10958_v63  ;;  %12716 = vst [vmem:[#allocation157_spill] sm:$0xff] %v10963_v62  ;;  %v10983_v63 = vld [vmem:[%s12126_s5 + $0x1d0] sm:$0xff]  ;;  %v10988_v62 = vld [vmem:[%s12126_s5 + $0x1d8] sm:$0xff] }
 0x293   :  { %12720 = vst [vmem:[#allocation161_spill] sm:$0xff] %v10983_v63  ;;  %12721 = vst [vmem:[#allocation162_spill] sm:$0xff] %v10988_v62  ;;  %v11008_v63 = vld [vmem:[%s12126_s5 + $0x1f8] sm:$0xff]  ;;  %v11013_v62 = vld [vmem:[%s12126_s5 + $0x200] sm:$0xff] }
 0x294   :  { %12725 = vst [vmem:[#allocation166_spill] sm:$0xff] %v11008_v63  ;;  %12726 = vst [vmem:[#allocation167_spill] sm:$0xff] %v11013_v62  ;;  %v11033_v63 = vld [vmem:[%s12126_s5 + $0x220] sm:$0xff]  ;;  %v11038_v62 = vld [vmem:[%s12126_s5 + $0x228] sm:$0xff] }
 0x295   :  { %12730 = vst [vmem:[#allocation171_spill] sm:$0xff] %v11033_v63  ;;  %12731 = vst [vmem:[#allocation172_spill] sm:$0xff] %v11038_v62  ;;  %v11058_v63 = vld [vmem:[%s12126_s5 + $0x248] sm:$0xff]  ;;  %v11063_v62 = vld [vmem:[%s12126_s5 + $0x250] sm:$0xff] }
 0x296   :  { %12735 = vst [vmem:[#allocation176_spill] sm:$0xff] %v11058_v63  ;;  %12736 = vst [vmem:[#allocation177_spill] sm:$0xff] %v11063_v62  ;;  %v11083_v63 = vld [vmem:[%s12126_s5 + $0x270] sm:$0xff]  ;;  %v11088_v62 = vld [vmem:[%s12126_s5 + $0x278] sm:$0xff] }
 0x297   :  { %12740 = vst [vmem:[#allocation181_spill] sm:$0xff] %v11083_v63  ;;  %12741 = vst [vmem:[#allocation182_spill] sm:$0xff] %v11088_v62  ;;  %v11108_v63 = vld [vmem:[%s12126_s5 + $0x298] sm:$0xff]  ;;  %v11113_v62 = vld [vmem:[%s12126_s5 + $0x2a0] sm:$0xff] }
 0x298   :  { %12745 = vst [vmem:[#allocation186_spill] sm:$0xff] %v11108_v63  ;;  %12746 = vst [vmem:[#allocation187_spill] sm:$0xff] %v11113_v62  ;;  %v11133_v63 = vld [vmem:[%s12126_s5 + $0x2c0] sm:$0xff]  ;;  %v11138_v62 = vld [vmem:[%s12126_s5 + $0x2c8] sm:$0xff] }
 0x299   :  { %12750 = vst [vmem:[#allocation191_spill] sm:$0xff] %v11133_v63  ;;  %12751 = vst [vmem:[#allocation192_spill] sm:$0xff] %v11138_v62  ;;  %v11158_v63 = vld [vmem:[%s12126_s5 + $0x2e8] sm:$0xff]  ;;  %v11163_v62 = vld [vmem:[%s12126_s5 + $0x2f0] sm:$0xff] }
 0x29a   :  { %12755 = vst [vmem:[#allocation196_spill] sm:$0xff] %v11158_v63  ;;  %12756 = vst [vmem:[#allocation197_spill] sm:$0xff] %v11163_v62  ;;  %v11183_v63 = vld [vmem:[%s12126_s5 + $0x310] sm:$0xff]  ;;  %v11188_v62 = vld [vmem:[%s12126_s5 + $0x318] sm:$0xff] }
 0x29b   :  { %12760 = vst [vmem:[#allocation201_spill] sm:$0xff] %v11183_v63  ;;  %12761 = vst [vmem:[#allocation202_spill] sm:$0xff] %v11188_v62  ;;  %v11208_v63 = vld [vmem:[%s12126_s5 + $0x338] sm:$0xff]  ;;  %v11213_v62 = vld [vmem:[%s12126_s5 + $0x340] sm:$0xff] }
 0x29c   :  { %12765 = vst [vmem:[#allocation206_spill] sm:$0xff] %v11208_v63  ;;  %12766 = vst [vmem:[#allocation207_spill] sm:$0xff] %v11213_v62  ;;  %v11233_v63 = vld [vmem:[%s12126_s5 + $0x360] sm:$0xff]  ;;  %v11238_v62 = vld [vmem:[%s12126_s5 + $0x368] sm:$0xff] }
 0x29d   :  { %12770 = vst [vmem:[#allocation211_spill] sm:$0xff] %v11233_v63  ;;  %12771 = vst [vmem:[#allocation212_spill] sm:$0xff] %v11238_v62  ;;  %v11258_v63 = vld [vmem:[%s12126_s5 + $0x388] sm:$0xff]  ;;  %v11263_v62 = vld [vmem:[%s12126_s5 + $0x390] sm:$0xff] }
 0x29e   :  { %12775 = vst [vmem:[#allocation216_spill] sm:$0xff] %v11258_v63  ;;  %12776 = vst [vmem:[#allocation217_spill] sm:$0xff] %v11263_v62  ;;  %v11283_v63 = vld [vmem:[%s12126_s5 + $0x3b0] sm:$0xff]  ;;  %v11288_v62 = vld [vmem:[%s12126_s5 + $0x3b8] sm:$0xff] }
 0x29f   :  { %12780 = vst [vmem:[#allocation221_spill] sm:$0xff] %v11283_v63  ;;  %12781 = vst [vmem:[#allocation222_spill] sm:$0xff] %v11288_v62  ;;  %v11308_v63 = vld [vmem:[%s12126_s5 + $0x3d8] sm:$0xff]  ;;  %v11313_v62 = vld [vmem:[%s12126_s5 + $0x3e0] sm:$0xff]  ;;  %s11358_s5 = smov 0  }
 0x2a0   :  { %12785 = vst [vmem:[#allocation226_spill] sm:$0xff] %v11308_v63  ;;  %12786 = vst [vmem:[#allocation227_spill] sm:$0xff] %v11313_v62  ;;  %v12790_v63 = vsub.s32 4, %v8378_v51  ;;  %v12791_v62 = vsub.s32 6, %v8378_v51 }
 0x2a2   :  { %v2521_v59 = vrot.slane %v10028_v52, %v12790_v63  ;;  %v2529_v20 = vrot.slane %v10028_v52, %v12791_v62 }
 0x2d8   :  { %v4071_v1 = vpop.f32.mrb[12].mxu0 }
 0x2d9   :  { %v8015_v27 = vadd.f32 %v4071_v1, %v2521_v59  ;;  %v4157_v11 = vpop.f32.mrb[12].mxu1  ;;  %v4073_v50 = vpop.f32.mrb[13].mxu0 }
 0x2da   :  { %v8019_v10 = vadd.f32 %v4157_v11, %v2529_v20  ;;  %v8016_v7 = vadd.f32 %v4073_v50, %v2525_v6  ;;  %v4159_v2 = vpop.f32.mrb[13].mxu1  ;;  %v4075_v63 = vpop.f32.mrb[14].mxu0 }
 0x2db   :  { %v8020_v17 = vadd.f32 %v4159_v2, %v2533_v49  ;;  %v8017_v16 = vadd.f32 %v4075_v63, %v2521_v59  ;;  %v4161_v14 = vpop.f32.mrb[14].mxu1  ;;  %v4077_v62 = vpop.f32.mrb[15].mxu0 }
 0x2dc   :  { %v4218_v8 = vcombine.low %v8015_v27, %v8016_v7  ;;  %v4219_v31 = vcombine.high %v8015_v27, %v8016_v7  ;;  %v8021_v28 = vadd.f32 %v4161_v14, %v2529_v20  ;;  %v8018_v46 = vadd.f32 %v4077_v62, %v2525_v6  ;;  %v4163_v21 = vpop.f32.mrb[15].mxu1 }
 0x2dd   :  { %v4220_v51 = vcombine.low %v8019_v10, %v8020_v17  ;;  %v4221_v41 = vcombine.high %v8019_v10, %v8020_v17  ;;  %v8022_v52 = vadd.f32 %v4163_v21, %v2533_v49  ;;  %v11356_v62 = vmov 0.0  }
 0x2de   :  { %v4228_v1 = vrot.slane %v4218_v8, %v9461_v13  ;;  %v4235_v5 = vrot.slane %v4219_v31, %v9461_v13  ;;  %v4290_v11 = vcombine.low %v8017_v16, %v8018_v46  ;;  %v4291_v50 = vcombine.high %v8017_v16, %v8018_v46 }
 0x2df   :  { %v4242_v42 = vrot.slane %v4220_v51, %v9461_v13  ;;  %v4249_v59 = vrot.slane %v4221_v41, %v9461_v13  ;;  %v4292_v2 = vcombine.low %v8021_v28, %v8022_v52  ;;  %v4293_v63 = vcombine.high %v8021_v28, %v8022_v52 }
 0x2e0   :  { %v4300_v27 = vrot.slane %v4290_v11, %v9461_v13  ;;  %v4307_v20 = vrot.slane %v4291_v50, %v9461_v13  ;;  %v11350_v28 = vmov 0.0   ;;  %v11352_v31 = vmov 0.0  }
 0x2e1   :  { %v4250_v6 = vcombine.low %v4228_v1, %v4242_v42  ;;  %v4251_v7 = vcombine.high %v4228_v1, %v4242_v42  ;;  %v4252_v10 = vcombine.low %v4235_v5, %v4249_v59  ;;  %v4253_v49 = vcombine.high %v4235_v5, %v4249_v59 }
 0x2e2   :  { %v4314_v8 = vrot.slane %v4292_v2, %v9461_v13  ;;  %v4321_v14 = vrot.slane %v4293_v63, %v9461_v13  ;;  %v11354_v42 = vmov 0.0  }
 0x2e3   :  { %4343 = vst [vmem:[#allocation3 + $0x8] sm:$0xff] %v4250_v6  ;;  %4345 = vst [vmem:[#allocation3 + $0x18] sm:$0xff] %v4251_v7 }
 0x2e4   :  { %4347 = vst [vmem:[#allocation3 + $0x28] sm:$0xff] %v4252_v10  ;;  %4349 = vst [vmem:[#allocation3 + $0x38] sm:$0xff] %v4253_v49  ;;  %v4322_v16 = vcombine.low %v4300_v27, %v4314_v8  ;;  %v4323_v41 = vcombine.high %v4300_v27, %v4314_v8  ;;  %v4324_v17 = vcombine.low %v4307_v20, %v4321_v14 }
 0x2e5   :  { %v4325_v21 = vcombine.high %v4307_v20, %v4321_v14 }
 0x2e6   :  { %4351 = vst [vmem:[#allocation3 + $0x48] sm:$0xff] %v4322_v16  ;;  %4353 = vst [vmem:[#allocation3 + $0x58] sm:$0xff] %v4323_v41 }
 0x2e7   :  { %4355 = vst [vmem:[#allocation3 + $0x68] sm:$0xff] %v4324_v17  ;;  %4357 = vst [vmem:[#allocation3 + $0x78] sm:$0xff] %v4325_v21 }
 0x2e8 LB: > { %v12794_v15 = vld [vmem:[#allocation29_spill] sm:$0xff]  ;;  %v12795_v12 = vld [vmem:[#allocation26_spill] sm:$0xff]  ;;  %v12796_v9 = vld [vmem:[#allocation23_spill] sm:$0xff]  ;;  %v7601_v46 = vcombine.high %v10053_v44, %v10073_v23  ;;  %v7603_v51 = vcombine.high %v10058_v45, %v10078_v48  ;;  %v7600_v52 = vcombine.low %v10053_v44, %v10073_v23  ;;  %v7602_v1 = vcombine.low %v10058_v45, %v10078_v48  ;;  %s7914_s27 = sshll.u32 %s8229_s5, 4  ;;  %s7916_s0 = sshll.u32 %s8229_s5, 2  ;;  %v8213_v28 = vphi %v11350_v28, %v6406_v28   ;;  %s8229_s5 = sphi %s11358_s5, %s4619_s5   ;;  %v8225_v62 = vphi %v11356_v62, %v11934_v62   ;;  %v8221_v42 = vphi %v11354_v42, %v11930_v42   ;;  %v8217_v31 = vphi %v11352_v31, %v6408_v31  }
 0x2e9   : > { %v12797_v4 = vld [vmem:[#allocation18_spill] sm:$0xff]  ;;  %v12798_v3 = vld [vmem:[#allocation17_spill] sm:$0xff]  ;;  %v7609_v5 = vcombine.high %v10093_v55, %v10113_v60  ;;  %v7611_v11 = vcombine.high %v10098_v58, %v10118_v61  ;;  %v7608_v50 = vcombine.low %v10093_v55, %v10113_v60  ;;  %v7610_v59 = vcombine.low %v10098_v58, %v10118_v61  ;;  %s4627_s28 = scalar_lea.vmem [#allocation2], %s7914_s27  ;;  %s6411_s4 = scalar_lea.vmem [#allocation4], %s7916_s0 }
 0x2ea   : > { %v12799_v0 = vld [vmem:[#allocation14_spill] sm:$0xff]  ;;  %5283 = vmatprep.subr.bf16.mxu0 %v7601_v46  ;;  %5324 = vmatprep.subr.bf16.mxu1 %v7603_v51  ;;  %v7617_v2 = vcombine.high %v10133_v57, %v12798_v3  ;;  %v7616_v27 = vcombine.low %v10133_v57, %v12798_v3  ;;  %v7625_v6 = vcombine.high %v10173_v47, %v10193_v53  ;;  %s4624_s29 = ssub.s32 7, %s8229_s5  ;;  %s4619_s5 = sadd.s32 1, %s8229_s5  }
 0x2eb   : > { %5284 = vmatpush1.bf16.msra.mxu0 %v7600_v52  ;;  %5325 = vmatpush1.bf16.msra.mxu1 %v7602_v1  ;;  %v7619_v63 = vcombine.high %v12799_v0, %v12797_v4  ;;  %v7618_v20 = vcombine.low %v12799_v0, %v12797_v4  ;;  %v7627_v7 = vcombine.high %v10178_v32, %v12796_v9  ;;  %v12817_v4 = vld [vmem:[#allocation83_spill] sm:$0xff]  ;;  %s7915_s6 = sshll.u32 %s4624_s29, 4  ;;  %s7917_s13 = sshll.u32 %s4624_s29, 2 }
 0x2ec   : > { %5285 = vmatprep.subr.bf16.mxu0 %v7609_v5  ;;  %5326 = vmatprep.subr.bf16.mxu1 %v7611_v11  ;;  %v7624_v10 = vcombine.low %v10173_v47, %v10193_v53  ;;  %v7626_v49 = vcombine.low %v10178_v32, %v12796_v9  ;;  %v7633_v8 = vcombine.high %v10213_v54, %v10233_v56  ;;  %s5495_s30 = scalar_lea.vmem [#allocation3], %s7915_s6  ;;  %s6415_s3 = scalar_lea.vmem [#allocation5], %s7917_s13 }
 0x2ed   : > { %v7635_v14 = vcombine.high %v12795_v12, %v12794_v15  ;;  %v7632_v16 = vcombine.low %v10213_v54, %v10233_v56  ;;  %v7634_v41 = vcombine.low %v12795_v12, %v12794_v15  ;;  %v7641_v17 = vcombine.high %v10253_v18, %v10273_v25  ;;  %p4616_p0 = scmp.ge.s32.totalorder %s4619_s5, 8  }
 0x2ee   : > { %v7643_v21 = vcombine.high %v10258_v19, %v10278_v26  ;;  %v11418_v46 = vrot.slane %v8225_v62, %v9461_v13  ;;  %v7640_v51 = vcombine.low %v10253_v18, %v10273_v25  ;;  %v7642_v52 = vcombine.low %v10258_v19, %v10278_v26  ;;  %v8135_v44 = vld [vmem:[%s12116_s8 + $0x50] sm:$0xff] (%p4616_p0)   ;;  %v8139_v55 = vld [vmem:[%s12116_s8 + $0x58] sm:$0xff] (%p4616_p0)   ;;  %v8143_v57 = vld [vmem:[%s12116_s8 + $0x60] sm:$0xff] (%p4616_p0)  }
 0x2ef   : > { %5286 = vmatpush1.bf16.msra.mxu0 %v7608_v50  ;;  %5327 = vmatpush1.bf16.msra.mxu1 %v7610_v59  ;;  %v7649_v1 = vcombine.high %v10293_v34, %v10313_v38  ;;  %v7651_v5 = vcombine.high %v10298_v35, %v10318_v39  ;;  %v7648_v50 = vcombine.low %v10293_v34, %v10313_v38  ;;  %v8136_v45 = vld [vmem:[%s12115_s7 + $0x50] sm:$0xff] (%p4616_p0)   ;;  %v8140_v58 = vld [vmem:[%s12115_s7 + $0x58] sm:$0xff] (%p4616_p0)   ;;  %v8144_v47 = vld [vmem:[%s12115_s7 + $0x60] sm:$0xff] (%p4616_p0)   ;;  %vm8234_vm0 = vmmov (%p4616_p0), 0  }
 0x2f0   : > { %5287 = vmatprep.subr.bf16.mxu0 %v7617_v2  ;;  %5328 = vmatprep.subr.bf16.mxu1 %v7619_v63  ;;  %v4638_v62 = vcombine.high %v11418_v46, %v11418_v46  ;;  %v7650_v59 = vcombine.low %v10298_v35, %v10318_v39  ;;  %v7657_v2 = vcombine.high %v10333_v43, %v10353_v24  ;;  %v8137_v23 = vld [vmem:[%s12116_s8 + $0x10] sm:$0xff] (%p4616_p0)   ;;  %v8141_v60 = vld [vmem:[%s12116_s8 + $0x18] sm:$0xff] (%p4616_p0)   ;;  %v8145_v32 = vld [vmem:[%s12116_s8 + $0x20] sm:$0xff] (%p4616_p0)   ;;  %v8233_v39 = vmov (%p4616_p0), 0.0  }
 0x2f1   : > { %v7659_v63 = vcombine.high %v10338_v33, %v10358_v37  ;;  %v11644_v15 = vrot.slane %v8217_v31, %v9461_v13  ;;  %v8138_v48 = vld [vmem:[%s12115_s7 + $0x10] sm:$0xff] (%p4616_p0)   ;;  %v8142_v61 = vld [vmem:[%s12115_s7 + $0x18] sm:$0xff] (%p4616_p0)   ;;  %v8146_v53 = vld [vmem:[%s12115_s7 + $0x20] sm:$0xff] (%p4616_p0)  }
 0x2f2   : > { %v11430_v11 = vpack.c.bf16 %v4638_v62, %v4638_v62  ;;  %v12805_v62 = vld [vmem:[#allocation60_spill] sm:$0xff]  ;;  %v8147_v54 = vld [vmem:[%s12116_s8 + $0x68] sm:$0xff] (%p4616_p0)   ;;  %v8155_v35 = vld [vmem:[%s12116_s8 + $0x78] sm:$0xff] (%p4616_p0)  }
 0x2f3   : > { %5288 = vmatpush1.bf16.msra.mxu0 %v7616_v27  ;;  %5329 = vmatpush1.bf16.msra.mxu1 %v7618_v20  ;;  %v7656_v27 = vcombine.low %v10333_v43, %v10353_v24  ;;  %v7658_v20 = vcombine.low %v10338_v33, %v10358_v37  ;;  %v5506_v31 = vcombine.high %v11644_v15, %v11644_v15  ;;  %v8131_v24 = vld [vmem:[%s12116_s8 + $0x48] sm:$0xff] (%p4616_p0)   ;;  %v8152_v25 = vld [vmem:[%s12115_s7 + $0x70] sm:$0xff] (%p4616_p0)   ;;  %v8157_v37 = vld [vmem:[%s12116_s8 + $0x38] sm:$0xff] (%p4616_p0)  }
 0x2f4   : > { %5289 = vmatprep.subr.bf16.mxu0 %v7625_v6  ;;  %5330 = vmatprep.subr.bf16.mxu1 %v7627_v7  ;;  %v7665_v6 = vcombine.high %v10373_v29, %v10393_v30  ;;  %v7667_v7 = vcombine.high %v10378_v36, %v10398_v22  ;;  %v8134_v33 = vld [vmem:[%s12115_s7 + $0x8] sm:$0xff] (%p4616_p0)   ;;  %v8153_v26 = vld [vmem:[%s12116_s8 + $0x30] sm:$0xff] (%p4616_p0)   ;;  %v8158_v38 = vld [vmem:[%s12115_s7 + $0x38] sm:$0xff] (%p4616_p0)  }
 0x2f5   : > { %5315 = vmatprep.mubr.bf16.mxu0 %v11430_v11  ;;  %5356 = vmatprep.mubr.bf16.mxu1 %v11430_v11  ;;  %v8148_v56 = vld [vmem:[%s12115_s7 + $0x68] sm:$0xff] (%p4616_p0)   ;;  %v8154_v34 = vld [vmem:[%s12115_s7 + $0x30] sm:$0xff] (%p4616_p0)  }
 0x2f6   :  { %v8149_v18 = vld [vmem:[%s12116_s8 + $0x28] sm:$0xff] (%p4616_p0)  }
 0x2f7   : > { %5290 = vmatpush1.bf16.msra.mxu0 %v7624_v10  ;;  %5331 = vmatpush1.bf16.msra.mxu1 %v7626_v49  ;;  %v7664_v10 = vcombine.low %v10373_v29, %v10393_v30  ;;  %v7666_v49 = vcombine.low %v10378_v36, %v10398_v22  ;;  %v8132_v29 = vld [vmem:[%s12115_s7 + $0x48] sm:$0xff] (%p4616_p0)   ;;  %v8151_v22 = vld [vmem:[%s12116_s8 + $0x70] sm:$0xff] (%p4616_p0)   ;;  %v8156_v36 = vld [vmem:[%s12115_s7 + $0x78] sm:$0xff] (%p4616_p0)  }
 0x2f8   : > { %5291 = vmatprep.subr.bf16.mxu0 %v7633_v8  ;;  %5332 = vmatprep.subr.bf16.mxu1 %v7635_v14  ;;  %v12800_v8 = vld [vmem:[#allocation48_spill] sm:$0xff]  ;;  %v8133_v30 = vld [vmem:[%s12116_s8 + $0x8] sm:$0xff] (%p4616_p0)  }
 0x2f9   : > { %v7673_v14 = vcombine.high %v12800_v8, %v10433_v40  ;;  %v8150_v19 = vld [vmem:[%s12115_s7 + $0x28] sm:$0xff] (%p4616_p0)  }
 0x2fb   : > { %5292 = vmatpush1.bf16.msra.mxu0 %v7632_v16  ;;  %5333 = vmatpush1.bf16.msra.mxu1 %v7634_v41  ;;  %v12801_v16 = vld [vmem:[#allocation52_spill] sm:$0xff]  ;;  %v12802_v41 = vld [vmem:[#allocation49_spill] sm:$0xff] }
 0x2fc   : > { %5293 = vmatprep.subr.bf16.mxu0 %v7641_v17  ;;  %5334 = vmatprep.subr.bf16.mxu1 %v7643_v21  ;;  %v7675_v17 = vcombine.high %v12802_v41, %v12801_v16  ;;  %v7672_v21 = vcombine.low %v12800_v8, %v10433_v40  ;;  %v12820_v8 = vld [vmem:[#allocation80_spill] sm:$0xff] }
 0x2ff   : > { %5294 = vmatpush1.bf16.msra.mxu0 %v7640_v51  ;;  %5335 = vmatpush1.bf16.msra.mxu1 %v7642_v52  ;;  %v7674_v51 = vcombine.low %v12802_v41, %v12801_v16  ;;  %v12803_v52 = vld [vmem:[#allocation59_spill] sm:$0xff] }
 0x300   : > { %5295 = vmatprep.subr.bf16.mxu0 %v7649_v1  ;;  %5336 = vmatprep.subr.bf16.mxu1 %v7651_v5  ;;  %v12804_v1 = vld [vmem:[#allocation55_spill] sm:$0xff] }
 0x301   : > { %v7681_v5 = vcombine.high %v12804_v1, %v12803_v52 }
 0x303   : > { %5296 = vmatpush1.bf16.msra.mxu0 %v7648_v50  ;;  %5337 = vmatpush1.bf16.msra.mxu1 %v7650_v59  ;;  %v12806_v50 = vmov %v12805_v62  ;;  %v12807_v59 = vld [vmem:[#allocation56_spill] sm:$0xff] }
 0x304   : > { %5297 = vmatprep.subr.bf16.mxu0 %v7657_v2  ;;  %5338 = vmatprep.subr.bf16.mxu1 %v7659_v63  ;;  %v7683_v2 = vcombine.high %v12807_v59, %v12805_v62  ;;  %v7680_v63 = vcombine.low %v12804_v1, %v12803_v52  ;;  %v12813_v62 = vld [vmem:[#allocation71_spill] sm:$0xff]  ;;  %v12816_v1 = vld [vmem:[#allocation72_spill] sm:$0xff] }
 0x305   : > { %v12814_v0 = vmov %v12813_v62 }
 0x307   : > { %5298 = vmatpush1.bf16.msra.mxu0 %v7656_v27  ;;  %5339 = vmatpush1.bf16.msra.mxu1 %v7658_v20  ;;  %v7682_v27 = vcombine.low %v12807_v59, %v12806_v50  ;;  %v12808_v20 = vld [vmem:[#allocation67_spill] sm:$0xff] }
 0x308   : > { %5299 = vmatprep.subr.bf16.mxu0 %v7665_v6  ;;  %5340 = vmatprep.subr.bf16.mxu1 %v7667_v7  ;;  %v12809_v6 = vld [vmem:[#allocation63_spill] sm:$0xff] }
 0x309   : > { %v7689_v7 = vcombine.high %v12809_v6, %v12808_v20 }
 0x30b   : > { %5300 = vmatpush1.bf16.msra.mxu0 %v7664_v10  ;;  %5341 = vmatpush1.bf16.msra.mxu1 %v7666_v49  ;;  %v12810_v10 = vld [vmem:[#allocation68_spill] sm:$0xff] }
 0x30c   : > { %5301 = vmatprep.subr.bf16.mxu0 %v7673_v14  ;;  %5342 = vmatprep.subr.bf16.mxu1 %v7675_v17  ;;  %v12811_v49 = vld [vmem:[#allocation64_spill] sm:$0xff]  ;;  %v7688_v17 = vcombine.low %v12809_v6, %v12808_v20  ;;  %v12818_v6 = vld [vmem:[#allocation79_spill] sm:$0xff] }
 0x30d   : > { %v7691_v14 = vcombine.high %v12811_v49, %v12810_v10 }
 0x30f   : > { %5302 = vmatpush1.bf16.msra.mxu0 %v7672_v21  ;;  %5343 = vmatpush1.bf16.msra.mxu1 %v7674_v51  ;;  %v7690_v21 = vcombine.low %v12811_v49, %v12810_v10  ;;  %v12812_v51 = vld [vmem:[#allocation75_spill] sm:$0xff] }
 0x310   : > { %5303 = vmatprep.subr.bf16.mxu0 %v7681_v5  ;;  %5344 = vmatprep.subr.bf16.mxu1 %v7683_v2  ;;  %v7697_v5 = vcombine.high %v12813_v62, %v12812_v51  ;;  %v12815_v2 = vld [vmem:[#allocation76_spill] sm:$0xff]  ;;  %v12821_v62 = vld [vmem:[#allocation91_spill] sm:$0xff] }
 0x311   : > { %v7699_v3 = vcombine.high %v12816_v1, %v12815_v2 }
 0x313   : > { %5304 = vmatpush1.bf16.msra.mxu0 %v7680_v63  ;;  %5345 = vmatpush1.bf16.msra.mxu1 %v7682_v27  ;;  %v7696_v63 = vcombine.low %v12814_v0, %v12812_v51  ;;  %v7698_v27 = vcombine.low %v12816_v1, %v12815_v2  ;;  %v12822_v0 = vmov %v12821_v62  ;;  %v12823_v1 = vld [vmem:[#allocation87_spill] sm:$0xff]  ;;  %v12825_v2 = vld [vmem:[#allocation88_spill] sm:$0xff] }
 0x314   : > { %5305 = vmatprep.subr.bf16.mxu0 %v7689_v7  ;;  %5346 = vmatprep.subr.bf16.mxu1 %v7691_v14  ;;  %v7705_v7 = vcombine.high %v12818_v6, %v12817_v4  ;;  %v12819_v14 = vld [vmem:[#allocation84_spill] sm:$0xff] }
 0x315   : > { %v7707_v9 = vcombine.high %v12820_v8, %v12819_v14 }
 0x317   : > { %5306 = vmatpush1.bf16.msra.mxu0 %v7688_v17  ;;  %5347 = vmatpush1.bf16.msra.mxu1 %v7690_v21  ;;  %v7704_v17 = vcombine.low %v12818_v6, %v12817_v4  ;;  %v7706_v21 = vcombine.low %v12820_v8, %v12819_v14  ;;  %v12826_v4 = vld [vmem:[#allocation99_spill] sm:$0xff]  ;;  %v12829_v8 = vld [vmem:[#allocation96_spill] sm:$0xff]  ;;  %v11516_v14 = vpack.c.bf16 %v11418_v46, %v11418_v46 }
 0x318   : > { %5307 = vmatprep.subr.bf16.mxu0 %v7697_v5  ;;  %5348 = vmatprep.subr.bf16.mxu1 %v7699_v3  ;;  %v7713_v5 = vcombine.high %v12823_v1, %v12821_v62  ;;  %v12824_v3 = vld [vmem:[#allocation92_spill] sm:$0xff]  ;;  %v12827_v6 = vld [vmem:[#allocation95_spill] sm:$0xff] }
 0x319   : > { %v7715_v10 = vcombine.high %v12825_v2, %v12824_v3  ;;  %v12830_v62 = vld [vmem:[#allocation8_spill] sm:$0xff] }
 0x31b   : > { %5308 = vmatpush1.bf16.msra.mxu0 %v7696_v63  ;;  %5349 = vmatpush1.bf16.msra.mxu1 %v7698_v27  ;;  %v7712_v63 = vcombine.low %v12823_v1, %v12822_v0  ;;  %v7714_v27 = vcombine.low %v12825_v2, %v12824_v3  ;;  %v12831_v0 = vmov %v12830_v62  ;;  %v12832_v1 = vld [vmem:[#allocation6_spill] sm:$0xff]  ;;  %v12834_v2 = vld [vmem:[#allocation7_spill] sm:$0xff] }
 0x31c   : > { %5309 = vmatprep.subr.bf16.mxu0 %v7705_v7  ;;  %5350 = vmatprep.subr.bf16.mxu1 %v7707_v9  ;;  %v7721_v7 = vcombine.high %v12827_v6, %v12826_v4  ;;  %v12828_v9 = vld [vmem:[#allocation100_spill] sm:$0xff] }
 0x31d   : > { %v7723_v12 = vcombine.high %v12829_v8, %v12828_v9 }
 0x31f   : > { %5310 = vmatpush1.bf16.msra.mxu0 %v7704_v17  ;;  %5351 = vmatpush1.bf16.msra.mxu1 %v7706_v21  ;;  %v7720_v17 = vcombine.low %v12827_v6, %v12826_v4  ;;  %v7722_v21 = vcombine.low %v12829_v8, %v12828_v9  ;;  %v12837_v4 = vld [vmem:[#allocation13_spill] sm:$0xff]  ;;  %v12838_v6 = vld [vmem:[#allocation11_spill] sm:$0xff]  ;;  %v12847_v9 = vld [vmem:[#allocation22_spill] sm:$0xff] }
 0x320   : > { %5311 = vmatprep.subr.bf16.mxu0 %v7713_v5  ;;  %5352 = vmatprep.subr.bf16.mxu1 %v7715_v10  ;;  %v7605_v5 = vcombine.high %v12832_v1, %v12830_v62  ;;  %v12833_v10 = vld [vmem:[#allocation9_spill] sm:$0xff]  ;;  %v7615_v8 = vcombine.high %v12838_v6, %v12837_v4 }
 0x321   : > { %v7607_v3 = vcombine.high %v12834_v2, %v12833_v10 }
 0x323   : > { %5312 = vmatpush1.bf16.msra.mxu0 %v7712_v63  ;;  %5353 = vmatpush1.bf16.msra.mxu1 %v7714_v27  ;;  %v7604_v63 = vcombine.low %v12832_v1, %v12831_v0  ;;  %v7606_v27 = vcombine.low %v12834_v2, %v12833_v10  ;;  %v12841_v0 = vld [vmem:[#allocation20_spill] sm:$0xff] }
 0x324   : > { %5313 = vmatprep.subr.bf16.mxu0 %v7721_v7  ;;  %5354 = vmatprep.subr.bf16.mxu1 %v7723_v12  ;;  %v12835_v12 = vld [vmem:[#allocation12_spill] sm:$0xff]  ;;  %v12836_v7 = vld [vmem:[#allocation10_spill] sm:$0xff] }
 0x325   : > { %v7613_v62 = vcombine.high %v12836_v7, %v12835_v12  ;;  %v7612_v46 = vcombine.low %v12836_v7, %v12835_v12  ;;  %v12842_v1 = vld [vmem:[#allocation16_spill] sm:$0xff]  ;;  %v12846_v7 = vld [vmem:[#allocation25_spill] sm:$0xff] }
 0x326   : > { %v7623_v2 = vcombine.high %v12842_v1, %v12841_v0  ;;  %v7631_v10 = vcombine.high %v12847_v9, %v12846_v7 }
 0x327   : > { %5314 = vmatpush1.bf16.msra.mxu0 %v7720_v17  ;;  %5355 = vmatpush1.bf16.msra.mxu1 %v7722_v21  ;;  %v7614_v17 = vcombine.low %v12838_v6, %v12837_v4  ;;  %v12840_v21 = vld [vmem:[#allocation15_spill] sm:$0xff] }
 0x328   : > { %5365 = vmatprep.subr.bf16.mxu0 %v7605_v5  ;;  %5406 = vmatprep.subr.bf16.mxu1 %v7607_v3  ;;  %v12839_v3 = vld [vmem:[#allocation19_spill] sm:$0xff] }
 0x329   : > { %v7621_v5 = vcombine.high %v12840_v21, %v12839_v3 }
 0x32a   : > { %5316 = vmatmul.mubr.bf16.vlgmr.msra.gmra.mrb[0].mxu0 %v11516_v14  ;;  %5357 = vmatmul.mubr.bf16.vlgmr.msra.gmra.mrb[0].mxu1 %v11516_v14 }
 0x32b   : > { %5366 = vmatpush1.bf16.msra.mxu0 %v7604_v63  ;;  %5407 = vmatpush1.bf16.msra.mxu1 %v7606_v27  ;;  %v7620_v63 = vcombine.low %v12840_v21, %v12839_v3  ;;  %v7622_v27 = vcombine.low %v12842_v1, %v12841_v0  ;;  %v12849_v0 = vld [vmem:[#allocation27_spill] sm:$0xff]  ;;  %v12851_v1 = vld [vmem:[#allocation28_spill] sm:$0xff] }
 0x32c   : > { %5367 = vmatprep.subr.bf16.mxu0 %v7613_v62  ;;  %5408 = vmatprep.subr.bf16.mxu1 %v7615_v8  ;;  %v12843_v8 = vld [vmem:[#allocation24_spill] sm:$0xff]  ;;  %v12844_v62 = vld [vmem:[#allocation21_spill] sm:$0xff] }
 0x32d   : > { %5397 = vmatprep.mubr.bf16.mxu0 %v11430_v11  ;;  %5438 = vmatprep.mubr.bf16.mxu1 %v11430_v11  ;;  %v12845_v4 = vmov %v12844_v62  ;;  %v7629_v6 = vcombine.high %v12844_v62, %v12843_v8  ;;  %v12852_v62 = vld [vmem:[#allocation34_spill] sm:$0xff] }
 0x32e   : > { %v7628_v11 = vcombine.low %v12845_v4, %v12843_v8  ;;  %v12853_v4 = vmov %v12852_v62  ;;  %v12856_v8 = vld [vmem:[#allocation33_spill] sm:$0xff] }
 0x32f   : > { %5368 = vmatpush1.bf16.msra.mxu0 %v7612_v46  ;;  %5409 = vmatpush1.bf16.msra.mxu1 %v7614_v17  ;;  %v7630_v46 = vcombine.low %v12847_v9, %v12846_v7  ;;  %v12848_v17 = vld [vmem:[#allocation30_spill] sm:$0xff]  ;;  %v12854_v7 = vld [vmem:[#allocation32_spill] sm:$0xff] }
 0x330   : > { %5369 = vmatprep.subr.bf16.mxu0 %v7621_v5  ;;  %5410 = vmatprep.subr.bf16.mxu1 %v7623_v2  ;;  %v7637_v5 = vcombine.high %v12849_v0, %v12848_v17  ;;  %v12850_v2 = vld [vmem:[#allocation31_spill] sm:$0xff] }
 0x331   : > { %v7639_v3 = vcombine.high %v12851_v1, %v12850_v2 }
 0x333   : > { %5370 = vmatpush1.bf16.msra.mxu0 %v7620_v63  ;;  %5411 = vmatpush1.bf16.msra.mxu1 %v7622_v27  ;;  %v7636_v63 = vcombine.low %v12849_v0, %v12848_v17  ;;  %v7638_v27 = vcombine.low %v12851_v1, %v12850_v2  ;;  %v12857_v0 = vld [vmem:[#allocation38_spill] sm:$0xff]  ;;  %v12858_v1 = vld [vmem:[#allocation36_spill] sm:$0xff]  ;;  %v12860_v2 = vld [vmem:[#allocation37_spill] sm:$0xff] }
 0x334   : > { %5371 = vmatprep.subr.bf16.mxu0 %v7629_v6  ;;  %5412 = vmatprep.subr.bf16.mxu1 %v7631_v10  ;;  %v7645_v6 = vcombine.high %v12854_v7, %v12852_v62  ;;  %v12855_v10 = vld [vmem:[#allocation35_spill] sm:$0xff]  ;;  %v12861_v62 = vld [vmem:[#allocation42_spill] sm:$0xff] }
 0x335   : > { %v7647_v9 = vcombine.high %v12856_v8, %v12855_v10 }
 0x337   : > { %5372 = vmatpush1.bf16.msra.mxu0 %v7628_v11  ;;  %5413 = vmatpush1.bf16.msra.mxu1 %v7630_v46  ;;  %v7644_v11 = vcombine.low %v12854_v7, %v12853_v4  ;;  %v7646_v46 = vcombine.low %v12856_v8, %v12855_v10  ;;  %v12862_v4 = vmov %v12861_v62  ;;  %v12863_v7 = vld [vmem:[#allocation40_spill] sm:$0xff]  ;;  %v12865_v8 = vld [vmem:[#allocation41_spill] sm:$0xff] }
 0x338   : > { %5373 = vmatprep.subr.bf16.mxu0 %v7637_v5  ;;  %5414 = vmatprep.subr.bf16.mxu1 %v7639_v3  ;;  %v7653_v5 = vcombine.high %v12858_v1, %v12857_v0  ;;  %v12859_v3 = vld [vmem:[#allocation39_spill] sm:$0xff] }
 0x339   : > { %v7655_v12 = vcombine.high %v12860_v2, %v12859_v3 }
 0x33b   : > { %5374 = vmatpush1.bf16.msra.mxu0 %v7636_v63  ;;  %5415 = vmatpush1.bf16.msra.mxu1 %v7638_v27  ;;  %v7652_v63 = vcombine.low %v12858_v1, %v12857_v0  ;;  %v7654_v27 = vcombine.low %v12860_v2, %v12859_v3  ;;  %v12866_v0 = vld [vmem:[#allocation46_spill] sm:$0xff]  ;;  %v12867_v1 = vld [vmem:[#allocation44_spill] sm:$0xff]  ;;  %v12869_v2 = vld [vmem:[#allocation45_spill] sm:$0xff] }
 0x33c   : > { %5375 = vmatprep.subr.bf16.mxu0 %v7645_v6  ;;  %5416 = vmatprep.subr.bf16.mxu1 %v7647_v9  ;;  %v7661_v6 = vcombine.high %v12863_v7, %v12861_v62  ;;  %v12864_v9 = vld [vmem:[#allocation43_spill] sm:$0xff]  ;;  %v12870_v62 = vld [vmem:[#allocation53_spill] sm:$0xff] }
 0x33d   : > { %v7663_v10 = vcombine.high %v12865_v8, %v12864_v9 }
 0x33f   : > { %5376 = vmatpush1.bf16.msra.mxu0 %v7644_v11  ;;  %5417 = vmatpush1.bf16.msra.mxu1 %v7646_v46  ;;  %v7660_v11 = vcombine.low %v12863_v7, %v12862_v4  ;;  %v7662_v46 = vcombine.low %v12865_v8, %v12864_v9  ;;  %v12871_v4 = vmov %v12870_v62  ;;  %v12872_v7 = vld [vmem:[#allocation50_spill] sm:$0xff]  ;;  %v12874_v8 = vld [vmem:[#allocation51_spill] sm:$0xff] }
 0x340   : > { %5377 = vmatprep.subr.bf16.mxu0 %v7653_v5  ;;  %5418 = vmatprep.subr.bf16.mxu1 %v7655_v12  ;;  %v7669_v5 = vcombine.high %v12867_v1, %v12866_v0  ;;  %v12868_v12 = vld [vmem:[#allocation47_spill] sm:$0xff] }
 0x341   : > { %v7671_v3 = vcombine.high %v12869_v2, %v12868_v12 }
 0x343   : > { %5378 = vmatpush1.bf16.msra.mxu0 %v7652_v63  ;;  %5419 = vmatpush1.bf16.msra.mxu1 %v7654_v27  ;;  %v7668_v63 = vcombine.low %v12867_v1, %v12866_v0  ;;  %v7670_v27 = vcombine.low %v12869_v2, %v12868_v12  ;;  %v12875_v0 = vld [vmem:[#allocation61_spill] sm:$0xff]  ;;  %v12878_v2 = vld [vmem:[#allocation58_spill] sm:$0xff] }
 0x344   : > { %5379 = vmatprep.subr.bf16.mxu0 %v7661_v6  ;;  %5420 = vmatprep.subr.bf16.mxu1 %v7663_v10  ;;  %v7677_v6 = vcombine.high %v12872_v7, %v12870_v62  ;;  %v12873_v10 = vld [vmem:[#allocation54_spill] sm:$0xff]  ;;  %v12876_v1 = vld [vmem:[#allocation57_spill] sm:$0xff] }
 0x345   : > { %v7679_v9 = vcombine.high %v12874_v8, %v12873_v10  ;;  %v12879_v62 = vld [vmem:[#allocation69_spill] sm:$0xff] }
 0x347   : > { %5380 = vmatpush1.bf16.msra.mxu0 %v7660_v11  ;;  %5421 = vmatpush1.bf16.msra.mxu1 %v7662_v46  ;;  %v7676_v11 = vcombine.low %v12872_v7, %v12871_v4  ;;  %v7678_v46 = vcombine.low %v12874_v8, %v12873_v10  ;;  %v12880_v4 = vmov %v12879_v62  ;;  %v12881_v7 = vld [vmem:[#allocation65_spill] sm:$0xff]  ;;  %v12883_v8 = vld [vmem:[#allocation66_spill] sm:$0xff] }
 0x348   : > { %5381 = vmatprep.subr.bf16.mxu0 %v7669_v5  ;;  %5422 = vmatprep.subr.bf16.mxu1 %v7671_v3  ;;  %v7685_v5 = vcombine.high %v12876_v1, %v12875_v0  ;;  %v12877_v3 = vld [vmem:[#allocation62_spill] sm:$0xff] }
 0x349   : > { %v7687_v12 = vcombine.high %v12878_v2, %v12877_v3 }
 0x34b   : > { %5382 = vmatpush1.bf16.msra.mxu0 %v7668_v63  ;;  %5423 = vmatpush1.bf16.msra.mxu1 %v7670_v27  ;;  %v7684_v63 = vcombine.low %v12876_v1, %v12875_v0  ;;  %v7686_v27 = vcombine.low %v12878_v2, %v12877_v3  ;;  %v12884_v0 = vld [vmem:[#allocation77_spill] sm:$0xff]  ;;  %v12887_v2 = vld [vmem:[#allocation74_spill] sm:$0xff] }
 0x34c   : > { %5383 = vmatprep.subr.bf16.mxu0 %v7677_v6  ;;  %5424 = vmatprep.subr.bf16.mxu1 %v7679_v9  ;;  %v7693_v6 = vcombine.high %v12881_v7, %v12879_v62  ;;  %v12882_v9 = vld [vmem:[#allocation70_spill] sm:$0xff]  ;;  %v12885_v1 = vld [vmem:[#allocation73_spill] sm:$0xff] }
 0x34d   : > { %v7695_v10 = vcombine.high %v12883_v8, %v12882_v9  ;;  %v12888_v62 = vld [vmem:[#allocation85_spill] sm:$0xff] }
 0x34f   : > { %5384 = vmatpush1.bf16.msra.mxu0 %v7676_v11  ;;  %5425 = vmatpush1.bf16.msra.mxu1 %v7678_v46  ;;  %v7692_v11 = vcombine.low %v12881_v7, %v12880_v4  ;;  %v7694_v46 = vcombine.low %v12883_v8, %v12882_v9  ;;  %v12889_v4 = vmov %v12888_v62  ;;  %v12890_v7 = vld [vmem:[#allocation81_spill] sm:$0xff]  ;;  %v12892_v8 = vld [vmem:[#allocation82_spill] sm:$0xff] }
 0x350   : > { %5385 = vmatprep.subr.bf16.mxu0 %v7685_v5  ;;  %5426 = vmatprep.subr.bf16.mxu1 %v7687_v12  ;;  %v7701_v5 = vcombine.high %v12885_v1, %v12884_v0  ;;  %v12886_v12 = vld [vmem:[#allocation78_spill] sm:$0xff] }
 0x351   : > { %v7703_v3 = vcombine.high %v12887_v2, %v12886_v12 }
 0x353   : > { %5386 = vmatpush1.bf16.msra.mxu0 %v7684_v63  ;;  %5427 = vmatpush1.bf16.msra.mxu1 %v7686_v27  ;;  %v7700_v63 = vcombine.low %v12885_v1, %v12884_v0  ;;  %v7702_v27 = vcombine.low %v12887_v2, %v12886_v12  ;;  %v12893_v0 = vld [vmem:[#allocation93_spill] sm:$0xff]  ;;  %v12896_v2 = vld [vmem:[#allocation90_spill] sm:$0xff] }
 0x354   : > { %5387 = vmatprep.subr.bf16.mxu0 %v7693_v6  ;;  %5428 = vmatprep.subr.bf16.mxu1 %v7695_v10  ;;  %v7709_v6 = vcombine.high %v12890_v7, %v12888_v62  ;;  %v12891_v10 = vld [vmem:[#allocation86_spill] sm:$0xff]  ;;  %v12894_v1 = vld [vmem:[#allocation89_spill] sm:$0xff] }
 0x355   : > { %v7711_v9 = vcombine.high %v12892_v8, %v12891_v10  ;;  %v12897_v62 = vld [vmem:[#allocation101_spill] sm:$0xff] }
 0x357   : > { %5388 = vmatpush1.bf16.msra.mxu0 %v7692_v11  ;;  %5429 = vmatpush1.bf16.msra.mxu1 %v7694_v46  ;;  %v7708_v11 = vcombine.low %v12890_v7, %v12889_v4  ;;  %v7710_v46 = vcombine.low %v12892_v8, %v12891_v10  ;;  %v12898_v4 = vmov %v12897_v62  ;;  %v12899_v7 = vld [vmem:[#allocation97_spill] sm:$0xff]  ;;  %v12901_v8 = vld [vmem:[#allocation98_spill] sm:$0xff] }
 0x358   : > { %5389 = vmatprep.subr.bf16.mxu0 %v7701_v5  ;;  %5430 = vmatprep.subr.bf16.mxu1 %v7703_v3  ;;  %v7717_v5 = vcombine.high %v12894_v1, %v12893_v0  ;;  %v12895_v3 = vld [vmem:[#allocation94_spill] sm:$0xff] }
 0x359   : > { %v7719_v12 = vcombine.high %v12896_v2, %v12895_v3 }
 0x35b   : > { %5390 = vmatpush1.bf16.msra.mxu0 %v7700_v63  ;;  %5431 = vmatpush1.bf16.msra.mxu1 %v7702_v27  ;;  %v7716_v63 = vcombine.low %v12894_v1, %v12893_v0  ;;  %v7718_v27 = vcombine.low %v12896_v2, %v12895_v3  ;;  %v12904_v0 = vld [vmem:[#allocation108_spill] sm:$0xff] }
 0x35c   : > { %5391 = vmatprep.subr.bf16.mxu0 %v7709_v6  ;;  %5432 = vmatprep.subr.bf16.mxu1 %v7711_v9  ;;  %v7725_v6 = vcombine.high %v12899_v7, %v12897_v62  ;;  %v12900_v9 = vld [vmem:[#allocation102_spill] sm:$0xff]  ;;  %v12905_v1 = vld [vmem:[#allocation104_spill] sm:$0xff] }
 0x35d   : > { %v7727_v10 = vcombine.high %v12901_v8, %v12900_v9  ;;  %v7733_v2 = vcombine.high %v12905_v1, %v12904_v0 }
 0x35f   : > { %5392 = vmatpush1.bf16.msra.mxu0 %v7708_v11  ;;  %5433 = vmatpush1.bf16.msra.mxu1 %v7710_v46  ;;  %v7724_v11 = vcombine.low %v12899_v7, %v12898_v4  ;;  %v7726_v46 = vcombine.low %v12901_v8, %v12900_v9  ;;  %v12908_v4 = vld [vmem:[#allocation116_spill] sm:$0xff]  ;;  %v11664_v9 = vpack.c.bf16 %v5506_v31, %v5506_v31 }
 0x360   : > { %5393 = vmatprep.subr.bf16.mxu0 %v7717_v5  ;;  %5434 = vmatprep.subr.bf16.mxu1 %v7719_v12  ;;  %v12902_v12 = vld [vmem:[#allocation107_spill] sm:$0xff]  ;;  %v12909_v7 = vld [vmem:[#allocation112_spill] sm:$0xff] }
 0x361   : > { %v12903_v5 = vld [vmem:[#allocation103_spill] sm:$0xff]  ;;  %v7741_v8 = vcombine.high %v12909_v7, %v12908_v4  ;;  %v12914_v31 = vld [vmem:[#allocation120_spill] sm:$0xff] }
 0x362   : > { %v7731_v62 = vcombine.high %v12903_v5, %v12902_v12 }
 0x363   : > { %5394 = vmatpush1.bf16.msra.mxu0 %v7716_v63  ;;  %5435 = vmatpush1.bf16.msra.mxu1 %v7718_v27  ;;  %v7730_v63 = vcombine.low %v12903_v5, %v12902_v12  ;;  %v7732_v27 = vcombine.low %v12905_v1, %v12904_v0  ;;  %v12913_v5 = vld [vmem:[#allocation124_spill] sm:$0xff]  ;;  %v12915_v12 = vmov %v12914_v31 }
 0x364   : > { %5395 = vmatprep.subr.bf16.mxu0 %v7725_v6  ;;  %5436 = vmatprep.subr.bf16.mxu1 %v7727_v10  ;;  %v12906_v10 = vld [vmem:[#allocation115_spill] sm:$0xff]  ;;  %v7749_v16 = vcombine.high %v12914_v31, %v12913_v5 }
 0x365   : > { %v12907_v6 = vld [vmem:[#allocation111_spill] sm:$0xff] }
 0x366   : > { %v7739_v3 = vcombine.high %v12907_v6, %v12906_v10 }
 0x367   : > { %5396 = vmatpush1.bf16.msra.mxu0 %v7724_v11  ;;  %5437 = vmatpush1.bf16.msra.mxu1 %v7726_v46  ;;  %v7738_v11 = vcombine.low %v12907_v6, %v12906_v10  ;;  %v12910_v46 = vld [vmem:[#allocation123_spill] sm:$0xff]  ;;  %v12920_v6 = vld [vmem:[#allocation128_spill] sm:$0xff] }
 0x368   : > { %6151 = vmatprep.subr.bf16.mxu0 %v7731_v62  ;;  %6192 = vmatprep.subr.bf16.mxu1 %v7733_v2  ;;  %v7740_v2 = vcombine.low %v12909_v7, %v12908_v4  ;;  %v12911_v62 = vld [vmem:[#allocation119_spill] sm:$0xff]  ;;  %v12924_v7 = vld [vmem:[#allocation136_spill] sm:$0xff] }
 0x369   : > { %v12912_v0 = vmov %v12911_v62  ;;  %v7747_v1 = vcombine.high %v12911_v62, %v12910_v46  ;;  %v12918_v62 = vld [vmem:[#allocation132_spill] sm:$0xff] }
 0x36a   : > { %5398 = vmatmul.mubr.bf16.vlgmr.msra.gmra.mrb[4].mxu0 %v11516_v14  ;;  %5439 = vmatmul.mubr.bf16.vlgmr.msra.gmra.mrb[4].mxu1 %v11516_v14  ;;  %v7746_v14 = vcombine.low %v12912_v0, %v12910_v46  ;;  %v12919_v4 = vmov %v12918_v62  ;;  %v7757_v31 = vcombine.high %v12920_v6, %v12918_v62  ;;  %v12921_v0 = vld [vmem:[#allocation139_spill] sm:$0xff]  ;;  %v8167_v46 = vld [vmem:[%s12118_s10] sm:$0xff] (%p4616_p0)  }
 0x36b   : > { %6152 = vmatpush1.bf16.msra.mxu0 %v7730_v63  ;;  %6193 = vmatpush1.bf16.msra.mxu1 %v7732_v27  ;;  %v7748_v63 = vcombine.low %v12915_v12, %v12913_v5  ;;  %v12922_v5 = vld [vmem:[#allocation135_spill] sm:$0xff] }
 0x36c   : > { %6153 = vmatprep.subr.bf16.mxu0 %v7739_v3  ;;  %6194 = vmatprep.subr.bf16.mxu1 %v7741_v8  ;;  %v12916_v8 = vld [vmem:[#allocation131_spill] sm:$0xff] }
 0x36d   : > { %6183 = vmatprep.mubr.bf16.mxu0 %v11664_v9  ;;  %6224 = vmatprep.mubr.bf16.mxu1 %v11664_v9  ;;  %v12917_v3 = vld [vmem:[#allocation127_spill] sm:$0xff] }
 0x36e   : > { %v7755_v27 = vcombine.high %v12917_v3, %v12916_v8  ;;  %v12925_v62 = vld [vmem:[#allocation147_spill] sm:$0xff] }
 0x36f   : > { %6154 = vmatpush1.bf16.msra.mxu0 %v7738_v11  ;;  %6195 = vmatpush1.bf16.msra.mxu1 %v7740_v2  ;;  %v7754_v11 = vcombine.low %v12917_v3, %v12916_v8  ;;  %v7756_v2 = vcombine.low %v12920_v6, %v12919_v4  ;;  %v12926_v3 = vmov %v12925_v62  ;;  %v12927_v4 = vld [vmem:[#allocation143_spill] sm:$0xff]  ;;  %v12930_v8 = vld [vmem:[#allocation144_spill] sm:$0xff] }
 0x370   : > { %6155 = vmatprep.subr.bf16.mxu0 %v7747_v1  ;;  %6196 = vmatprep.subr.bf16.mxu1 %v7749_v16  ;;  %v7763_v1 = vcombine.high %v12922_v5, %v12921_v0  ;;  %v12923_v16 = vld [vmem:[#allocation140_spill] sm:$0xff] }
 0x371   : > { %v7765_v10 = vcombine.high %v12924_v7, %v12923_v16 }
 0x373   : > { %6156 = vmatpush1.bf16.msra.mxu0 %v7746_v14  ;;  %6197 = vmatpush1.bf16.msra.mxu1 %v7748_v63  ;;  %v7762_v14 = vcombine.low %v12922_v5, %v12921_v0  ;;  %v7764_v63 = vcombine.low %v12924_v7, %v12923_v16  ;;  %v12931_v0 = vld [vmem:[#allocation155_spill] sm:$0xff]  ;;  %v12934_v7 = vld [vmem:[#allocation152_spill] sm:$0xff] }
 0x374   : > { %6157 = vmatprep.subr.bf16.mxu0 %v7755_v27  ;;  %6198 = vmatprep.subr.bf16.mxu1 %v7757_v31  ;;  %v7771_v27 = vcombine.high %v12927_v4, %v12925_v62  ;;  %v12928_v31 = vld [vmem:[#allocation148_spill] sm:$0xff]  ;;  %v12932_v5 = vld [vmem:[#allocation151_spill] sm:$0xff] }
 0x375   : > { %v12929_v6 = vmov %v12928_v31  ;;  %v7773_v12 = vcombine.high %v12930_v8, %v12928_v31  ;;  %v12935_v62 = vld [vmem:[#allocation163_spill] sm:$0xff] }
 0x376   : > { %v12937_v31 = vld [vmem:[#allocation159_spill] sm:$0xff] }
 0x377   : > { %6158 = vmatpush1.bf16.msra.mxu0 %v7754_v11  ;;  %6199 = vmatpush1.bf16.msra.mxu1 %v7756_v2  ;;  %v7770_v11 = vcombine.low %v12927_v4, %v12926_v3  ;;  %v7772_v2 = vcombine.low %v12930_v8, %v12929_v6  ;;  %v12936_v3 = vmov %v12935_v62  ;;  %v12938_v4 = vmov %v12937_v31  ;;  %v12940_v6 = vld [vmem:[#allocation160_spill] sm:$0xff] }
 0x378   : > { %6159 = vmatprep.subr.bf16.mxu0 %v7763_v1  ;;  %6200 = vmatprep.subr.bf16.mxu1 %v7765_v10  ;;  %v7779_v1 = vcombine.high %v12932_v5, %v12931_v0  ;;  %v12933_v10 = vld [vmem:[#allocation156_spill] sm:$0xff] }
 0x379   : > { %v7781_v16 = vcombine.high %v12934_v7, %v12933_v10 }
 0x37b   : > { %6160 = vmatpush1.bf16.msra.mxu0 %v7762_v14  ;;  %6201 = vmatpush1.bf16.msra.mxu1 %v7764_v63  ;;  %v7778_v14 = vcombine.low %v12932_v5, %v12931_v0  ;;  %v7780_v63 = vcombine.low %v12934_v7, %v12933_v10  ;;  %v12941_v0 = vld [vmem:[#allocation171_spill] sm:$0xff]  ;;  %v12944_v7 = vld [vmem:[#allocation168_spill] sm:$0xff] }
 0x37c   : > { %6161 = vmatprep.subr.bf16.mxu0 %v7771_v27  ;;  %6202 = vmatprep.subr.bf16.mxu1 %v7773_v12  ;;  %v7787_v27 = vcombine.high %v12937_v31, %v12935_v62  ;;  %v12939_v12 = vld [vmem:[#allocation164_spill] sm:$0xff]  ;;  %v12942_v5 = vld [vmem:[#allocation167_spill] sm:$0xff] }
 0x37d   : > { %v7789_v8 = vcombine.high %v12940_v6, %v12939_v12  ;;  %v12945_v62 = vld [vmem:[#allocation179_spill] sm:$0xff] }
 0x37e   : > { %v12947_v31 = vld [vmem:[#allocation175_spill] sm:$0xff] }
 0x37f   : > { %6162 = vmatpush1.bf16.msra.mxu0 %v7770_v11  ;;  %6203 = vmatpush1.bf16.msra.mxu1 %v7772_v2  ;;  %v7786_v11 = vcombine.low %v12938_v4, %v12936_v3  ;;  %v7788_v2 = vcombine.low %v12940_v6, %v12939_v12  ;;  %v12946_v3 = vmov %v12945_v62  ;;  %v12948_v4 = vmov %v12947_v31  ;;  %v12950_v6 = vld [vmem:[#allocation176_spill] sm:$0xff] }
 0x380   : > { %6163 = vmatprep.subr.bf16.mxu0 %v7779_v1  ;;  %6204 = vmatprep.subr.bf16.mxu1 %v7781_v16  ;;  %v7795_v1 = vcombine.high %v12942_v5, %v12941_v0  ;;  %v12943_v16 = vld [vmem:[#allocation172_spill] sm:$0xff] }
 0x381   : > { %v7797_v10 = vcombine.high %v12944_v7, %v12943_v16 }
 0x383   : > { %6164 = vmatpush1.bf16.msra.mxu0 %v7778_v14  ;;  %6205 = vmatpush1.bf16.msra.mxu1 %v7780_v63  ;;  %v7794_v14 = vcombine.low %v12942_v5, %v12941_v0  ;;  %v7796_v63 = vcombine.low %v12944_v7, %v12943_v16  ;;  %v12951_v0 = vld [vmem:[#allocation187_spill] sm:$0xff]  ;;  %v12954_v7 = vld [vmem:[#allocation184_spill] sm:$0xff] }
 0x384   : > { %6165 = vmatprep.subr.bf16.mxu0 %v7787_v27  ;;  %6206 = vmatprep.subr.bf16.mxu1 %v7789_v8  ;;  %v7803_v27 = vcombine.high %v12947_v31, %v12945_v62  ;;  %v12949_v8 = vld [vmem:[#allocation180_spill] sm:$0xff]  ;;  %v12952_v5 = vld [vmem:[#allocation183_spill] sm:$0xff] }
 0x385   : > { %v7805_v12 = vcombine.high %v12950_v6, %v12949_v8  ;;  %v12955_v62 = vld [vmem:[#allocation195_spill] sm:$0xff] }
 0x386   : > { %v12957_v31 = vld [vmem:[#allocation191_spill] sm:$0xff] }
 0x387   : > { %6166 = vmatpush1.bf16.msra.mxu0 %v7786_v11  ;;  %6207 = vmatpush1.bf16.msra.mxu1 %v7788_v2  ;;  %v7802_v11 = vcombine.low %v12948_v4, %v12946_v3  ;;  %v7804_v2 = vcombine.low %v12950_v6, %v12949_v8  ;;  %v12956_v3 = vmov %v12955_v62  ;;  %v12958_v4 = vmov %v12957_v31  ;;  %v12960_v6 = vld [vmem:[#allocation192_spill] sm:$0xff] }
 0x388   : > { %6167 = vmatprep.subr.bf16.mxu0 %v7795_v1  ;;  %6208 = vmatprep.subr.bf16.mxu1 %v7797_v10  ;;  %v7811_v1 = vcombine.high %v12952_v5, %v12951_v0  ;;  %v12953_v10 = vld [vmem:[#allocation188_spill] sm:$0xff] }
 0x389   : > { %v7813_v16 = vcombine.high %v12954_v7, %v12953_v10 }
 0x38b   : > { %6168 = vmatpush1.bf16.msra.mxu0 %v7794_v14  ;;  %6209 = vmatpush1.bf16.msra.mxu1 %v7796_v63  ;;  %v7810_v14 = vcombine.low %v12952_v5, %v12951_v0  ;;  %v7812_v63 = vcombine.low %v12954_v7, %v12953_v10  ;;  %v12961_v0 = vld [vmem:[#allocation203_spill] sm:$0xff]  ;;  %v12964_v7 = vld [vmem:[#allocation200_spill] sm:$0xff] }
 0x38c   : > { %6169 = vmatprep.subr.bf16.mxu0 %v7803_v27  ;;  %6210 = vmatprep.subr.bf16.mxu1 %v7805_v12  ;;  %v7819_v27 = vcombine.high %v12957_v31, %v12955_v62  ;;  %v12959_v12 = vld [vmem:[#allocation196_spill] sm:$0xff]  ;;  %v12962_v5 = vld [vmem:[#allocation199_spill] sm:$0xff] }
 0x38d   : > { %v7821_v8 = vcombine.high %v12960_v6, %v12959_v12  ;;  %v12965_v62 = vld [vmem:[#allocation211_spill] sm:$0xff] }
 0x38e   : > { %v12967_v31 = vld [vmem:[#allocation207_spill] sm:$0xff] }
 0x38f   : > { %6170 = vmatpush1.bf16.msra.mxu0 %v7802_v11  ;;  %6211 = vmatpush1.bf16.msra.mxu1 %v7804_v2  ;;  %v7818_v11 = vcombine.low %v12958_v4, %v12956_v3  ;;  %v7820_v2 = vcombine.low %v12960_v6, %v12959_v12  ;;  %v12966_v3 = vmov %v12965_v62  ;;  %v12968_v4 = vmov %v12967_v31  ;;  %v12970_v6 = vld [vmem:[#allocation208_spill] sm:$0xff] }
 0x390   : > { %6171 = vmatprep.subr.bf16.mxu0 %v7811_v1  ;;  %6212 = vmatprep.subr.bf16.mxu1 %v7813_v16  ;;  %v7827_v1 = vcombine.high %v12962_v5, %v12961_v0  ;;  %v12963_v16 = vld [vmem:[#allocation204_spill] sm:$0xff] }
 0x391   : > { %v7829_v10 = vcombine.high %v12964_v7, %v12963_v16 }
 0x393   : > { %6172 = vmatpush1.bf16.msra.mxu0 %v7810_v14  ;;  %6213 = vmatpush1.bf16.msra.mxu1 %v7812_v63  ;;  %v7826_v14 = vcombine.low %v12962_v5, %v12961_v0  ;;  %v7828_v63 = vcombine.low %v12964_v7, %v12963_v16  ;;  %v12971_v0 = vld [vmem:[#allocation219_spill] sm:$0xff]  ;;  %v12974_v7 = vld [vmem:[#allocation216_spill] sm:$0xff] }
 0x394   : > { %6173 = vmatprep.subr.bf16.mxu0 %v7819_v27  ;;  %6214 = vmatprep.subr.bf16.mxu1 %v7821_v8  ;;  %v7835_v27 = vcombine.high %v12967_v31, %v12965_v62  ;;  %v12969_v8 = vld [vmem:[#allocation212_spill] sm:$0xff]  ;;  %v12972_v5 = vld [vmem:[#allocation215_spill] sm:$0xff] }
 0x395   : > { %v7837_v12 = vcombine.high %v12970_v6, %v12969_v8  ;;  %v12975_v62 = vld [vmem:[#allocation227_spill] sm:$0xff] }
 0x396   : > { %v12977_v31 = vld [vmem:[#allocation223_spill] sm:$0xff] }
 0x397   : > { %6174 = vmatpush1.bf16.msra.mxu0 %v7818_v11  ;;  %6215 = vmatpush1.bf16.msra.mxu1 %v7820_v2  ;;  %v7834_v11 = vcombine.low %v12968_v4, %v12966_v3  ;;  %v7836_v2 = vcombine.low %v12970_v6, %v12969_v8  ;;  %v12976_v3 = vmov %v12975_v62  ;;  %v12978_v4 = vmov %v12977_v31  ;;  %v12980_v6 = vld [vmem:[#allocation224_spill] sm:$0xff] }
 0x398   : > { %6175 = vmatprep.subr.bf16.mxu0 %v7827_v1  ;;  %6216 = vmatprep.subr.bf16.mxu1 %v7829_v10  ;;  %v7843_v1 = vcombine.high %v12972_v5, %v12971_v0  ;;  %v12973_v10 = vld [vmem:[#allocation220_spill] sm:$0xff] }
 0x399   : > { %v7845_v16 = vcombine.high %v12974_v7, %v12973_v10 }
 0x39b   : > { %6176 = vmatpush1.bf16.msra.mxu0 %v7826_v14  ;;  %6217 = vmatpush1.bf16.msra.mxu1 %v7828_v63  ;;  %v7842_v14 = vcombine.low %v12972_v5, %v12971_v0  ;;  %v7844_v63 = vcombine.low %v12974_v7, %v12973_v10  ;;  %v12981_v0 = vld [vmem:[#allocation109_spill] sm:$0xff]  ;;  %v12984_v7 = vld [vmem:[#allocation106_spill] sm:$0xff] }
 0x39c   : > { %6177 = vmatprep.subr.bf16.mxu0 %v7835_v27  ;;  %6218 = vmatprep.subr.bf16.mxu1 %v7837_v12  ;;  %v7851_v27 = vcombine.high %v12977_v31, %v12975_v62  ;;  %v12979_v12 = vld [vmem:[#allocation228_spill] sm:$0xff]  ;;  %v12982_v5 = vld [vmem:[#allocation105_spill] sm:$0xff]  ;;  %v11792_v62 = vpack.c.bf16 %v11644_v15, %v11644_v15 }
 0x39d   : > { %v7853_v8 = vcombine.high %v12980_v6, %v12979_v12  ;;  %v12986_v31 = vld [vmem:[#allocation113_spill] sm:$0xff] }
 0x39f   : > { %6178 = vmatpush1.bf16.msra.mxu0 %v7834_v11  ;;  %6219 = vmatpush1.bf16.msra.mxu1 %v7836_v2  ;;  %v7850_v11 = vcombine.low %v12978_v4, %v12976_v3  ;;  %v7852_v2 = vcombine.low %v12980_v6, %v12979_v12  ;;  %v12988_v4 = vld [vmem:[#allocation118_spill] sm:$0xff] }
 0x3a0   : > { %6179 = vmatprep.subr.bf16.mxu0 %v7843_v1  ;;  %6220 = vmatprep.subr.bf16.mxu1 %v7845_v16  ;;  %v7735_v1 = vcombine.high %v12982_v5, %v12981_v0  ;;  %v12983_v16 = vld [vmem:[#allocation110_spill] sm:$0xff] }
 0x3a1   : > { %v7737_v10 = vcombine.high %v12984_v7, %v12983_v16  ;;  %v12989_v6 = vld [vmem:[#allocation114_spill] sm:$0xff] }
 0x3a2   : > { %v7745_v12 = vcombine.high %v12989_v6, %v12988_v4 }
 0x3a3   : > { %6180 = vmatpush1.bf16.msra.mxu0 %v7842_v14  ;;  %6221 = vmatpush1.bf16.msra.mxu1 %v7844_v63  ;;  %v7734_v14 = vcombine.low %v12982_v5, %v12981_v0  ;;  %v7736_v63 = vcombine.low %v12984_v7, %v12983_v16  ;;  %v12994_v5 = vld [vmem:[#allocation122_spill] sm:$0xff] }
 0x3a4   : > { %6181 = vmatprep.subr.bf16.mxu0 %v7851_v27  ;;  %6222 = vmatprep.subr.bf16.mxu1 %v7853_v8  ;;  %v12985_v8 = vld [vmem:[#allocation117_spill] sm:$0xff]  ;;  %v12987_v27 = vmov %v12986_v31 }
 0x3a5   : > { %v7743_v3 = vcombine.high %v12986_v31, %v12985_v8  ;;  %v7742_v15 = vcombine.low %v12987_v27, %v12985_v8  ;;  %v12992_v31 = vld [vmem:[#allocation126_spill] sm:$0xff] }
 0x3a6   : > { %v12993_v0 = vmov %v12992_v31  ;;  %v7753_v7 = vcombine.high %v12994_v5, %v12992_v31  ;;  %v12998_v8 = vld [vmem:[#allocation130_spill] sm:$0xff] }
 0x3a7   : > { %6182 = vmatpush1.bf16.msra.mxu0 %v7850_v11  ;;  %6223 = vmatpush1.bf16.msra.mxu1 %v7852_v2  ;;  %v7744_v11 = vcombine.low %v12989_v6, %v12988_v4  ;;  %v12991_v2 = vld [vmem:[#allocation121_spill] sm:$0xff]  ;;  %v12997_v6 = vld [vmem:[#allocation134_spill] sm:$0xff] }
 0x3a8   : > { %6233 = vmatprep.subr.bf16.mxu0 %v7735_v1  ;;  %6274 = vmatprep.subr.bf16.mxu1 %v7737_v10  ;;  %v12990_v10 = vld [vmem:[#allocation125_spill] sm:$0xff]  ;;  %v7761_v31 = vcombine.high %v12998_v8, %v12997_v6 }
 0x3a9   : > { %v7751_v1 = vcombine.high %v12991_v2, %v12990_v10 }
 0x3aa   : > { %6184 = vmatmul.mubr.bf16.vlgmr.msra.gmra.mrb[8].mxu0 %v11792_v62  ;;  %6225 = vmatmul.mubr.bf16.vlgmr.msra.gmra.mrb[8].mxu1 %v11792_v62 }
 0x3ab   : > { %6234 = vmatpush1.bf16.msra.mxu0 %v7734_v14  ;;  %6275 = vmatpush1.bf16.msra.mxu1 %v7736_v63  ;;  %v7750_v14 = vcombine.low %v12991_v2, %v12990_v10  ;;  %v7752_v63 = vcombine.low %v12994_v5, %v12993_v0  ;;  %v13000_v0 = vld [vmem:[#allocation137_spill] sm:$0xff]  ;;  %v13002_v2 = vld [vmem:[#allocation138_spill] sm:$0xff] }
 0x3ac   : > { %6235 = vmatprep.subr.bf16.mxu0 %v7743_v3  ;;  %6276 = vmatprep.subr.bf16.mxu1 %v7745_v12  ;;  %v12995_v3 = vld [vmem:[#allocation133_spill] sm:$0xff]  ;;  %v13007_v10 = vld [vmem:[#allocation146_spill] sm:$0xff] }
 0x3ad   : > { %6265 = vmatprep.mubr.bf16.mxu0 %v11664_v9  ;;  %6306 = vmatprep.mubr.bf16.mxu1 %v11664_v9  ;;  %v12996_v12 = vld [vmem:[#allocation129_spill] sm:$0xff] }
 0x3ae   : > { %v7759_v4 = vcombine.high %v12996_v12, %v12995_v3  ;;  %v7758_v9 = vcombine.low %v12996_v12, %v12995_v3  ;;  %v13003_v3 = vld [vmem:[#allocation149_spill] sm:$0xff] }
 0x3af   : > { %6236 = vmatpush1.bf16.msra.mxu0 %v7742_v15  ;;  %6277 = vmatpush1.bf16.msra.mxu1 %v7744_v11  ;;  %v7760_v15 = vcombine.low %v12998_v8, %v12997_v6  ;;  %v12999_v11 = vld [vmem:[#allocation141_spill] sm:$0xff] }
 0x3b0   : > { %6237 = vmatprep.subr.bf16.mxu0 %v7751_v1  ;;  %6278 = vmatprep.subr.bf16.mxu1 %v7753_v7  ;;  %v7767_v1 = vcombine.high %v13000_v0, %v12999_v11  ;;  %v13001_v7 = vld [vmem:[#allocation142_spill] sm:$0xff]  ;;  %v13004_v6 = vld [vmem:[#allocation145_spill] sm:$0xff] }
 0x3b1   : > { %v7769_v5 = vcombine.high %v13002_v2, %v13001_v7 }
 0x3b3   : > { %6238 = vmatpush1.bf16.msra.mxu0 %v7750_v14  ;;  %6279 = vmatpush1.bf16.msra.mxu1 %v7752_v63  ;;  %v7766_v14 = vcombine.low %v13000_v0, %v12999_v11  ;;  %v7768_v63 = vcombine.low %v13002_v2, %v13001_v7  ;;  %v13008_v0 = vld [vmem:[#allocation157_spill] sm:$0xff]  ;;  %v13011_v7 = vld [vmem:[#allocation154_spill] sm:$0xff] }
 0x3b4   : > { %6239 = vmatprep.subr.bf16.mxu0 %v7759_v4  ;;  %6280 = vmatprep.subr.bf16.mxu1 %v7761_v31  ;;  %v7775_v4 = vcombine.high %v13004_v6, %v13003_v3  ;;  %v13005_v31 = vld [vmem:[#allocation150_spill] sm:$0xff]  ;;  %v13009_v2 = vld [vmem:[#allocation153_spill] sm:$0xff] }
 0x3b5   : > { %v13006_v8 = vmov %v13005_v31  ;;  %v7777_v12 = vcombine.high %v13007_v10, %v13005_v31  ;;  %v13012_v31 = vld [vmem:[#allocation165_spill] sm:$0xff] }
 0x3b7   : > { %6240 = vmatpush1.bf16.msra.mxu0 %v7758_v9  ;;  %6281 = vmatpush1.bf16.msra.mxu1 %v7760_v15  ;;  %v7774_v9 = vcombine.low %v13004_v6, %v13003_v3  ;;  %v7776_v15 = vcombine.low %v13007_v10, %v13006_v8  ;;  %v13013_v3 = vmov %v13012_v31  ;;  %v13014_v6 = vld [vmem:[#allocation161_spill] sm:$0xff]  ;;  %v13016_v8 = vld [vmem:[#allocation162_spill] sm:$0xff] }
 0x3b8   : > { %6241 = vmatprep.subr.bf16.mxu0 %v7767_v1  ;;  %6282 = vmatprep.subr.bf16.mxu1 %v7769_v5  ;;  %v7783_v1 = vcombine.high %v13009_v2, %v13008_v0  ;;  %v13010_v5 = vld [vmem:[#allocation158_spill] sm:$0xff] }
 0x3b9   : > { %v7785_v11 = vcombine.high %v13011_v7, %v13010_v5 }
 0x3bb   : > { %6242 = vmatpush1.bf16.msra.mxu0 %v7766_v14  ;;  %6283 = vmatpush1.bf16.msra.mxu1 %v7768_v63  ;;  %v7782_v14 = vcombine.low %v13009_v2, %v13008_v0  ;;  %v7784_v63 = vcombine.low %v13011_v7, %v13010_v5  ;;  %v13017_v0 = vld [vmem:[#allocation173_spill] sm:$0xff]  ;;  %v13020_v5 = vld [vmem:[#allocation170_spill] sm:$0xff] }
 0x3bc   : > { %6243 = vmatprep.subr.bf16.mxu0 %v7775_v4  ;;  %6284 = vmatprep.subr.bf16.mxu1 %v7777_v12  ;;  %v7791_v4 = vcombine.high %v13014_v6, %v13012_v31  ;;  %v13015_v12 = vld [vmem:[#allocation166_spill] sm:$0xff]  ;;  %v13018_v2 = vld [vmem:[#allocation169_spill] sm:$0xff] }
 0x3bd   : > { %v7793_v10 = vcombine.high %v13016_v8, %v13015_v12  ;;  %v13021_v31 = vld [vmem:[#allocation181_spill] sm:$0xff] }
 0x3bf   : > { %6244 = vmatpush1.bf16.msra.mxu0 %v7774_v9  ;;  %6285 = vmatpush1.bf16.msra.mxu1 %v7776_v15  ;;  %v7790_v9 = vcombine.low %v13014_v6, %v13013_v3  ;;  %v7792_v15 = vcombine.low %v13016_v8, %v13015_v12  ;;  %v13022_v3 = vmov %v13021_v31  ;;  %v13023_v6 = vld [vmem:[#allocation177_spill] sm:$0xff]  ;;  %v13025_v8 = vld [vmem:[#allocation178_spill] sm:$0xff] }
 0x3c0   : > { %6245 = vmatprep.subr.bf16.mxu0 %v7783_v1  ;;  %6286 = vmatprep.subr.bf16.mxu1 %v7785_v11  ;;  %v7799_v1 = vcombine.high %v13018_v2, %v13017_v0  ;;  %v13019_v11 = vld [vmem:[#allocation174_spill] sm:$0xff] }
 0x3c1   : > { %v7801_v7 = vcombine.high %v13020_v5, %v13019_v11 }
 0x3c3   : > { %6246 = vmatpush1.bf16.msra.mxu0 %v7782_v14  ;;  %6287 = vmatpush1.bf16.msra.mxu1 %v7784_v63  ;;  %v7798_v14 = vcombine.low %v13018_v2, %v13017_v0  ;;  %v7800_v63 = vcombine.low %v13020_v5, %v13019_v11  ;;  %v13026_v0 = vld [vmem:[#allocation189_spill] sm:$0xff]  ;;  %v13029_v5 = vld [vmem:[#allocation186_spill] sm:$0xff] }
 0x3c4   : > { %6247 = vmatprep.subr.bf16.mxu0 %v7791_v4  ;;  %6288 = vmatprep.subr.bf16.mxu1 %v7793_v10  ;;  %v7807_v4 = vcombine.high %v13023_v6, %v13021_v31  ;;  %v13024_v10 = vld [vmem:[#allocation182_spill] sm:$0xff]  ;;  %v13027_v2 = vld [vmem:[#allocation185_spill] sm:$0xff] }
 0x3c5   : > { %v7809_v12 = vcombine.high %v13025_v8, %v13024_v10  ;;  %v13030_v31 = vld [vmem:[#allocation197_spill] sm:$0xff] }
 0x3c7   : > { %6248 = vmatpush1.bf16.msra.mxu0 %v7790_v9  ;;  %6289 = vmatpush1.bf16.msra.mxu1 %v7792_v15  ;;  %v7806_v9 = vcombine.low %v13023_v6, %v13022_v3  ;;  %v7808_v15 = vcombine.low %v13025_v8, %v13024_v10  ;;  %v13031_v3 = vmov %v13030_v31  ;;  %v13032_v6 = vld [vmem:[#allocation193_spill] sm:$0xff]  ;;  %v13034_v8 = vld [vmem:[#allocation194_spill] sm:$0xff] }
 0x3c8   : > { %6249 = vmatprep.subr.bf16.mxu0 %v7799_v1  ;;  %6290 = vmatprep.subr.bf16.mxu1 %v7801_v7  ;;  %v7815_v1 = vcombine.high %v13027_v2, %v13026_v0  ;;  %v13028_v7 = vld [vmem:[#allocation190_spill] sm:$0xff] }
 0x3c9   : > { %v7817_v11 = vcombine.high %v13029_v5, %v13028_v7 }
 0x3cb   : > { %6250 = vmatpush1.bf16.msra.mxu0 %v7798_v14  ;;  %6291 = vmatpush1.bf16.msra.mxu1 %v7800_v63  ;;  %v7814_v14 = vcombine.low %v13027_v2, %v13026_v0  ;;  %v7816_v63 = vcombine.low %v13029_v5, %v13028_v7  ;;  %v13035_v0 = vld [vmem:[#allocation205_spill] sm:$0xff]  ;;  %v13038_v5 = vld [vmem:[#allocation202_spill] sm:$0xff] }
 0x3cc   : > { %6251 = vmatprep.subr.bf16.mxu0 %v7807_v4  ;;  %6292 = vmatprep.subr.bf16.mxu1 %v7809_v12  ;;  %v7823_v4 = vcombine.high %v13032_v6, %v13030_v31  ;;  %v13033_v12 = vld [vmem:[#allocation198_spill] sm:$0xff]  ;;  %v13036_v2 = vld [vmem:[#allocation201_spill] sm:$0xff] }
 0x3cd   : > { %v7825_v10 = vcombine.high %v13034_v8, %v13033_v12  ;;  %v13039_v31 = vld [vmem:[#allocation213_spill] sm:$0xff] }
 0x3cf   : > { %6252 = vmatpush1.bf16.msra.mxu0 %v7806_v9  ;;  %6293 = vmatpush1.bf16.msra.mxu1 %v7808_v15  ;;  %v7822_v9 = vcombine.low %v13032_v6, %v13031_v3  ;;  %v7824_v15 = vcombine.low %v13034_v8, %v13033_v12  ;;  %v13040_v3 = vmov %v13039_v31  ;;  %v13041_v6 = vld [vmem:[#allocation209_spill] sm:$0xff]  ;;  %v13043_v8 = vld [vmem:[#allocation210_spill] sm:$0xff] }
 0x3d0   : > { %6253 = vmatprep.subr.bf16.mxu0 %v7815_v1  ;;  %6294 = vmatprep.subr.bf16.mxu1 %v7817_v11  ;;  %v7831_v1 = vcombine.high %v13036_v2, %v13035_v0  ;;  %v13037_v11 = vld [vmem:[#allocation206_spill] sm:$0xff] }
 0x3d1   : > { %v7833_v7 = vcombine.high %v13038_v5, %v13037_v11 }
 0x3d3   : > { %6254 = vmatpush1.bf16.msra.mxu0 %v7814_v14  ;;  %6295 = vmatpush1.bf16.msra.mxu1 %v7816_v63  ;;  %v7830_v14 = vcombine.low %v13036_v2, %v13035_v0  ;;  %v7832_v63 = vcombine.low %v13038_v5, %v13037_v11  ;;  %v13044_v0 = vld [vmem:[#allocation221_spill] sm:$0xff]  ;;  %v13047_v5 = vld [vmem:[#allocation218_spill] sm:$0xff] }
 0x3d4   : > { %6255 = vmatprep.subr.bf16.mxu0 %v7823_v4  ;;  %6296 = vmatprep.subr.bf16.mxu1 %v7825_v10  ;;  %v7839_v4 = vcombine.high %v13041_v6, %v13039_v31  ;;  %v13042_v10 = vld [vmem:[#allocation214_spill] sm:$0xff]  ;;  %v13045_v2 = vld [vmem:[#allocation217_spill] sm:$0xff] }
 0x3d5   : > { %v7841_v12 = vcombine.high %v13043_v8, %v13042_v10  ;;  %v13048_v31 = vld [vmem:[#allocation229_spill] sm:$0xff] }
 0x3d7   : > { %6256 = vmatpush1.bf16.msra.mxu0 %v7822_v9  ;;  %6297 = vmatpush1.bf16.msra.mxu1 %v7824_v15  ;;  %v7838_v9 = vcombine.low %v13041_v6, %v13040_v3  ;;  %v7840_v15 = vcombine.low %v13043_v8, %v13042_v10  ;;  %v13049_v3 = vmov %v13048_v31  ;;  %v13050_v6 = vld [vmem:[#allocation225_spill] sm:$0xff]  ;;  %v13052_v8 = vld [vmem:[#allocation226_spill] sm:$0xff] }
 0x3d8   : > { %6257 = vmatprep.subr.bf16.mxu0 %v7831_v1  ;;  %6298 = vmatprep.subr.bf16.mxu1 %v7833_v7  ;;  %v7847_v1 = vcombine.high %v13045_v2, %v13044_v0  ;;  %v13046_v7 = vld [vmem:[#allocation222_spill] sm:$0xff] }
 0x3d9   : > { %v7849_v11 = vcombine.high %v13047_v5, %v13046_v7 }
 0x3db   : > { %6258 = vmatpush1.bf16.msra.mxu0 %v7830_v14  ;;  %6299 = vmatpush1.bf16.msra.mxu1 %v7832_v63  ;;  %v7846_v14 = vcombine.low %v13045_v2, %v13044_v0  ;;  %v7848_v63 = vcombine.low %v13047_v5, %v13046_v7 }
 0x3dc   : > { %6259 = vmatprep.subr.bf16.mxu0 %v7839_v4  ;;  %6300 = vmatprep.subr.bf16.mxu1 %v7841_v12  ;;  %v7855_v4 = vcombine.high %v13050_v6, %v13048_v31  ;;  %v13051_v12 = vld [vmem:[#allocation230_spill] sm:$0xff] }
 0x3dd   : > { %v7857_v10 = vcombine.high %v13052_v8, %v13051_v12 }
 0x3df   : > { %6260 = vmatpush1.bf16.msra.mxu0 %v7838_v9  ;;  %6301 = vmatpush1.bf16.msra.mxu1 %v7840_v15  ;;  %v7854_v9 = vcombine.low %v13050_v6, %v13049_v3  ;;  %v7856_v15 = vcombine.low %v13052_v8, %v13051_v12 }
 0x3e0   : > { %6261 = vmatprep.subr.bf16.mxu0 %v7847_v1  ;;  %6302 = vmatprep.subr.bf16.mxu1 %v7849_v11 }
 0x3e3   : > { %6262 = vmatpush1.bf16.msra.mxu0 %v7846_v14  ;;  %6303 = vmatpush1.bf16.msra.mxu1 %v7848_v63 }
 0x3e4   : > { %6263 = vmatprep.subr.bf16.mxu0 %v7855_v4  ;;  %6304 = vmatprep.subr.bf16.mxu1 %v7857_v10 }
 0x3e7   : > { %6264 = vmatpush1.bf16.msra.mxu0 %v7854_v9  ;;  %6305 = vmatpush1.bf16.msra.mxu1 %v7856_v15  ;;  %v4628_v15 = vld [vmem:[%s4627_s28] sm:$0xff] }
 0x3ea   : > { %6266 = vmatmul.mubr.bf16.vlgmr.msra.gmra.mrb[12].mxu0 %v11792_v62  ;;  %6307 = vmatmul.mubr.bf16.vlgmr.msra.gmra.mrb[12].mxu1 %v11792_v62 }
 0x3fd   : > { %v5317_v11 = vpop.f32.mrb[0].mxu0  ;;  %v5358_v1 = vpop.f32.mrb[0].mxu1 }
 0x3fe   : > { %v5319_v31 = vpop.f32.mrb[1].mxu0  ;;  %v5360_v14 = vpop.f32.mrb[1].mxu1 }
 0x3ff   : > { %v5455_v63 = vcombine.low %v5317_v11, %v5319_v31  ;;  %v5456_v0 = vcombine.low %v5358_v1, %v5360_v14  ;;  %v5321_v2 = vpop.f32.mrb[2].mxu0  ;;  %v5362_v3 = vpop.f32.mrb[2].mxu1 }
 0x400   : > { %v5322_v5 = vpop.f32.mrb[3].mxu0  ;;  %v5363_v6 = vpop.f32.mrb[3].mxu1 }
 0x401   : > { %v5463_v4 = vrot.slane %v5455_v63, %v9461_v13  ;;  %v5470_v10 = vrot.slane %v5456_v0, %v9461_v13 }
 0x403   : > { %v5471_v9 = vcombine.low %v5463_v4, %v5470_v10  ;;  %v4629_v10 = vld [vmem:[%s4627_s28 + $0x8] sm:$0xff] }
 0x405   : > { %v5491_v7 = vadd.f32 %v5471_v9, %v4628_v15 }
 0x407   : > { %v7858_v62 = vmul.f32 -1.442695, %v5491_v7 }
 0x409   : > { %8103 = vpow2.f32 %v7858_v62 }
 0x413   : > { %v8104_v8 = vpop.eup %8103 }
 0x414   : > { %v6364_v12 = vadd.f32 1.0, %v8104_v8 }
 0x416   : > { %8105 = vrcp.f32 %v6364_v12 }
 0x420   : > { %v8106_v62 = vpop.eup %8105 }
 0x43d   : > { %v5399_v16 = vpop.f32.mrb[4].mxu0  ;;  %v5440_v11 = vpop.f32.mrb[4].mxu1 }
 0x43e   : > { %v5401_v1 = vpop.f32.mrb[5].mxu0  ;;  %v5442_v2 = vpop.f32.mrb[5].mxu1 }
 0x43f   : > { %v5472_v3 = vcombine.low %v5399_v16, %v5401_v1  ;;  %v5473_v5 = vcombine.low %v5440_v11, %v5442_v2  ;;  %v5403_v6 = vpop.f32.mrb[6].mxu0  ;;  %v5444_v31 = vpop.f32.mrb[6].mxu1  ;;  %v6378_v16 = vrot.slane %v8106_v62, 4 }
 0x440   : > { %v5404_v14 = vpop.f32.mrb[7].mxu0  ;;  %v5445_v63 = vpop.f32.mrb[7].mxu1 }
 0x441   : > { %v5480_v0 = vrot.slane %v5472_v3, %v9461_v13  ;;  %v5487_v4 = vrot.slane %v5473_v5, %v9461_v13  ;;  %v6380_v1 = vmul.f32 %v8221_v42, %v6378_v16 }
 0x443   : > { %v5488_v7 = vcombine.low %v5480_v0, %v5487_v4 }
 0x445   : > { %v5492_v9 = vadd.f32 %v5488_v7, %v4629_v10 }
 0x447   : > { %8107 = vtanh.f32 %v5492_v9  ;;  %v6369_v8 = vrot.slane %v5492_v9, 4 }
 0x449   : > { %v7859_v15 = vmul.f32 -1.442695, %v6369_v8 }
 0x44b   : > { %8109 = vpow2.f32 %v7859_v15 }
 0x451   : > { %v8108_v11 = vpop.eup %8107 }
 0x452   : > { %v6381_v2 = vmul.f32 %v8108_v11, %v8106_v62 }
 0x454   : > { %v11930_v42 = vadd.f32 %v6381_v2, %v6380_v1   ;;  %v5496_v2 = vld [vmem:[%s5495_s30] sm:$0xff] }
 0x455   : > { %v8110_v12 = vpop.eup %8109 }
 0x456   : > { %v6374_v3 = vadd.f32 1.0, %v8110_v12  ;;  %8111 = vtanh.f32 %v11930_v42 }
 0x458   : > { %8113 = vrcp.f32 %v6374_v3 }
 0x460   : > { %v8112_v5 = vpop.eup %8111 }
 0x462   : > { %v8114_v6 = vpop.eup %8113 }
 0x463   : > { %v11934_v62 = vmul.f32 %v8114_v6, %v8112_v5  }
 0x465   : > { %6412 = vst [vmem:[%s6411_s4] sm:$0xf] %v11934_v62  ;;  %v8130_v62 = vld [vmem:[%s12115_s7] sm:$0xff] (%p4616_p0)  }
 0x46c   :  { %v8187_v41 = vld.sshfl [vmem:[#allocation4] sm:$0xff pattern:$0x76325410] (%p4616_p0)  ;;  %v8188_v59 = vld.sshfl [vmem:[#allocation4 + $0x8] sm:$0xff pattern:$0x76325410] (%p4616_p0) }
 0x46d   :  { %v8189_v20 = vld.sshfl [vmem:[#allocation4 + $0x10] sm:$0xff pattern:$0x76325410] (%p4616_p0)  ;;  %v8190_v49 = vld.sshfl [vmem:[#allocation4 + $0x18] sm:$0xff pattern:$0x76325410] (%p4616_p0) }
 0x47d   : > { %v6185_v31 = vpop.f32.mrb[8].mxu0  ;;  %v6226_v14 = vpop.f32.mrb[8].mxu1 }
 0x47e   : > { %v6187_v63 = vpop.f32.mrb[9].mxu0  ;;  %v6228_v0 = vpop.f32.mrb[9].mxu1 }
 0x47f   : > { %v6323_v4 = vcombine.low %v6185_v31, %v6187_v63  ;;  %v6324_v10 = vcombine.low %v6226_v14, %v6228_v0  ;;  %v6189_v7 = vpop.f32.mrb[10].mxu0  ;;  %v6230_v9 = vpop.f32.mrb[10].mxu1 }
 0x480   : > { %v6190_v8 = vpop.f32.mrb[11].mxu0  ;;  %v6231_v15 = vpop.f32.mrb[11].mxu1 }
 0x481   : > { %v6331_v16 = vrot.slane %v6323_v4, %v9461_v13  ;;  %v6338_v11 = vrot.slane %v6324_v10, %v9461_v13 }
 0x483   : > { %v6339_v1 = vcombine.low %v6331_v16, %v6338_v11 }
 0x485   : > { %v6359_v12 = vadd.f32 %v6339_v1, %v5496_v2  ;;  %v5497_v1 = vld [vmem:[%s5495_s30 + $0x8] sm:$0xff] }
 0x487   : > { %v7860_v3 = vmul.f32 -1.442695, %v6359_v12 }
 0x489   : > { %8115 = vpow2.f32 %v7860_v3 }
 0x493   : > { %v8116_v5 = vpop.eup %8115 }
 0x494   : > { %v6388_v6 = vadd.f32 1.0, %v8116_v5 }
 0x496   : > { %8117 = vrcp.f32 %v6388_v6 }
 0x4a0   : > { %v8118_v17 = vpop.eup %8117 }
 0x4bd   : > { %v6267_v31 = vpop.f32.mrb[12].mxu0  ;;  %v6308_v14 = vpop.f32.mrb[12].mxu1 }
 0x4be   : > { %v6269_v63 = vpop.f32.mrb[13].mxu0  ;;  %v6310_v0 = vpop.f32.mrb[13].mxu1 }
 0x4bf   : > { %v6340_v7 = vcombine.low %v6267_v31, %v6269_v63  ;;  %v6341_v9 = vcombine.low %v6308_v14, %v6310_v0  ;;  %v6271_v4 = vpop.f32.mrb[14].mxu0  ;;  %v6312_v8 = vpop.f32.mrb[14].mxu1  ;;  %v6402_v31 = vrot.slane %v8118_v17, 4 }
 0x4c0   : > { %v6272_v10 = vpop.f32.mrb[15].mxu0  ;;  %v6313_v15 = vpop.f32.mrb[15].mxu1  ;;  %v8128_v8 = vld [vmem:[%s12115_s7 + $0x40] sm:$0xff] (%p4616_p0)  }
 0x4c1   : > { %v6348_v16 = vrot.slane %v6340_v7, %v9461_v13  ;;  %v6355_v11 = vrot.slane %v6341_v9, %v9461_v13  ;;  %v6404_v63 = vmul.f32 %v8213_v28, %v6402_v31  ;;  %v8129_v10 = vld [vmem:[%s12116_s8] sm:$0xff] (%p4616_p0)   ;;  %7940 = vmatprep.subr.bf16.mxu1 (%p4616_p0), %v8128_v8 }
 0x4c2   :  { %7941 = vmatpush3.bf16.msra.mxu1 (%p4616_p0), %v8130_v62 }
 0x4c3   : > { %v6356_v2 = vcombine.low %v6348_v16, %v6355_v11  ;;  %7942 = vmatprep.subr.bf16.mxu1 (%p4616_p0), %v8132_v29  ;;  %v6450_v16 = vcombine.high (%p4616_p0), %v8187_v41, %v8188_v59  ;;  %v6468_v11 = vcombine.high (%p4616_p0), %v8189_v20, %v8190_v49 }
 0x4c5   : > { %v6360_v12 = vadd.f32 %v6356_v2, %v5497_v1  ;;  %v6449_v1 = vcombine.low (%p4616_p0), %v8187_v41, %v8188_v59  ;;  %v6467_v2 = vcombine.low (%p4616_p0), %v8189_v20, %v8190_v49 }
 0x4c6   :  { %7943 = vmatpush3.bf16.msra.mxu1 (%p4616_p0), %v8134_v33 }
 0x4c7   : > { %8119 = vtanh.f32 %v6360_v12  ;;  %v6393_v3 = vrot.slane %v6360_v12, 4  ;;  %7944 = vmatprep.subr.bf16.mxu1 (%p4616_p0), %v8136_v45  ;;  %v6474_v12 = vpack.c.bf16 (%p4616_p0), %v6468_v11, %v6450_v16 }
 0x4c9   : > { %v7861_v5 = vmul.f32 -1.442695, %v6393_v3  ;;  %v6473_v3 = vpack.c.bf16 (%p4616_p0), %v6467_v2, %v6449_v1  ;;  %6862 = vmatprep.mubr.bf16.mxu1 (%p4616_p0), %v6474_v12 }
 0x4ca   :  { %7945 = vmatpush3.bf16.msra.mxu1 (%p4616_p0), %v8138_v48 }
 0x4cb   : > { %8121 = vpow2.f32 %v7861_v5  ;;  %7946 = vmatprep.subr.bf16.mxu1 (%p4616_p0), %v8140_v58  ;;  %v8168_v5 = vld [vmem:[%s12118_s10 + $0x8] sm:$0xff] (%p4616_p0)  }
 0x4ce   :  { %7947 = vmatpush3.bf16.msra.mxu1 (%p4616_p0), %v8142_v61 }
 0x4cf   :  { %7948 = vmatprep.subr.bf16.mxu1 (%p4616_p0), %v8144_v47 }
 0x4d1   : > { %v8120_v14 = vpop.eup %8119 }
 0x4d2   : > { %v6405_v0 = vmul.f32 %v8120_v14, %v8118_v17  ;;  %v8127_v17 = vld [vmem:[%s12116_s8 + $0x40] sm:$0xff] (%p4616_p0)   ;;  %7949 = vmatpush3.bf16.msra.mxu1 (%p4616_p0), %v8146_v53  ;;  %v8170_v14 = vld [vmem:[%s12118_s10 + $0x18] sm:$0xff] (%p4616_p0)  }
 0x4d3   :  { %7918 = vmatprep.subr.bf16.mxu0 (%p4616_p0), %v8127_v17  ;;  %7950 = vmatprep.subr.bf16.mxu1 (%p4616_p0), %v8148_v56 }
 0x4d4   : > { %v6406_v28 = vadd.f32 %v6405_v0, %v6404_v63   ;;  %7919 = vmatpush3.bf16.msra.mxu0 (%p4616_p0), %v8129_v10  ;;  %v8171_v63 = vld [vmem:[%s12118_s10 + $0x20] sm:$0xff] (%p4616_p0)   ;;  %v8172_v0 = vld [vmem:[%s12118_s10 + $0x28] sm:$0xff] (%p4616_p0)  }
 0x4d5   : > { %v8122_v6 = vpop.eup %8121  ;;  %7920 = vmatprep.subr.bf16.mxu0 (%p4616_p0), %v8131_v24 }
 0x4d6   : > { %v6398_v4 = vadd.f32 1.0, %v8122_v6  ;;  %8123 = vtanh.f32 %v6406_v28  ;;  %7951 = vmatpush3.bf16.msra.mxu1 (%p4616_p0), %v8150_v19  ;;  %v8173_v6 = vld [vmem:[%s12118_s10 + $0x30] sm:$0xff] (%p4616_p0)  }
 0x4d7   :  { %7952 = vmatprep.subr.bf16.mxu1 (%p4616_p0), %v8152_v25 }
 0x4d8   : > { %8125 = vrcp.f32 %v6398_v4  ;;  %7921 = vmatpush3.bf16.msra.mxu0 (%p4616_p0), %v8133_v30  ;;  %v8174_v4 = vld [vmem:[%s12118_s10 + $0x38] sm:$0xff] (%p4616_p0)  }
 0x4d9   :  { %7922 = vmatprep.subr.bf16.mxu0 (%p4616_p0), %v8135_v44  ;;  %v7898_v44 = vld [vmem:[%s12117_s9] ss:$0 sm:$0xff] (%p4616_p0) }
 0x4da   :  { %7953 = vmatpush3.bf16.msra.mxu1 (%p4616_p0), %v8154_v34 }
 0x4db   :  { %7954 = vmatprep.subr.bf16.mxu1 (%p4616_p0), %v8156_v36 }
 0x4dc   :  { %7923 = vmatpush3.bf16.msra.mxu0 (%p4616_p0), %v8137_v23 }
 0x4dd   :  { %7924 = vmatprep.subr.bf16.mxu0 (%p4616_p0), %v8139_v55 }
 0x4de   :  { %7955 = vmatpush3.bf16.msra.mxu1 (%p4616_p0), %v8158_v38 }
 0x4df   :  { %4618 = sbr.rel (!%p4616_p0) target bundleno = 744 (0x2e8), region = 79 }
 0x4e0   : > { %v8124_v7 = vpop.eup %8123  ;;  %7925 = vmatpush3.bf16.msra.mxu0 (%p4616_p0), %v8141_v60 }
 0x4e1   :  { %7926 = vmatprep.subr.bf16.mxu0 (%p4616_p0), %v8143_v57  ;;  %6863 = vmatmul.mubr.bf16.vlgmr.msra.gmra.mrb[0].mxu1 (%p4616_p0), %v6473_v3 }
 0x4e2   : > { %v8126_v9 = vpop.eup %8125 }
 0x4e3   : > { %v6408_v31 = vmul.f32 %v8126_v9, %v8124_v7  }
 0x4e4   :  { %7927 = vmatpush3.bf16.msra.mxu0 (%p4616_p0), %v8145_v32 }
 0x4e5   : > { %6416 = vst [vmem:[%s6415_s3] sm:$0xf] %v6408_v31  ;;  %7928 = vmatprep.subr.bf16.mxu0 (%p4616_p0), %v8147_v54  ;;  %v8169_v31 = vld [vmem:[%s12118_s10 + $0x10] sm:$0xff] (%p4616_p0)  }
 0x4e8   :  { %7929 = vmatpush3.bf16.msra.mxu0 %v8149_v18 }
 0x4e9   :  { %7930 = vmatprep.subr.bf16.mxu0 %v8151_v22 }
 0x4ec   :  { %7931 = vmatpush3.bf16.msra.mxu0 %v8153_v26  ;;  %v8183_v40 = vld.sshfl [vmem:[#allocation5] sm:$0xff pattern:$0x76325410]  ;;  %v8184_v43 = vld.sshfl [vmem:[#allocation5 + $0x8] sm:$0xff pattern:$0x76325410] }
 0x4ed   :  { %7932 = vmatprep.subr.bf16.mxu0 %v8155_v35  ;;  %v8185_v28 = vld.sshfl [vmem:[#allocation5 + $0x10] sm:$0xff pattern:$0x76325410]  ;;  %v8186_v42 = vld.sshfl [vmem:[#allocation5 + $0x18] sm:$0xff pattern:$0x76325410]  ;;  %v6508_v52 = vcombine.high %v8183_v40, %v8184_v43  ;;  %v6507_v51 = vcombine.low %v8183_v40, %v8184_v43 }
 0x4ee   :  { %v6526_v50 = vcombine.high %v8185_v28, %v8186_v42  ;;  %v6525_v21 = vcombine.low %v8185_v28, %v8186_v42  ;;  %v7901_v26 = vld [vmem:[%s12119_s11] ss:$0 sm:$0xff] }
 0x4f0   :  { %7933 = vmatpush3.bf16.msra.mxu0 %v8157_v37  ;;  %v6532_v27 = vpack.c.bf16 %v6526_v50, %v6508_v52  ;;  %v6531_v15 = vpack.c.bf16 %v6525_v21, %v6507_v51 }
 0x4f1   :  { %7971 = vmatprep.subr.bf16.mxu0 %v8233_v39 }
 0x4f2   :  { %6725 = vmatprep.mubr.bf16.mxu0 %v6532_v27 }
 0x4f3   :  { %6726 = vmatmul.mubr.bf16.vlgmr.msra.gmra.mrb[0].mxu0 %v6531_v15 }
 0x4f4   :  { %7972 = vmatpush3.bf16.msra.mxu0 %v8167_v46  ;;  %7987 = vmatprep.mubr.msk.bf16.mxu0 %vm8234_vm0, %v8233_v39 }
 0x4f5   :  { %7973 = vmatprep.subr.bf16.mxu0 %v8233_v39 }
 0x4f8   :  { %7974 = vmatpush3.bf16.msra.mxu0 %v8168_v5 }
 0x4f9   :  { %7975 = vmatprep.subr.bf16.mxu0 %v8233_v39 }
 0x4fc   :  { %7976 = vmatpush3.bf16.msra.mxu0 %v8169_v31 }
 0x4fd   :  { %7977 = vmatprep.subr.bf16.mxu0 %v8233_v39 }
 0x500   :  { %7978 = vmatpush3.bf16.msra.mxu0 %v8170_v14 }
 0x501   :  { %7979 = vmatprep.subr.bf16.mxu0 %v8233_v39 }
 0x504   :  { %7980 = vmatpush3.bf16.msra.mxu0 %v8171_v63 }
 0x505   :  { %7981 = vmatprep.subr.bf16.mxu0 %v8233_v39 }
 0x508   :  { %7982 = vmatpush3.bf16.msra.mxu0 %v8172_v0 }
 0x509   :  { %7983 = vmatprep.subr.bf16.mxu0 %v8233_v39 }
 0x50c   :  { %7984 = vmatpush3.bf16.msra.mxu0 %v8173_v6 }
 0x50d   :  { %7985 = vmatprep.subr.bf16.mxu0 %v8233_v39 }
 0x510   :  { %7986 = vmatpush3.bf16.msra.mxu0 %v8174_v4 }
 0x5b4   :  { %v7956_v62 = vpop.f32.mrb[0].mxu1 }
 0x5b5   :  { %v7957_v29 = vpop.f32.mrb[1].mxu1 }
 0x5b6   :  { %v7958_v30 = vadd.f32 %v7957_v29, %v7956_v62  ;;  %v7959_v33 = vpop.f32.mrb[2].mxu1 }
 0x5b7   :  { %v7960_v45 = vpop.f32.mrb[3].mxu1 }
 0x5b8   :  { %v7961_v48 = vadd.f32 %v7960_v45, %v7959_v33 }
 0x5c6   :  { %v7934_v7 = vpop.f32.mrb[0].mxu0 }
 0x5c7   :  { %v7935_v9 = vpop.f32.mrb[1].mxu0 }
 0x5c8   :  { %v7936_v17 = vadd.f32 %v7935_v9, %v7934_v7  ;;  %v7937_v8 = vpop.f32.mrb[2].mxu0 }
 0x5c9   :  { %v7938_v10 = vpop.f32.mrb[3].mxu0 }
 0x5ca   :  { %v7939_v24 = vadd.f32 %v7938_v10, %v7937_v8  ;;  %v6865_v23 = vadd.f32 %v7958_v30, %v7936_v17 }
 0x5cc   :  { %v6878_v55 = vadd.f32 %v7898_v44, %v6865_v23  ;;  %v6868_v58 = vadd.f32 %v7961_v48, %v7939_v24 }
 0x5ce   :  { %v6882_v60 = vmin.f32 %v6878_v55, 0.0  ;;  %v6879_v61 = vadd.f32 %v7898_v44, %v6868_v58  ;;  %vm6880_vm1 = vcmp.gt.f32.partialorder %v6878_v55, 0.0 }
 0x5d0   :  { %v6884_v57 = vmul.f32 1.442695, %v6882_v60  ;;  %v6883_v47 = vmin.f32 %v6879_v61, 0.0  ;;  %vm6881_vm2 = vcmp.gt.f32.partialorder %v6879_v61, 0.0 }
 0x5d2   :  { %8175 = vpow2.f32 %v6884_v57  ;;  %v6886_v32 = vmul.f32 1.442695, %v6883_v47 }
 0x5d4   :  { %8177 = vpow2.f32 %v6886_v32 }
 0x5dc   :  { %v8176_v53 = vpop.eup %8175 }
 0x5dd   :  { %v7899_v54 = vadd.f32 -1.0, %v8176_v53 }
 0x5de   :  { %v8178_v56 = vpop.eup %8177 }
 0x5df   :  { %v7900_v18 = vadd.f32 -1.0, %v8178_v56  ;;  %v6890_v19 = vsel %vm6880_vm1, %v6878_v55, %v7899_v54 }
 0x5e1   :  { %v6891_v22 = vsel %vm6881_vm2, %v6879_v61, %v7900_v18 }
 0x5e2   :  { %v6892_v25 = vpack.c.bf16 %v6891_v22, %v6890_v19 }
 0x5e4   :  { %7988 = vmatmul.mubr.bf16.vlgmr.msra.gmra.mrb[4].mxu0 %v6892_v25 }
 0x6b7   :  { %v6998_v34 = vpop.f32.mrb[4].mxu0 }
 0x6b8   :  { %v6999_v35 = vadd.f32 %v7901_v26, %v6998_v34  ;;  %v7989_v36 = vpop.f32.mrb[5].mxu0 }
 0x6b9   :  { %v7001_v37 = vpop.f32.mrb[6].mxu0 }
 0x6ba   :  { %v7007_v38 = vcombine.high %v6999_v35, %v6999_v35  ;;  %v7014_v39 = vrot.slane %v6999_v35, %v9461_v13  ;;  %7910 = vst.sshfl [vmem:[%s12120_s12] sm:$0x3 pattern:$0x76325410] %v6999_v35  ;;  %v7002_v40 = vadd.f32 %v7901_v26, %v7001_v37  ;;  %v7990_v43 = vpop.f32.mrb[7].mxu0 }
 0x6bc   :  { %v7021_v28 = vrot.slane %v7007_v38, %v9461_v13  ;;  %v7022_v42 = vcombine.high %v7014_v39, %v7014_v39  ;;  %7911 = vst.sshfl [vmem:[%s12120_s12 + $0x4] sm:$0x3 pattern:$0x76325410] %v7007_v38  ;;  %v7024_v41 = vcombine.high %v7002_v40, %v7002_v40  ;;  %v7031_v52 = vrot.slane %v7002_v40, %v9461_v13 }
 0x6bd   :  { %7912 = vst.sshfl [vmem:[%s12120_s12 + $0x8] sm:$0x3 pattern:$0x76325410] %v7002_v40 }
 0x6be   :  { %v7023_v50 = vcombine.high %v7021_v28, %v7021_v28  ;;  %7050 = vst [vmem:[%s12120_s12 + $0x2] sm:$0x3] %v7022_v42  ;;  %v7038_v59 = vrot.slane %v7024_v41, %v9461_v13  ;;  %v7039_v20 = vcombine.high %v7031_v52, %v7031_v52  ;;  %7913 = vst.sshfl [vmem:[%s12120_s12 + $0xc] sm:$0x3 pattern:$0x76325410] %v7024_v41 }
 0x6c0   :  { %7052 = vst [vmem:[%s12120_s12 + $0x6] sm:$0x3] %v7023_v50  ;;  %v7040_v49 = vcombine.high %v7038_v59, %v7038_v59  ;;  %7054 = vst [vmem:[%s12120_s12 + $0xa] sm:$0x3] %v7039_v20 }
 0x6c2   :  { %7056 = vst [vmem:[%s12120_s12 + $0xe] sm:$0x3] %v7040_v49 }

</bundles_post_ra>
